<compile_context>
chip_gen: v7x
topology: tpu7x:2x2x1
jax: 0.10.0
libtpu: 0.0.40
codegen_flags: <defaults>
</compile_context>

<pallas_src>
import math
import functools

import jax
import jax.numpy as jnp
from jax.experimental import pallas as pl
from jax.experimental.pallas import tpu as pltpu


def _gru_layer_kernel(x_ref, h0_ref, wih_ref, whh_ref, bg_ref, bn_ref,
                      out_ref, gx_scr):
    """One bidirectional GRU layer, whole sequence, single grid step.

    x_ref   : (T*B, D_in)      time-major, time-flattened input
    h0_ref  : (2, B, H)        initial hidden state [forward, reverse]
    wih_ref : (2, 3, D_in, H)  W_ih^T, per direction / gate (r, z, n)
    whh_ref : (2, 3, H, H)     W_hh^T, per direction / gate (r, z, n)
    bg_ref  : (2, 3, 1, H)     folded biases: [b_ir+b_hr, b_iz+b_hz, b_in]
    bn_ref  : (2, 1, H)        b_hn (must stay inside the r*(...) term)
    out_ref : (T*B, 2H)        output; cols [0:H)=forward, [H:2H)=reverse
    gx_scr  : (2, 3, T*B, H)   VMEM scratch for the precomputed x-projections
    """
    TB = x_ref.shape[0]
    B = h0_ref.shape[1]
    H = h0_ref.shape[2]
    T = TB // B

    # ---- Phase 0 (time-parallel): project all timesteps at once, M = T*B.
    x2d = x_ref[...]                                      # (T*B, D_in)
    for d in range(2):
        for g in range(3):
            gx_scr[d, g] = (
                jnp.dot(x2d, wih_ref[d, g],
                        preferred_element_type=jnp.float32)
                + bg_ref[d, g])                           # (T*B, H)

    # Hoist recurrent weights / bias loads out of the unrolled time loop.
    whh = [[whh_ref[d, g] for g in range(3)] for d in range(2)]
    bn = [bn_ref[0], bn_ref[1]]
    h = [h0_ref[0], h0_ref[1]]                            # (B, H) each

    # ---- Phase 1 (serial): recurrence over T, both directions per step,
    # fully unrolled (T small & static).  Reverse direction reads / writes
    # timestep T-1-t directly, so no flips are ever materialized.
    for t in range(T):
        for d in range(2):
            tt = t if d == 0 else T - 1 - t
            rs = tt * B
            h_prev = h[d]                                 # (B, H)
            gxr = gx_scr[d, 0, rs:rs + B, :]
            gxz = gx_scr[d, 1, rs:rs + B, :]
            gxn = gx_scr[d, 2, rs:rs + B, :]
            ghr = jnp.dot(h_prev, whh[d][0],
                          preferred_element_type=jnp.float32)
            ghz = jnp.dot(h_prev, whh[d][1],
                          preferred_element_type=jnp.float32)
            ghn = jnp.dot(h_prev, whh[d][2],
                          preferred_element_type=jnp.float32) + bn[d]
            r = jax.nn.sigmoid(gxr + ghr)
            z = jax.nn.sigmoid(gxz + ghz)
            n = jnp.tanh(gxn + r * ghn)
            h_new = (1.0 - z) * n + z * h_prev
            h[d] = h_new
            out_ref[rs:rs + B, d * H:(d + 1) * H] = h_new


def _gru_layer(x2d, h0_l, wih, whh, bg, bn):
    """x2d: (T*B, D_in), h0_l: (2, B, H). Returns (T*B, 2H)."""
    TB, D = x2d.shape
    _, B, H = h0_l.shape
    return pl.pallas_call(
        _gru_layer_kernel,
        out_shape=jax.ShapeDtypeStruct((TB, 2 * H), jnp.float32),
        grid=(1,),
        in_specs=[
            pl.BlockSpec((TB, D), lambda i: (0, 0)),
            pl.BlockSpec((2, B, H), lambda i: (0, 0, 0)),
            pl.BlockSpec((2, 3, D, H), lambda i: (0, 0, 0, 0)),
            pl.BlockSpec((2, 3, H, H), lambda i: (0, 0, 0, 0)),
            pl.BlockSpec((2, 3, 1, H), lambda i: (0, 0, 0, 0)),
            pl.BlockSpec((2, 1, H), lambda i: (0, 0, 0)),
        ],
        out_specs=pl.BlockSpec((TB, 2 * H), lambda i: (0, 0)),
        scratch_shapes=[pltpu.VMEM((2, 3, TB, H), jnp.float32)],
        compiler_params=pltpu.CompilerParams(
            dimension_semantics=("arbitrary",)),
    )(x2d, h0_l, wih, whh, bg, bn)


def init_gru_params(key, input_size, hidden_size, num_layers):
    """PyTorch nn.GRU-shaped init (uniform +-1/sqrt(H)), rearranged for the
    kernel: gate-separated, transposed, biases pre-folded."""
    H = hidden_size
    bound = 1.0 / math.sqrt(H)
    params = []
    for l in range(num_layers):
        d_in = input_size if l == 0 else 2 * H
        wih_d, whh_d, bg_d, bn_d = [], [], [], []
        for _d in range(2):  # 0 = forward, 1 = reverse
            key, k1, k2, k3, k4 = jax.random.split(key, 5)
            wih = jax.random.uniform(k1, (3 * H, d_in), minval=-bound,
                                     maxval=bound, dtype=jnp.float32)
            whh = jax.random.uniform(k2, (3 * H, H), minval=-bound,
                                     maxval=bound, dtype=jnp.float32)
            bih = jax.random.uniform(k3, (3 * H,), minval=-bound,
                                     maxval=bound, dtype=jnp.float32)
            bhh = jax.random.uniform(k4, (3 * H,), minval=-bound,
                                     maxval=bound, dtype=jnp.float32)
            wih_g = jnp.stack([wih[g * H:(g + 1) * H, :].T for g in range(3)])
            whh_g = jnp.stack([whh[g * H:(g + 1) * H, :].T for g in range(3)])
            bg = jnp.stack([
                (bih[0:H] + bhh[0:H]).reshape(1, H),          # r
                (bih[H:2 * H] + bhh[H:2 * H]).reshape(1, H),  # z
                bih[2 * H:3 * H].reshape(1, H),               # n (b_ih only)
            ])
            bn = bhh[2 * H:3 * H].reshape(1, H)               # b_hn
            wih_d.append(wih_g)
            whh_d.append(whh_g)
            bg_d.append(bg)
            bn_d.append(bn)
        params.append((jnp.stack(wih_d), jnp.stack(whh_d),
                       jnp.stack(bg_d), jnp.stack(bn_d)))
    return params


def rnn_gru_forward(x, params, h0):
    """Equivalent of RNN_GRU.forward.

    x  : (B, T, input_size)       (batch_first=True as in the PyTorch module)
    h0 : (num_layers * 2, B, H)   initial hidden state (torch.randn in PyTorch;
                                  drawn deterministically by the caller here)
    Returns (B, T, 2*H).
    """
    B, T, _ = x.shape
    H = h0.shape[-1]
    # time-major, time-flattened (T*B, D); kept across layers so inter-layer
    # handoff needs no transposes / flips.
    cur = jnp.transpose(x, (1, 0, 2)).reshape(T * B, x.shape[-1])
    for l, (wih, whh, bg, bn) in enumerate(params):
        cur = _gru_layer(cur, h0[2 * l:2 * l + 2], wih, whh, bg, bn)
    return jnp.transpose(cur.reshape(T, B, 2 * H), (1, 0, 2))


if __name__ == "__main__":
    INPUT_SIZE = 16
    HIDDEN_SIZE = 32
    NUM_LAYERS = 2
    BATCH = 2
    SEQ = 8

    root = jax.random.PRNGKey(0)
    k_param, k_x, k_h0 = jax.random.split(root, 3)

    params = init_gru_params(k_param, INPUT_SIZE, HIDDEN_SIZE, NUM_LAYERS)
    x = jax.random.normal(k_x, (BATCH, SEQ, INPUT_SIZE), dtype=jnp.float32)
    # PyTorch forward draws h0 ~ randn each call; we draw it deterministically.
    h0 = jax.random.normal(k_h0, (NUM_LAYERS * 2, BATCH, HIDDEN_SIZE),
                           dtype=jnp.float32)

    fwd = jax.jit(rnn_gru_forward)
    out = fwd(x, params, h0)
    out = jax.block_until_ready(out)

    assert out.shape == (BATCH, SEQ, 2 * HIDDEN_SIZE), out.shape
    assert out.dtype == jnp.float32
    assert bool(jnp.all(jnp.isfinite(out)))
    print("KERNEL_OK")
</pallas_src>

<mosaic_0001>
module attributes {stable_mosaic.version = 11 : i64} {
  func.func @_gru_layer_kernel(%arg0: i32, %arg1: memref<16x16xf32, #tpu.memory_space<vmem>>, %arg2: memref<2x2x32xf32, #tpu.memory_space<vmem>>, %arg3: memref<2x3x16x32xf32, #tpu.memory_space<vmem>>, %arg4: memref<2x3x32x32xf32, #tpu.memory_space<vmem>>, %arg5: memref<2x3x1x32xf32, #tpu.memory_space<vmem>>, %arg6: memref<2x1x32xf32, #tpu.memory_space<vmem>>, %arg7: memref<16x64xf32, #tpu.memory_space<vmem>>, %arg8: memref<2x3x16x32xf32, #tpu.memory_space<vmem>>) attributes {dimension_semantics = [#tpu.dimension_semantics<arbitrary>], iteration_bounds = array<i64: 1>, scalar_prefetch = 0 : i64, scratch_operands = 1 : i64, tpu.core_type = #tpu.core_type<tc>, window_params = [{pipeline_mode = #tpu.pipeline_mode<synchronous>, transform_indices = @transform_0, window_bounds = array<i64: 16, 16>}, {pipeline_mode = #tpu.pipeline_mode<synchronous>, transform_indices = @transform_1, window_bounds = array<i64: 2, 2, 32>}, {pipeline_mode = #tpu.pipeline_mode<synchronous>, transform_indices = @transform_2, window_bounds = array<i64: 2, 3, 16, 32>}, {pipeline_mode = #tpu.pipeline_mode<synchronous>, transform_indices = @transform_3, window_bounds = array<i64: 2, 3, 32, 32>}, {pipeline_mode = #tpu.pipeline_mode<synchronous>, transform_indices = @transform_4, window_bounds = array<i64: 2, 3, 1, 32>}, {pipeline_mode = #tpu.pipeline_mode<synchronous>, transform_indices = @transform_5, window_bounds = array<i64: 2, 1, 32>}, {pipeline_mode = #tpu.pipeline_mode<synchronous>, transform_indices = @transform_6, window_bounds = array<i64: 16, 64>}]} {
    %c0 = arith.constant 0 : index
    %c0_0 = arith.constant 0 : index
    %0 = vector.load %arg1[%c0, %c0_0] : memref<16x16xf32, #tpu.memory_space<vmem>>, vector<16x16xf32>
    %c0_1 = arith.constant 0 : index
    %c0_2 = arith.constant 0 : index
    %c0_3 = arith.constant 0 : index
    %c0_4 = arith.constant 0 : index
    %1 = vector.load %arg3[%c0_1, %c0_2, %c0_3, %c0_4] : memref<2x3x16x32xf32, #tpu.memory_space<vmem>>, vector<1x1x16x32xf32>
    %2 = vector.shape_cast %1 : vector<1x1x16x32xf32> to vector<16x32xf32>
    %cst = arith.constant dense<0.000000e+00> : vector<16x32xf32>
    %3 = tpu.matmul %0, %2, %cst {dimension_numbers = #tpu.dot_dimension_numbers<[1], [0], [0], [1], [0, 0, 1, 1], [], []>} : vector<16x16xf32>, vector<16x32xf32>, vector<16x32xf32> -> vector<16x32xf32>
    %c0_5 = arith.constant 0 : index
    %c0_6 = arith.constant 0 : index
    %c0_7 = arith.constant 0 : index
    %c0_8 = arith.constant 0 : index
    %4 = vector.load %arg5[%c0_5, %c0_6, %c0_7, %c0_8] : memref<2x3x1x32xf32, #tpu.memory_space<vmem>>, vector<1x1x1x32xf32>
    %5 = vector.shape_cast %4 : vector<1x1x1x32xf32> to vector<1x32xf32>
    %6 = vector.broadcast %5 : vector<1x32xf32> to vector<16x32xf32>
    %7 = arith.addf %3, %6 : vector<16x32xf32>
    %c0_9 = arith.constant 0 : index
    %c0_10 = arith.constant 0 : index
    %c0_11 = arith.constant 0 : index
    %c0_12 = arith.constant 0 : index
    %8 = vector.load %arg8[%c0_9, %c0_10, %c0_11, %c0_12] : memref<2x3x16x32xf32, #tpu.memory_space<vmem>>, vector<1x1x16x32xf32>
    %9 = vector.shape_cast %8 : vector<1x1x16x32xf32> to vector<16x32xf32>
    %10 = vector.shape_cast %7 : vector<16x32xf32> to vector<1x1x16x32xf32>
    tpu.vector_store %arg8[%c0_9, %c0_10, %c0_11, %c0_12], %10 {strides = array<i32>} : memref<2x3x16x32xf32, #tpu.memory_space<vmem>>, vector<1x1x16x32xf32>,
    %c0_13 = arith.constant 0 : index
    %c1 = arith.constant 1 : index
    %c0_14 = arith.constant 0 : index
    %c0_15 = arith.constant 0 : index
    %11 = vector.load %arg3[%c0_13, %c1, %c0_14, %c0_15] : memref<2x3x16x32xf32, #tpu.memory_space<vmem>>, vector<1x1x16x32xf32>
    %12 = vector.shape_cast %11 : vector<1x1x16x32xf32> to vector<16x32xf32>
    %cst_16 = arith.constant dense<0.000000e+00> : vector<16x32xf32>
    %13 = tpu.matmul %0, %12, %cst_16 {dimension_numbers = #tpu.dot_dimension_numbers<[1], [0], [0], [1], [0, 0, 1, 1], [], []>} : vector<16x16xf32>, vector<16x32xf32>, vector<16x32xf32> -> vector<16x32xf32>
    %c0_17 = arith.constant 0 : index
    %c1_18 = arith.constant 1 : index
    %c0_19 = arith.constant 0 : index
    %c0_20 = arith.constant 0 : index
    %14 = vector.load %arg5[%c0_17, %c1_18, %c0_19, %c0_20] : memref<2x3x1x32xf32, #tpu.memory_space<vmem>>, vector<1x1x1x32xf32>
    %15 = vector.shape_cast %14 : vector<1x1x1x32xf32> to vector<1x32xf32>
    %16 = vector.broadcast %15 : vector<1x32xf32> to vector<16x32xf32>
    %17 = arith.addf %13, %16 : vector<16x32xf32>
    %c0_21 = arith.constant 0 : index
    %c1_22 = arith.constant 1 : index
    %c0_23 = arith.constant 0 : index
    %c0_24 = arith.constant 0 : index
    %18 = vector.load %arg8[%c0_21, %c1_22, %c0_23, %c0_24] : memref<2x3x16x32xf32, #tpu.memory_space<vmem>>, vector<1x1x16x32xf32>
    %19 = vector.shape_cast %18 : vector<1x1x16x32xf32> to vector<16x32xf32>
    %20 = vector.shape_cast %17 : vector<16x32xf32> to vector<1x1x16x32xf32>
    tpu.vector_store %arg8[%c0_21, %c1_22, %c0_23, %c0_24], %20 {strides = array<i32>} : memref<2x3x16x32xf32, #tpu.memory_space<vmem>>, vector<1x1x16x32xf32>,
    %c0_25 = arith.constant 0 : index
    %c2 = arith.constant 2 : index
    %c0_26 = arith.constant 0 : index
    %c0_27 = arith.constant 0 : index
    %21 = vector.load %arg3[%c0_25, %c2, %c0_26, %c0_27] : memref<2x3x16x32xf32, #tpu.memory_space<vmem>>, vector<1x1x16x32xf32>
    %22 = vector.shape_cast %21 : vector<1x1x16x32xf32> to vector<16x32xf32>
    %cst_28 = arith.constant dense<0.000000e+00> : vector<16x32xf32>
    %23 = tpu.matmul %0, %22, %cst_28 {dimension_numbers = #tpu.dot_dimension_numbers<[1], [0], [0], [1], [0, 0, 1, 1], [], []>} : vector<16x16xf32>, vector<16x32xf32>, vector<16x32xf32> -> vector<16x32xf32>
    %c0_29 = arith.constant 0 : index
    %c2_30 = arith.constant 2 : index
    %c0_31 = arith.constant 0 : index
    %c0_32 = arith.constant 0 : index
    %24 = vector.load %arg5[%c0_29, %c2_30, %c0_31, %c0_32] : memref<2x3x1x32xf32, #tpu.memory_space<vmem>>, vector<1x1x1x32xf32>
    %25 = vector.shape_cast %24 : vector<1x1x1x32xf32> to vector<1x32xf32>
    %26 = vector.broadcast %25 : vector<1x32xf32> to vector<16x32xf32>
    %27 = arith.addf %23, %26 : vector<16x32xf32>
    %c0_33 = arith.constant 0 : index
    %c2_34 = arith.constant 2 : index
    %c0_35 = arith.constant 0 : index
    %c0_36 = arith.constant 0 : index
    %28 = vector.load %arg8[%c0_33, %c2_34, %c0_35, %c0_36] : memref<2x3x16x32xf32, #tpu.memory_space<vmem>>, vector<1x1x16x32xf32>
    %29 = vector.shape_cast %28 : vector<1x1x16x32xf32> to vector<16x32xf32>
    %30 = vector.shape_cast %27 : vector<16x32xf32> to vector<1x1x16x32xf32>
    tpu.vector_store %arg8[%c0_33, %c2_34, %c0_35, %c0_36], %30 {strides = array<i32>} : memref<2x3x16x32xf32, #tpu.memory_space<vmem>>, vector<1x1x16x32xf32>,
    %c1_37 = arith.constant 1 : index
    %c0_38 = arith.constant 0 : index
    %c0_39 = arith.constant 0 : index
    %c0_40 = arith.constant 0 : index
    %31 = vector.load %arg3[%c1_37, %c0_38, %c0_39, %c0_40] : memref<2x3x16x32xf32, #tpu.memory_space<vmem>>, vector<1x1x16x32xf32>
    %32 = vector.shape_cast %31 : vector<1x1x16x32xf32> to vector<16x32xf32>
    %cst_41 = arith.constant dense<0.000000e+00> : vector<16x32xf32>
    %33 = tpu.matmul %0, %32, %cst_41 {dimension_numbers = #tpu.dot_dimension_numbers<[1], [0], [0], [1], [0, 0, 1, 1], [], []>} : vector<16x16xf32>, vector<16x32xf32>, vector<16x32xf32> -> vector<16x32xf32>
    %c1_42 = arith.constant 1 : index
    %c0_43 = arith.constant 0 : index
    %c0_44 = arith.constant 0 : index
    %c0_45 = arith.constant 0 : index
    %34 = vector.load %arg5[%c1_42, %c0_43, %c0_44, %c0_45] : memref<2x3x1x32xf32, #tpu.memory_space<vmem>>, vector<1x1x1x32xf32>
    %35 = vector.shape_cast %34 : vector<1x1x1x32xf32> to vector<1x32xf32>
    %36 = vector.broadcast %35 : vector<1x32xf32> to vector<16x32xf32>
    %37 = arith.addf %33, %36 : vector<16x32xf32>
    %c1_46 = arith.constant 1 : index
    %c0_47 = arith.constant 0 : index
    %c0_48 = arith.constant 0 : index
    %c0_49 = arith.constant 0 : index
    %38 = vector.load %arg8[%c1_46, %c0_47, %c0_48, %c0_49] : memref<2x3x16x32xf32, #tpu.memory_space<vmem>>, vector<1x1x16x32xf32>
    %39 = vector.shape_cast %38 : vector<1x1x16x32xf32> to vector<16x32xf32>
    %40 = vector.shape_cast %37 : vector<16x32xf32> to vector<1x1x16x32xf32>
    tpu.vector_store %arg8[%c1_46, %c0_47, %c0_48, %c0_49], %40 {strides = array<i32>} : memref<2x3x16x32xf32, #tpu.memory_space<vmem>>, vector<1x1x16x32xf32>,
    %c1_50 = arith.constant 1 : index
    %c1_51 = arith.constant 1 : index
    %c0_52 = arith.constant 0 : index
    %c0_53 = arith.constant 0 : index
    %41 = vector.load %arg3[%c1_50, %c1_51, %c0_52, %c0_53] : memref<2x3x16x32xf32, #tpu.memory_space<vmem>>, vector<1x1x16x32xf32>
    %42 = vector.shape_cast %41 : vector<1x1x16x32xf32> to vector<16x32xf32>
    %cst_54 = arith.constant dense<0.000000e+00> : vector<16x32xf32>
    %43 = tpu.matmul %0, %42, %cst_54 {dimension_numbers = #tpu.dot_dimension_numbers<[1], [0], [0], [1], [0, 0, 1, 1], [], []>} : vector<16x16xf32>, vector<16x32xf32>, vector<16x32xf32> -> vector<16x32xf32>
    %c1_55 = arith.constant 1 : index
    %c1_56 = arith.constant 1 : index
    %c0_57 = arith.constant 0 : index
    %c0_58 = arith.constant 0 : index
    %44 = vector.load %arg5[%c1_55, %c1_56, %c0_57, %c0_58] : memref<2x3x1x32xf32, #tpu.memory_space<vmem>>, vector<1x1x1x32xf32>
    %45 = vector.shape_cast %44 : vector<1x1x1x32xf32> to vector<1x32xf32>
    %46 = vector.broadcast %45 : vector<1x32xf32> to vector<16x32xf32>
    %47 = arith.addf %43, %46 : vector<16x32xf32>
    %c1_59 = arith.constant 1 : index
    %c1_60 = arith.constant 1 : index
    %c0_61 = arith.constant 0 : index
    %c0_62 = arith.constant 0 : index
    %48 = vector.load %arg8[%c1_59, %c1_60, %c0_61, %c0_62] : memref<2x3x16x32xf32, #tpu.memory_space<vmem>>, vector<1x1x16x32xf32>
    %49 = vector.shape_cast %48 : vector<1x1x16x32xf32> to vector<16x32xf32>
    %50 = vector.shape_cast %47 : vector<16x32xf32> to vector<1x1x16x32xf32>
    tpu.vector_store %arg8[%c1_59, %c1_60, %c0_61, %c0_62], %50 {strides = array<i32>} : memref<2x3x16x32xf32, #tpu.memory_space<vmem>>, vector<1x1x16x32xf32>,
    %c1_63 = arith.constant 1 : index
    %c2_64 = arith.constant 2 : index
    %c0_65 = arith.constant 0 : index
    %c0_66 = arith.constant 0 : index
    %51 = vector.load %arg3[%c1_63, %c2_64, %c0_65, %c0_66] : memref<2x3x16x32xf32, #tpu.memory_space<vmem>>, vector<1x1x16x32xf32>
    %52 = vector.shape_cast %51 : vector<1x1x16x32xf32> to vector<16x32xf32>
    %cst_67 = arith.constant dense<0.000000e+00> : vector<16x32xf32>
    %53 = tpu.matmul %0, %52, %cst_67 {dimension_numbers = #tpu.dot_dimension_numbers<[1], [0], [0], [1], [0, 0, 1, 1], [], []>} : vector<16x16xf32>, vector<16x32xf32>, vector<16x32xf32> -> vector<16x32xf32>
    %c1_68 = arith.constant 1 : index
    %c2_69 = arith.constant 2 : index
    %c0_70 = arith.constant 0 : index
    %c0_71 = arith.constant 0 : index
    %54 = vector.load %arg5[%c1_68, %c2_69, %c0_70, %c0_71] : memref<2x3x1x32xf32, #tpu.memory_space<vmem>>, vector<1x1x1x32xf32>
    %55 = vector.shape_cast %54 : vector<1x1x1x32xf32> to vector<1x32xf32>
    %56 = vector.broadcast %55 : vector<1x32xf32> to vector<16x32xf32>
    %57 = arith.addf %53, %56 : vector<16x32xf32>
    %c1_72 = arith.constant 1 : index
    %c2_73 = arith.constant 2 : index
    %c0_74 = arith.constant 0 : index
    %c0_75 = arith.constant 0 : index
    %58 = vector.load %arg8[%c1_72, %c2_73, %c0_74, %c0_75] : memref<2x3x16x32xf32, #tpu.memory_space<vmem>>, vector<1x1x16x32xf32>
    %59 = vector.shape_cast %58 : vector<1x1x16x32xf32> to vector<16x32xf32>
    %60 = vector.shape_cast %57 : vector<16x32xf32> to vector<1x1x16x32xf32>
    tpu.vector_store %arg8[%c1_72, %c2_73, %c0_74, %c0_75], %60 {strides = array<i32>} : memref<2x3x16x32xf32, #tpu.memory_space<vmem>>, vector<1x1x16x32xf32>,
    %c0_76 = arith.constant 0 : index
    %c0_77 = arith.constant 0 : index
    %c0_78 = arith.constant 0 : index
    %c0_79 = arith.constant 0 : index
    %61 = vector.load %arg4[%c0_76, %c0_77, %c0_78, %c0_79] : memref<2x3x32x32xf32, #tpu.memory_space<vmem>>, vector<1x1x32x32xf32>
    %62 = vector.shape_cast %61 : vector<1x1x32x32xf32> to vector<32x32xf32>
    %c0_80 = arith.constant 0 : index
    %c1_81 = arith.constant 1 : index
    %c0_82 = arith.constant 0 : index
    %c0_83 = arith.constant 0 : index
    %63 = vector.load %arg4[%c0_80, %c1_81, %c0_82, %c0_83] : memref<2x3x32x32xf32, #tpu.memory_space<vmem>>, vector<1x1x32x32xf32>
    %64 = vector.shape_cast %63 : vector<1x1x32x32xf32> to vector<32x32xf32>
    %c0_84 = arith.constant 0 : index
    %c2_85 = arith.constant 2 : index
    %c0_86 = arith.constant 0 : index
    %c0_87 = arith.constant 0 : index
    %65 = vector.load %arg4[%c0_84, %c2_85, %c0_86, %c0_87] : memref<2x3x32x32xf32, #tpu.memory_space<vmem>>, vector<1x1x32x32xf32>
    %66 = vector.shape_cast %65 : vector<1x1x32x32xf32> to vector<32x32xf32>
    %c1_88 = arith.constant 1 : index
    %c0_89 = arith.constant 0 : index
    %c0_90 = arith.constant 0 : index
    %c0_91 = arith.constant 0 : index
    %67 = vector.load %arg4[%c1_88, %c0_89, %c0_90, %c0_91] : memref<2x3x32x32xf32, #tpu.memory_space<vmem>>, vector<1x1x32x32xf32>
    %68 = vector.shape_cast %67 : vector<1x1x32x32xf32> to vector<32x32xf32>
    %c1_92 = arith.constant 1 : index
    %c1_93 = arith.constant 1 : index
    %c0_94 = arith.constant 0 : index
    %c0_95 = arith.constant 0 : index
    %69 = vector.load %arg4[%c1_92, %c1_93, %c0_94, %c0_95] : memref<2x3x32x32xf32, #tpu.memory_space<vmem>>, vector<1x1x32x32xf32>
    %70 = vector.shape_cast %69 : vector<1x1x32x32xf32> to vector<32x32xf32>
    %c1_96 = arith.constant 1 : index
    %c2_97 = arith.constant 2 : index
    %c0_98 = arith.constant 0 : index
    %c0_99 = arith.constant 0 : index
    %71 = vector.load %arg4[%c1_96, %c2_97, %c0_98, %c0_99] : memref<2x3x32x32xf32, #tpu.memory_space<vmem>>, vector<1x1x32x32xf32>
    %72 = vector.shape_cast %71 : vector<1x1x32x32xf32> to vector<32x32xf32>
    %c0_100 = arith.constant 0 : index
    %c0_101 = arith.constant 0 : index
    %c0_102 = arith.constant 0 : index
    %73 = vector.load %arg6[%c0_100, %c0_101, %c0_102] : memref<2x1x32xf32, #tpu.memory_space<vmem>>, vector<1x1x32xf32>
    %74 = vector.shape_cast %73 : vector<1x1x32xf32> to vector<1x32xf32>
    %c1_103 = arith.constant 1 : index
    %c0_104 = arith.constant 0 : index
    %c0_105 = arith.constant 0 : index
    %75 = vector.load %arg6[%c1_103, %c0_104, %c0_105] : memref<2x1x32xf32, #tpu.memory_space<vmem>>, vector<1x1x32xf32>
    %76 = vector.shape_cast %75 : vector<1x1x32xf32> to vector<1x32xf32>
    %c0_106 = arith.constant 0 : index
    %c0_107 = arith.constant 0 : index
    %c0_108 = arith.constant 0 : index
    %77 = vector.load %arg2[%c0_106, %c0_107, %c0_108] : memref<2x2x32xf32, #tpu.memory_space<vmem>>, vector<1x2x32xf32>
    %78 = vector.shape_cast %77 : vector<1x2x32xf32> to vector<2x32xf32>
    %c1_109 = arith.constant 1 : index
    %c0_110 = arith.constant 0 : index
    %c0_111 = arith.constant 0 : index
    %79 = vector.load %arg2[%c1_109, %c0_110, %c0_111] : memref<2x2x32xf32, #tpu.memory_space<vmem>>, vector<1x2x32xf32>
    %80 = vector.shape_cast %79 : vector<1x2x32xf32> to vector<2x32xf32>
    %c0_112 = arith.constant 0 : index
    %c0_113 = arith.constant 0 : index
    %c0_114 = arith.constant 0 : index
    %c0_115 = arith.constant 0 : index
    %81 = vector.load %arg8[%c0_112, %c0_113, %c0_114, %c0_115] : memref<2x3x16x32xf32, #tpu.memory_space<vmem>>, vector<1x1x2x32xf32>
    %82 = vector.shape_cast %81 : vector<1x1x2x32xf32> to vector<2x32xf32>
    %c0_116 = arith.constant 0 : index
    %c1_117 = arith.constant 1 : index
    %c0_118 = arith.constant 0 : index
    %c0_119 = arith.constant 0 : index
    %83 = vector.load %arg8[%c0_116, %c1_117, %c0_118, %c0_119] : memref<2x3x16x32xf32, #tpu.memory_space<vmem>>, vector<1x1x2x32xf32>
    %84 = vector.shape_cast %83 : vector<1x1x2x32xf32> to vector<2x32xf32>
    %c0_120 = arith.constant 0 : index
    %c2_121 = arith.constant 2 : index
    %c0_122 = arith.constant 0 : index
    %c0_123 = arith.constant 0 : index
    %85 = vector.load %arg8[%c0_120, %c2_121, %c0_122, %c0_123] : memref<2x3x16x32xf32, #tpu.memory_space<vmem>>, vector<1x1x2x32xf32>
    %86 = vector.shape_cast %85 : vector<1x1x2x32xf32> to vector<2x32xf32>
    %cst_124 = arith.constant dense<0.000000e+00> : vector<2x32xf32>
    %87 = tpu.matmul %78, %62, %cst_124 {dimension_numbers = #tpu.dot_dimension_numbers<[1], [0], [0], [1], [0, 0, 1, 1], [], []>} : vector<2x32xf32>, vector<32x32xf32>, vector<2x32xf32> -> vector<2x32xf32>
    %cst_125 = arith.constant dense<0.000000e+00> : vector<2x32xf32>
    %88 = tpu.matmul %78, %64, %cst_125 {dimension_numbers = #tpu.dot_dimension_numbers<[1], [0], [0], [1], [0, 0, 1, 1], [], []>} : vector<2x32xf32>, vector<32x32xf32>, vector<2x32xf32> -> vector<2x32xf32>
    %cst_126 = arith.constant dense<0.000000e+00> : vector<2x32xf32>
    %89 = tpu.matmul %78, %66, %cst_126 {dimension_numbers = #tpu.dot_dimension_numbers<[1], [0], [0], [1], [0, 0, 1, 1], [], []>} : vector<2x32xf32>, vector<32x32xf32>, vector<2x32xf32> -> vector<2x32xf32>
    %90 = vector.broadcast %74 : vector<1x32xf32> to vector<2x32xf32>
    %91 = arith.addf %89, %90 : vector<2x32xf32>
    %92 = arith.addf %82, %87 : vector<2x32xf32>
    %93 = arith.negf %92 : vector<2x32xf32>
    %94 = math.exp %93 : vector<2x32xf32>
    %cst_127 = arith.constant 1.000000e+00 : f32
    %95 = vector.broadcast %cst_127 : f32 to vector<2x32xf32>
    %96 = arith.addf %95, %94 : vector<2x32xf32>
    %97 = arith.divf %95, %96 : vector<2x32xf32>
    %98 = arith.addf %84, %88 : vector<2x32xf32>
    %99 = arith.negf %98 : vector<2x32xf32>
    %100 = math.exp %99 : vector<2x32xf32>
    %cst_128 = arith.constant 1.000000e+00 : f32
    %101 = vector.broadcast %cst_128 : f32 to vector<2x32xf32>
    %102 = arith.addf %101, %100 : vector<2x32xf32>
    %103 = arith.divf %101, %102 : vector<2x32xf32>
    %104 = arith.mulf %97, %91 : vector<2x32xf32>
    %105 = arith.addf %86, %104 : vector<2x32xf32>
    %106 = math.tanh %105 : vector<2x32xf32>
    %cst_129 = arith.constant 1.000000e+00 : f32
    %107 = vector.broadcast %cst_129 : f32 to vector<2x32xf32>
    %108 = arith.subf %107, %103 : vector<2x32xf32>
    %109 = arith.mulf %108, %106 : vector<2x32xf32>
    %110 = arith.mulf %103, %78 : vector<2x32xf32>
    %111 = arith.addf %109, %110 : vector<2x32xf32>
    %c0_130 = arith.constant 0 : index
    %c0_131 = arith.constant 0 : index
    %112 = vector.load %arg7[%c0_130, %c0_131] : memref<16x64xf32, #tpu.memory_space<vmem>>, vector<2x32xf32>
    tpu.vector_store %arg7[%c0_130, %c0_131], %111 {strides = array<i32>} : memref<16x64xf32, #tpu.memory_space<vmem>>, vector<2x32xf32>,
    %c1_132 = arith.constant 1 : index
    %c0_133 = arith.constant 0 : index
    %c14 = arith.constant 14 : index
    %c0_134 = arith.constant 0 : index
    %113 = vector.load %arg8[%c1_132, %c0_133, %c14, %c0_134] : memref<2x3x16x32xf32, #tpu.memory_space<vmem>>, vector<1x1x2x32xf32>
    %114 = vector.shape_cast %113 : vector<1x1x2x32xf32> to vector<2x32xf32>
    %c1_135 = arith.constant 1 : index
    %c1_136 = arith.constant 1 : index
    %c14_137 = arith.constant 14 : index
    %c0_138 = arith.constant 0 : index
    %115 = vector.load %arg8[%c1_135, %c1_136, %c14_137, %c0_138] : memref<2x3x16x32xf32, #tpu.memory_space<vmem>>, vector<1x1x2x32xf32>
    %116 = vector.shape_cast %115 : vector<1x1x2x32xf32> to vector<2x32xf32>
    %c1_139 = arith.constant 1 : index
    %c2_140 = arith.constant 2 : index
    %c14_141 = arith.constant 14 : index
    %c0_142 = arith.constant 0 : index
    %117 = vector.load %arg8[%c1_139, %c2_140, %c14_141, %c0_142] : memref<2x3x16x32xf32, #tpu.memory_space<vmem>>, vector<1x1x2x32xf32>
    %118 = vector.shape_cast %117 : vector<1x1x2x32xf32> to vector<2x32xf32>
    %cst_143 = arith.constant dense<0.000000e+00> : vector<2x32xf32>
    %119 = tpu.matmul %80, %68, %cst_143 {dimension_numbers = #tpu.dot_dimension_numbers<[1], [0], [0], [1], [0, 0, 1, 1], [], []>} : vector<2x32xf32>, vector<32x32xf32>, vector<2x32xf32> -> vector<2x32xf32>
    %cst_144 = arith.constant dense<0.000000e+00> : vector<2x32xf32>
    %120 = tpu.matmul %80, %70, %cst_144 {dimension_numbers = #tpu.dot_dimension_numbers<[1], [0], [0], [1], [0, 0, 1, 1], [], []>} : vector<2x32xf32>, vector<32x32xf32>, vector<2x32xf32> -> vector<2x32xf32>
    %cst_145 = arith.constant dense<0.000000e+00> : vector<2x32xf32>
    %121 = tpu.matmul %80, %72, %cst_145 {dimension_numbers = #tpu.dot_dimension_numbers<[1], [0], [0], [1], [0, 0, 1, 1], [], []>} : vector<2x32xf32>, vector<32x32xf32>, vector<2x32xf32> -> vector<2x32xf32>
    %122 = vector.broadcast %76 : vector<1x32xf32> to vector<2x32xf32>
    %123 = arith.addf %121, %122 : vector<2x32xf32>
    %124 = arith.addf %114, %119 : vector<2x32xf32>
    %125 = arith.negf %124 : vector<2x32xf32>
    %126 = math.exp %125 : vector<2x32xf32>
    %cst_146 = arith.constant 1.000000e+00 : f32
    %127 = vector.broadcast %cst_146 : f32 to vector<2x32xf32>
    %128 = arith.addf %127, %126 : vector<2x32xf32>
    %129 = arith.divf %127, %128 : vector<2x32xf32>
    %130 = arith.addf %116, %120 : vector<2x32xf32>
    %131 = arith.negf %130 : vector<2x32xf32>
    %132 = math.exp %131 : vector<2x32xf32>
    %cst_147 = arith.constant 1.000000e+00 : f32
    %133 = vector.broadcast %cst_147 : f32 to vector<2x32xf32>
    %134 = arith.addf %133, %132 : vector<2x32xf32>
    %135 = arith.divf %133, %134 : vector<2x32xf32>
    %136 = arith.mulf %129, %123 : vector<2x32xf32>
    %137 = arith.addf %118, %136 : vector<2x32xf32>
    %138 = math.tanh %137 : vector<2x32xf32>
    %cst_148 = arith.constant 1.000000e+00 : f32
    %139 = vector.broadcast %cst_148 : f32 to vector<2x32xf32>
    %140 = arith.subf %139, %135 : vector<2x32xf32>
    %141 = arith.mulf %140, %138 : vector<2x32xf32>
    %142 = arith.mulf %135, %80 : vector<2x32xf32>
    %143 = arith.addf %141, %142 : vector<2x32xf32>
    %c14_149 = arith.constant 14 : index
    %c32 = arith.constant 32 : index
    %144 = vector.load %arg7[%c14_149, %c32] : memref<16x64xf32, #tpu.memory_space<vmem>>, vector<2x32xf32>
    tpu.vector_store %arg7[%c14_149, %c32], %143 {strides = array<i32>} : memref<16x64xf32, #tpu.memory_space<vmem>>, vector<2x32xf32>,
    %c0_150 = arith.constant 0 : index
    %c0_151 = arith.constant 0 : index
    %c2_152 = arith.constant 2 : index
    %c0_153 = arith.constant 0 : index
    %145 = vector.load %arg8[%c0_150, %c0_151, %c2_152, %c0_153] : memref<2x3x16x32xf32, #tpu.memory_space<vmem>>, vector<1x1x2x32xf32>
    %146 = vector.shape_cast %145 : vector<1x1x2x32xf32> to vector<2x32xf32>
    %c0_154 = arith.constant 0 : index
    %c1_155 = arith.constant 1 : index
    %c2_156 = arith.constant 2 : index
    %c0_157 = arith.constant 0 : index
    %147 = vector.load %arg8[%c0_154, %c1_155, %c2_156, %c0_157] : memref<2x3x16x32xf32, #tpu.memory_space<vmem>>, vector<1x1x2x32xf32>
    %148 = vector.shape_cast %147 : vector<1x1x2x32xf32> to vector<2x32xf32>
    %c0_158 = arith.constant 0 : index
    %c2_159 = arith.constant 2 : index
    %c2_160 = arith.constant 2 : index
    %c0_161 = arith.constant 0 : index
    %149 = vector.load %arg8[%c0_158, %c2_159, %c2_160, %c0_161] : memref<2x3x16x32xf32, #tpu.memory_space<vmem>>, vector<1x1x2x32xf32>
    %150 = vector.shape_cast %149 : vector<1x1x2x32xf32> to vector<2x32xf32>
    %cst_162 = arith.constant dense<0.000000e+00> : vector<2x32xf32>
    %151 = tpu.matmul %111, %62, %cst_162 {dimension_numbers = #tpu.dot_dimension_numbers<[1], [0], [0], [1], [0, 0, 1, 1], [], []>} : vector<2x32xf32>, vector<32x32xf32>, vector<2x32xf32> -> vector<2x32xf32>
    %cst_163 = arith.constant dense<0.000000e+00> : vector<2x32xf32>
    %152 = tpu.matmul %111, %64, %cst_163 {dimension_numbers = #tpu.dot_dimension_numbers<[1], [0], [0], [1], [0, 0, 1, 1], [], []>} : vector<2x32xf32>, vector<32x32xf32>, vector<2x32xf32> -> vector<2x32xf32>
    %cst_164 = arith.constant dense<0.000000e+00> : vector<2x32xf32>
    %153 = tpu.matmul %111, %66, %cst_164 {dimension_numbers = #tpu.dot_dimension_numbers<[1], [0], [0], [1], [0, 0, 1, 1], [], []>} : vector<2x32xf32>, vector<32x32xf32>, vector<2x32xf32> -> vector<2x32xf32>
    %154 = vector.broadcast %74 : vector<1x32xf32> to vector<2x32xf32>
    %155 = arith.addf %153, %154 : vector<2x32xf32>
    %156 = arith.addf %146, %151 : vector<2x32xf32>
    %157 = arith.negf %156 : vector<2x32xf32>
    %158 = math.exp %157 : vector<2x32xf32>
    %cst_165 = arith.constant 1.000000e+00 : f32
    %159 = vector.broadcast %cst_165 : f32 to vector<2x32xf32>
    %160 = arith.addf %159, %158 : vector<2x32xf32>
    %161 = arith.divf %159, %160 : vector<2x32xf32>
    %162 = arith.addf %148, %152 : vector<2x32xf32>
    %163 = arith.negf %162 : vector<2x32xf32>
    %164 = math.exp %163 : vector<2x32xf32>
    %cst_166 = arith.constant 1.000000e+00 : f32
    %165 = vector.broadcast %cst_166 : f32 to vector<2x32xf32>
    %166 = arith.addf %165, %164 : vector<2x32xf32>
    %167 = arith.divf %165, %166 : vector<2x32xf32>
    %168 = arith.mulf %161, %155 : vector<2x32xf32>
    %169 = arith.addf %150, %168 : vector<2x32xf32>
    %170 = math.tanh %169 : vector<2x32xf32>
    %cst_167 = arith.constant 1.000000e+00 : f32
    %171 = vector.broadcast %cst_167 : f32 to vector<2x32xf32>
    %172 = arith.subf %171, %167 : vector<2x32xf32>
    %173 = arith.mulf %172, %170 : vector<2x32xf32>
    %174 = arith.mulf %167, %111 : vector<2x32xf32>
    %175 = arith.addf %173, %174 : vector<2x32xf32>
    %c2_168 = arith.constant 2 : index
    %c0_169 = arith.constant 0 : index
    %176 = vector.load %arg7[%c2_168, %c0_169] : memref<16x64xf32, #tpu.memory_space<vmem>>, vector<2x32xf32>
    tpu.vector_store %arg7[%c2_168, %c0_169], %175 {strides = array<i32>} : memref<16x64xf32, #tpu.memory_space<vmem>>, vector<2x32xf32>,
    %c1_170 = arith.constant 1 : index
    %c0_171 = arith.constant 0 : index
    %c12 = arith.constant 12 : index
    %c0_172 = arith.constant 0 : index
    %177 = vector.load %arg8[%c1_170, %c0_171, %c12, %c0_172] : memref<2x3x16x32xf32, #tpu.memory_space<vmem>>, vector<1x1x2x32xf32>
    %178 = vector.shape_cast %177 : vector<1x1x2x32xf32> to vector<2x32xf32>
    %c1_173 = arith.constant 1 : index
    %c1_174 = arith.constant 1 : index
    %c12_175 = arith.constant 12 : index
    %c0_176 = arith.constant 0 : index
    %179 = vector.load %arg8[%c1_173, %c1_174, %c12_175, %c0_176] : memref<2x3x16x32xf32, #tpu.memory_space<vmem>>, vector<1x1x2x32xf32>
    %180 = vector.shape_cast %179 : vector<1x1x2x32xf32> to vector<2x32xf32>
    %c1_177 = arith.constant 1 : index
    %c2_178 = arith.constant 2 : index
    %c12_179 = arith.constant 12 : index
    %c0_180 = arith.constant 0 : index
    %181 = vector.load %arg8[%c1_177, %c2_178, %c12_179, %c0_180] : memref<2x3x16x32xf32, #tpu.memory_space<vmem>>, vector<1x1x2x32xf32>
    %182 = vector.shape_cast %181 : vector<1x1x2x32xf32> to vector<2x32xf32>
    %cst_181 = arith.constant dense<0.000000e+00> : vector<2x32xf32>
    %183 = tpu.matmul %143, %68, %cst_181 {dimension_numbers = #tpu.dot_dimension_numbers<[1], [0], [0], [1], [0, 0, 1, 1], [], []>} : vector<2x32xf32>, vector<32x32xf32>, vector<2x32xf32> -> vector<2x32xf32>
    %cst_182 = arith.constant dense<0.000000e+00> : vector<2x32xf32>
    %184 = tpu.matmul %143, %70, %cst_182 {dimension_numbers = #tpu.dot_dimension_numbers<[1], [0], [0], [1], [0, 0, 1, 1], [], []>} : vector<2x32xf32>, vector<32x32xf32>, vector<2x32xf32> -> vector<2x32xf32>
    %cst_183 = arith.constant dense<0.000000e+00> : vector<2x32xf32>
    %185 = tpu.matmul %143, %72, %cst_183 {dimension_numbers = #tpu.dot_dimension_numbers<[1], [0], [0], [1], [0, 0, 1, 1], [], []>} : vector<2x32xf32>, vector<32x32xf32>, vector<2x32xf32> -> vector<2x32xf32>
    %186 = vector.broadcast %76 : vector<1x32xf32> to vector<2x32xf32>
    %187 = arith.addf %185, %186 : vector<2x32xf32>
    %188 = arith.addf %178, %183 : vector<2x32xf32>
    %189 = arith.negf %188 : vector<2x32xf32>
    %190 = math.exp %189 : vector<2x32xf32>
    %cst_184 = arith.constant 1.000000e+00 : f32
    %191 = vector.broadcast %cst_184 : f32 to vector<2x32xf32>
    %192 = arith.addf %191, %190 : vector<2x32xf32>
    %193 = arith.divf %191, %192 : vector<2x32xf32>
    %194 = arith.addf %180, %184 : vector<2x32xf32>
    %195 = arith.negf %194 : vector<2x32xf32>
    %196 = math.exp %195 : vector<2x32xf32>
    %cst_185 = arith.constant 1.000000e+00 : f32
    %197 = vector.broadcast %cst_185 : f32 to vector<2x32xf32>
    %198 = arith.addf %197, %196 : vector<2x32xf32>
    %199 = arith.divf %197, %198 : vector<2x32xf32>
    %200 = arith.mulf %193, %187 : vector<2x32xf32>
    %201 = arith.addf %182, %200 : vector<2x32xf32>
    %202 = math.tanh %201 : vector<2x32xf32>
    %cst_186 = arith.constant 1.000000e+00 : f32
    %203 = vector.broadcast %cst_186 : f32 to vector<2x32xf32>
    %204 = arith.subf %203, %199 : vector<2x32xf32>
    %205 = arith.mulf %204, %202 : vector<2x32xf32>
    %206 = arith.mulf %199, %143 : vector<2x32xf32>
    %207 = arith.addf %205, %206 : vector<2x32xf32>
    %c12_187 = arith.constant 12 : index
    %c32_188 = arith.constant 32 : index
    %208 = vector.load %arg7[%c12_187, %c32_188] : memref<16x64xf32, #tpu.memory_space<vmem>>, vector<2x32xf32>
    tpu.vector_store %arg7[%c12_187, %c32_188], %207 {strides = array<i32>} : memref<16x64xf32, #tpu.memory_space<vmem>>, vector<2x32xf32>,
    %c0_189 = arith.constant 0 : index
    %c0_190 = arith.constant 0 : index
    %c4 = arith.constant 4 : index
    %c0_191 = arith.constant 0 : index
    %209 = vector.load %arg8[%c0_189, %c0_190, %c4, %c0_191] : memref<2x3x16x32xf32, #tpu.memory_space<vmem>>, vector<1x1x2x32xf32>
    %210 = vector.shape_cast %209 : vector<1x1x2x32xf32> to vector<2x32xf32>
    %c0_192 = arith.constant 0 : index
    %c1_193 = arith.constant 1 : index
    %c4_194 = arith.constant 4 : index
    %c0_195 = arith.constant 0 : index
    %211 = vector.load %arg8[%c0_192, %c1_193, %c4_194, %c0_195] : memref<2x3x16x32xf32, #tpu.memory_space<vmem>>, vector<1x1x2x32xf32>
    %212 = vector.shape_cast %211 : vector<1x1x2x32xf32> to vector<2x32xf32>
    %c0_196 = arith.constant 0 : index
    %c2_197 = arith.constant 2 : index
    %c4_198 = arith.constant 4 : index
    %c0_199 = arith.constant 0 : index
    %213 = vector.load %arg8[%c0_196, %c2_197, %c4_198, %c0_199] : memref<2x3x16x32xf32, #tpu.memory_space<vmem>>, vector<1x1x2x32xf32>
    %214 = vector.shape_cast %213 : vector<1x1x2x32xf32> to vector<2x32xf32>
    %cst_200 = arith.constant dense<0.000000e+00> : vector<2x32xf32>
    %215 = tpu.matmul %175, %62, %cst_200 {dimension_numbers = #tpu.dot_dimension_numbers<[1], [0], [0], [1], [0, 0, 1, 1], [], []>} : vector<2x32xf32>, vector<32x32xf32>, vector<2x32xf32> -> vector<2x32xf32>
    %cst_201 = arith.constant dense<0.000000e+00> : vector<2x32xf32>
    %216 = tpu.matmul %175, %64, %cst_201 {dimension_numbers = #tpu.dot_dimension_numbers<[1], [0], [0], [1], [0, 0, 1, 1], [], []>} : vector<2x32xf32>, vector<32x32xf32>, vector<2x32xf32> -> vector<2x32xf32>
    %cst_202 = arith.constant dense<0.000000e+00> : vector<2x32xf32>
    %217 = tpu.matmul %175, %66, %cst_202 {dimension_numbers = #tpu.dot_dimension_numbers<[1], [0], [0], [1], [0, 0, 1, 1], [], []>} : vector<2x32xf32>, vector<32x32xf32>, vector<2x32xf32> -> vector<2x32xf32>
    %218 = vector.broadcast %74 : vector<1x32xf32> to vector<2x32xf32>
    %219 = arith.addf %217, %218 : vector<2x32xf32>
    %220 = arith.addf %210, %215 : vector<2x32xf32>
    %221 = arith.negf %220 : vector<2x32xf32>
    %222 = math.exp %221 : vector<2x32xf32>
    %cst_203 = arith.constant 1.000000e+00 : f32
    %223 = vector.broadcast %cst_203 : f32 to vector<2x32xf32>
    %224 = arith.addf %223, %222 : vector<2x32xf32>
    %225 = arith.divf %223, %224 : vector<2x32xf32>
    %226 = arith.addf %212, %216 : vector<2x32xf32>
    %227 = arith.negf %226 : vector<2x32xf32>
    %228 = math.exp %227 : vector<2x32xf32>
    %cst_204 = arith.constant 1.000000e+00 : f32
    %229 = vector.broadcast %cst_204 : f32 to vector<2x32xf32>
    %230 = arith.addf %229, %228 : vector<2x32xf32>
    %231 = arith.divf %229, %230 : vector<2x32xf32>
    %232 = arith.mulf %225, %219 : vector<2x32xf32>
    %233 = arith.addf %214, %232 : vector<2x32xf32>
    %234 = math.tanh %233 : vector<2x32xf32>
    %cst_205 = arith.constant 1.000000e+00 : f32
    %235 = vector.broadcast %cst_205 : f32 to vector<2x32xf32>
    %236 = arith.subf %235, %231 : vector<2x32xf32>
    %237 = arith.mulf %236, %234 : vector<2x32xf32>
    %238 = arith.mulf %231, %175 : vector<2x32xf32>
    %239 = arith.addf %237, %238 : vector<2x32xf32>
    %c4_206 = arith.constant 4 : index
    %c0_207 = arith.constant 0 : index
    %240 = vector.load %arg7[%c4_206, %c0_207] : memref<16x64xf32, #tpu.memory_space<vmem>>, vector<2x32xf32>
    tpu.vector_store %arg7[%c4_206, %c0_207], %239 {strides = array<i32>} : memref<16x64xf32, #tpu.memory_space<vmem>>, vector<2x32xf32>,
    %c1_208 = arith.constant 1 : index
    %c0_209 = arith.constant 0 : index
    %c10 = arith.constant 10 : index
    %c0_210 = arith.constant 0 : index
    %241 = vector.load %arg8[%c1_208, %c0_209, %c10, %c0_210] : memref<2x3x16x32xf32, #tpu.memory_space<vmem>>, vector<1x1x2x32xf32>
    %242 = vector.shape_cast %241 : vector<1x1x2x32xf32> to vector<2x32xf32>
    %c1_211 = arith.constant 1 : index
    %c1_212 = arith.constant 1 : index
    %c10_213 = arith.constant 10 : index
    %c0_214 = arith.constant 0 : index
    %243 = vector.load %arg8[%c1_211, %c1_212, %c10_213, %c0_214] : memref<2x3x16x32xf32, #tpu.memory_space<vmem>>, vector<1x1x2x32xf32>
    %244 = vector.shape_cast %243 : vector<1x1x2x32xf32> to vector<2x32xf32>
    %c1_215 = arith.constant 1 : index
    %c2_216 = arith.constant 2 : index
    %c10_217 = arith.constant 10 : index
    %c0_218 = arith.constant 0 : index
    %245 = vector.load %arg8[%c1_215, %c2_216, %c10_217, %c0_218] : memref<2x3x16x32xf32, #tpu.memory_space<vmem>>, vector<1x1x2x32xf32>
    %246 = vector.shape_cast %245 : vector<1x1x2x32xf32> to vector<2x32xf32>
    %cst_219 = arith.constant dense<0.000000e+00> : vector<2x32xf32>
    %247 = tpu.matmul %207, %68, %cst_219 {dimension_numbers = #tpu.dot_dimension_numbers<[1], [0], [0], [1], [0, 0, 1, 1], [], []>} : vector<2x32xf32>, vector<32x32xf32>, vector<2x32xf32> -> vector<2x32xf32>
    %cst_220 = arith.constant dense<0.000000e+00> : vector<2x32xf32>
    %248 = tpu.matmul %207, %70, %cst_220 {dimension_numbers = #tpu.dot_dimension_numbers<[1], [0], [0], [1], [0, 0, 1, 1], [], []>} : vector<2x32xf32>, vector<32x32xf32>, vector<2x32xf32> -> vector<2x32xf32>
    %cst_221 = arith.constant dense<0.000000e+00> : vector<2x32xf32>
    %249 = tpu.matmul %207, %72, %cst_221 {dimension_numbers = #tpu.dot_dimension_numbers<[1], [0], [0], [1], [0, 0, 1, 1], [], []>} : vector<2x32xf32>, vector<32x32xf32>, vector<2x32xf32> -> vector<2x32xf32>
    %250 = vector.broadcast %76 : vector<1x32xf32> to vector<2x32xf32>
    %251 = arith.addf %249, %250 : vector<2x32xf32>
    %252 = arith.addf %242, %247 : vector<2x32xf32>
    %253 = arith.negf %252 : vector<2x32xf32>
    %254 = math.exp %253 : vector<2x32xf32>
    %cst_222 = arith.constant 1.000000e+00 : f32
    %255 = vector.broadcast %cst_222 : f32 to vector<2x32xf32>
    %256 = arith.addf %255, %254 : vector<2x32xf32>
    %257 = arith.divf %255, %256 : vector<2x32xf32>
    %258 = arith.addf %244, %248 : vector<2x32xf32>
    %259 = arith.negf %258 : vector<2x32xf32>
    %260 = math.exp %259 : vector<2x32xf32>
    %cst_223 = arith.constant 1.000000e+00 : f32
    %261 = vector.broadcast %cst_223 : f32 to vector<2x32xf32>
    %262 = arith.addf %261, %260 : vector<2x32xf32>
    %263 = arith.divf %261, %262 : vector<2x32xf32>
    %264 = arith.mulf %257, %251 : vector<2x32xf32>
    %265 = arith.addf %246, %264 : vector<2x32xf32>
    %266 = math.tanh %265 : vector<2x32xf32>
    %cst_224 = arith.constant 1.000000e+00 : f32
    %267 = vector.broadcast %cst_224 : f32 to vector<2x32xf32>
    %268 = arith.subf %267, %263 : vector<2x32xf32>
    %269 = arith.mulf %268, %266 : vector<2x32xf32>
    %270 = arith.mulf %263, %207 : vector<2x32xf32>
    %271 = arith.addf %269, %270 : vector<2x32xf32>
    %c10_225 = arith.constant 10 : index
    %c32_226 = arith.constant 32 : index
    %272 = vector.load %arg7[%c10_225, %c32_226] : memref<16x64xf32, #tpu.memory_space<vmem>>, vector<2x32xf32>
    tpu.vector_store %arg7[%c10_225, %c32_226], %271 {strides = array<i32>} : memref<16x64xf32, #tpu.memory_space<vmem>>, vector<2x32xf32>,
    %c0_227 = arith.constant 0 : index
    %c0_228 = arith.constant 0 : index
    %c6 = arith.constant 6 : index
    %c0_229 = arith.constant 0 : index
    %273 = vector.load %arg8[%c0_227, %c0_228, %c6, %c0_229] : memref<2x3x16x32xf32, #tpu.memory_space<vmem>>, vector<1x1x2x32xf32>
    %274 = vector.shape_cast %273 : vector<1x1x2x32xf32> to vector<2x32xf32>
    %c0_230 = arith.constant 0 : index
    %c1_231 = arith.constant 1 : index
    %c6_232 = arith.constant 6 : index
    %c0_233 = arith.constant 0 : index
    %275 = vector.load %arg8[%c0_230, %c1_231, %c6_232, %c0_233] : memref<2x3x16x32xf32, #tpu.memory_space<vmem>>, vector<1x1x2x32xf32>
    %276 = vector.shape_cast %275 : vector<1x1x2x32xf32> to vector<2x32xf32>
    %c0_234 = arith.constant 0 : index
    %c2_235 = arith.constant 2 : index
    %c6_236 = arith.constant 6 : index
    %c0_237 = arith.constant 0 : index
    %277 = vector.load %arg8[%c0_234, %c2_235, %c6_236, %c0_237] : memref<2x3x16x32xf32, #tpu.memory_space<vmem>>, vector<1x1x2x32xf32>
    %278 = vector.shape_cast %277 : vector<1x1x2x32xf32> to vector<2x32xf32>
    %cst_238 = arith.constant dense<0.000000e+00> : vector<2x32xf32>
    %279 = tpu.matmul %239, %62, %cst_238 {dimension_numbers = #tpu.dot_dimension_numbers<[1], [0], [0], [1], [0, 0, 1, 1], [], []>} : vector<2x32xf32>, vector<32x32xf32>, vector<2x32xf32> -> vector<2x32xf32>
    %cst_239 = arith.constant dense<0.000000e+00> : vector<2x32xf32>
    %280 = tpu.matmul %239, %64, %cst_239 {dimension_numbers = #tpu.dot_dimension_numbers<[1], [0], [0], [1], [0, 0, 1, 1], [], []>} : vector<2x32xf32>, vector<32x32xf32>, vector<2x32xf32> -> vector<2x32xf32>
    %cst_240 = arith.constant dense<0.000000e+00> : vector<2x32xf32>
    %281 = tpu.matmul %239, %66, %cst_240 {dimension_numbers = #tpu.dot_dimension_numbers<[1], [0], [0], [1], [0, 0, 1, 1], [], []>} : vector<2x32xf32>, vector<32x32xf32>, vector<2x32xf32> -> vector<2x32xf32>
    %282 = vector.broadcast %74 : vector<1x32xf32> to vector<2x32xf32>
    %283 = arith.addf %281, %282 : vector<2x32xf32>
    %284 = arith.addf %274, %279 : vector<2x32xf32>
    %285 = arith.negf %284 : vector<2x32xf32>
    %286 = math.exp %285 : vector<2x32xf32>
    %cst_241 = arith.constant 1.000000e+00 : f32
    %287 = vector.broadcast %cst_241 : f32 to vector<2x32xf32>
    %288 = arith.addf %287, %286 : vector<2x32xf32>
    %289 = arith.divf %287, %288 : vector<2x32xf32>
    %290 = arith.addf %276, %280 : vector<2x32xf32>
    %291 = arith.negf %290 : vector<2x32xf32>
    %292 = math.exp %291 : vector<2x32xf32>
    %cst_242 = arith.constant 1.000000e+00 : f32
    %293 = vector.broadcast %cst_242 : f32 to vector<2x32xf32>
    %294 = arith.addf %293, %292 : vector<2x32xf32>
    %295 = arith.divf %293, %294 : vector<2x32xf32>
    %296 = arith.mulf %289, %283 : vector<2x32xf32>
    %297 = arith.addf %278, %296 : vector<2x32xf32>
    %298 = math.tanh %297 : vector<2x32xf32>
    %cst_243 = arith.constant 1.000000e+00 : f32
    %299 = vector.broadcast %cst_243 : f32 to vector<2x32xf32>
    %300 = arith.subf %299, %295 : vector<2x32xf32>
    %301 = arith.mulf %300, %298 : vector<2x32xf32>
    %302 = arith.mulf %295, %239 : vector<2x32xf32>
    %303 = arith.addf %301, %302 : vector<2x32xf32>
    %c6_244 = arith.constant 6 : index
    %c0_245 = arith.constant 0 : index
    %304 = vector.load %arg7[%c6_244, %c0_245] : memref<16x64xf32, #tpu.memory_space<vmem>>, vector<2x32xf32>
    tpu.vector_store %arg7[%c6_244, %c0_245], %303 {strides = array<i32>} : memref<16x64xf32, #tpu.memory_space<vmem>>, vector<2x32xf32>,
    %c1_246 = arith.constant 1 : index
    %c0_247 = arith.constant 0 : index
    %c8 = arith.constant 8 : index
    %c0_248 = arith.constant 0 : index
    %305 = vector.load %arg8[%c1_246, %c0_247, %c8, %c0_248] : memref<2x3x16x32xf32, #tpu.memory_space<vmem>>, vector<1x1x2x32xf32>
    %306 = vector.shape_cast %305 : vector<1x1x2x32xf32> to vector<2x32xf32>
    %c1_249 = arith.constant 1 : index
    %c1_250 = arith.constant 1 : index
    %c8_251 = arith.constant 8 : index
    %c0_252 = arith.constant 0 : index
    %307 = vector.load %arg8[%c1_249, %c1_250, %c8_251, %c0_252] : memref<2x3x16x32xf32, #tpu.memory_space<vmem>>, vector<1x1x2x32xf32>
    %308 = vector.shape_cast %307 : vector<1x1x2x32xf32> to vector<2x32xf32>
    %c1_253 = arith.constant 1 : index
    %c2_254 = arith.constant 2 : index
    %c8_255 = arith.constant 8 : index
    %c0_256 = arith.constant 0 : index
    %309 = vector.load %arg8[%c1_253, %c2_254, %c8_255, %c0_256] : memref<2x3x16x32xf32, #tpu.memory_space<vmem>>, vector<1x1x2x32xf32>
    %310 = vector.shape_cast %309 : vector<1x1x2x32xf32> to vector<2x32xf32>
    %cst_257 = arith.constant dense<0.000000e+00> : vector<2x32xf32>
    %311 = tpu.matmul %271, %68, %cst_257 {dimension_numbers = #tpu.dot_dimension_numbers<[1], [0], [0], [1], [0, 0, 1, 1], [], []>} : vector<2x32xf32>, vector<32x32xf32>, vector<2x32xf32> -> vector<2x32xf32>
    %cst_258 = arith.constant dense<0.000000e+00> : vector<2x32xf32>
    %312 = tpu.matmul %271, %70, %cst_258 {dimension_numbers = #tpu.dot_dimension_numbers<[1], [0], [0], [1], [0, 0, 1, 1], [], []>} : vector<2x32xf32>, vector<32x32xf32>, vector<2x32xf32> -> vector<2x32xf32>
    %cst_259 = arith.constant dense<0.000000e+00> : vector<2x32xf32>
    %313 = tpu.matmul %271, %72, %cst_259 {dimension_numbers = #tpu.dot_dimension_numbers<[1], [0], [0], [1], [0, 0, 1, 1], [], []>} : vector<2x32xf32>, vector<32x32xf32>, vector<2x32xf32> -> vector<2x32xf32>
    %314 = vector.broadcast %76 : vector<1x32xf32> to vector<2x32xf32>
    %315 = arith.addf %313, %314 : vector<2x32xf32>
    %316 = arith.addf %306, %311 : vector<2x32xf32>
    %317 = arith.negf %316 : vector<2x32xf32>
    %318 = math.exp %317 : vector<2x32xf32>
    %cst_260 = arith.constant 1.000000e+00 : f32
    %319 = vector.broadcast %cst_260 : f32 to vector<2x32xf32>
    %320 = arith.addf %319, %318 : vector<2x32xf32>
    %321 = arith.divf %319, %320 : vector<2x32xf32>
    %322 = arith.addf %308, %312 : vector<2x32xf32>
    %323 = arith.negf %322 : vector<2x32xf32>
    %324 = math.exp %323 : vector<2x32xf32>
    %cst_261 = arith.constant 1.000000e+00 : f32
    %325 = vector.broadcast %cst_261 : f32 to vector<2x32xf32>
    %326 = arith.addf %325, %324 : vector<2x32xf32>
    %327 = arith.divf %325, %326 : vector<2x32xf32>
    %328 = arith.mulf %321, %315 : vector<2x32xf32>
    %329 = arith.addf %310, %328 : vector<2x32xf32>
    %330 = math.tanh %329 : vector<2x32xf32>
    %cst_262 = arith.constant 1.000000e+00 : f32
    %331 = vector.broadcast %cst_262 : f32 to vector<2x32xf32>
    %332 = arith.subf %331, %327 : vector<2x32xf32>
    %333 = arith.mulf %332, %330 : vector<2x32xf32>
    %334 = arith.mulf %327, %271 : vector<2x32xf32>
    %335 = arith.addf %333, %334 : vector<2x32xf32>
    %c8_263 = arith.constant 8 : index
    %c32_264 = arith.constant 32 : index
    %336 = vector.load %arg7[%c8_263, %c32_264] : memref<16x64xf32, #tpu.memory_space<vmem>>, vector<2x32xf32>
    tpu.vector_store %arg7[%c8_263, %c32_264], %335 {strides = array<i32>} : memref<16x64xf32, #tpu.memory_space<vmem>>, vector<2x32xf32>,
    %c0_265 = arith.constant 0 : index
    %c0_266 = arith.constant 0 : index
    %c8_267 = arith.constant 8 : index
    %c0_268 = arith.constant 0 : index
    %337 = vector.load %arg8[%c0_265, %c0_266, %c8_267, %c0_268] : memref<2x3x16x32xf32, #tpu.memory_space<vmem>>, vector<1x1x2x32xf32>
    %338 = vector.shape_cast %337 : vector<1x1x2x32xf32> to vector<2x32xf32>
    %c0_269 = arith.constant 0 : index
    %c1_270 = arith.constant 1 : index
    %c8_271 = arith.constant 8 : index
    %c0_272 = arith.constant 0 : index
    %339 = vector.load %arg8[%c0_269, %c1_270, %c8_271, %c0_272] : memref<2x3x16x32xf32, #tpu.memory_space<vmem>>, vector<1x1x2x32xf32>
    %340 = vector.shape_cast %339 : vector<1x1x2x32xf32> to vector<2x32xf32>
    %c0_273 = arith.constant 0 : index
    %c2_274 = arith.constant 2 : index
    %c8_275 = arith.constant 8 : index
    %c0_276 = arith.constant 0 : index
    %341 = vector.load %arg8[%c0_273, %c2_274, %c8_275, %c0_276] : memref<2x3x16x32xf32, #tpu.memory_space<vmem>>, vector<1x1x2x32xf32>
    %342 = vector.shape_cast %341 : vector<1x1x2x32xf32> to vector<2x32xf32>
    %cst_277 = arith.constant dense<0.000000e+00> : vector<2x32xf32>
    %343 = tpu.matmul %303, %62, %cst_277 {dimension_numbers = #tpu.dot_dimension_numbers<[1], [0], [0], [1], [0, 0, 1, 1], [], []>} : vector<2x32xf32>, vector<32x32xf32>, vector<2x32xf32> -> vector<2x32xf32>
    %cst_278 = arith.constant dense<0.000000e+00> : vector<2x32xf32>
    %344 = tpu.matmul %303, %64, %cst_278 {dimension_numbers = #tpu.dot_dimension_numbers<[1], [0], [0], [1], [0, 0, 1, 1], [], []>} : vector<2x32xf32>, vector<32x32xf32>, vector<2x32xf32> -> vector<2x32xf32>
    %cst_279 = arith.constant dense<0.000000e+00> : vector<2x32xf32>
    %345 = tpu.matmul %303, %66, %cst_279 {dimension_numbers = #tpu.dot_dimension_numbers<[1], [0], [0], [1], [0, 0, 1, 1], [], []>} : vector<2x32xf32>, vector<32x32xf32>, vector<2x32xf32> -> vector<2x32xf32>
    %346 = vector.broadcast %74 : vector<1x32xf32> to vector<2x32xf32>
    %347 = arith.addf %345, %346 : vector<2x32xf32>
    %348 = arith.addf %338, %343 : vector<2x32xf32>
    %349 = arith.negf %348 : vector<2x32xf32>
    %350 = math.exp %349 : vector<2x32xf32>
    %cst_280 = arith.constant 1.000000e+00 : f32
    %351 = vector.broadcast %cst_280 : f32 to vector<2x32xf32>
    %352 = arith.addf %351, %350 : vector<2x32xf32>
    %353 = arith.divf %351, %352 : vector<2x32xf32>
    %354 = arith.addf %340, %344 : vector<2x32xf32>
    %355 = arith.negf %354 : vector<2x32xf32>
    %356 = math.exp %355 : vector<2x32xf32>
    %cst_281 = arith.constant 1.000000e+00 : f32
    %357 = vector.broadcast %cst_281 : f32 to vector<2x32xf32>
    %358 = arith.addf %357, %356 : vector<2x32xf32>
    %359 = arith.divf %357, %358 : vector<2x32xf32>
    %360 = arith.mulf %353, %347 : vector<2x32xf32>
    %361 = arith.addf %342, %360 : vector<2x32xf32>
    %362 = math.tanh %361 : vector<2x32xf32>
    %cst_282 = arith.constant 1.000000e+00 : f32
    %363 = vector.broadcast %cst_282 : f32 to vector<2x32xf32>
    %364 = arith.subf %363, %359 : vector<2x32xf32>
    %365 = arith.mulf %364, %362 : vector<2x32xf32>
    %366 = arith.mulf %359, %303 : vector<2x32xf32>
    %367 = arith.addf %365, %366 : vector<2x32xf32>
    %c8_283 = arith.constant 8 : index
    %c0_284 = arith.constant 0 : index
    %368 = vector.load %arg7[%c8_283, %c0_284] : memref<16x64xf32, #tpu.memory_space<vmem>>, vector<2x32xf32>
    tpu.vector_store %arg7[%c8_283, %c0_284], %367 {strides = array<i32>} : memref<16x64xf32, #tpu.memory_space<vmem>>, vector<2x32xf32>,
    %c1_285 = arith.constant 1 : index
    %c0_286 = arith.constant 0 : index
    %c6_287 = arith.constant 6 : index
    %c0_288 = arith.constant 0 : index
    %369 = vector.load %arg8[%c1_285, %c0_286, %c6_287, %c0_288] : memref<2x3x16x32xf32, #tpu.memory_space<vmem>>, vector<1x1x2x32xf32>
    %370 = vector.shape_cast %369 : vector<1x1x2x32xf32> to vector<2x32xf32>
    %c1_289 = arith.constant 1 : index
    %c1_290 = arith.constant 1 : index
    %c6_291 = arith.constant 6 : index
    %c0_292 = arith.constant 0 : index
    %371 = vector.load %arg8[%c1_289, %c1_290, %c6_291, %c0_292] : memref<2x3x16x32xf32, #tpu.memory_space<vmem>>, vector<1x1x2x32xf32>
    %372 = vector.shape_cast %371 : vector<1x1x2x32xf32> to vector<2x32xf32>
    %c1_293 = arith.constant 1 : index
    %c2_294 = arith.constant 2 : index
    %c6_295 = arith.constant 6 : index
    %c0_296 = arith.constant 0 : index
    %373 = vector.load %arg8[%c1_293, %c2_294, %c6_295, %c0_296] : memref<2x3x16x32xf32, #tpu.memory_space<vmem>>, vector<1x1x2x32xf32>
    %374 = vector.shape_cast %373 : vector<1x1x2x32xf32> to vector<2x32xf32>
    %cst_297 = arith.constant dense<0.000000e+00> : vector<2x32xf32>
    %375 = tpu.matmul %335, %68, %cst_297 {dimension_numbers = #tpu.dot_dimension_numbers<[1], [0], [0], [1], [0, 0, 1, 1], [], []>} : vector<2x32xf32>, vector<32x32xf32>, vector<2x32xf32> -> vector<2x32xf32>
    %cst_298 = arith.constant dense<0.000000e+00> : vector<2x32xf32>
    %376 = tpu.matmul %335, %70, %cst_298 {dimension_numbers = #tpu.dot_dimension_numbers<[1], [0], [0], [1], [0, 0, 1, 1], [], []>} : vector<2x32xf32>, vector<32x32xf32>, vector<2x32xf32> -> vector<2x32xf32>
    %cst_299 = arith.constant dense<0.000000e+00> : vector<2x32xf32>
    %377 = tpu.matmul %335, %72, %cst_299 {dimension_numbers = #tpu.dot_dimension_numbers<[1], [0], [0], [1], [0, 0, 1, 1], [], []>} : vector<2x32xf32>, vector<32x32xf32>, vector<2x32xf32> -> vector<2x32xf32>
    %378 = vector.broadcast %76 : vector<1x32xf32> to vector<2x32xf32>
    %379 = arith.addf %377, %378 : vector<2x32xf32>
    %380 = arith.addf %370, %375 : vector<2x32xf32>
    %381 = arith.negf %380 : vector<2x32xf32>
    %382 = math.exp %381 : vector<2x32xf32>
    %cst_300 = arith.constant 1.000000e+00 : f32
    %383 = vector.broadcast %cst_300 : f32 to vector<2x32xf32>
    %384 = arith.addf %383, %382 : vector<2x32xf32>
    %385 = arith.divf %383, %384 : vector<2x32xf32>
    %386 = arith.addf %372, %376 : vector<2x32xf32>
    %387 = arith.negf %386 : vector<2x32xf32>
    %388 = math.exp %387 : vector<2x32xf32>
    %cst_301 = arith.constant 1.000000e+00 : f32
    %389 = vector.broadcast %cst_301 : f32 to vector<2x32xf32>
    %390 = arith.addf %389, %388 : vector<2x32xf32>
    %391 = arith.divf %389, %390 : vector<2x32xf32>
    %392 = arith.mulf %385, %379 : vector<2x32xf32>
    %393 = arith.addf %374, %392 : vector<2x32xf32>
    %394 = math.tanh %393 : vector<2x32xf32>
    %cst_302 = arith.constant 1.000000e+00 : f32
    %395 = vector.broadcast %cst_302 : f32 to vector<2x32xf32>
    %396 = arith.subf %395, %391 : vector<2x32xf32>
    %397 = arith.mulf %396, %394 : vector<2x32xf32>
    %398 = arith.mulf %391, %335 : vector<2x32xf32>
    %399 = arith.addf %397, %398 : vector<2x32xf32>
    %c6_303 = arith.constant 6 : index
    %c32_304 = arith.constant 32 : index
    %400 = vector.load %arg7[%c6_303, %c32_304] : memref<16x64xf32, #tpu.memory_space<vmem>>, vector<2x32xf32>
    tpu.vector_store %arg7[%c6_303, %c32_304], %399 {strides = array<i32>} : memref<16x64xf32, #tpu.memory_space<vmem>>, vector<2x32xf32>,
    %c0_305 = arith.constant 0 : index
    %c0_306 = arith.constant 0 : index
    %c10_307 = arith.constant 10 : index
    %c0_308 = arith.constant 0 : index
    %401 = vector.load %arg8[%c0_305, %c0_306, %c10_307, %c0_308] : memref<2x3x16x32xf32, #tpu.memory_space<vmem>>, vector<1x1x2x32xf32>
    %402 = vector.shape_cast %401 : vector<1x1x2x32xf32> to vector<2x32xf32>
    %c0_309 = arith.constant 0 : index
    %c1_310 = arith.constant 1 : index
    %c10_311 = arith.constant 10 : index
    %c0_312 = arith.constant 0 : index
    %403 = vector.load %arg8[%c0_309, %c1_310, %c10_311, %c0_312] : memref<2x3x16x32xf32, #tpu.memory_space<vmem>>, vector<1x1x2x32xf32>
    %404 = vector.shape_cast %403 : vector<1x1x2x32xf32> to vector<2x32xf32>
    %c0_313 = arith.constant 0 : index
    %c2_314 = arith.constant 2 : index
    %c10_315 = arith.constant 10 : index
    %c0_316 = arith.constant 0 : index
    %405 = vector.load %arg8[%c0_313, %c2_314, %c10_315, %c0_316] : memref<2x3x16x32xf32, #tpu.memory_space<vmem>>, vector<1x1x2x32xf32>
    %406 = vector.shape_cast %405 : vector<1x1x2x32xf32> to vector<2x32xf32>
    %cst_317 = arith.constant dense<0.000000e+00> : vector<2x32xf32>
    %407 = tpu.matmul %367, %62, %cst_317 {dimension_numbers = #tpu.dot_dimension_numbers<[1], [0], [0], [1], [0, 0, 1, 1], [], []>} : vector<2x32xf32>, vector<32x32xf32>, vector<2x32xf32> -> vector<2x32xf32>
    %cst_318 = arith.constant dense<0.000000e+00> : vector<2x32xf32>
    %408 = tpu.matmul %367, %64, %cst_318 {dimension_numbers = #tpu.dot_dimension_numbers<[1], [0], [0], [1], [0, 0, 1, 1], [], []>} : vector<2x32xf32>, vector<32x32xf32>, vector<2x32xf32> -> vector<2x32xf32>
    %cst_319 = arith.constant dense<0.000000e+00> : vector<2x32xf32>
    %409 = tpu.matmul %367, %66, %cst_319 {dimension_numbers = #tpu.dot_dimension_numbers<[1], [0], [0], [1], [0, 0, 1, 1], [], []>} : vector<2x32xf32>, vector<32x32xf32>, vector<2x32xf32> -> vector<2x32xf32>
    %410 = vector.broadcast %74 : vector<1x32xf32> to vector<2x32xf32>
    %411 = arith.addf %409, %410 : vector<2x32xf32>
    %412 = arith.addf %402, %407 : vector<2x32xf32>
    %413 = arith.negf %412 : vector<2x32xf32>
    %414 = math.exp %413 : vector<2x32xf32>
    %cst_320 = arith.constant 1.000000e+00 : f32
    %415 = vector.broadcast %cst_320 : f32 to vector<2x32xf32>
    %416 = arith.addf %415, %414 : vector<2x32xf32>
    %417 = arith.divf %415, %416 : vector<2x32xf32>
    %418 = arith.addf %404, %408 : vector<2x32xf32>
    %419 = arith.negf %418 : vector<2x32xf32>
    %420 = math.exp %419 : vector<2x32xf32>
    %cst_321 = arith.constant 1.000000e+00 : f32
    %421 = vector.broadcast %cst_321 : f32 to vector<2x32xf32>
    %422 = arith.addf %421, %420 : vector<2x32xf32>
    %423 = arith.divf %421, %422 : vector<2x32xf32>
    %424 = arith.mulf %417, %411 : vector<2x32xf32>
    %425 = arith.addf %406, %424 : vector<2x32xf32>
    %426 = math.tanh %425 : vector<2x32xf32>
    %cst_322 = arith.constant 1.000000e+00 : f32
    %427 = vector.broadcast %cst_322 : f32 to vector<2x32xf32>
    %428 = arith.subf %427, %423 : vector<2x32xf32>
    %429 = arith.mulf %428, %426 : vector<2x32xf32>
    %430 = arith.mulf %423, %367 : vector<2x32xf32>
    %431 = arith.addf %429, %430 : vector<2x32xf32>
    %c10_323 = arith.constant 10 : index
    %c0_324 = arith.constant 0 : index
    %432 = vector.load %arg7[%c10_323, %c0_324] : memref<16x64xf32, #tpu.memory_space<vmem>>, vector<2x32xf32>
    tpu.vector_store %arg7[%c10_323, %c0_324], %431 {strides = array<i32>} : memref<16x64xf32, #tpu.memory_space<vmem>>, vector<2x32xf32>,
    %c1_325 = arith.constant 1 : index
    %c0_326 = arith.constant 0 : index
    %c4_327 = arith.constant 4 : index
    %c0_328 = arith.constant 0 : index
    %433 = vector.load %arg8[%c1_325, %c0_326, %c4_327, %c0_328] : memref<2x3x16x32xf32, #tpu.memory_space<vmem>>, vector<1x1x2x32xf32>
    %434 = vector.shape_cast %433 : vector<1x1x2x32xf32> to vector<2x32xf32>
    %c1_329 = arith.constant 1 : index
    %c1_330 = arith.constant 1 : index
    %c4_331 = arith.constant 4 : index
    %c0_332 = arith.constant 0 : index
    %435 = vector.load %arg8[%c1_329, %c1_330, %c4_331, %c0_332] : memref<2x3x16x32xf32, #tpu.memory_space<vmem>>, vector<1x1x2x32xf32>
    %436 = vector.shape_cast %435 : vector<1x1x2x32xf32> to vector<2x32xf32>
    %c1_333 = arith.constant 1 : index
    %c2_334 = arith.constant 2 : index
    %c4_335 = arith.constant 4 : index
    %c0_336 = arith.constant 0 : index
    %437 = vector.load %arg8[%c1_333, %c2_334, %c4_335, %c0_336] : memref<2x3x16x32xf32, #tpu.memory_space<vmem>>, vector<1x1x2x32xf32>
    %438 = vector.shape_cast %437 : vector<1x1x2x32xf32> to vector<2x32xf32>
    %cst_337 = arith.constant dense<0.000000e+00> : vector<2x32xf32>
    %439 = tpu.matmul %399, %68, %cst_337 {dimension_numbers = #tpu.dot_dimension_numbers<[1], [0], [0], [1], [0, 0, 1, 1], [], []>} : vector<2x32xf32>, vector<32x32xf32>, vector<2x32xf32> -> vector<2x32xf32>
    %cst_338 = arith.constant dense<0.000000e+00> : vector<2x32xf32>
    %440 = tpu.matmul %399, %70, %cst_338 {dimension_numbers = #tpu.dot_dimension_numbers<[1], [0], [0], [1], [0, 0, 1, 1], [], []>} : vector<2x32xf32>, vector<32x32xf32>, vector<2x32xf32> -> vector<2x32xf32>
    %cst_339 = arith.constant dense<0.000000e+00> : vector<2x32xf32>
    %441 = tpu.matmul %399, %72, %cst_339 {dimension_numbers = #tpu.dot_dimension_numbers<[1], [0], [0], [1], [0, 0, 1, 1], [], []>} : vector<2x32xf32>, vector<32x32xf32>, vector<2x32xf32> -> vector<2x32xf32>
    %442 = vector.broadcast %76 : vector<1x32xf32> to vector<2x32xf32>
    %443 = arith.addf %441, %442 : vector<2x32xf32>
    %444 = arith.addf %434, %439 : vector<2x32xf32>
    %445 = arith.negf %444 : vector<2x32xf32>
    %446 = math.exp %445 : vector<2x32xf32>
    %cst_340 = arith.constant 1.000000e+00 : f32
    %447 = vector.broadcast %cst_340 : f32 to vector<2x32xf32>
    %448 = arith.addf %447, %446 : vector<2x32xf32>
    %449 = arith.divf %447, %448 : vector<2x32xf32>
    %450 = arith.addf %436, %440 : vector<2x32xf32>
    %451 = arith.negf %450 : vector<2x32xf32>
    %452 = math.exp %451 : vector<2x32xf32>
    %cst_341 = arith.constant 1.000000e+00 : f32
    %453 = vector.broadcast %cst_341 : f32 to vector<2x32xf32>
    %454 = arith.addf %453, %452 : vector<2x32xf32>
    %455 = arith.divf %453, %454 : vector<2x32xf32>
    %456 = arith.mulf %449, %443 : vector<2x32xf32>
    %457 = arith.addf %438, %456 : vector<2x32xf32>
    %458 = math.tanh %457 : vector<2x32xf32>
    %cst_342 = arith.constant 1.000000e+00 : f32
    %459 = vector.broadcast %cst_342 : f32 to vector<2x32xf32>
    %460 = arith.subf %459, %455 : vector<2x32xf32>
    %461 = arith.mulf %460, %458 : vector<2x32xf32>
    %462 = arith.mulf %455, %399 : vector<2x32xf32>
    %463 = arith.addf %461, %462 : vector<2x32xf32>
    %c4_343 = arith.constant 4 : index
    %c32_344 = arith.constant 32 : index
    %464 = vector.load %arg7[%c4_343, %c32_344] : memref<16x64xf32, #tpu.memory_space<vmem>>, vector<2x32xf32>
    tpu.vector_store %arg7[%c4_343, %c32_344], %463 {strides = array<i32>} : memref<16x64xf32, #tpu.memory_space<vmem>>, vector<2x32xf32>,
    %c0_345 = arith.constant 0 : index
    %c0_346 = arith.constant 0 : index
    %c12_347 = arith.constant 12 : index
    %c0_348 = arith.constant 0 : index
    %465 = vector.load %arg8[%c0_345, %c0_346, %c12_347, %c0_348] : memref<2x3x16x32xf32, #tpu.memory_space<vmem>>, vector<1x1x2x32xf32>
    %466 = vector.shape_cast %465 : vector<1x1x2x32xf32> to vector<2x32xf32>
    %c0_349 = arith.constant 0 : index
    %c1_350 = arith.constant 1 : index
    %c12_351 = arith.constant 12 : index
    %c0_352 = arith.constant 0 : index
    %467 = vector.load %arg8[%c0_349, %c1_350, %c12_351, %c0_352] : memref<2x3x16x32xf32, #tpu.memory_space<vmem>>, vector<1x1x2x32xf32>
    %468 = vector.shape_cast %467 : vector<1x1x2x32xf32> to vector<2x32xf32>
    %c0_353 = arith.constant 0 : index
    %c2_354 = arith.constant 2 : index
    %c12_355 = arith.constant 12 : index
    %c0_356 = arith.constant 0 : index
    %469 = vector.load %arg8[%c0_353, %c2_354, %c12_355, %c0_356] : memref<2x3x16x32xf32, #tpu.memory_space<vmem>>, vector<1x1x2x32xf32>
    %470 = vector.shape_cast %469 : vector<1x1x2x32xf32> to vector<2x32xf32>
    %cst_357 = arith.constant dense<0.000000e+00> : vector<2x32xf32>
    %471 = tpu.matmul %431, %62, %cst_357 {dimension_numbers = #tpu.dot_dimension_numbers<[1], [0], [0], [1], [0, 0, 1, 1], [], []>} : vector<2x32xf32>, vector<32x32xf32>, vector<2x32xf32> -> vector<2x32xf32>
    %cst_358 = arith.constant dense<0.000000e+00> : vector<2x32xf32>
    %472 = tpu.matmul %431, %64, %cst_358 {dimension_numbers = #tpu.dot_dimension_numbers<[1], [0], [0], [1], [0, 0, 1, 1], [], []>} : vector<2x32xf32>, vector<32x32xf32>, vector<2x32xf32> -> vector<2x32xf32>
    %cst_359 = arith.constant dense<0.000000e+00> : vector<2x32xf32>
    %473 = tpu.matmul %431, %66, %cst_359 {dimension_numbers = #tpu.dot_dimension_numbers<[1], [0], [0], [1], [0, 0, 1, 1], [], []>} : vector<2x32xf32>, vector<32x32xf32>, vector<2x32xf32> -> vector<2x32xf32>
    %474 = vector.broadcast %74 : vector<1x32xf32> to vector<2x32xf32>
    %475 = arith.addf %473, %474 : vector<2x32xf32>
    %476 = arith.addf %466, %471 : vector<2x32xf32>
    %477 = arith.negf %476 : vector<2x32xf32>
    %478 = math.exp %477 : vector<2x32xf32>
    %cst_360 = arith.constant 1.000000e+00 : f32
    %479 = vector.broadcast %cst_360 : f32 to vector<2x32xf32>
    %480 = arith.addf %479, %478 : vector<2x32xf32>
    %481 = arith.divf %479, %480 : vector<2x32xf32>
    %482 = arith.addf %468, %472 : vector<2x32xf32>
    %483 = arith.negf %482 : vector<2x32xf32>
    %484 = math.exp %483 : vector<2x32xf32>
    %cst_361 = arith.constant 1.000000e+00 : f32
    %485 = vector.broadcast %cst_361 : f32 to vector<2x32xf32>
    %486 = arith.addf %485, %484 : vector<2x32xf32>
    %487 = arith.divf %485, %486 : vector<2x32xf32>
    %488 = arith.mulf %481, %475 : vector<2x32xf32>
    %489 = arith.addf %470, %488 : vector<2x32xf32>
    %490 = math.tanh %489 : vector<2x32xf32>
    %cst_362 = arith.constant 1.000000e+00 : f32
    %491 = vector.broadcast %cst_362 : f32 to vector<2x32xf32>
    %492 = arith.subf %491, %487 : vector<2x32xf32>
    %493 = arith.mulf %492, %490 : vector<2x32xf32>
    %494 = arith.mulf %487, %431 : vector<2x32xf32>
    %495 = arith.addf %493, %494 : vector<2x32xf32>
    %c12_363 = arith.constant 12 : index
    %c0_364 = arith.constant 0 : index
    %496 = vector.load %arg7[%c12_363, %c0_364] : memref<16x64xf32, #tpu.memory_space<vmem>>, vector<2x32xf32>
    tpu.vector_store %arg7[%c12_363, %c0_364], %495 {strides = array<i32>} : memref<16x64xf32, #tpu.memory_space<vmem>>, vector<2x32xf32>,
    %c1_365 = arith.constant 1 : index
    %c0_366 = arith.constant 0 : index
    %c2_367 = arith.constant 2 : index
    %c0_368 = arith.constant 0 : index
    %497 = vector.load %arg8[%c1_365, %c0_366, %c2_367, %c0_368] : memref<2x3x16x32xf32, #tpu.memory_space<vmem>>, vector<1x1x2x32xf32>
    %498 = vector.shape_cast %497 : vector<1x1x2x32xf32> to vector<2x32xf32>
    %c1_369 = arith.constant 1 : index
    %c1_370 = arith.constant 1 : index
    %c2_371 = arith.constant 2 : index
    %c0_372 = arith.constant 0 : index
    %499 = vector.load %arg8[%c1_369, %c1_370, %c2_371, %c0_372] : memref<2x3x16x32xf32, #tpu.memory_space<vmem>>, vector<1x1x2x32xf32>
    %500 = vector.shape_cast %499 : vector<1x1x2x32xf32> to vector<2x32xf32>
    %c1_373 = arith.constant 1 : index
    %c2_374 = arith.constant 2 : index
    %c2_375 = arith.constant 2 : index
    %c0_376 = arith.constant 0 : index
    %501 = vector.load %arg8[%c1_373, %c2_374, %c2_375, %c0_376] : memref<2x3x16x32xf32, #tpu.memory_space<vmem>>, vector<1x1x2x32xf32>
    %502 = vector.shape_cast %501 : vector<1x1x2x32xf32> to vector<2x32xf32>
    %cst_377 = arith.constant dense<0.000000e+00> : vector<2x32xf32>
    %503 = tpu.matmul %463, %68, %cst_377 {dimension_numbers = #tpu.dot_dimension_numbers<[1], [0], [0], [1], [0, 0, 1, 1], [], []>} : vector<2x32xf32>, vector<32x32xf32>, vector<2x32xf32> -> vector<2x32xf32>
    %cst_378 = arith.constant dense<0.000000e+00> : vector<2x32xf32>
    %504 = tpu.matmul %463, %70, %cst_378 {dimension_numbers = #tpu.dot_dimension_numbers<[1], [0], [0], [1], [0, 0, 1, 1], [], []>} : vector<2x32xf32>, vector<32x32xf32>, vector<2x32xf32> -> vector<2x32xf32>
    %cst_379 = arith.constant dense<0.000000e+00> : vector<2x32xf32>
    %505 = tpu.matmul %463, %72, %cst_379 {dimension_numbers = #tpu.dot_dimension_numbers<[1], [0], [0], [1], [0, 0, 1, 1], [], []>} : vector<2x32xf32>, vector<32x32xf32>, vector<2x32xf32> -> vector<2x32xf32>
    %506 = vector.broadcast %76 : vector<1x32xf32> to vector<2x32xf32>
    %507 = arith.addf %505, %506 : vector<2x32xf32>
    %508 = arith.addf %498, %503 : vector<2x32xf32>
    %509 = arith.negf %508 : vector<2x32xf32>
    %510 = math.exp %509 : vector<2x32xf32>
    %cst_380 = arith.constant 1.000000e+00 : f32
    %511 = vector.broadcast %cst_380 : f32 to vector<2x32xf32>
    %512 = arith.addf %511, %510 : vector<2x32xf32>
    %513 = arith.divf %511, %512 : vector<2x32xf32>
    %514 = arith.addf %500, %504 : vector<2x32xf32>
    %515 = arith.negf %514 : vector<2x32xf32>
    %516 = math.exp %515 : vector<2x32xf32>
    %cst_381 = arith.constant 1.000000e+00 : f32
    %517 = vector.broadcast %cst_381 : f32 to vector<2x32xf32>
    %518 = arith.addf %517, %516 : vector<2x32xf32>
    %519 = arith.divf %517, %518 : vector<2x32xf32>
    %520 = arith.mulf %513, %507 : vector<2x32xf32>
    %521 = arith.addf %502, %520 : vector<2x32xf32>
    %522 = math.tanh %521 : vector<2x32xf32>
    %cst_382 = arith.constant 1.000000e+00 : f32
    %523 = vector.broadcast %cst_382 : f32 to vector<2x32xf32>
    %524 = arith.subf %523, %519 : vector<2x32xf32>
    %525 = arith.mulf %524, %522 : vector<2x32xf32>
    %526 = arith.mulf %519, %463 : vector<2x32xf32>
    %527 = arith.addf %525, %526 : vector<2x32xf32>
    %c2_383 = arith.constant 2 : index
    %c32_384 = arith.constant 32 : index
    %528 = vector.load %arg7[%c2_383, %c32_384] : memref<16x64xf32, #tpu.memory_space<vmem>>, vector<2x32xf32>
    tpu.vector_store %arg7[%c2_383, %c32_384], %527 {strides = array<i32>} : memref<16x64xf32, #tpu.memory_space<vmem>>, vector<2x32xf32>,
    %c0_385 = arith.constant 0 : index
    %c0_386 = arith.constant 0 : index
    %c14_387 = arith.constant 14 : index
    %c0_388 = arith.constant 0 : index
    %529 = vector.load %arg8[%c0_385, %c0_386, %c14_387, %c0_388] : memref<2x3x16x32xf32, #tpu.memory_space<vmem>>, vector<1x1x2x32xf32>
    %530 = vector.shape_cast %529 : vector<1x1x2x32xf32> to vector<2x32xf32>
    %c0_389 = arith.constant 0 : index
    %c1_390 = arith.constant 1 : index
    %c14_391 = arith.constant 14 : index
    %c0_392 = arith.constant 0 : index
    %531 = vector.load %arg8[%c0_389, %c1_390, %c14_391, %c0_392] : memref<2x3x16x32xf32, #tpu.memory_space<vmem>>, vector<1x1x2x32xf32>
    %532 = vector.shape_cast %531 : vector<1x1x2x32xf32> to vector<2x32xf32>
    %c0_393 = arith.constant 0 : index
    %c2_394 = arith.constant 2 : index
    %c14_395 = arith.constant 14 : index
    %c0_396 = arith.constant 0 : index
    %533 = vector.load %arg8[%c0_393, %c2_394, %c14_395, %c0_396] : memref<2x3x16x32xf32, #tpu.memory_space<vmem>>, vector<1x1x2x32xf32>
    %534 = vector.shape_cast %533 : vector<1x1x2x32xf32> to vector<2x32xf32>
    %cst_397 = arith.constant dense<0.000000e+00> : vector<2x32xf32>
    %535 = tpu.matmul %495, %62, %cst_397 {dimension_numbers = #tpu.dot_dimension_numbers<[1], [0], [0], [1], [0, 0, 1, 1], [], []>} : vector<2x32xf32>, vector<32x32xf32>, vector<2x32xf32> -> vector<2x32xf32>
    %cst_398 = arith.constant dense<0.000000e+00> : vector<2x32xf32>
    %536 = tpu.matmul %495, %64, %cst_398 {dimension_numbers = #tpu.dot_dimension_numbers<[1], [0], [0], [1], [0, 0, 1, 1], [], []>} : vector<2x32xf32>, vector<32x32xf32>, vector<2x32xf32> -> vector<2x32xf32>
    %cst_399 = arith.constant dense<0.000000e+00> : vector<2x32xf32>
    %537 = tpu.matmul %495, %66, %cst_399 {dimension_numbers = #tpu.dot_dimension_numbers<[1], [0], [0], [1], [0, 0, 1, 1], [], []>} : vector<2x32xf32>, vector<32x32xf32>, vector<2x32xf32> -> vector<2x32xf32>
    %538 = vector.broadcast %74 : vector<1x32xf32> to vector<2x32xf32>
    %539 = arith.addf %537, %538 : vector<2x32xf32>
    %540 = arith.addf %530, %535 : vector<2x32xf32>
    %541 = arith.negf %540 : vector<2x32xf32>
    %542 = math.exp %541 : vector<2x32xf32>
    %cst_400 = arith.constant 1.000000e+00 : f32
    %543 = vector.broadcast %cst_400 : f32 to vector<2x32xf32>
    %544 = arith.addf %543, %542 : vector<2x32xf32>
    %545 = arith.divf %543, %544 : vector<2x32xf32>
    %546 = arith.addf %532, %536 : vector<2x32xf32>
    %547 = arith.negf %546 : vector<2x32xf32>
    %548 = math.exp %547 : vector<2x32xf32>
    %cst_401 = arith.constant 1.000000e+00 : f32
    %549 = vector.broadcast %cst_401 : f32 to vector<2x32xf32>
    %550 = arith.addf %549, %548 : vector<2x32xf32>
    %551 = arith.divf %549, %550 : vector<2x32xf32>
    %552 = arith.mulf %545, %539 : vector<2x32xf32>
    %553 = arith.addf %534, %552 : vector<2x32xf32>
    %554 = math.tanh %553 : vector<2x32xf32>
    %cst_402 = arith.constant 1.000000e+00 : f32
    %555 = vector.broadcast %cst_402 : f32 to vector<2x32xf32>
    %556 = arith.subf %555, %551 : vector<2x32xf32>
    %557 = arith.mulf %556, %554 : vector<2x32xf32>
    %558 = arith.mulf %551, %495 : vector<2x32xf32>
    %559 = arith.addf %557, %558 : vector<2x32xf32>
    %c14_403 = arith.constant 14 : index
    %c0_404 = arith.constant 0 : index
    %560 = vector.load %arg7[%c14_403, %c0_404] : memref<16x64xf32, #tpu.memory_space<vmem>>, vector<2x32xf32>
    tpu.vector_store %arg7[%c14_403, %c0_404], %559 {strides = array<i32>} : memref<16x64xf32, #tpu.memory_space<vmem>>, vector<2x32xf32>,
    %c1_405 = arith.constant 1 : index
    %c0_406 = arith.constant 0 : index
    %c0_407 = arith.constant 0 : index
    %c0_408 = arith.constant 0 : index
    %561 = vector.load %arg8[%c1_405, %c0_406, %c0_407, %c0_408] : memref<2x3x16x32xf32, #tpu.memory_space<vmem>>, vector<1x1x2x32xf32>
    %562 = vector.shape_cast %561 : vector<1x1x2x32xf32> to vector<2x32xf32>
    %c1_409 = arith.constant 1 : index
    %c1_410 = arith.constant 1 : index
    %c0_411 = arith.constant 0 : index
    %c0_412 = arith.constant 0 : index
    %563 = vector.load %arg8[%c1_409, %c1_410, %c0_411, %c0_412] : memref<2x3x16x32xf32, #tpu.memory_space<vmem>>, vector<1x1x2x32xf32>
    %564 = vector.shape_cast %563 : vector<1x1x2x32xf32> to vector<2x32xf32>
    %c1_413 = arith.constant 1 : index
    %c2_414 = arith.constant 2 : index
    %c0_415 = arith.constant 0 : index
    %c0_416 = arith.constant 0 : index
    %565 = vector.load %arg8[%c1_413, %c2_414, %c0_415, %c0_416] : memref<2x3x16x32xf32, #tpu.memory_space<vmem>>, vector<1x1x2x32xf32>
    %566 = vector.shape_cast %565 : vector<1x1x2x32xf32> to vector<2x32xf32>
    %cst_417 = arith.constant dense<0.000000e+00> : vector<2x32xf32>
    %567 = tpu.matmul %527, %68, %cst_417 {dimension_numbers = #tpu.dot_dimension_numbers<[1], [0], [0], [1], [0, 0, 1, 1], [], []>} : vector<2x32xf32>, vector<32x32xf32>, vector<2x32xf32> -> vector<2x32xf32>
    %cst_418 = arith.constant dense<0.000000e+00> : vector<2x32xf32>
    %568 = tpu.matmul %527, %70, %cst_418 {dimension_numbers = #tpu.dot_dimension_numbers<[1], [0], [0], [1], [0, 0, 1, 1], [], []>} : vector<2x32xf32>, vector<32x32xf32>, vector<2x32xf32> -> vector<2x32xf32>
    %cst_419 = arith.constant dense<0.000000e+00> : vector<2x32xf32>
    %569 = tpu.matmul %527, %72, %cst_419 {dimension_numbers = #tpu.dot_dimension_numbers<[1], [0], [0], [1], [0, 0, 1, 1], [], []>} : vector<2x32xf32>, vector<32x32xf32>, vector<2x32xf32> -> vector<2x32xf32>
    %570 = vector.broadcast %76 : vector<1x32xf32> to vector<2x32xf32>
    %571 = arith.addf %569, %570 : vector<2x32xf32>
    %572 = arith.addf %562, %567 : vector<2x32xf32>
    %573 = arith.negf %572 : vector<2x32xf32>
    %574 = math.exp %573 : vector<2x32xf32>
    %cst_420 = arith.constant 1.000000e+00 : f32
    %575 = vector.broadcast %cst_420 : f32 to vector<2x32xf32>
    %576 = arith.addf %575, %574 : vector<2x32xf32>
    %577 = arith.divf %575, %576 : vector<2x32xf32>
    %578 = arith.addf %564, %568 : vector<2x32xf32>
    %579 = arith.negf %578 : vector<2x32xf32>
    %580 = math.exp %579 : vector<2x32xf32>
    %cst_421 = arith.constant 1.000000e+00 : f32
    %581 = vector.broadcast %cst_421 : f32 to vector<2x32xf32>
    %582 = arith.addf %581, %580 : vector<2x32xf32>
    %583 = arith.divf %581, %582 : vector<2x32xf32>
    %584 = arith.mulf %577, %571 : vector<2x32xf32>
    %585 = arith.addf %566, %584 : vector<2x32xf32>
    %586 = math.tanh %585 : vector<2x32xf32>
    %cst_422 = arith.constant 1.000000e+00 : f32
    %587 = vector.broadcast %cst_422 : f32 to vector<2x32xf32>
    %588 = arith.subf %587, %583 : vector<2x32xf32>
    %589 = arith.mulf %588, %586 : vector<2x32xf32>
    %590 = arith.mulf %583, %527 : vector<2x32xf32>
    %591 = arith.addf %589, %590 : vector<2x32xf32>
    %c0_423 = arith.constant 0 : index
    %c32_424 = arith.constant 32 : index
    %592 = vector.load %arg7[%c0_423, %c32_424] : memref<16x64xf32, #tpu.memory_space<vmem>>, vector<2x32xf32>
    tpu.vector_store %arg7[%c0_423, %c32_424], %591 {strides = array<i32>} : memref<16x64xf32, #tpu.memory_space<vmem>>, vector<2x32xf32>,
    return
  }
  func.func @transform_0(%arg0: i32) -> (i32, i32) {
    %c0_i32 = arith.constant 0 : i32
    %c0_i32_0 = arith.constant 0 : i32
    %c0_i32_1 = arith.constant 0 : i32
    return %c0_i32, %c0_i32_0 : i32, i32
  }
  func.func @transform_1(%arg0: i32) -> (i32, i32, i32) {
    %c0_i32 = arith.constant 0 : i32
    %c0_i32_0 = arith.constant 0 : i32
    %c0_i32_1 = arith.constant 0 : i32
    %c0_i32_2 = arith.constant 0 : i32
    return %c0_i32, %c0_i32_0, %c0_i32_1 : i32, i32, i32
  }
  func.func @transform_2(%arg0: i32) -> (i32, i32, i32, i32) {
    %c0_i32 = arith.constant 0 : i32
    %c0_i32_0 = arith.constant 0 : i32
    %c0_i32_1 = arith.constant 0 : i32
    %c0_i32_2 = arith.constant 0 : i32
    %c0_i32_3 = arith.constant 0 : i32
    return %c0_i32, %c0_i32_0, %c0_i32_1, %c0_i32_2 : i32, i32, i32, i32
  }
  func.func @transform_3(%arg0: i32) -> (i32, i32, i32, i32) {
    %c0_i32 = arith.constant 0 : i32
    %c0_i32_0 = arith.constant 0 : i32
    %c0_i32_1 = arith.constant 0 : i32
    %c0_i32_2 = arith.constant 0 : i32
    %c0_i32_3 = arith.constant 0 : i32
    return %c0_i32, %c0_i32_0, %c0_i32_1, %c0_i32_2 : i32, i32, i32, i32
  }
  func.func @transform_4(%arg0: i32) -> (i32, i32, i32, i32) {
    %c0_i32 = arith.constant 0 : i32
    %c0_i32_0 = arith.constant 0 : i32
    %c0_i32_1 = arith.constant 0 : i32
    %c0_i32_2 = arith.constant 0 : i32
    %c0_i32_3 = arith.constant 0 : i32
    return %c0_i32, %c0_i32_0, %c0_i32_1, %c0_i32_2 : i32, i32, i32, i32
  }
  func.func @transform_5(%arg0: i32) -> (i32, i32, i32) {
    %c0_i32 = arith.constant 0 : i32
    %c0_i32_0 = arith.constant 0 : i32
    %c0_i32_1 = arith.constant 0 : i32
    %c0_i32_2 = arith.constant 0 : i32
    return %c0_i32, %c0_i32_0, %c0_i32_1 : i32, i32, i32
  }
  func.func @transform_6(%arg0: i32) -> (i32, i32) {
    %c0_i32 = arith.constant 0 : i32
    %c0_i32_0 = arith.constant 0 : i32
    %c0_i32_1 = arith.constant 0 : i32
    return %c0_i32, %c0_i32_0 : i32, i32
  }
}

module attributes {stable_mosaic.version = 11 : i64} {
  func.func @_gru_layer_kernel(%arg0: i32, %arg1: memref<16x64xf32, #tpu.memory_space<vmem>>, %arg2: memref<2x2x32xf32, #tpu.memory_space<vmem>>, %arg3: memref<2x3x64x32xf32, #tpu.memory_space<vmem>>, %arg4: memref<2x3x32x32xf32, #tpu.memory_space<vmem>>, %arg5: memref<2x3x1x32xf32, #tpu.memory_space<vmem>>, %arg6: memref<2x1x32xf32, #tpu.memory_space<vmem>>, %arg7: memref<16x64xf32, #tpu.memory_space<vmem>>, %arg8: memref<2x3x16x32xf32, #tpu.memory_space<vmem>>) attributes {dimension_semantics = [#tpu.dimension_semantics<arbitrary>], iteration_bounds = array<i64: 1>, scalar_prefetch = 0 : i64, scratch_operands = 1 : i64, tpu.core_type = #tpu.core_type<tc>, window_params = [{pipeline_mode = #tpu.pipeline_mode<synchronous>, transform_indices = @transform_0, window_bounds = array<i64: 16, 64>}, {pipeline_mode = #tpu.pipeline_mode<synchronous>, transform_indices = @transform_1, window_bounds = array<i64: 2, 2, 32>}, {pipeline_mode = #tpu.pipeline_mode<synchronous>, transform_indices = @transform_2, window_bounds = array<i64: 2, 3, 64, 32>}, {pipeline_mode = #tpu.pipeline_mode<synchronous>, transform_indices = @transform_3, window_bounds = array<i64: 2, 3, 32, 32>}, {pipeline_mode = #tpu.pipeline_mode<synchronous>, transform_indices = @transform_4, window_bounds = array<i64: 2, 3, 1, 32>}, {pipeline_mode = #tpu.pipeline_mode<synchronous>, transform_indices = @transform_5, window_bounds = array<i64: 2, 1, 32>}, {pipeline_mode = #tpu.pipeline_mode<synchronous>, transform_indices = @transform_6, window_bounds = array<i64: 16, 64>}]} {
    %c0 = arith.constant 0 : index
    %c0_0 = arith.constant 0 : index
    %0 = vector.load %arg1[%c0, %c0_0] : memref<16x64xf32, #tpu.memory_space<vmem>>, vector<16x64xf32>
    %c0_1 = arith.constant 0 : index
    %c0_2 = arith.constant 0 : index
    %c0_3 = arith.constant 0 : index
    %c0_4 = arith.constant 0 : index
    %1 = vector.load %arg3[%c0_1, %c0_2, %c0_3, %c0_4] : memref<2x3x64x32xf32, #tpu.memory_space<vmem>>, vector<1x1x64x32xf32>
    %2 = vector.shape_cast %1 : vector<1x1x64x32xf32> to vector<64x32xf32>
    %cst = arith.constant dense<0.000000e+00> : vector<16x32xf32>
    %3 = tpu.matmul %0, %2, %cst {dimension_numbers = #tpu.dot_dimension_numbers<[1], [0], [0], [1], [0, 0, 1, 1], [], []>} : vector<16x64xf32>, vector<64x32xf32>, vector<16x32xf32> -> vector<16x32xf32>
    %c0_5 = arith.constant 0 : index
    %c0_6 = arith.constant 0 : index
    %c0_7 = arith.constant 0 : index
    %c0_8 = arith.constant 0 : index
    %4 = vector.load %arg5[%c0_5, %c0_6, %c0_7, %c0_8] : memref<2x3x1x32xf32, #tpu.memory_space<vmem>>, vector<1x1x1x32xf32>
    %5 = vector.shape_cast %4 : vector<1x1x1x32xf32> to vector<1x32xf32>
    %6 = vector.broadcast %5 : vector<1x32xf32> to vector<16x32xf32>
    %7 = arith.addf %3, %6 : vector<16x32xf32>
    %c0_9 = arith.constant 0 : index
    %c0_10 = arith.constant 0 : index
    %c0_11 = arith.constant 0 : index
    %c0_12 = arith.constant 0 : index
    %8 = vector.load %arg8[%c0_9, %c0_10, %c0_11, %c0_12] : memref<2x3x16x32xf32, #tpu.memory_space<vmem>>, vector<1x1x16x32xf32>
    %9 = vector.shape_cast %8 : vector<1x1x16x32xf32> to vector<16x32xf32>
    %10 = vector.shape_cast %7 : vector<16x32xf32> to vector<1x1x16x32xf32>
    tpu.vector_store %arg8[%c0_9, %c0_10, %c0_11, %c0_12], %10 {strides = array<i32>} : memref<2x3x16x32xf32, #tpu.memory_space<vmem>>, vector<1x1x16x32xf32>,
    %c0_13 = arith.constant 0 : index
    %c1 = arith.constant 1 : index
    %c0_14 = arith.constant 0 : index
    %c0_15 = arith.constant 0 : index
    %11 = vector.load %arg3[%c0_13, %c1, %c0_14, %c0_15] : memref<2x3x64x32xf32, #tpu.memory_space<vmem>>, vector<1x1x64x32xf32>
    %12 = vector.shape_cast %11 : vector<1x1x64x32xf32> to vector<64x32xf32>
    %cst_16 = arith.constant dense<0.000000e+00> : vector<16x32xf32>
    %13 = tpu.matmul %0, %12, %cst_16 {dimension_numbers = #tpu.dot_dimension_numbers<[1], [0], [0], [1], [0, 0, 1, 1], [], []>} : vector<16x64xf32>, vector<64x32xf32>, vector<16x32xf32> -> vector<16x32xf32>
    %c0_17 = arith.constant 0 : index
    %c1_18 = arith.constant 1 : index
    %c0_19 = arith.constant 0 : index
    %c0_20 = arith.constant 0 : index
    %14 = vector.load %arg5[%c0_17, %c1_18, %c0_19, %c0_20] : memref<2x3x1x32xf32, #tpu.memory_space<vmem>>, vector<1x1x1x32xf32>
    %15 = vector.shape_cast %14 : vector<1x1x1x32xf32> to vector<1x32xf32>
    %16 = vector.broadcast %15 : vector<1x32xf32> to vector<16x32xf32>
    %17 = arith.addf %13, %16 : vector<16x32xf32>
    %c0_21 = arith.constant 0 : index
    %c1_22 = arith.constant 1 : index
    %c0_23 = arith.constant 0 : index
    %c0_24 = arith.constant 0 : index
    %18 = vector.load %arg8[%c0_21, %c1_22, %c0_23, %c0_24] : memref<2x3x16x32xf32, #tpu.memory_space<vmem>>, vector<1x1x16x32xf32>
    %19 = vector.shape_cast %18 : vector<1x1x16x32xf32> to vector<16x32xf32>
    %20 = vector.shape_cast %17 : vector<16x32xf32> to vector<1x1x16x32xf32>
    tpu.vector_store %arg8[%c0_21, %c1_22, %c0_23, %c0_24], %20 {strides = array<i32>} : memref<2x3x16x32xf32, #tpu.memory_space<vmem>>, vector<1x1x16x32xf32>,
    %c0_25 = arith.constant 0 : index
    %c2 = arith.constant 2 : index
    %c0_26 = arith.constant 0 : index
    %c0_27 = arith.constant 0 : index
    %21 = vector.load %arg3[%c0_25, %c2, %c0_26, %c0_27] : memref<2x3x64x32xf32, #tpu.memory_space<vmem>>, vector<1x1x64x32xf32>
    %22 = vector.shape_cast %21 : vector<1x1x64x32xf32> to vector<64x32xf32>
    %cst_28 = arith.constant dense<0.000000e+00> : vector<16x32xf32>
    %23 = tpu.matmul %0, %22, %cst_28 {dimension_numbers = #tpu.dot_dimension_numbers<[1], [0], [0], [1], [0, 0, 1, 1], [], []>} : vector<16x64xf32>, vector<64x32xf32>, vector<16x32xf32> -> vector<16x32xf32>
    %c0_29 = arith.constant 0 : index
    %c2_30 = arith.constant 2 : index
    %c0_31 = arith.constant 0 : index
    %c0_32 = arith.constant 0 : index
    %24 = vector.load %arg5[%c0_29, %c2_30, %c0_31, %c0_32] : memref<2x3x1x32xf32, #tpu.memory_space<vmem>>, vector<1x1x1x32xf32>
    %25 = vector.shape_cast %24 : vector<1x1x1x32xf32> to vector<1x32xf32>
    %26 = vector.broadcast %25 : vector<1x32xf32> to vector<16x32xf32>
    %27 = arith.addf %23, %26 : vector<16x32xf32>
    %c0_33 = arith.constant 0 : index
    %c2_34 = arith.constant 2 : index
    %c0_35 = arith.constant 0 : index
    %c0_36 = arith.constant 0 : index
    %28 = vector.load %arg8[%c0_33, %c2_34, %c0_35, %c0_36] : memref<2x3x16x32xf32, #tpu.memory_space<vmem>>, vector<1x1x16x32xf32>
    %29 = vector.shape_cast %28 : vector<1x1x16x32xf32> to vector<16x32xf32>
    %30 = vector.shape_cast %27 : vector<16x32xf32> to vector<1x1x16x32xf32>
    tpu.vector_store %arg8[%c0_33, %c2_34, %c0_35, %c0_36], %30 {strides = array<i32>} : memref<2x3x16x32xf32, #tpu.memory_space<vmem>>, vector<1x1x16x32xf32>,
    %c1_37 = arith.constant 1 : index
    %c0_38 = arith.constant 0 : index
    %c0_39 = arith.constant 0 : index
    %c0_40 = arith.constant 0 : index
    %31 = vector.load %arg3[%c1_37, %c0_38, %c0_39, %c0_40] : memref<2x3x64x32xf32, #tpu.memory_space<vmem>>, vector<1x1x64x32xf32>
    %32 = vector.shape_cast %31 : vector<1x1x64x32xf32> to vector<64x32xf32>
    %cst_41 = arith.constant dense<0.000000e+00> : vector<16x32xf32>
    %33 = tpu.matmul %0, %32, %cst_41 {dimension_numbers = #tpu.dot_dimension_numbers<[1], [0], [0], [1], [0, 0, 1, 1], [], []>} : vector<16x64xf32>, vector<64x32xf32>, vector<16x32xf32> -> vector<16x32xf32>
    %c1_42 = arith.constant 1 : index
    %c0_43 = arith.constant 0 : index
    %c0_44 = arith.constant 0 : index
    %c0_45 = arith.constant 0 : index
    %34 = vector.load %arg5[%c1_42, %c0_43, %c0_44, %c0_45] : memref<2x3x1x32xf32, #tpu.memory_space<vmem>>, vector<1x1x1x32xf32>
    %35 = vector.shape_cast %34 : vector<1x1x1x32xf32> to vector<1x32xf32>
    %36 = vector.broadcast %35 : vector<1x32xf32> to vector<16x32xf32>
    %37 = arith.addf %33, %36 : vector<16x32xf32>
    %c1_46 = arith.constant 1 : index
    %c0_47 = arith.constant 0 : index
    %c0_48 = arith.constant 0 : index
    %c0_49 = arith.constant 0 : index
    %38 = vector.load %arg8[%c1_46, %c0_47, %c0_48, %c0_49] : memref<2x3x16x32xf32, #tpu.memory_space<vmem>>, vector<1x1x16x32xf32>
    %39 = vector.shape_cast %38 : vector<1x1x16x32xf32> to vector<16x32xf32>
    %40 = vector.shape_cast %37 : vector<16x32xf32> to vector<1x1x16x32xf32>
    tpu.vector_store %arg8[%c1_46, %c0_47, %c0_48, %c0_49], %40 {strides = array<i32>} : memref<2x3x16x32xf32, #tpu.memory_space<vmem>>, vector<1x1x16x32xf32>,
    %c1_50 = arith.constant 1 : index
    %c1_51 = arith.constant 1 : index
    %c0_52 = arith.constant 0 : index
    %c0_53 = arith.constant 0 : index
    %41 = vector.load %arg3[%c1_50, %c1_51, %c0_52, %c0_53] : memref<2x3x64x32xf32, #tpu.memory_space<vmem>>, vector<1x1x64x32xf32>
    %42 = vector.shape_cast %41 : vector<1x1x64x32xf32> to vector<64x32xf32>
    %cst_54 = arith.constant dense<0.000000e+00> : vector<16x32xf32>
    %43 = tpu.matmul %0, %42, %cst_54 {dimension_numbers = #tpu.dot_dimension_numbers<[1], [0], [0], [1], [0, 0, 1, 1], [], []>} : vector<16x64xf32>, vector<64x32xf32>, vector<16x32xf32> -> vector<16x32xf32>
    %c1_55 = arith.constant 1 : index
    %c1_56 = arith.constant 1 : index
    %c0_57 = arith.constant 0 : index
    %c0_58 = arith.constant 0 : index
    %44 = vector.load %arg5[%c1_55, %c1_56, %c0_57, %c0_58] : memref<2x3x1x32xf32, #tpu.memory_space<vmem>>, vector<1x1x1x32xf32>
    %45 = vector.shape_cast %44 : vector<1x1x1x32xf32> to vector<1x32xf32>
    %46 = vector.broadcast %45 : vector<1x32xf32> to vector<16x32xf32>
    %47 = arith.addf %43, %46 : vector<16x32xf32>
    %c1_59 = arith.constant 1 : index
    %c1_60 = arith.constant 1 : index
    %c0_61 = arith.constant 0 : index
    %c0_62 = arith.constant 0 : index
    %48 = vector.load %arg8[%c1_59, %c1_60, %c0_61, %c0_62] : memref<2x3x16x32xf32, #tpu.memory_space<vmem>>, vector<1x1x16x32xf32>
    %49 = vector.shape_cast %48 : vector<1x1x16x32xf32> to vector<16x32xf32>
    %50 = vector.shape_cast %47 : vector<16x32xf32> to vector<1x1x16x32xf32>
    tpu.vector_store %arg8[%c1_59, %c1_60, %c0_61, %c0_62], %50 {strides = array<i32>} : memref<2x3x16x32xf32, #tpu.memory_space<vmem>>, vector<1x1x16x32xf32>,
    %c1_63 = arith.constant 1 : index
    %c2_64 = arith.constant 2 : index
    %c0_65 = arith.constant 0 : index
    %c0_66 = arith.constant 0 : index
    %51 = vector.load %arg3[%c1_63, %c2_64, %c0_65, %c0_66] : memref<2x3x64x32xf32, #tpu.memory_space<vmem>>, vector<1x1x64x32xf32>
    %52 = vector.shape_cast %51 : vector<1x1x64x32xf32> to vector<64x32xf32>
    %cst_67 = arith.constant dense<0.000000e+00> : vector<16x32xf32>
    %53 = tpu.matmul %0, %52, %cst_67 {dimension_numbers = #tpu.dot_dimension_numbers<[1], [0], [0], [1], [0, 0, 1, 1], [], []>} : vector<16x64xf32>, vector<64x32xf32>, vector<16x32xf32> -> vector<16x32xf32>
    %c1_68 = arith.constant 1 : index
    %c2_69 = arith.constant 2 : index
    %c0_70 = arith.constant 0 : index
    %c0_71 = arith.constant 0 : index
    %54 = vector.load %arg5[%c1_68, %c2_69, %c0_70, %c0_71] : memref<2x3x1x32xf32, #tpu.memory_space<vmem>>, vector<1x1x1x32xf32>
    %55 = vector.shape_cast %54 : vector<1x1x1x32xf32> to vector<1x32xf32>
    %56 = vector.broadcast %55 : vector<1x32xf32> to vector<16x32xf32>
    %57 = arith.addf %53, %56 : vector<16x32xf32>
    %c1_72 = arith.constant 1 : index
    %c2_73 = arith.constant 2 : index
    %c0_74 = arith.constant 0 : index
    %c0_75 = arith.constant 0 : index
    %58 = vector.load %arg8[%c1_72, %c2_73, %c0_74, %c0_75] : memref<2x3x16x32xf32, #tpu.memory_space<vmem>>, vector<1x1x16x32xf32>
    %59 = vector.shape_cast %58 : vector<1x1x16x32xf32> to vector<16x32xf32>
    %60 = vector.shape_cast %57 : vector<16x32xf32> to vector<1x1x16x32xf32>
    tpu.vector_store %arg8[%c1_72, %c2_73, %c0_74, %c0_75], %60 {strides = array<i32>} : memref<2x3x16x32xf32, #tpu.memory_space<vmem>>, vector<1x1x16x32xf32>,
    %c0_76 = arith.constant 0 : index
    %c0_77 = arith.constant 0 : index
    %c0_78 = arith.constant 0 : index
    %c0_79 = arith.constant 0 : index
    %61 = vector.load %arg4[%c0_76, %c0_77, %c0_78, %c0_79] : memref<2x3x32x32xf32, #tpu.memory_space<vmem>>, vector<1x1x32x32xf32>
    %62 = vector.shape_cast %61 : vector<1x1x32x32xf32> to vector<32x32xf32>
    %c0_80 = arith.constant 0 : index
    %c1_81 = arith.constant 1 : index
    %c0_82 = arith.constant 0 : index
    %c0_83 = arith.constant 0 : index
    %63 = vector.load %arg4[%c0_80, %c1_81, %c0_82, %c0_83] : memref<2x3x32x32xf32, #tpu.memory_space<vmem>>, vector<1x1x32x32xf32>
    %64 = vector.shape_cast %63 : vector<1x1x32x32xf32> to vector<32x32xf32>
    %c0_84 = arith.constant 0 : index
    %c2_85 = arith.constant 2 : index
    %c0_86 = arith.constant 0 : index
    %c0_87 = arith.constant 0 : index
    %65 = vector.load %arg4[%c0_84, %c2_85, %c0_86, %c0_87] : memref<2x3x32x32xf32, #tpu.memory_space<vmem>>, vector<1x1x32x32xf32>
    %66 = vector.shape_cast %65 : vector<1x1x32x32xf32> to vector<32x32xf32>
    %c1_88 = arith.constant 1 : index
    %c0_89 = arith.constant 0 : index
    %c0_90 = arith.constant 0 : index
    %c0_91 = arith.constant 0 : index
    %67 = vector.load %arg4[%c1_88, %c0_89, %c0_90, %c0_91] : memref<2x3x32x32xf32, #tpu.memory_space<vmem>>, vector<1x1x32x32xf32>
    %68 = vector.shape_cast %67 : vector<1x1x32x32xf32> to vector<32x32xf32>
    %c1_92 = arith.constant 1 : index
    %c1_93 = arith.constant 1 : index
    %c0_94 = arith.constant 0 : index
    %c0_95 = arith.constant 0 : index
    %69 = vector.load %arg4[%c1_92, %c1_93, %c0_94, %c0_95] : memref<2x3x32x32xf32, #tpu.memory_space<vmem>>, vector<1x1x32x32xf32>
    %70 = vector.shape_cast %69 : vector<1x1x32x32xf32> to vector<32x32xf32>
    %c1_96 = arith.constant 1 : index
    %c2_97 = arith.constant 2 : index
    %c0_98 = arith.constant 0 : index
    %c0_99 = arith.constant 0 : index
    %71 = vector.load %arg4[%c1_96, %c2_97, %c0_98, %c0_99] : memref<2x3x32x32xf32, #tpu.memory_space<vmem>>, vector<1x1x32x32xf32>
    %72 = vector.shape_cast %71 : vector<1x1x32x32xf32> to vector<32x32xf32>
    %c0_100 = arith.constant 0 : index
    %c0_101 = arith.constant 0 : index
    %c0_102 = arith.constant 0 : index
    %73 = vector.load %arg6[%c0_100, %c0_101, %c0_102] : memref<2x1x32xf32, #tpu.memory_space<vmem>>, vector<1x1x32xf32>
    %74 = vector.shape_cast %73 : vector<1x1x32xf32> to vector<1x32xf32>
    %c1_103 = arith.constant 1 : index
    %c0_104 = arith.constant 0 : index
    %c0_105 = arith.constant 0 : index
    %75 = vector.load %arg6[%c1_103, %c0_104, %c0_105] : memref<2x1x32xf32, #tpu.memory_space<vmem>>, vector<1x1x32xf32>
    %76 = vector.shape_cast %75 : vector<1x1x32xf32> to vector<1x32xf32>
    %c0_106 = arith.constant 0 : index
    %c0_107 = arith.constant 0 : index
    %c0_108 = arith.constant 0 : index
    %77 = vector.load %arg2[%c0_106, %c0_107, %c0_108] : memref<2x2x32xf32, #tpu.memory_space<vmem>>, vector<1x2x32xf32>
    %78 = vector.shape_cast %77 : vector<1x2x32xf32> to vector<2x32xf32>
    %c1_109 = arith.constant 1 : index
    %c0_110 = arith.constant 0 : index
    %c0_111 = arith.constant 0 : index
    %79 = vector.load %arg2[%c1_109, %c0_110, %c0_111] : memref<2x2x32xf32, #tpu.memory_space<vmem>>, vector<1x2x32xf32>
    %80 = vector.shape_cast %79 : vector<1x2x32xf32> to vector<2x32xf32>
    %c0_112 = arith.constant 0 : index
    %c0_113 = arith.constant 0 : index
    %c0_114 = arith.constant 0 : index
    %c0_115 = arith.constant 0 : index
    %81 = vector.load %arg8[%c0_112, %c0_113, %c0_114, %c0_115] : memref<2x3x16x32xf32, #tpu.memory_space<vmem>>, vector<1x1x2x32xf32>
    %82 = vector.shape_cast %81 : vector<1x1x2x32xf32> to vector<2x32xf32>
    %c0_116 = arith.constant 0 : index
    %c1_117 = arith.constant 1 : index
    %c0_118 = arith.constant 0 : index
    %c0_119 = arith.constant 0 : index
    %83 = vector.load %arg8[%c0_116, %c1_117, %c0_118, %c0_119] : memref<2x3x16x32xf32, #tpu.memory_space<vmem>>, vector<1x1x2x32xf32>
    %84 = vector.shape_cast %83 : vector<1x1x2x32xf32> to vector<2x32xf32>
    %c0_120 = arith.constant 0 : index
    %c2_121 = arith.constant 2 : index
    %c0_122 = arith.constant 0 : index
    %c0_123 = arith.constant 0 : index
    %85 = vector.load %arg8[%c0_120, %c2_121, %c0_122, %c0_123] : memref<2x3x16x32xf32, #tpu.memory_space<vmem>>, vector<1x1x2x32xf32>
    %86 = vector.shape_cast %85 : vector<1x1x2x32xf32> to vector<2x32xf32>
    %cst_124 = arith.constant dense<0.000000e+00> : vector<2x32xf32>
    %87 = tpu.matmul %78, %62, %cst_124 {dimension_numbers = #tpu.dot_dimension_numbers<[1], [0], [0], [1], [0, 0, 1, 1], [], []>} : vector<2x32xf32>, vector<32x32xf32>, vector<2x32xf32> -> vector<2x32xf32>
    %cst_125 = arith.constant dense<0.000000e+00> : vector<2x32xf32>
    %88 = tpu.matmul %78, %64, %cst_125 {dimension_numbers = #tpu.dot_dimension_numbers<[1], [0], [0], [1], [0, 0, 1, 1], [], []>} : vector<2x32xf32>, vector<32x32xf32>, vector<2x32xf32> -> vector<2x32xf32>
    %cst_126 = arith.constant dense<0.000000e+00> : vector<2x32xf32>
    %89 = tpu.matmul %78, %66, %cst_126 {dimension_numbers = #tpu.dot_dimension_numbers<[1], [0], [0], [1], [0, 0, 1, 1], [], []>} : vector<2x32xf32>, vector<32x32xf32>, vector<2x32xf32> -> vector<2x32xf32>
    %90 = vector.broadcast %74 : vector<1x32xf32> to vector<2x32xf32>
    %91 = arith.addf %89, %90 : vector<2x32xf32>
    %92 = arith.addf %82, %87 : vector<2x32xf32>
    %93 = arith.negf %92 : vector<2x32xf32>
    %94 = math.exp %93 : vector<2x32xf32>
    %cst_127 = arith.constant 1.000000e+00 : f32
    %95 = vector.broadcast %cst_127 : f32 to vector<2x32xf32>
    %96 = arith.addf %95, %94 : vector<2x32xf32>
    %97 = arith.divf %95, %96 : vector<2x32xf32>
    %98 = arith.addf %84, %88 : vector<2x32xf32>
    %99 = arith.negf %98 : vector<2x32xf32>
    %100 = math.exp %99 : vector<2x32xf32>
    %cst_128 = arith.constant 1.000000e+00 : f32
    %101 = vector.broadcast %cst_128 : f32 to vector<2x32xf32>
    %102 = arith.addf %101, %100 : vector<2x32xf32>
    %103 = arith.divf %101, %102 : vector<2x32xf32>
    %104 = arith.mulf %97, %91 : vector<2x32xf32>
    %105 = arith.addf %86, %104 : vector<2x32xf32>
    %106 = math.tanh %105 : vector<2x32xf32>
    %cst_129 = arith.constant 1.000000e+00 : f32
    %107 = vector.broadcast %cst_129 : f32 to vector<2x32xf32>
    %108 = arith.subf %107, %103 : vector<2x32xf32>
    %109 = arith.mulf %108, %106 : vector<2x32xf32>
    %110 = arith.mulf %103, %78 : vector<2x32xf32>
    %111 = arith.addf %109, %110 : vector<2x32xf32>
    %c0_130 = arith.constant 0 : index
    %c0_131 = arith.constant 0 : index
    %112 = vector.load %arg7[%c0_130, %c0_131] : memref<16x64xf32, #tpu.memory_space<vmem>>, vector<2x32xf32>
    tpu.vector_store %arg7[%c0_130, %c0_131], %111 {strides = array<i32>} : memref<16x64xf32, #tpu.memory_space<vmem>>, vector<2x32xf32>,
    %c1_132 = arith.constant 1 : index
    %c0_133 = arith.constant 0 : index
    %c14 = arith.constant 14 : index
    %c0_134 = arith.constant 0 : index
    %113 = vector.load %arg8[%c1_132, %c0_133, %c14, %c0_134] : memref<2x3x16x32xf32, #tpu.memory_space<vmem>>, vector<1x1x2x32xf32>
    %114 = vector.shape_cast %113 : vector<1x1x2x32xf32> to vector<2x32xf32>
    %c1_135 = arith.constant 1 : index
    %c1_136 = arith.constant 1 : index
    %c14_137 = arith.constant 14 : index
    %c0_138 = arith.constant 0 : index
    %115 = vector.load %arg8[%c1_135, %c1_136, %c14_137, %c0_138] : memref<2x3x16x32xf32, #tpu.memory_space<vmem>>, vector<1x1x2x32xf32>
    %116 = vector.shape_cast %115 : vector<1x1x2x32xf32> to vector<2x32xf32>
    %c1_139 = arith.constant 1 : index
    %c2_140 = arith.constant 2 : index
    %c14_141 = arith.constant 14 : index
    %c0_142 = arith.constant 0 : index
    %117 = vector.load %arg8[%c1_139, %c2_140, %c14_141, %c0_142] : memref<2x3x16x32xf32, #tpu.memory_space<vmem>>, vector<1x1x2x32xf32>
    %118 = vector.shape_cast %117 : vector<1x1x2x32xf32> to vector<2x32xf32>
    %cst_143 = arith.constant dense<0.000000e+00> : vector<2x32xf32>
    %119 = tpu.matmul %80, %68, %cst_143 {dimension_numbers = #tpu.dot_dimension_numbers<[1], [0], [0], [1], [0, 0, 1, 1], [], []>} : vector<2x32xf32>, vector<32x32xf32>, vector<2x32xf32> -> vector<2x32xf32>
    %cst_144 = arith.constant dense<0.000000e+00> : vector<2x32xf32>
    %120 = tpu.matmul %80, %70, %cst_144 {dimension_numbers = #tpu.dot_dimension_numbers<[1], [0], [0], [1], [0, 0, 1, 1], [], []>} : vector<2x32xf32>, vector<32x32xf32>, vector<2x32xf32> -> vector<2x32xf32>
    %cst_145 = arith.constant dense<0.000000e+00> : vector<2x32xf32>
    %121 = tpu.matmul %80, %72, %cst_145 {dimension_numbers = #tpu.dot_dimension_numbers<[1], [0], [0], [1], [0, 0, 1, 1], [], []>} : vector<2x32xf32>, vector<32x32xf32>, vector<2x32xf32> -> vector<2x32xf32>
    %122 = vector.broadcast %76 : vector<1x32xf32> to vector<2x32xf32>
    %123 = arith.addf %121, %122 : vector<2x32xf32>
    %124 = arith.addf %114, %119 : vector<2x32xf32>
    %125 = arith.negf %124 : vector<2x32xf32>
    %126 = math.exp %125 : vector<2x32xf32>
    %cst_146 = arith.constant 1.000000e+00 : f32
    %127 = vector.broadcast %cst_146 : f32 to vector<2x32xf32>
    %128 = arith.addf %127, %126 : vector<2x32xf32>
    %129 = arith.divf %127, %128 : vector<2x32xf32>
    %130 = arith.addf %116, %120 : vector<2x32xf32>
    %131 = arith.negf %130 : vector<2x32xf32>
    %132 = math.exp %131 : vector<2x32xf32>
    %cst_147 = arith.constant 1.000000e+00 : f32
    %133 = vector.broadcast %cst_147 : f32 to vector<2x32xf32>
    %134 = arith.addf %133, %132 : vector<2x32xf32>
    %135 = arith.divf %133, %134 : vector<2x32xf32>
    %136 = arith.mulf %129, %123 : vector<2x32xf32>
    %137 = arith.addf %118, %136 : vector<2x32xf32>
    %138 = math.tanh %137 : vector<2x32xf32>
    %cst_148 = arith.constant 1.000000e+00 : f32
    %139 = vector.broadcast %cst_148 : f32 to vector<2x32xf32>
    %140 = arith.subf %139, %135 : vector<2x32xf32>
    %141 = arith.mulf %140, %138 : vector<2x32xf32>
    %142 = arith.mulf %135, %80 : vector<2x32xf32>
    %143 = arith.addf %141, %142 : vector<2x32xf32>
    %c14_149 = arith.constant 14 : index
    %c32 = arith.constant 32 : index
    %144 = vector.load %arg7[%c14_149, %c32] : memref<16x64xf32, #tpu.memory_space<vmem>>, vector<2x32xf32>
    tpu.vector_store %arg7[%c14_149, %c32], %143 {strides = array<i32>} : memref<16x64xf32, #tpu.memory_space<vmem>>, vector<2x32xf32>,
    %c0_150 = arith.constant 0 : index
    %c0_151 = arith.constant 0 : index
    %c2_152 = arith.constant 2 : index
    %c0_153 = arith.constant 0 : index
    %145 = vector.load %arg8[%c0_150, %c0_151, %c2_152, %c0_153] : memref<2x3x16x32xf32, #tpu.memory_space<vmem>>, vector<1x1x2x32xf32>
    %146 = vector.shape_cast %145 : vector<1x1x2x32xf32> to vector<2x32xf32>
    %c0_154 = arith.constant 0 : index
    %c1_155 = arith.constant 1 : index
    %c2_156 = arith.constant 2 : index
    %c0_157 = arith.constant 0 : index
    %147 = vector.load %arg8[%c0_154, %c1_155, %c2_156, %c0_157] : memref<2x3x16x32xf32, #tpu.memory_space<vmem>>, vector<1x1x2x32xf32>
    %148 = vector.shape_cast %147 : vector<1x1x2x32xf32> to vector<2x32xf32>
    %c0_158 = arith.constant 0 : index
    %c2_159 = arith.constant 2 : index
    %c2_160 = arith.constant 2 : index
    %c0_161 = arith.constant 0 : index
    %149 = vector.load %arg8[%c0_158, %c2_159, %c2_160, %c0_161] : memref<2x3x16x32xf32, #tpu.memory_space<vmem>>, vector<1x1x2x32xf32>
    %150 = vector.shape_cast %149 : vector<1x1x2x32xf32> to vector<2x32xf32>
    %cst_162 = arith.constant dense<0.000000e+00> : vector<2x32xf32>
    %151 = tpu.matmul %111, %62, %cst_162 {dimension_numbers = #tpu.dot_dimension_numbers<[1], [0], [0], [1], [0, 0, 1, 1], [], []>} : vector<2x32xf32>, vector<32x32xf32>, vector<2x32xf32> -> vector<2x32xf32>
    %cst_163 = arith.constant dense<0.000000e+00> : vector<2x32xf32>
    %152 = tpu.matmul %111, %64, %cst_163 {dimension_numbers = #tpu.dot_dimension_numbers<[1], [0], [0], [1], [0, 0, 1, 1], [], []>} : vector<2x32xf32>, vector<32x32xf32>, vector<2x32xf32> -> vector<2x32xf32>
    %cst_164 = arith.constant dense<0.000000e+00> : vector<2x32xf32>
    %153 = tpu.matmul %111, %66, %cst_164 {dimension_numbers = #tpu.dot_dimension_numbers<[1], [0], [0], [1], [0, 0, 1, 1], [], []>} : vector<2x32xf32>, vector<32x32xf32>, vector<2x32xf32> -> vector<2x32xf32>
    %154 = vector.broadcast %74 : vector<1x32xf32> to vector<2x32xf32>
    %155 = arith.addf %153, %154 : vector<2x32xf32>
    %156 = arith.addf %146, %151 : vector<2x32xf32>
    %157 = arith.negf %156 : vector<2x32xf32>
    %158 = math.exp %157 : vector<2x32xf32>
    %cst_165 = arith.constant 1.000000e+00 : f32
    %159 = vector.broadcast %cst_165 : f32 to vector<2x32xf32>
    %160 = arith.addf %159, %158 : vector<2x32xf32>
    %161 = arith.divf %159, %160 : vector<2x32xf32>
    %162 = arith.addf %148, %152 : vector<2x32xf32>
    %163 = arith.negf %162 : vector<2x32xf32>
    %164 = math.exp %163 : vector<2x32xf32>
    %cst_166 = arith.constant 1.000000e+00 : f32
    %165 = vector.broadcast %cst_166 : f32 to vector<2x32xf32>
    %166 = arith.addf %165, %164 : vector<2x32xf32>
    %167 = arith.divf %165, %166 : vector<2x32xf32>
    %168 = arith.mulf %161, %155 : vector<2x32xf32>
    %169 = arith.addf %150, %168 : vector<2x32xf32>
    %170 = math.tanh %169 : vector<2x32xf32>
    %cst_167 = arith.constant 1.000000e+00 : f32
    %171 = vector.broadcast %cst_167 : f32 to vector<2x32xf32>
    %172 = arith.subf %171, %167 : vector<2x32xf32>
    %173 = arith.mulf %172, %170 : vector<2x32xf32>
    %174 = arith.mulf %167, %111 : vector<2x32xf32>
    %175 = arith.addf %173, %174 : vector<2x32xf32>
    %c2_168 = arith.constant 2 : index
    %c0_169 = arith.constant 0 : index
    %176 = vector.load %arg7[%c2_168, %c0_169] : memref<16x64xf32, #tpu.memory_space<vmem>>, vector<2x32xf32>
    tpu.vector_store %arg7[%c2_168, %c0_169], %175 {strides = array<i32>} : memref<16x64xf32, #tpu.memory_space<vmem>>, vector<2x32xf32>,
    %c1_170 = arith.constant 1 : index
    %c0_171 = arith.constant 0 : index
    %c12 = arith.constant 12 : index
    %c0_172 = arith.constant 0 : index
    %177 = vector.load %arg8[%c1_170, %c0_171, %c12, %c0_172] : memref<2x3x16x32xf32, #tpu.memory_space<vmem>>, vector<1x1x2x32xf32>
    %178 = vector.shape_cast %177 : vector<1x1x2x32xf32> to vector<2x32xf32>
    %c1_173 = arith.constant 1 : index
    %c1_174 = arith.constant 1 : index
    %c12_175 = arith.constant 12 : index
    %c0_176 = arith.constant 0 : index
    %179 = vector.load %arg8[%c1_173, %c1_174, %c12_175, %c0_176] : memref<2x3x16x32xf32, #tpu.memory_space<vmem>>, vector<1x1x2x32xf32>
    %180 = vector.shape_cast %179 : vector<1x1x2x32xf32> to vector<2x32xf32>
    %c1_177 = arith.constant 1 : index
    %c2_178 = arith.constant 2 : index
    %c12_179 = arith.constant 12 : index
    %c0_180 = arith.constant 0 : index
    %181 = vector.load %arg8[%c1_177, %c2_178, %c12_179, %c0_180] : memref<2x3x16x32xf32, #tpu.memory_space<vmem>>, vector<1x1x2x32xf32>
    %182 = vector.shape_cast %181 : vector<1x1x2x32xf32> to vector<2x32xf32>
    %cst_181 = arith.constant dense<0.000000e+00> : vector<2x32xf32>
    %183 = tpu.matmul %143, %68, %cst_181 {dimension_numbers = #tpu.dot_dimension_numbers<[1], [0], [0], [1], [0, 0, 1, 1], [], []>} : vector<2x32xf32>, vector<32x32xf32>, vector<2x32xf32> -> vector<2x32xf32>
    %cst_182 = arith.constant dense<0.000000e+00> : vector<2x32xf32>
    %184 = tpu.matmul %143, %70, %cst_182 {dimension_numbers = #tpu.dot_dimension_numbers<[1], [0], [0], [1], [0, 0, 1, 1], [], []>} : vector<2x32xf32>, vector<32x32xf32>, vector<2x32xf32> -> vector<2x32xf32>
    %cst_183 = arith.constant dense<0.000000e+00> : vector<2x32xf32>
    %185 = tpu.matmul %143, %72, %cst_183 {dimension_numbers = #tpu.dot_dimension_numbers<[1], [0], [0], [1], [0, 0, 1, 1], [], []>} : vector<2x32xf32>, vector<32x32xf32>, vector<2x32xf32> -> vector<2x32xf32>
    %186 = vector.broadcast %76 : vector<1x32xf32> to vector<2x32xf32>
    %187 = arith.addf %185, %186 : vector<2x32xf32>
    %188 = arith.addf %178, %183 : vector<2x32xf32>
    %189 = arith.negf %188 : vector<2x32xf32>
    %190 = math.exp %189 : vector<2x32xf32>
    %cst_184 = arith.constant 1.000000e+00 : f32
    %191 = vector.broadcast %cst_184 : f32 to vector<2x32xf32>
    %192 = arith.addf %191, %190 : vector<2x32xf32>
    %193 = arith.divf %191, %192 : vector<2x32xf32>
    %194 = arith.addf %180, %184 : vector<2x32xf32>
    %195 = arith.negf %194 : vector<2x32xf32>
    %196 = math.exp %195 : vector<2x32xf32>
    %cst_185 = arith.constant 1.000000e+00 : f32
    %197 = vector.broadcast %cst_185 : f32 to vector<2x32xf32>
    %198 = arith.addf %197, %196 : vector<2x32xf32>
    %199 = arith.divf %197, %198 : vector<2x32xf32>
    %200 = arith.mulf %193, %187 : vector<2x32xf32>
    %201 = arith.addf %182, %200 : vector<2x32xf32>
    %202 = math.tanh %201 : vector<2x32xf32>
    %cst_186 = arith.constant 1.000000e+00 : f32
    %203 = vector.broadcast %cst_186 : f32 to vector<2x32xf32>
    %204 = arith.subf %203, %199 : vector<2x32xf32>
    %205 = arith.mulf %204, %202 : vector<2x32xf32>
    %206 = arith.mulf %199, %143 : vector<2x32xf32>
    %207 = arith.addf %205, %206 : vector<2x32xf32>
    %c12_187 = arith.constant 12 : index
    %c32_188 = arith.constant 32 : index
    %208 = vector.load %arg7[%c12_187, %c32_188] : memref<16x64xf32, #tpu.memory_space<vmem>>, vector<2x32xf32>
    tpu.vector_store %arg7[%c12_187, %c32_188], %207 {strides = array<i32>} : memref<16x64xf32, #tpu.memory_space<vmem>>, vector<2x32xf32>,
    %c0_189 = arith.constant 0 : index
    %c0_190 = arith.constant 0 : index
    %c4 = arith.constant 4 : index
    %c0_191 = arith.constant 0 : index
    %209 = vector.load %arg8[%c0_189, %c0_190, %c4, %c0_191] : memref<2x3x16x32xf32, #tpu.memory_space<vmem>>, vector<1x1x2x32xf32>
    %210 = vector.shape_cast %209 : vector<1x1x2x32xf32> to vector<2x32xf32>
    %c0_192 = arith.constant 0 : index
    %c1_193 = arith.constant 1 : index
    %c4_194 = arith.constant 4 : index
    %c0_195 = arith.constant 0 : index
    %211 = vector.load %arg8[%c0_192, %c1_193, %c4_194, %c0_195] : memref<2x3x16x32xf32, #tpu.memory_space<vmem>>, vector<1x1x2x32xf32>
    %212 = vector.shape_cast %211 : vector<1x1x2x32xf32> to vector<2x32xf32>
    %c0_196 = arith.constant 0 : index
    %c2_197 = arith.constant 2 : index
    %c4_198 = arith.constant 4 : index
    %c0_199 = arith.constant 0 : index
    %213 = vector.load %arg8[%c0_196, %c2_197, %c4_198, %c0_199] : memref<2x3x16x32xf32, #tpu.memory_space<vmem>>, vector<1x1x2x32xf32>
    %214 = vector.shape_cast %213 : vector<1x1x2x32xf32> to vector<2x32xf32>
    %cst_200 = arith.constant dense<0.000000e+00> : vector<2x32xf32>
    %215 = tpu.matmul %175, %62, %cst_200 {dimension_numbers = #tpu.dot_dimension_numbers<[1], [0], [0], [1], [0, 0, 1, 1], [], []>} : vector<2x32xf32>, vector<32x32xf32>, vector<2x32xf32> -> vector<2x32xf32>
    %cst_201 = arith.constant dense<0.000000e+00> : vector<2x32xf32>
    %216 = tpu.matmul %175, %64, %cst_201 {dimension_numbers = #tpu.dot_dimension_numbers<[1], [0], [0], [1], [0, 0, 1, 1], [], []>} : vector<2x32xf32>, vector<32x32xf32>, vector<2x32xf32> -> vector<2x32xf32>
    %cst_202 = arith.constant dense<0.000000e+00> : vector<2x32xf32>
    %217 = tpu.matmul %175, %66, %cst_202 {dimension_numbers = #tpu.dot_dimension_numbers<[1], [0], [0], [1], [0, 0, 1, 1], [], []>} : vector<2x32xf32>, vector<32x32xf32>, vector<2x32xf32> -> vector<2x32xf32>
    %218 = vector.broadcast %74 : vector<1x32xf32> to vector<2x32xf32>
    %219 = arith.addf %217, %218 : vector<2x32xf32>
    %220 = arith.addf %210, %215 : vector<2x32xf32>
    %221 = arith.negf %220 : vector<2x32xf32>
    %222 = math.exp %221 : vector<2x32xf32>
    %cst_203 = arith.constant 1.000000e+00 : f32
    %223 = vector.broadcast %cst_203 : f32 to vector<2x32xf32>
    %224 = arith.addf %223, %222 : vector<2x32xf32>
    %225 = arith.divf %223, %224 : vector<2x32xf32>
    %226 = arith.addf %212, %216 : vector<2x32xf32>
    %227 = arith.negf %226 : vector<2x32xf32>
    %228 = math.exp %227 : vector<2x32xf32>
    %cst_204 = arith.constant 1.000000e+00 : f32
    %229 = vector.broadcast %cst_204 : f32 to vector<2x32xf32>
    %230 = arith.addf %229, %228 : vector<2x32xf32>
    %231 = arith.divf %229, %230 : vector<2x32xf32>
    %232 = arith.mulf %225, %219 : vector<2x32xf32>
    %233 = arith.addf %214, %232 : vector<2x32xf32>
    %234 = math.tanh %233 : vector<2x32xf32>
    %cst_205 = arith.constant 1.000000e+00 : f32
    %235 = vector.broadcast %cst_205 : f32 to vector<2x32xf32>
    %236 = arith.subf %235, %231 : vector<2x32xf32>
    %237 = arith.mulf %236, %234 : vector<2x32xf32>
    %238 = arith.mulf %231, %175 : vector<2x32xf32>
    %239 = arith.addf %237, %238 : vector<2x32xf32>
    %c4_206 = arith.constant 4 : index
    %c0_207 = arith.constant 0 : index
    %240 = vector.load %arg7[%c4_206, %c0_207] : memref<16x64xf32, #tpu.memory_space<vmem>>, vector<2x32xf32>
    tpu.vector_store %arg7[%c4_206, %c0_207], %239 {strides = array<i32>} : memref<16x64xf32, #tpu.memory_space<vmem>>, vector<2x32xf32>,
    %c1_208 = arith.constant 1 : index
    %c0_209 = arith.constant 0 : index
    %c10 = arith.constant 10 : index
    %c0_210 = arith.constant 0 : index
    %241 = vector.load %arg8[%c1_208, %c0_209, %c10, %c0_210] : memref<2x3x16x32xf32, #tpu.memory_space<vmem>>, vector<1x1x2x32xf32>
    %242 = vector.shape_cast %241 : vector<1x1x2x32xf32> to vector<2x32xf32>
    %c1_211 = arith.constant 1 : index
    %c1_212 = arith.constant 1 : index
    %c10_213 = arith.constant 10 : index
    %c0_214 = arith.constant 0 : index
    %243 = vector.load %arg8[%c1_211, %c1_212, %c10_213, %c0_214] : memref<2x3x16x32xf32, #tpu.memory_space<vmem>>, vector<1x1x2x32xf32>
    %244 = vector.shape_cast %243 : vector<1x1x2x32xf32> to vector<2x32xf32>
    %c1_215 = arith.constant 1 : index
    %c2_216 = arith.constant 2 : index
    %c10_217 = arith.constant 10 : index
    %c0_218 = arith.constant 0 : index
    %245 = vector.load %arg8[%c1_215, %c2_216, %c10_217, %c0_218] : memref<2x3x16x32xf32, #tpu.memory_space<vmem>>, vector<1x1x2x32xf32>
    %246 = vector.shape_cast %245 : vector<1x1x2x32xf32> to vector<2x32xf32>
    %cst_219 = arith.constant dense<0.000000e+00> : vector<2x32xf32>
    %247 = tpu.matmul %207, %68, %cst_219 {dimension_numbers = #tpu.dot_dimension_numbers<[1], [0], [0], [1], [0, 0, 1, 1], [], []>} : vector<2x32xf32>, vector<32x32xf32>, vector<2x32xf32> -> vector<2x32xf32>
    %cst_220 = arith.constant dense<0.000000e+00> : vector<2x32xf32>
    %248 = tpu.matmul %207, %70, %cst_220 {dimension_numbers = #tpu.dot_dimension_numbers<[1], [0], [0], [1], [0, 0, 1, 1], [], []>} : vector<2x32xf32>, vector<32x32xf32>, vector<2x32xf32> -> vector<2x32xf32>
    %cst_221 = arith.constant dense<0.000000e+00> : vector<2x32xf32>
    %249 = tpu.matmul %207, %72, %cst_221 {dimension_numbers = #tpu.dot_dimension_numbers<[1], [0], [0], [1], [0, 0, 1, 1], [], []>} : vector<2x32xf32>, vector<32x32xf32>, vector<2x32xf32> -> vector<2x32xf32>
    %250 = vector.broadcast %76 : vector<1x32xf32> to vector<2x32xf32>
    %251 = arith.addf %249, %250 : vector<2x32xf32>
    %252 = arith.addf %242, %247 : vector<2x32xf32>
    %253 = arith.negf %252 : vector<2x32xf32>
    %254 = math.exp %253 : vector<2x32xf32>
    %cst_222 = arith.constant 1.000000e+00 : f32
    %255 = vector.broadcast %cst_222 : f32 to vector<2x32xf32>
    %256 = arith.addf %255, %254 : vector<2x32xf32>
    %257 = arith.divf %255, %256 : vector<2x32xf32>
    %258 = arith.addf %244, %248 : vector<2x32xf32>
    %259 = arith.negf %258 : vector<2x32xf32>
    %260 = math.exp %259 : vector<2x32xf32>
    %cst_223 = arith.constant 1.000000e+00 : f32
    %261 = vector.broadcast %cst_223 : f32 to vector<2x32xf32>
    %262 = arith.addf %261, %260 : vector<2x32xf32>
    %263 = arith.divf %261, %262 : vector<2x32xf32>
    %264 = arith.mulf %257, %251 : vector<2x32xf32>
    %265 = arith.addf %246, %264 : vector<2x32xf32>
    %266 = math.tanh %265 : vector<2x32xf32>
    %cst_224 = arith.constant 1.000000e+00 : f32
    %267 = vector.broadcast %cst_224 : f32 to vector<2x32xf32>
    %268 = arith.subf %267, %263 : vector<2x32xf32>
    %269 = arith.mulf %268, %266 : vector<2x32xf32>
    %270 = arith.mulf %263, %207 : vector<2x32xf32>
    %271 = arith.addf %269, %270 : vector<2x32xf32>
    %c10_225 = arith.constant 10 : index
    %c32_226 = arith.constant 32 : index
    %272 = vector.load %arg7[%c10_225, %c32_226] : memref<16x64xf32, #tpu.memory_space<vmem>>, vector<2x32xf32>
    tpu.vector_store %arg7[%c10_225, %c32_226], %271 {strides = array<i32>} : memref<16x64xf32, #tpu.memory_space<vmem>>, vector<2x32xf32>,
    %c0_227 = arith.constant 0 : index
    %c0_228 = arith.constant 0 : index
    %c6 = arith.constant 6 : index
    %c0_229 = arith.constant 0 : index
    %273 = vector.load %arg8[%c0_227, %c0_228, %c6, %c0_229] : memref<2x3x16x32xf32, #tpu.memory_space<vmem>>, vector<1x1x2x32xf32>
    %274 = vector.shape_cast %273 : vector<1x1x2x32xf32> to vector<2x32xf32>
    %c0_230 = arith.constant 0 : index
    %c1_231 = arith.constant 1 : index
    %c6_232 = arith.constant 6 : index
    %c0_233 = arith.constant 0 : index
    %275 = vector.load %arg8[%c0_230, %c1_231, %c6_232, %c0_233] : memref<2x3x16x32xf32, #tpu.memory_space<vmem>>, vector<1x1x2x32xf32>
    %276 = vector.shape_cast %275 : vector<1x1x2x32xf32> to vector<2x32xf32>
    %c0_234 = arith.constant 0 : index
    %c2_235 = arith.constant 2 : index
    %c6_236 = arith.constant 6 : index
    %c0_237 = arith.constant 0 : index
    %277 = vector.load %arg8[%c0_234, %c2_235, %c6_236, %c0_237] : memref<2x3x16x32xf32, #tpu.memory_space<vmem>>, vector<1x1x2x32xf32>
    %278 = vector.shape_cast %277 : vector<1x1x2x32xf32> to vector<2x32xf32>
    %cst_238 = arith.constant dense<0.000000e+00> : vector<2x32xf32>
    %279 = tpu.matmul %239, %62, %cst_238 {dimension_numbers = #tpu.dot_dimension_numbers<[1], [0], [0], [1], [0, 0, 1, 1], [], []>} : vector<2x32xf32>, vector<32x32xf32>, vector<2x32xf32> -> vector<2x32xf32>
    %cst_239 = arith.constant dense<0.000000e+00> : vector<2x32xf32>
    %280 = tpu.matmul %239, %64, %cst_239 {dimension_numbers = #tpu.dot_dimension_numbers<[1], [0], [0], [1], [0, 0, 1, 1], [], []>} : vector<2x32xf32>, vector<32x32xf32>, vector<2x32xf32> -> vector<2x32xf32>
    %cst_240 = arith.constant dense<0.000000e+00> : vector<2x32xf32>
    %281 = tpu.matmul %239, %66, %cst_240 {dimension_numbers = #tpu.dot_dimension_numbers<[1], [0], [0], [1], [0, 0, 1, 1], [], []>} : vector<2x32xf32>, vector<32x32xf32>, vector<2x32xf32> -> vector<2x32xf32>
    %282 = vector.broadcast %74 : vector<1x32xf32> to vector<2x32xf32>
    %283 = arith.addf %281, %282 : vector<2x32xf32>
    %284 = arith.addf %274, %279 : vector<2x32xf32>
    %285 = arith.negf %284 : vector<2x32xf32>
    %286 = math.exp %285 : vector<2x32xf32>
    %cst_241 = arith.constant 1.000000e+00 : f32
    %287 = vector.broadcast %cst_241 : f32 to vector<2x32xf32>
    %288 = arith.addf %287, %286 : vector<2x32xf32>
    %289 = arith.divf %287, %288 : vector<2x32xf32>
    %290 = arith.addf %276, %280 : vector<2x32xf32>
    %291 = arith.negf %290 : vector<2x32xf32>
    %292 = math.exp %291 : vector<2x32xf32>
    %cst_242 = arith.constant 1.000000e+00 : f32
    %293 = vector.broadcast %cst_242 : f32 to vector<2x32xf32>
    %294 = arith.addf %293, %292 : vector<2x32xf32>
    %295 = arith.divf %293, %294 : vector<2x32xf32>
    %296 = arith.mulf %289, %283 : vector<2x32xf32>
    %297 = arith.addf %278, %296 : vector<2x32xf32>
    %298 = math.tanh %297 : vector<2x32xf32>
    %cst_243 = arith.constant 1.000000e+00 : f32
    %299 = vector.broadcast %cst_243 : f32 to vector<2x32xf32>
    %300 = arith.subf %299, %295 : vector<2x32xf32>
    %301 = arith.mulf %300, %298 : vector<2x32xf32>
    %302 = arith.mulf %295, %239 : vector<2x32xf32>
    %303 = arith.addf %301, %302 : vector<2x32xf32>
    %c6_244 = arith.constant 6 : index
    %c0_245 = arith.constant 0 : index
    %304 = vector.load %arg7[%c6_244, %c0_245] : memref<16x64xf32, #tpu.memory_space<vmem>>, vector<2x32xf32>
    tpu.vector_store %arg7[%c6_244, %c0_245], %303 {strides = array<i32>} : memref<16x64xf32, #tpu.memory_space<vmem>>, vector<2x32xf32>,
    %c1_246 = arith.constant 1 : index
    %c0_247 = arith.constant 0 : index
    %c8 = arith.constant 8 : index
    %c0_248 = arith.constant 0 : index
    %305 = vector.load %arg8[%c1_246, %c0_247, %c8, %c0_248] : memref<2x3x16x32xf32, #tpu.memory_space<vmem>>, vector<1x1x2x32xf32>
    %306 = vector.shape_cast %305 : vector<1x1x2x32xf32> to vector<2x32xf32>
    %c1_249 = arith.constant 1 : index
    %c1_250 = arith.constant 1 : index
    %c8_251 = arith.constant 8 : index
    %c0_252 = arith.constant 0 : index
    %307 = vector.load %arg8[%c1_249, %c1_250, %c8_251, %c0_252] : memref<2x3x16x32xf32, #tpu.memory_space<vmem>>, vector<1x1x2x32xf32>
    %308 = vector.shape_cast %307 : vector<1x1x2x32xf32> to vector<2x32xf32>
    %c1_253 = arith.constant 1 : index
    %c2_254 = arith.constant 2 : index
    %c8_255 = arith.constant 8 : index
    %c0_256 = arith.constant 0 : index
    %309 = vector.load %arg8[%c1_253, %c2_254, %c8_255, %c0_256] : memref<2x3x16x32xf32, #tpu.memory_space<vmem>>, vector<1x1x2x32xf32>
    %310 = vector.shape_cast %309 : vector<1x1x2x32xf32> to vector<2x32xf32>
    %cst_257 = arith.constant dense<0.000000e+00> : vector<2x32xf32>
    %311 = tpu.matmul %271, %68, %cst_257 {dimension_numbers = #tpu.dot_dimension_numbers<[1], [0], [0], [1], [0, 0, 1, 1], [], []>} : vector<2x32xf32>, vector<32x32xf32>, vector<2x32xf32> -> vector<2x32xf32>
    %cst_258 = arith.constant dense<0.000000e+00> : vector<2x32xf32>
    %312 = tpu.matmul %271, %70, %cst_258 {dimension_numbers = #tpu.dot_dimension_numbers<[1], [0], [0], [1], [0, 0, 1, 1], [], []>} : vector<2x32xf32>, vector<32x32xf32>, vector<2x32xf32> -> vector<2x32xf32>
    %cst_259 = arith.constant dense<0.000000e+00> : vector<2x32xf32>
    %313 = tpu.matmul %271, %72, %cst_259 {dimension_numbers = #tpu.dot_dimension_numbers<[1], [0], [0], [1], [0, 0, 1, 1], [], []>} : vector<2x32xf32>, vector<32x32xf32>, vector<2x32xf32> -> vector<2x32xf32>
    %314 = vector.broadcast %76 : vector<1x32xf32> to vector<2x32xf32>
    %315 = arith.addf %313, %314 : vector<2x32xf32>
    %316 = arith.addf %306, %311 : vector<2x32xf32>
    %317 = arith.negf %316 : vector<2x32xf32>
    %318 = math.exp %317 : vector<2x32xf32>
    %cst_260 = arith.constant 1.000000e+00 : f32
    %319 = vector.broadcast %cst_260 : f32 to vector<2x32xf32>
    %320 = arith.addf %319, %318 : vector<2x32xf32>
    %321 = arith.divf %319, %320 : vector<2x32xf32>
    %322 = arith.addf %308, %312 : vector<2x32xf32>
    %323 = arith.negf %322 : vector<2x32xf32>
    %324 = math.exp %323 : vector<2x32xf32>
    %cst_261 = arith.constant 1.000000e+00 : f32
    %325 = vector.broadcast %cst_261 : f32 to vector<2x32xf32>
    %326 = arith.addf %325, %324 : vector<2x32xf32>
    %327 = arith.divf %325, %326 : vector<2x32xf32>
    %328 = arith.mulf %321, %315 : vector<2x32xf32>
    %329 = arith.addf %310, %328 : vector<2x32xf32>
    %330 = math.tanh %329 : vector<2x32xf32>
    %cst_262 = arith.constant 1.000000e+00 : f32
    %331 = vector.broadcast %cst_262 : f32 to vector<2x32xf32>
    %332 = arith.subf %331, %327 : vector<2x32xf32>
    %333 = arith.mulf %332, %330 : vector<2x32xf32>
    %334 = arith.mulf %327, %271 : vector<2x32xf32>
    %335 = arith.addf %333, %334 : vector<2x32xf32>
    %c8_263 = arith.constant 8 : index
    %c32_264 = arith.constant 32 : index
    %336 = vector.load %arg7[%c8_263, %c32_264] : memref<16x64xf32, #tpu.memory_space<vmem>>, vector<2x32xf32>
    tpu.vector_store %arg7[%c8_263, %c32_264], %335 {strides = array<i32>} : memref<16x64xf32, #tpu.memory_space<vmem>>, vector<2x32xf32>,
    %c0_265 = arith.constant 0 : index
    %c0_266 = arith.constant 0 : index
    %c8_267 = arith.constant 8 : index
    %c0_268 = arith.constant 0 : index
    %337 = vector.load %arg8[%c0_265, %c0_266, %c8_267, %c0_268] : memref<2x3x16x32xf32, #tpu.memory_space<vmem>>, vector<1x1x2x32xf32>
    %338 = vector.shape_cast %337 : vector<1x1x2x32xf32> to vector<2x32xf32>
    %c0_269 = arith.constant 0 : index
    %c1_270 = arith.constant 1 : index
    %c8_271 = arith.constant 8 : index
    %c0_272 = arith.constant 0 : index
    %339 = vector.load %arg8[%c0_269, %c1_270, %c8_271, %c0_272] : memref<2x3x16x32xf32, #tpu.memory_space<vmem>>, vector<1x1x2x32xf32>
    %340 = vector.shape_cast %339 : vector<1x1x2x32xf32> to vector<2x32xf32>
    %c0_273 = arith.constant 0 : index
    %c2_274 = arith.constant 2 : index
    %c8_275 = arith.constant 8 : index
    %c0_276 = arith.constant 0 : index
    %341 = vector.load %arg8[%c0_273, %c2_274, %c8_275, %c0_276] : memref<2x3x16x32xf32, #tpu.memory_space<vmem>>, vector<1x1x2x32xf32>
    %342 = vector.shape_cast %341 : vector<1x1x2x32xf32> to vector<2x32xf32>
    %cst_277 = arith.constant dense<0.000000e+00> : vector<2x32xf32>
    %343 = tpu.matmul %303, %62, %cst_277 {dimension_numbers = #tpu.dot_dimension_numbers<[1], [0], [0], [1], [0, 0, 1, 1], [], []>} : vector<2x32xf32>, vector<32x32xf32>, vector<2x32xf32> -> vector<2x32xf32>
    %cst_278 = arith.constant dense<0.000000e+00> : vector<2x32xf32>
    %344 = tpu.matmul %303, %64, %cst_278 {dimension_numbers = #tpu.dot_dimension_numbers<[1], [0], [0], [1], [0, 0, 1, 1], [], []>} : vector<2x32xf32>, vector<32x32xf32>, vector<2x32xf32> -> vector<2x32xf32>
    %cst_279 = arith.constant dense<0.000000e+00> : vector<2x32xf32>
    %345 = tpu.matmul %303, %66, %cst_279 {dimension_numbers = #tpu.dot_dimension_numbers<[1], [0], [0], [1], [0, 0, 1, 1], [], []>} : vector<2x32xf32>, vector<32x32xf32>, vector<2x32xf32> -> vector<2x32xf32>
    %346 = vector.broadcast %74 : vector<1x32xf32> to vector<2x32xf32>
    %347 = arith.addf %345, %346 : vector<2x32xf32>
    %348 = arith.addf %338, %343 : vector<2x32xf32>
    %349 = arith.negf %348 : vector<2x32xf32>
    %350 = math.exp %349 : vector<2x32xf32>
    %cst_280 = arith.constant 1.000000e+00 : f32
    %351 = vector.broadcast %cst_280 : f32 to vector<2x32xf32>
    %352 = arith.addf %351, %350 : vector<2x32xf32>
    %353 = arith.divf %351, %352 : vector<2x32xf32>
    %354 = arith.addf %340, %344 : vector<2x32xf32>
    %355 = arith.negf %354 : vector<2x32xf32>
    %356 = math.exp %355 : vector<2x32xf32>
    %cst_281 = arith.constant 1.000000e+00 : f32
    %357 = vector.broadcast %cst_281 : f32 to vector<2x32xf32>
    %358 = arith.addf %357, %356 : vector<2x32xf32>
    %359 = arith.divf %357, %358 : vector<2x32xf32>
    %360 = arith.mulf %353, %347 : vector<2x32xf32>
    %361 = arith.addf %342, %360 : vector<2x32xf32>
    %362 = math.tanh %361 : vector<2x32xf32>
    %cst_282 = arith.constant 1.000000e+00 : f32
    %363 = vector.broadcast %cst_282 : f32 to vector<2x32xf32>
    %364 = arith.subf %363, %359 : vector<2x32xf32>
    %365 = arith.mulf %364, %362 : vector<2x32xf32>
    %366 = arith.mulf %359, %303 : vector<2x32xf32>
    %367 = arith.addf %365, %366 : vector<2x32xf32>
    %c8_283 = arith.constant 8 : index
    %c0_284 = arith.constant 0 : index
    %368 = vector.load %arg7[%c8_283, %c0_284] : memref<16x64xf32, #tpu.memory_space<vmem>>, vector<2x32xf32>
    tpu.vector_store %arg7[%c8_283, %c0_284], %367 {strides = array<i32>} : memref<16x64xf32, #tpu.memory_space<vmem>>, vector<2x32xf32>,
    %c1_285 = arith.constant 1 : index
    %c0_286 = arith.constant 0 : index
    %c6_287 = arith.constant 6 : index
    %c0_288 = arith.constant 0 : index
    %369 = vector.load %arg8[%c1_285, %c0_286, %c6_287, %c0_288] : memref<2x3x16x32xf32, #tpu.memory_space<vmem>>, vector<1x1x2x32xf32>
    %370 = vector.shape_cast %369 : vector<1x1x2x32xf32> to vector<2x32xf32>
    %c1_289 = arith.constant 1 : index
    %c1_290 = arith.constant 1 : index
    %c6_291 = arith.constant 6 : index
    %c0_292 = arith.constant 0 : index
    %371 = vector.load %arg8[%c1_289, %c1_290, %c6_291, %c0_292] : memref<2x3x16x32xf32, #tpu.memory_space<vmem>>, vector<1x1x2x32xf32>
    %372 = vector.shape_cast %371 : vector<1x1x2x32xf32> to vector<2x32xf32>
    %c1_293 = arith.constant 1 : index
    %c2_294 = arith.constant 2 : index
    %c6_295 = arith.constant 6 : index
    %c0_296 = arith.constant 0 : index
    %373 = vector.load %arg8[%c1_293, %c2_294, %c6_295, %c0_296] : memref<2x3x16x32xf32, #tpu.memory_space<vmem>>, vector<1x1x2x32xf32>
    %374 = vector.shape_cast %373 : vector<1x1x2x32xf32> to vector<2x32xf32>
    %cst_297 = arith.constant dense<0.000000e+00> : vector<2x32xf32>
    %375 = tpu.matmul %335, %68, %cst_297 {dimension_numbers = #tpu.dot_dimension_numbers<[1], [0], [0], [1], [0, 0, 1, 1], [], []>} : vector<2x32xf32>, vector<32x32xf32>, vector<2x32xf32> -> vector<2x32xf32>
    %cst_298 = arith.constant dense<0.000000e+00> : vector<2x32xf32>
    %376 = tpu.matmul %335, %70, %cst_298 {dimension_numbers = #tpu.dot_dimension_numbers<[1], [0], [0], [1], [0, 0, 1, 1], [], []>} : vector<2x32xf32>, vector<32x32xf32>, vector<2x32xf32> -> vector<2x32xf32>
    %cst_299 = arith.constant dense<0.000000e+00> : vector<2x32xf32>
    %377 = tpu.matmul %335, %72, %cst_299 {dimension_numbers = #tpu.dot_dimension_numbers<[1], [0], [0], [1], [0, 0, 1, 1], [], []>} : vector<2x32xf32>, vector<32x32xf32>, vector<2x32xf32> -> vector<2x32xf32>
    %378 = vector.broadcast %76 : vector<1x32xf32> to vector<2x32xf32>
    %379 = arith.addf %377, %378 : vector<2x32xf32>
    %380 = arith.addf %370, %375 : vector<2x32xf32>
    %381 = arith.negf %380 : vector<2x32xf32>
    %382 = math.exp %381 : vector<2x32xf32>
    %cst_300 = arith.constant 1.000000e+00 : f32
    %383 = vector.broadcast %cst_300 : f32 to vector<2x32xf32>
    %384 = arith.addf %383, %382 : vector<2x32xf32>
    %385 = arith.divf %383, %384 : vector<2x32xf32>
    %386 = arith.addf %372, %376 : vector<2x32xf32>
    %387 = arith.negf %386 : vector<2x32xf32>
    %388 = math.exp %387 : vector<2x32xf32>
    %cst_301 = arith.constant 1.000000e+00 : f32
    %389 = vector.broadcast %cst_301 : f32 to vector<2x32xf32>
    %390 = arith.addf %389, %388 : vector<2x32xf32>
    %391 = arith.divf %389, %390 : vector<2x32xf32>
    %392 = arith.mulf %385, %379 : vector<2x32xf32>
    %393 = arith.addf %374, %392 : vector<2x32xf32>
    %394 = math.tanh %393 : vector<2x32xf32>
    %cst_302 = arith.constant 1.000000e+00 : f32
    %395 = vector.broadcast %cst_302 : f32 to vector<2x32xf32>
    %396 = arith.subf %395, %391 : vector<2x32xf32>
    %397 = arith.mulf %396, %394 : vector<2x32xf32>
    %398 = arith.mulf %391, %335 : vector<2x32xf32>
    %399 = arith.addf %397, %398 : vector<2x32xf32>
    %c6_303 = arith.constant 6 : index
    %c32_304 = arith.constant 32 : index
    %400 = vector.load %arg7[%c6_303, %c32_304] : memref<16x64xf32, #tpu.memory_space<vmem>>, vector<2x32xf32>
    tpu.vector_store %arg7[%c6_303, %c32_304], %399 {strides = array<i32>} : memref<16x64xf32, #tpu.memory_space<vmem>>, vector<2x32xf32>,
    %c0_305 = arith.constant 0 : index
    %c0_306 = arith.constant 0 : index
    %c10_307 = arith.constant 10 : index
    %c0_308 = arith.constant 0 : index
    %401 = vector.load %arg8[%c0_305, %c0_306, %c10_307, %c0_308] : memref<2x3x16x32xf32, #tpu.memory_space<vmem>>, vector<1x1x2x32xf32>
    %402 = vector.shape_cast %401 : vector<1x1x2x32xf32> to vector<2x32xf32>
    %c0_309 = arith.constant 0 : index
    %c1_310 = arith.constant 1 : index
    %c10_311 = arith.constant 10 : index
    %c0_312 = arith.constant 0 : index
    %403 = vector.load %arg8[%c0_309, %c1_310, %c10_311, %c0_312] : memref<2x3x16x32xf32, #tpu.memory_space<vmem>>, vector<1x1x2x32xf32>
    %404 = vector.shape_cast %403 : vector<1x1x2x32xf32> to vector<2x32xf32>
    %c0_313 = arith.constant 0 : index
    %c2_314 = arith.constant 2 : index
    %c10_315 = arith.constant 10 : index
    %c0_316 = arith.constant 0 : index
    %405 = vector.load %arg8[%c0_313, %c2_314, %c10_315, %c0_316] : memref<2x3x16x32xf32, #tpu.memory_space<vmem>>, vector<1x1x2x32xf32>
    %406 = vector.shape_cast %405 : vector<1x1x2x32xf32> to vector<2x32xf32>
    %cst_317 = arith.constant dense<0.000000e+00> : vector<2x32xf32>
    %407 = tpu.matmul %367, %62, %cst_317 {dimension_numbers = #tpu.dot_dimension_numbers<[1], [0], [0], [1], [0, 0, 1, 1], [], []>} : vector<2x32xf32>, vector<32x32xf32>, vector<2x32xf32> -> vector<2x32xf32>
    %cst_318 = arith.constant dense<0.000000e+00> : vector<2x32xf32>
    %408 = tpu.matmul %367, %64, %cst_318 {dimension_numbers = #tpu.dot_dimension_numbers<[1], [0], [0], [1], [0, 0, 1, 1], [], []>} : vector<2x32xf32>, vector<32x32xf32>, vector<2x32xf32> -> vector<2x32xf32>
    %cst_319 = arith.constant dense<0.000000e+00> : vector<2x32xf32>
    %409 = tpu.matmul %367, %66, %cst_319 {dimension_numbers = #tpu.dot_dimension_numbers<[1], [0], [0], [1], [0, 0, 1, 1], [], []>} : vector<2x32xf32>, vector<32x32xf32>, vector<2x32xf32> -> vector<2x32xf32>
    %410 = vector.broadcast %74 : vector<1x32xf32> to vector<2x32xf32>
    %411 = arith.addf %409, %410 : vector<2x32xf32>
    %412 = arith.addf %402, %407 : vector<2x32xf32>
    %413 = arith.negf %412 : vector<2x32xf32>
    %414 = math.exp %413 : vector<2x32xf32>
    %cst_320 = arith.constant 1.000000e+00 : f32
    %415 = vector.broadcast %cst_320 : f32 to vector<2x32xf32>
    %416 = arith.addf %415, %414 : vector<2x32xf32>
    %417 = arith.divf %415, %416 : vector<2x32xf32>
    %418 = arith.addf %404, %408 : vector<2x32xf32>
    %419 = arith.negf %418 : vector<2x32xf32>
    %420 = math.exp %419 : vector<2x32xf32>
    %cst_321 = arith.constant 1.000000e+00 : f32
    %421 = vector.broadcast %cst_321 : f32 to vector<2x32xf32>
    %422 = arith.addf %421, %420 : vector<2x32xf32>
    %423 = arith.divf %421, %422 : vector<2x32xf32>
    %424 = arith.mulf %417, %411 : vector<2x32xf32>
    %425 = arith.addf %406, %424 : vector<2x32xf32>
    %426 = math.tanh %425 : vector<2x32xf32>
    %cst_322 = arith.constant 1.000000e+00 : f32
    %427 = vector.broadcast %cst_322 : f32 to vector<2x32xf32>
    %428 = arith.subf %427, %423 : vector<2x32xf32>
    %429 = arith.mulf %428, %426 : vector<2x32xf32>
    %430 = arith.mulf %423, %367 : vector<2x32xf32>
    %431 = arith.addf %429, %430 : vector<2x32xf32>
    %c10_323 = arith.constant 10 : index
    %c0_324 = arith.constant 0 : index
    %432 = vector.load %arg7[%c10_323, %c0_324] : memref<16x64xf32, #tpu.memory_space<vmem>>, vector<2x32xf32>
    tpu.vector_store %arg7[%c10_323, %c0_324], %431 {strides = array<i32>} : memref<16x64xf32, #tpu.memory_space<vmem>>, vector<2x32xf32>,
    %c1_325 = arith.constant 1 : index
    %c0_326 = arith.constant 0 : index
    %c4_327 = arith.constant 4 : index
    %c0_328 = arith.constant 0 : index
    %433 = vector.load %arg8[%c1_325, %c0_326, %c4_327, %c0_328] : memref<2x3x16x32xf32, #tpu.memory_space<vmem>>, vector<1x1x2x32xf32>
    %434 = vector.shape_cast %433 : vector<1x1x2x32xf32> to vector<2x32xf32>
    %c1_329 = arith.constant 1 : index
    %c1_330 = arith.constant 1 : index
    %c4_331 = arith.constant 4 : index
    %c0_332 = arith.constant 0 : index
    %435 = vector.load %arg8[%c1_329, %c1_330, %c4_331, %c0_332] : memref<2x3x16x32xf32, #tpu.memory_space<vmem>>, vector<1x1x2x32xf32>
    %436 = vector.shape_cast %435 : vector<1x1x2x32xf32> to vector<2x32xf32>
    %c1_333 = arith.constant 1 : index
    %c2_334 = arith.constant 2 : index
    %c4_335 = arith.constant 4 : index
    %c0_336 = arith.constant 0 : index
    %437 = vector.load %arg8[%c1_333, %c2_334, %c4_335, %c0_336] : memref<2x3x16x32xf32, #tpu.memory_space<vmem>>, vector<1x1x2x32xf32>
    %438 = vector.shape_cast %437 : vector<1x1x2x32xf32> to vector<2x32xf32>
    %cst_337 = arith.constant dense<0.000000e+00> : vector<2x32xf32>
    %439 = tpu.matmul %399, %68, %cst_337 {dimension_numbers = #tpu.dot_dimension_numbers<[1], [0], [0], [1], [0, 0, 1, 1], [], []>} : vector<2x32xf32>, vector<32x32xf32>, vector<2x32xf32> -> vector<2x32xf32>
    %cst_338 = arith.constant dense<0.000000e+00> : vector<2x32xf32>
    %440 = tpu.matmul %399, %70, %cst_338 {dimension_numbers = #tpu.dot_dimension_numbers<[1], [0], [0], [1], [0, 0, 1, 1], [], []>} : vector<2x32xf32>, vector<32x32xf32>, vector<2x32xf32> -> vector<2x32xf32>
    %cst_339 = arith.constant dense<0.000000e+00> : vector<2x32xf32>
    %441 = tpu.matmul %399, %72, %cst_339 {dimension_numbers = #tpu.dot_dimension_numbers<[1], [0], [0], [1], [0, 0, 1, 1], [], []>} : vector<2x32xf32>, vector<32x32xf32>, vector<2x32xf32> -> vector<2x32xf32>
    %442 = vector.broadcast %76 : vector<1x32xf32> to vector<2x32xf32>
    %443 = arith.addf %441, %442 : vector<2x32xf32>
    %444 = arith.addf %434, %439 : vector<2x32xf32>
    %445 = arith.negf %444 : vector<2x32xf32>
    %446 = math.exp %445 : vector<2x32xf32>
    %cst_340 = arith.constant 1.000000e+00 : f32
    %447 = vector.broadcast %cst_340 : f32 to vector<2x32xf32>
    %448 = arith.addf %447, %446 : vector<2x32xf32>
    %449 = arith.divf %447, %448 : vector<2x32xf32>
    %450 = arith.addf %436, %440 : vector<2x32xf32>
    %451 = arith.negf %450 : vector<2x32xf32>
    %452 = math.exp %451 : vector<2x32xf32>
    %cst_341 = arith.constant 1.000000e+00 : f32
    %453 = vector.broadcast %cst_341 : f32 to vector<2x32xf32>
    %454 = arith.addf %453, %452 : vector<2x32xf32>
    %455 = arith.divf %453, %454 : vector<2x32xf32>
    %456 = arith.mulf %449, %443 : vector<2x32xf32>
    %457 = arith.addf %438, %456 : vector<2x32xf32>
    %458 = math.tanh %457 : vector<2x32xf32>
    %cst_342 = arith.constant 1.000000e+00 : f32
    %459 = vector.broadcast %cst_342 : f32 to vector<2x32xf32>
    %460 = arith.subf %459, %455 : vector<2x32xf32>
    %461 = arith.mulf %460, %458 : vector<2x32xf32>
    %462 = arith.mulf %455, %399 : vector<2x32xf32>
    %463 = arith.addf %461, %462 : vector<2x32xf32>
    %c4_343 = arith.constant 4 : index
    %c32_344 = arith.constant 32 : index
    %464 = vector.load %arg7[%c4_343, %c32_344] : memref<16x64xf32, #tpu.memory_space<vmem>>, vector<2x32xf32>
    tpu.vector_store %arg7[%c4_343, %c32_344], %463 {strides = array<i32>} : memref<16x64xf32, #tpu.memory_space<vmem>>, vector<2x32xf32>,
    %c0_345 = arith.constant 0 : index
    %c0_346 = arith.constant 0 : index
    %c12_347 = arith.constant 12 : index
    %c0_348 = arith.constant 0 : index
    %465 = vector.load %arg8[%c0_345, %c0_346, %c12_347, %c0_348] : memref<2x3x16x32xf32, #tpu.memory_space<vmem>>, vector<1x1x2x32xf32>
    %466 = vector.shape_cast %465 : vector<1x1x2x32xf32> to vector<2x32xf32>
    %c0_349 = arith.constant 0 : index
    %c1_350 = arith.constant 1 : index
    %c12_351 = arith.constant 12 : index
    %c0_352 = arith.constant 0 : index
    %467 = vector.load %arg8[%c0_349, %c1_350, %c12_351, %c0_352] : memref<2x3x16x32xf32, #tpu.memory_space<vmem>>, vector<1x1x2x32xf32>
    %468 = vector.shape_cast %467 : vector<1x1x2x32xf32> to vector<2x32xf32>
    %c0_353 = arith.constant 0 : index
    %c2_354 = arith.constant 2 : index
    %c12_355 = arith.constant 12 : index
    %c0_356 = arith.constant 0 : index
    %469 = vector.load %arg8[%c0_353, %c2_354, %c12_355, %c0_356] : memref<2x3x16x32xf32, #tpu.memory_space<vmem>>, vector<1x1x2x32xf32>
    %470 = vector.shape_cast %469 : vector<1x1x2x32xf32> to vector<2x32xf32>
    %cst_357 = arith.constant dense<0.000000e+00> : vector<2x32xf32>
    %471 = tpu.matmul %431, %62, %cst_357 {dimension_numbers = #tpu.dot_dimension_numbers<[1], [0], [0], [1], [0, 0, 1, 1], [], []>} : vector<2x32xf32>, vector<32x32xf32>, vector<2x32xf32> -> vector<2x32xf32>
    %cst_358 = arith.constant dense<0.000000e+00> : vector<2x32xf32>
    %472 = tpu.matmul %431, %64, %cst_358 {dimension_numbers = #tpu.dot_dimension_numbers<[1], [0], [0], [1], [0, 0, 1, 1], [], []>} : vector<2x32xf32>, vector<32x32xf32>, vector<2x32xf32> -> vector<2x32xf32>
    %cst_359 = arith.constant dense<0.000000e+00> : vector<2x32xf32>
    %473 = tpu.matmul %431, %66, %cst_359 {dimension_numbers = #tpu.dot_dimension_numbers<[1], [0], [0], [1], [0, 0, 1, 1], [], []>} : vector<2x32xf32>, vector<32x32xf32>, vector<2x32xf32> -> vector<2x32xf32>
    %474 = vector.broadcast %74 : vector<1x32xf32> to vector<2x32xf32>
    %475 = arith.addf %473, %474 : vector<2x32xf32>
    %476 = arith.addf %466, %471 : vector<2x32xf32>
    %477 = arith.negf %476 : vector<2x32xf32>
    %478 = math.exp %477 : vector<2x32xf32>
    %cst_360 = arith.constant 1.000000e+00 : f32
    %479 = vector.broadcast %cst_360 : f32 to vector<2x32xf32>
    %480 = arith.addf %479, %478 : vector<2x32xf32>
    %481 = arith.divf %479, %480 : vector<2x32xf32>
    %482 = arith.addf %468, %472 : vector<2x32xf32>
    %483 = arith.negf %482 : vector<2x32xf32>
    %484 = math.exp %483 : vector<2x32xf32>
    %cst_361 = arith.constant 1.000000e+00 : f32
    %485 = vector.broadcast %cst_361 : f32 to vector<2x32xf32>
    %486 = arith.addf %485, %484 : vector<2x32xf32>
    %487 = arith.divf %485, %486 : vector<2x32xf32>
    %488 = arith.mulf %481, %475 : vector<2x32xf32>
    %489 = arith.addf %470, %488 : vector<2x32xf32>
    %490 = math.tanh %489 : vector<2x32xf32>
    %cst_362 = arith.constant 1.000000e+00 : f32
    %491 = vector.broadcast %cst_362 : f32 to vector<2x32xf32>
    %492 = arith.subf %491, %487 : vector<2x32xf32>
    %493 = arith.mulf %492, %490 : vector<2x32xf32>
    %494 = arith.mulf %487, %431 : vector<2x32xf32>
    %495 = arith.addf %493, %494 : vector<2x32xf32>
    %c12_363 = arith.constant 12 : index
    %c0_364 = arith.constant 0 : index
    %496 = vector.load %arg7[%c12_363, %c0_364] : memref<16x64xf32, #tpu.memory_space<vmem>>, vector<2x32xf32>
    tpu.vector_store %arg7[%c12_363, %c0_364], %495 {strides = array<i32>} : memref<16x64xf32, #tpu.memory_space<vmem>>, vector<2x32xf32>,
    %c1_365 = arith.constant 1 : index
    %c0_366 = arith.constant 0 : index
    %c2_367 = arith.constant 2 : index
    %c0_368 = arith.constant 0 : index
    %497 = vector.load %arg8[%c1_365, %c0_366, %c2_367, %c0_368] : memref<2x3x16x32xf32, #tpu.memory_space<vmem>>, vector<1x1x2x32xf32>
    %498 = vector.shape_cast %497 : vector<1x1x2x32xf32> to vector<2x32xf32>
    %c1_369 = arith.constant 1 : index
    %c1_370 = arith.constant 1 : index
    %c2_371 = arith.constant 2 : index
    %c0_372 = arith.constant 0 : index
    %499 = vector.load %arg8[%c1_369, %c1_370, %c2_371, %c0_372] : memref<2x3x16x32xf32, #tpu.memory_space<vmem>>, vector<1x1x2x32xf32>
    %500 = vector.shape_cast %499 : vector<1x1x2x32xf32> to vector<2x32xf32>
    %c1_373 = arith.constant 1 : index
    %c2_374 = arith.constant 2 : index
    %c2_375 = arith.constant 2 : index
    %c0_376 = arith.constant 0 : index
    %501 = vector.load %arg8[%c1_373, %c2_374, %c2_375, %c0_376] : memref<2x3x16x32xf32, #tpu.memory_space<vmem>>, vector<1x1x2x32xf32>
    %502 = vector.shape_cast %501 : vector<1x1x2x32xf32> to vector<2x32xf32>
    %cst_377 = arith.constant dense<0.000000e+00> : vector<2x32xf32>
    %503 = tpu.matmul %463, %68, %cst_377 {dimension_numbers = #tpu.dot_dimension_numbers<[1], [0], [0], [1], [0, 0, 1, 1], [], []>} : vector<2x32xf32>, vector<32x32xf32>, vector<2x32xf32> -> vector<2x32xf32>
    %cst_378 = arith.constant dense<0.000000e+00> : vector<2x32xf32>
    %504 = tpu.matmul %463, %70, %cst_378 {dimension_numbers = #tpu.dot_dimension_numbers<[1], [0], [0], [1], [0, 0, 1, 1], [], []>} : vector<2x32xf32>, vector<32x32xf32>, vector<2x32xf32> -> vector<2x32xf32>
    %cst_379 = arith.constant dense<0.000000e+00> : vector<2x32xf32>
    %505 = tpu.matmul %463, %72, %cst_379 {dimension_numbers = #tpu.dot_dimension_numbers<[1], [0], [0], [1], [0, 0, 1, 1], [], []>} : vector<2x32xf32>, vector<32x32xf32>, vector<2x32xf32> -> vector<2x32xf32>
    %506 = vector.broadcast %76 : vector<1x32xf32> to vector<2x32xf32>
    %507 = arith.addf %505, %506 : vector<2x32xf32>
    %508 = arith.addf %498, %503 : vector<2x32xf32>
    %509 = arith.negf %508 : vector<2x32xf32>
    %510 = math.exp %509 : vector<2x32xf32>
    %cst_380 = arith.constant 1.000000e+00 : f32
    %511 = vector.broadcast %cst_380 : f32 to vector<2x32xf32>
    %512 = arith.addf %511, %510 : vector<2x32xf32>
    %513 = arith.divf %511, %512 : vector<2x32xf32>
    %514 = arith.addf %500, %504 : vector<2x32xf32>
    %515 = arith.negf %514 : vector<2x32xf32>
    %516 = math.exp %515 : vector<2x32xf32>
    %cst_381 = arith.constant 1.000000e+00 : f32
    %517 = vector.broadcast %cst_381 : f32 to vector<2x32xf32>
    %518 = arith.addf %517, %516 : vector<2x32xf32>
    %519 = arith.divf %517, %518 : vector<2x32xf32>
    %520 = arith.mulf %513, %507 : vector<2x32xf32>
    %521 = arith.addf %502, %520 : vector<2x32xf32>
    %522 = math.tanh %521 : vector<2x32xf32>
    %cst_382 = arith.constant 1.000000e+00 : f32
    %523 = vector.broadcast %cst_382 : f32 to vector<2x32xf32>
    %524 = arith.subf %523, %519 : vector<2x32xf32>
    %525 = arith.mulf %524, %522 : vector<2x32xf32>
    %526 = arith.mulf %519, %463 : vector<2x32xf32>
    %527 = arith.addf %525, %526 : vector<2x32xf32>
    %c2_383 = arith.constant 2 : index
    %c32_384 = arith.constant 32 : index
    %528 = vector.load %arg7[%c2_383, %c32_384] : memref<16x64xf32, #tpu.memory_space<vmem>>, vector<2x32xf32>
    tpu.vector_store %arg7[%c2_383, %c32_384], %527 {strides = array<i32>} : memref<16x64xf32, #tpu.memory_space<vmem>>, vector<2x32xf32>,
    %c0_385 = arith.constant 0 : index
    %c0_386 = arith.constant 0 : index
    %c14_387 = arith.constant 14 : index
    %c0_388 = arith.constant 0 : index
    %529 = vector.load %arg8[%c0_385, %c0_386, %c14_387, %c0_388] : memref<2x3x16x32xf32, #tpu.memory_space<vmem>>, vector<1x1x2x32xf32>
    %530 = vector.shape_cast %529 : vector<1x1x2x32xf32> to vector<2x32xf32>
    %c0_389 = arith.constant 0 : index
    %c1_390 = arith.constant 1 : index
    %c14_391 = arith.constant 14 : index
    %c0_392 = arith.constant 0 : index
    %531 = vector.load %arg8[%c0_389, %c1_390, %c14_391, %c0_392] : memref<2x3x16x32xf32, #tpu.memory_space<vmem>>, vector<1x1x2x32xf32>
    %532 = vector.shape_cast %531 : vector<1x1x2x32xf32> to vector<2x32xf32>
    %c0_393 = arith.constant 0 : index
    %c2_394 = arith.constant 2 : index
    %c14_395 = arith.constant 14 : index
    %c0_396 = arith.constant 0 : index
    %533 = vector.load %arg8[%c0_393, %c2_394, %c14_395, %c0_396] : memref<2x3x16x32xf32, #tpu.memory_space<vmem>>, vector<1x1x2x32xf32>
    %534 = vector.shape_cast %533 : vector<1x1x2x32xf32> to vector<2x32xf32>
    %cst_397 = arith.constant dense<0.000000e+00> : vector<2x32xf32>
    %535 = tpu.matmul %495, %62, %cst_397 {dimension_numbers = #tpu.dot_dimension_numbers<[1], [0], [0], [1], [0, 0, 1, 1], [], []>} : vector<2x32xf32>, vector<32x32xf32>, vector<2x32xf32> -> vector<2x32xf32>
    %cst_398 = arith.constant dense<0.000000e+00> : vector<2x32xf32>
    %536 = tpu.matmul %495, %64, %cst_398 {dimension_numbers = #tpu.dot_dimension_numbers<[1], [0], [0], [1], [0, 0, 1, 1], [], []>} : vector<2x32xf32>, vector<32x32xf32>, vector<2x32xf32> -> vector<2x32xf32>
    %cst_399 = arith.constant dense<0.000000e+00> : vector<2x32xf32>
    %537 = tpu.matmul %495, %66, %cst_399 {dimension_numbers = #tpu.dot_dimension_numbers<[1], [0], [0], [1], [0, 0, 1, 1], [], []>} : vector<2x32xf32>, vector<32x32xf32>, vector<2x32xf32> -> vector<2x32xf32>
    %538 = vector.broadcast %74 : vector<1x32xf32> to vector<2x32xf32>
    %539 = arith.addf %537, %538 : vector<2x32xf32>
    %540 = arith.addf %530, %535 : vector<2x32xf32>
    %541 = arith.negf %540 : vector<2x32xf32>
    %542 = math.exp %541 : vector<2x32xf32>
    %cst_400 = arith.constant 1.000000e+00 : f32
    %543 = vector.broadcast %cst_400 : f32 to vector<2x32xf32>
    %544 = arith.addf %543, %542 : vector<2x32xf32>
    %545 = arith.divf %543, %544 : vector<2x32xf32>
    %546 = arith.addf %532, %536 : vector<2x32xf32>
    %547 = arith.negf %546 : vector<2x32xf32>
    %548 = math.exp %547 : vector<2x32xf32>
    %cst_401 = arith.constant 1.000000e+00 : f32
    %549 = vector.broadcast %cst_401 : f32 to vector<2x32xf32>
    %550 = arith.addf %549, %548 : vector<2x32xf32>
    %551 = arith.divf %549, %550 : vector<2x32xf32>
    %552 = arith.mulf %545, %539 : vector<2x32xf32>
    %553 = arith.addf %534, %552 : vector<2x32xf32>
    %554 = math.tanh %553 : vector<2x32xf32>
    %cst_402 = arith.constant 1.000000e+00 : f32
    %555 = vector.broadcast %cst_402 : f32 to vector<2x32xf32>
    %556 = arith.subf %555, %551 : vector<2x32xf32>
    %557 = arith.mulf %556, %554 : vector<2x32xf32>
    %558 = arith.mulf %551, %495 : vector<2x32xf32>
    %559 = arith.addf %557, %558 : vector<2x32xf32>
    %c14_403 = arith.constant 14 : index
    %c0_404 = arith.constant 0 : index
    %560 = vector.load %arg7[%c14_403, %c0_404] : memref<16x64xf32, #tpu.memory_space<vmem>>, vector<2x32xf32>
    tpu.vector_store %arg7[%c14_403, %c0_404], %559 {strides = array<i32>} : memref<16x64xf32, #tpu.memory_space<vmem>>, vector<2x32xf32>,
    %c1_405 = arith.constant 1 : index
    %c0_406 = arith.constant 0 : index
    %c0_407 = arith.constant 0 : index
    %c0_408 = arith.constant 0 : index
    %561 = vector.load %arg8[%c1_405, %c0_406, %c0_407, %c0_408] : memref<2x3x16x32xf32, #tpu.memory_space<vmem>>, vector<1x1x2x32xf32>
    %562 = vector.shape_cast %561 : vector<1x1x2x32xf32> to vector<2x32xf32>
    %c1_409 = arith.constant 1 : index
    %c1_410 = arith.constant 1 : index
    %c0_411 = arith.constant 0 : index
    %c0_412 = arith.constant 0 : index
    %563 = vector.load %arg8[%c1_409, %c1_410, %c0_411, %c0_412] : memref<2x3x16x32xf32, #tpu.memory_space<vmem>>, vector<1x1x2x32xf32>
    %564 = vector.shape_cast %563 : vector<1x1x2x32xf32> to vector<2x32xf32>
    %c1_413 = arith.constant 1 : index
    %c2_414 = arith.constant 2 : index
    %c0_415 = arith.constant 0 : index
    %c0_416 = arith.constant 0 : index
    %565 = vector.load %arg8[%c1_413, %c2_414, %c0_415, %c0_416] : memref<2x3x16x32xf32, #tpu.memory_space<vmem>>, vector<1x1x2x32xf32>
    %566 = vector.shape_cast %565 : vector<1x1x2x32xf32> to vector<2x32xf32>
    %cst_417 = arith.constant dense<0.000000e+00> : vector<2x32xf32>
    %567 = tpu.matmul %527, %68, %cst_417 {dimension_numbers = #tpu.dot_dimension_numbers<[1], [0], [0], [1], [0, 0, 1, 1], [], []>} : vector<2x32xf32>, vector<32x32xf32>, vector<2x32xf32> -> vector<2x32xf32>
    %cst_418 = arith.constant dense<0.000000e+00> : vector<2x32xf32>
    %568 = tpu.matmul %527, %70, %cst_418 {dimension_numbers = #tpu.dot_dimension_numbers<[1], [0], [0], [1], [0, 0, 1, 1], [], []>} : vector<2x32xf32>, vector<32x32xf32>, vector<2x32xf32> -> vector<2x32xf32>
    %cst_419 = arith.constant dense<0.000000e+00> : vector<2x32xf32>
    %569 = tpu.matmul %527, %72, %cst_419 {dimension_numbers = #tpu.dot_dimension_numbers<[1], [0], [0], [1], [0, 0, 1, 1], [], []>} : vector<2x32xf32>, vector<32x32xf32>, vector<2x32xf32> -> vector<2x32xf32>
    %570 = vector.broadcast %76 : vector<1x32xf32> to vector<2x32xf32>
    %571 = arith.addf %569, %570 : vector<2x32xf32>
    %572 = arith.addf %562, %567 : vector<2x32xf32>
    %573 = arith.negf %572 : vector<2x32xf32>
    %574 = math.exp %573 : vector<2x32xf32>
    %cst_420 = arith.constant 1.000000e+00 : f32
    %575 = vector.broadcast %cst_420 : f32 to vector<2x32xf32>
    %576 = arith.addf %575, %574 : vector<2x32xf32>
    %577 = arith.divf %575, %576 : vector<2x32xf32>
    %578 = arith.addf %564, %568 : vector<2x32xf32>
    %579 = arith.negf %578 : vector<2x32xf32>
    %580 = math.exp %579 : vector<2x32xf32>
    %cst_421 = arith.constant 1.000000e+00 : f32
    %581 = vector.broadcast %cst_421 : f32 to vector<2x32xf32>
    %582 = arith.addf %581, %580 : vector<2x32xf32>
    %583 = arith.divf %581, %582 : vector<2x32xf32>
    %584 = arith.mulf %577, %571 : vector<2x32xf32>
    %585 = arith.addf %566, %584 : vector<2x32xf32>
    %586 = math.tanh %585 : vector<2x32xf32>
    %cst_422 = arith.constant 1.000000e+00 : f32
    %587 = vector.broadcast %cst_422 : f32 to vector<2x32xf32>
    %588 = arith.subf %587, %583 : vector<2x32xf32>
    %589 = arith.mulf %588, %586 : vector<2x32xf32>
    %590 = arith.mulf %583, %527 : vector<2x32xf32>
    %591 = arith.addf %589, %590 : vector<2x32xf32>
    %c0_423 = arith.constant 0 : index
    %c32_424 = arith.constant 32 : index
    %592 = vector.load %arg7[%c0_423, %c32_424] : memref<16x64xf32, #tpu.memory_space<vmem>>, vector<2x32xf32>
    tpu.vector_store %arg7[%c0_423, %c32_424], %591 {strides = array<i32>} : memref<16x64xf32, #tpu.memory_space<vmem>>, vector<2x32xf32>,
    return
  }
  func.func @transform_0(%arg0: i32) -> (i32, i32) {
    %c0_i32 = arith.constant 0 : i32
    %c0_i32_0 = arith.constant 0 : i32
    %c0_i32_1 = arith.constant 0 : i32
    return %c0_i32, %c0_i32_0 : i32, i32
  }
  func.func @transform_1(%arg0: i32) -> (i32, i32, i32) {
    %c0_i32 = arith.constant 0 : i32
    %c0_i32_0 = arith.constant 0 : i32
    %c0_i32_1 = arith.constant 0 : i32
    %c0_i32_2 = arith.constant 0 : i32
    return %c0_i32, %c0_i32_0, %c0_i32_1 : i32, i32, i32
  }
  func.func @transform_2(%arg0: i32) -> (i32, i32, i32, i32) {
    %c0_i32 = arith.constant 0 : i32
    %c0_i32_0 = arith.constant 0 : i32
    %c0_i32_1 = arith.constant 0 : i32
    %c0_i32_2 = arith.constant 0 : i32
    %c0_i32_3 = arith.constant 0 : i32
    return %c0_i32, %c0_i32_0, %c0_i32_1, %c0_i32_2 : i32, i32, i32, i32
  }
  func.func @transform_3(%arg0: i32) -> (i32, i32, i32, i32) {
    %c0_i32 = arith.constant 0 : i32
    %c0_i32_0 = arith.constant 0 : i32
    %c0_i32_1 = arith.constant 0 : i32
    %c0_i32_2 = arith.constant 0 : i32
    %c0_i32_3 = arith.constant 0 : i32
    return %c0_i32, %c0_i32_0, %c0_i32_1, %c0_i32_2 : i32, i32, i32, i32
  }
  func.func @transform_4(%arg0: i32) -> (i32, i32, i32, i32) {
    %c0_i32 = arith.constant 0 : i32
    %c0_i32_0 = arith.constant 0 : i32
    %c0_i32_1 = arith.constant 0 : i32
    %c0_i32_2 = arith.constant 0 : i32
    %c0_i32_3 = arith.constant 0 : i32
    return %c0_i32, %c0_i32_0, %c0_i32_1, %c0_i32_2 : i32, i32, i32, i32
  }
  func.func @transform_5(%arg0: i32) -> (i32, i32, i32) {
    %c0_i32 = arith.constant 0 : i32
    %c0_i32_0 = arith.constant 0 : i32
    %c0_i32_1 = arith.constant 0 : i32
    %c0_i32_2 = arith.constant 0 : i32
    return %c0_i32, %c0_i32_0, %c0_i32_1 : i32, i32, i32
  }
  func.func @transform_6(%arg0: i32) -> (i32, i32) {
    %c0_i32 = arith.constant 0 : i32
    %c0_i32_0 = arith.constant 0 : i32
    %c0_i32_1 = arith.constant 0 : i32
    return %c0_i32, %c0_i32_0 : i32, i32
  }
}

</mosaic_0001>

<bundles_post_ra>
// kernel: rnn_gru_forward.3
= control target key start
LH: loop header
LB: loop body
LE: loop exit
PB: predicated region body
PF: predicated region fallthrough
CT: control target
= control target key end

     0   :  { %vm40_vm0 = vcmask 523264   ;;  %vm6146_vm1 = vmmov 0   ;;  %vm122_vm2 = vcmask 261120   ;;  %vm878_vm3 = vcmask 254976   ;;  %s6148_s12 = smov 32   ;;  %s7048_s2 = inlined_call_operand.vmem [shape: f32[2,3,64,32], index: 2, kind: input, shape index: {}]   ;;  %s7049_s0 = inlined_call_operand.vmem [shape: f32[16,64], index: 0, kind: input, shape index: {}]   ;;  %s7050_s3 = inlined_call_operand.vmem [shape: f32[2,3,32,32], index: 3, kind: input, shape index: {}]   ;;  %s7051_s1 = inlined_call_operand.vmem [shape: f32[2,2,32], index: 1, kind: input, shape index: {}]   ;;  %s7052_s4 = inlined_call_operand.vmem [shape: f32[2,3,1,32], index: 4, kind: input, shape index: {}]   ;;  %s7053_s5 = inlined_call_operand.vmem [shape: f32[2,1,32], index: 5, kind: input, shape index: {}]   ;;  %s7054_s6 = inlined_call_operand.vmem [shape: f32[16,64], index: 6, kind: output, shape index: {}]  }
   0x1   :  { %v25_v0 = vld [vmem:[%s7048_s2] sm:$0xff]  ;;  %v26_v1 = vld [vmem:[%s7048_s2 + $0x8] sm:$0xff]  ;;  %v27_v5 = vld [vmem:[%s7048_s2 + $0x10] sm:$0xff]  ;;  %vm1127_vm4 = vcmask 517376  }
   0x2   :  { %v4489_v2 = vld [vmem:[%s7048_s2 + $0x40] sm:$0xff]  ;;  %v5595_v3 = vpack.c.bf16 %v26_v1, %v25_v0  ;;  %v4490_v4 = vld [vmem:[%s7048_s2 + $0x48] sm:$0xff]  ;;  %v28_v6 = vld [vmem:[%s7048_s2 + $0x18] sm:$0xff] }
   0x3   :  { %v5611_v7 = vpack.c.bf16 %v4490_v4, %v4489_v2  ;;  %v5599_v8 = vpack.c.bf16 %v28_v6, %v27_v5  ;;  %v4491_v9 = vld [vmem:[%s7048_s2 + $0x50] sm:$0xff]  ;;  %v4492_v10 = vld [vmem:[%s7048_s2 + $0x58] sm:$0xff]  ;;  %v29_v11 = vld [vmem:[%s7048_s2 + $0x20] sm:$0xff] }
   0x4   :  { %5596 = vmatprep.subr.bf16.mxu0 %v5595_v3  ;;  %v5615_v12 = vpack.c.bf16 %v4492_v10, %v4491_v9  ;;  %v30_v13 = vld [vmem:[%s7048_s2 + $0x28] sm:$0xff]  ;;  %v4493_v14 = vld [vmem:[%s7048_s2 + $0x60] sm:$0xff]  ;;  %v31_v19 = vld [vmem:[%s7048_s2 + $0x30] sm:$0xff] }
   0x5   :  { %v4494_v15 = vld [vmem:[%s7048_s2 + $0x68] sm:$0xff]  ;;  %5612 = vmatprep.subr.bf16.mxu1 %v5611_v7  ;;  %5598 = vmatpush3.bf16.msra.mxu0 %v5595_v3  ;;  %v5603_v16 = vpack.c.bf16 %v30_v13, %v29_v11  ;;  %v6223_v17 = vld [vmem:[%s7049_s0] sm:$0xff]  ;;  %v32_v20 = vld [vmem:[%s7048_s2 + $0x38] sm:$0xff] }
   0x6   :  { %5614 = vmatpush3.bf16.msra.mxu1 %v5611_v7  ;;  %5600 = vmatprep.subr.bf16.mxu0 %v5599_v8  ;;  %v5619_v18 = vpack.c.bf16 %v4494_v15, %v4493_v14  ;;  %v4495_v21 = vld [vmem:[%s7048_s2 + $0x70] sm:$0xff]  ;;  %v4496_v22 = vld [vmem:[%s7048_s2 + $0x78] sm:$0xff]  ;;  %v5607_v23 = vpack.c.bf16 %v32_v20, %v31_v19  ;;  %v4501_v25 = vld [vmem:[%s7048_s2 + $0x80] sm:$0xff]  ;;  %v6145_v15 = vmov 0.0|0.0  }
   0x7   :  { %5616 = vmatprep.subr.bf16.mxu1 %v5615_v12  ;;  %4988 = vmatprep.mubr.msk.f32.mxu1 %vm40_vm0, %v6223_v17  ;;  %v5623_v24 = vpack.c.bf16 %v4496_v22, %v4495_v21  ;;  %v4502_v26 = vld [vmem:[%s7048_s2 + $0x88] sm:$0xff]  ;;  %v4513_v27 = vld [vmem:[%s7048_s2 + $0xc0] sm:$0xff]  ;;  %v4503_v31 = vld [vmem:[%s7048_s2 + $0x90] sm:$0xff] }
   0x8   :  { %4969 = vmatprep.mubr.msk.f32.mxu0 %vm40_vm0, %v6223_v17  ;;  %v4514_v28 = vld [vmem:[%s7048_s2 + $0xc8] sm:$0xff]  ;;  %v5627_v29 = vpack.c.bf16 %v4502_v26, %v4501_v25  ;;  %v4504_v32 = vld [vmem:[%s7048_s2 + $0x98] sm:$0xff]  ;;  %v4515_v33 = vld [vmem:[%s7048_s2 + $0xd0] sm:$0xff]  ;;  %v6147_v25 = vmov 0.0  }
   0x9   :  { %5602 = vmatpush3.bf16.msra.mxu0 %v5599_v8  ;;  %v5643_v30 = vpack.c.bf16 %v4514_v28, %v4513_v27  ;;  %v4516_v34 = vld [vmem:[%s7048_s2 + $0xd8] sm:$0xff]  ;;  %v6268_v35 = vld [vmem:[%s7049_s0 + $0x8] sm:$0xff]  ;;  %v5631_v36 = vpack.c.bf16 %v4504_v32, %v4503_v31  ;;  %v4505_v38 = vld [vmem:[%s7048_s2 + $0xa0] sm:$0xff] }
   0xa   :  { %5618 = vmatpush3.bf16.msra.mxu1 %v5615_v12  ;;  %5604 = vmatprep.subr.bf16.mxu0 %v5603_v16  ;;  %v5647_v37 = vpack.c.bf16 %v4516_v34, %v4515_v33  ;;  %v4506_v39 = vld [vmem:[%s7048_s2 + $0xa8] sm:$0xff]  ;;  %v4517_v40 = vld [vmem:[%s7048_s2 + $0xe0] sm:$0xff]  ;;  %v4507_v44 = vld [vmem:[%s7048_s2 + $0xb0] sm:$0xff] }
   0xb   :  { %5620 = vmatprep.subr.bf16.mxu1 %v5619_v18  ;;  %v4518_v41 = vld [vmem:[%s7048_s2 + $0xe8] sm:$0xff]  ;;  %v5635_v42 = vpack.c.bf16 %v4506_v39, %v4505_v38  ;;  %v4508_v45 = vld [vmem:[%s7048_s2 + $0xb8] sm:$0xff]  ;;  %v4519_v46 = vld [vmem:[%s7048_s2 + $0xf0] sm:$0xff] }
   0xc   :  { %v5651_v43 = vpack.c.bf16 %v4518_v41, %v4517_v40  ;;  %v4520_v47 = vld [vmem:[%s7048_s2 + $0xf8] sm:$0xff]  ;;  %v5639_v48 = vpack.c.bf16 %v4508_v45, %v4507_v44  ;;  %v4525_v50 = vld [vmem:[%s7048_s2 + $0x100] sm:$0xff]  ;;  %v4526_v51 = vld [vmem:[%s7048_s2 + $0x108] sm:$0xff] }
   0xd   :  { %5606 = vmatpush3.bf16.msra.mxu0 %v5603_v16  ;;  %v5655_v49 = vpack.c.bf16 %v4520_v47, %v4519_v46  ;;  %v4537_v52 = vld [vmem:[%s7048_s2 + $0x140] sm:$0xff]  ;;  %v4538_v53 = vld [vmem:[%s7048_s2 + $0x148] sm:$0xff]  ;;  %v5659_v54 = vpack.c.bf16 %v4526_v51, %v4525_v50  ;;  %v4527_v56 = vld [vmem:[%s7048_s2 + $0x110] sm:$0xff] }
   0xe   :  { %5622 = vmatpush3.bf16.msra.mxu1 %v5619_v18  ;;  %5608 = vmatprep.subr.bf16.mxu0 %v5607_v23  ;;  %v5675_v55 = vpack.c.bf16 %v4538_v53, %v4537_v52  ;;  %v4528_v57 = vld [vmem:[%s7048_s2 + $0x118] sm:$0xff]  ;;  %v4539_v58 = vld [vmem:[%s7048_s2 + $0x150] sm:$0xff]  ;;  %v4529_v62 = vld [vmem:[%s7048_s2 + $0x120] sm:$0xff] }
   0xf   :  { %5624 = vmatprep.subr.bf16.mxu1 %v5623_v24  ;;  %v4540_v59 = vld [vmem:[%s7048_s2 + $0x158] sm:$0xff]  ;;  %v5663_v60 = vpack.c.bf16 %v4528_v57, %v4527_v56  ;;  %v4530_v63 = vld [vmem:[%s7048_s2 + $0x128] sm:$0xff]  ;;  %v4541_v0 = vld [vmem:[%s7048_s2 + $0x160] sm:$0xff] }
  0x10   :  { %v5679_v61 = vpack.c.bf16 %v4540_v59, %v4539_v58  ;;  %v4542_v1 = vld [vmem:[%s7048_s2 + $0x168] sm:$0xff]  ;;  %v5667_v2 = vpack.c.bf16 %v4530_v63, %v4529_v62  ;;  %v4531_v4 = vld [vmem:[%s7048_s2 + $0x130] sm:$0xff]  ;;  %v4532_v5 = vld [vmem:[%s7048_s2 + $0x138] sm:$0xff] }
  0x11   :  { %5610 = vmatpush3.bf16.msra.mxu0 %v5607_v23  ;;  %v5683_v3 = vpack.c.bf16 %v4542_v1, %v4541_v0  ;;  %v4543_v6 = vld [vmem:[%s7048_s2 + $0x170] sm:$0xff]  ;;  %v4544_v7 = vld [vmem:[%s7048_s2 + $0x178] sm:$0xff]  ;;  %v5671_v8 = vpack.c.bf16 %v4532_v5, %v4531_v4  ;;  %v600_v10 = vld [vmem:[%s7050_s3] sm:$0xff] }
  0x12   :  { %5626 = vmatpush3.bf16.msra.mxu1 %v5623_v24  ;;  %5628 = vmatprep.subr.bf16.mxu0 %v5627_v29  ;;  %v5687_v9 = vpack.c.bf16 %v4544_v7, %v4543_v6  ;;  %v601_v11 = vld [vmem:[%s7050_s3 + $0x8] sm:$0xff]  ;;  %v4549_v12 = vld [vmem:[%s7050_s3 + $0x20] sm:$0xff]  ;;  %v603_v18 = vld [vmem:[%s7050_s3 + $0x18] sm:$0xff] }
  0x13   :  { %5644 = vmatprep.subr.bf16.mxu1 %v5643_v30  ;;  %v4550_v13 = vld [vmem:[%s7050_s3 + $0x28] sm:$0xff]  ;;  %v6370_v14 = vpack.c.bf16 %v601_v11, %v600_v10  ;;  %v4551_v19 = vld [vmem:[%s7050_s3 + $0x30] sm:$0xff]  ;;  %v4552_v20 = vld [vmem:[%s7050_s3 + $0x38] sm:$0xff] }
  0x14   :  { %4970 = vmatmul.mubr.msk.f32.vlgmr.msra.gmra.mrb[0].mxu0 %vm40_vm0, %v6268_v35  ;;  %v6373_v16 = vpack.c.bf16 %v4550_v13, %v4549_v12  ;;  %v6397_v22 = vpack.c.bf16 %v4552_v20, %v4551_v19  ;;  %v4553_v23 = vld [vmem:[%s7050_s3 + $0x40] sm:$0xff]  ;;  %v4554_v24 = vld [vmem:[%s7050_s3 + $0x48] sm:$0xff]  ;;  %v4555_v31 = vld [vmem:[%s7050_s3 + $0x50] sm:$0xff] }
  0x15   :  { %4989 = vmatmul.mubr.msk.f32.vlgmr.msra.gmra.mrb[0].mxu1 %vm40_vm0, %v6268_v35  ;;  %5630 = vmatpush3.bf16.msra.mxu0 %v5627_v29  ;;  %v4557_v26 = vld [vmem:[%s7050_s3 + $0x60] sm:$0xff]  ;;  %v4558_v27 = vld [vmem:[%s7050_s3 + $0x68] sm:$0xff]  ;;  %v6422_v29 = vpack.c.bf16 %v4554_v24, %v4553_v23  ;;  %v4556_v32 = vld [vmem:[%s7050_s3 + $0x58] sm:$0xff] }
  0x16   :  { %5646 = vmatpush3.bf16.msra.mxu1 %v5643_v30  ;;  %5632 = vmatprep.subr.bf16.mxu0 %v5631_v36  ;;  %v6420_v28 = vld [vmem:[%s7051_s1] sm:$0x3]  ;;  %v6426_v30 = vpack.c.bf16 %v4558_v27, %v4557_v26  ;;  %v4559_v33 = vld [vmem:[%s7050_s3 + $0x70] sm:$0xff]  ;;  %v4560_v34 = vld [vmem:[%s7050_s3 + $0x78] sm:$0xff] }
  0x17   :  { %5648 = vmatprep.subr.bf16.mxu1 %v5647_v37  ;;  %5026 = vmatprep.mubr.msk.f32.mxu1 %vm40_vm0, %v6223_v17  ;;  %v4562_v38 = vld [vmem:[%s7050_s3 + $0x88] sm:$0xff]  ;;  %v4565_v39 = vld [vmem:[%s7050_s3 + $0xa0] sm:$0xff]  ;;  %v4564_v44 = vld [vmem:[%s7050_s3 + $0x98] sm:$0xff] }
  0x18   :  { %5007 = vmatprep.mubr.msk.f32.mxu0 %vm40_vm0, %v6223_v17  ;;  %v4566_v40 = vld [vmem:[%s7050_s3 + $0xa8] sm:$0xff]  ;;  %v4567_v46 = vld [vmem:[%s7050_s3 + $0xb0] sm:$0xff]  ;;  %v4568_v47 = vld [vmem:[%s7050_s3 + $0xb8] sm:$0xff] }
  0x19   :  { %5634 = vmatpush3.bf16.msra.mxu0 %v5631_v36  ;;  %v6450_v36 = vpack.c.bf16 %v4560_v34, %v4559_v33  ;;  %v6486_v45 = vpack.c.bf16 %v4566_v40, %v4565_v39  ;;  %v4486_v50 = vld [vmem:[%s7052_s4] ss:$0 sm:$0xff]  ;;  %v4498_v51 = vld [vmem:[%s7052_s4 + $0x1] ss:$0 sm:$0xff]  ;;  %v4534_v6 = vld [vmem:[%s7052_s4 + $0x4] ss:$0 sm:$0xff] }
  0x1a   :  { %5650 = vmatpush3.bf16.msra.mxu1 %v5647_v37  ;;  %5636 = vmatprep.subr.bf16.mxu0 %v5635_v42  ;;  %v4561_v37 = vld [vmem:[%s7050_s3 + $0x80] sm:$0xff] }
  0x1b   :  { %5652 = vmatprep.subr.bf16.mxu1 %v5651_v43  ;;  %v6470_v41 = vpack.c.bf16 %v4562_v38, %v4561_v37  ;;  %v4546_v7 = vld [vmem:[%s7052_s4 + $0x5] ss:$0 sm:$0xff] }
  0x1d   :  { %5638 = vmatpush3.bf16.msra.mxu0 %v5635_v42  ;;  %v6476_v42 = vld [vmem:[%s7051_s1 + $0x2] sm:$0x3] }
  0x1e   :  { %5654 = vmatpush3.bf16.msra.mxu1 %v5651_v43  ;;  %5640 = vmatprep.subr.bf16.mxu0 %v5639_v48  ;;  %v4563_v43 = vld [vmem:[%s7050_s3 + $0x90] sm:$0xff] }
  0x1f   :  { %5656 = vmatprep.subr.bf16.mxu1 %v5655_v49 }
  0x21   :  { %5642 = vmatpush3.bf16.msra.mxu0 %v5639_v48  ;;  %v6499_v48 = vpack.c.bf16 %v4564_v44, %v4563_v43 }
  0x22   :  { %5658 = vmatpush3.bf16.msra.mxu1 %v5655_v49  ;;  %5660 = vmatprep.subr.bf16.mxu0 %v5659_v54  ;;  %v6505_v49 = vpack.c.bf16 %v4568_v47, %v4567_v46 }
  0x23   :  { %5676 = vmatprep.subr.bf16.mxu1 %v5675_v55 }
  0x24   :  { %5008 = vmatmul.mubr.msk.f32.vlgmr.msra.gmra.mrb[2].mxu0 %vm40_vm0, %v6268_v35 }
  0x25   :  { %5027 = vmatmul.mubr.msk.f32.vlgmr.msra.gmra.mrb[2].mxu1 %vm40_vm0, %v6268_v35  ;;  %5662 = vmatpush3.bf16.msra.mxu0 %v5659_v54 }
  0x26   :  { %5678 = vmatpush3.bf16.msra.mxu1 %v5675_v55  ;;  %5664 = vmatprep.subr.bf16.mxu0 %v5663_v60 }
  0x27   :  { %5680 = vmatprep.subr.bf16.mxu1 %v5679_v61  ;;  %5064 = vmatprep.mubr.msk.f32.mxu1 %vm40_vm0, %v6223_v17 }
  0x28   :  { %5045 = vmatprep.mubr.msk.f32.mxu0 %vm40_vm0, %v6223_v17  ;;  %v602_v17 = vld [vmem:[%s7050_s3 + $0x10] sm:$0xff] }
  0x29   :  { %5666 = vmatpush3.bf16.msra.mxu0 %v5663_v60  ;;  %v6393_v21 = vpack.c.bf16 %v603_v18, %v602_v17  ;;  %v4510_v60 = vld [vmem:[%s7052_s4 + $0x2] ss:$0 sm:$0xff] }
  0x2a   :  { %5682 = vmatpush3.bf16.msra.mxu1 %v5679_v61  ;;  %5668 = vmatprep.subr.bf16.mxu0 %v5667_v2  ;;  %v4522_v61 = vld [vmem:[%s7052_s4 + $0x3] ss:$0 sm:$0xff] }
  0x2b   :  { %5684 = vmatprep.subr.bf16.mxu1 %v5683_v3 }
  0x2d   :  { %5670 = vmatpush3.bf16.msra.mxu0 %v5667_v2 }
  0x2e   :  { %5686 = vmatpush3.bf16.msra.mxu1 %v5683_v3  ;;  %5672 = vmatprep.subr.bf16.mxu0 %v5671_v8 }
  0x2f   :  { %5688 = vmatprep.subr.bf16.mxu1 %v5687_v9 }
  0x31   :  { %5674 = vmatpush3.bf16.msra.mxu0 %v5671_v8 }
  0x32   :  { %5690 = vmatpush3.bf16.msra.mxu1 %v5687_v9  ;;  %5691 = vmatprep.subr.bf16.mxu0 %v6145_v15 }
  0x33   :  { %5697 = vmatprep.subr.bf16.mxu1 %v6145_v15 }
  0x34   :  { %5046 = vmatmul.mubr.msk.f32.vlgmr.msra.gmra.mrb[4].mxu0 %vm40_vm0, %v6268_v35 }
  0x35   :  { %5065 = vmatmul.mubr.msk.f32.vlgmr.msra.gmra.mrb[4].mxu1 %vm40_vm0, %v6268_v35  ;;  %5693 = vmatpush3.bf16.msra.mxu0 %v6370_v14  ;;  %v6446_v35 = vpack.c.bf16 %v4556_v32, %v4555_v31 }
  0x36   :  { %5699 = vmatpush3.bf16.msra.mxu1 %v6373_v16  ;;  %5694 = vmatprep.subr.bf16.mxu0 %v6145_v15 }
  0x37   :  { %5700 = vmatprep.subr.bf16.mxu1 %v6145_v15  ;;  %5075 = vmatprep.mubr.msk.f32.mxu0 %vm6146_vm1, %v6147_v25 }
  0x38   :  { %5086 = vmatprep.mubr.msk.f32.mxu1 %vm6146_vm1, %v6147_v25 }
  0x39   :  { %5696 = vmatpush3.bf16.msra.mxu0 %v6393_v21 }
  0x3a   :  { %5702 = vmatpush3.bf16.msra.mxu1 %v6397_v22  ;;  %5703 = vmatprep.subr.bf16.mxu0 %v6145_v15 }
  0x3b   :  { %5709 = vmatprep.subr.bf16.mxu1 %v6145_v15 }
  0x3c   :  { %5076 = vmatmul.mubr.msk.f32.vlgmr.msra.gmra.mrb[6].mxu0 %vm122_vm2, %v6420_v28 }
  0x3d   :  { %5087 = vmatmul.mubr.msk.f32.vlgmr.msra.gmra.mrb[6].mxu1 %vm122_vm2, %v6420_v28  ;;  %5705 = vmatpush3.bf16.msra.mxu0 %v6422_v29 }
  0x3e   :  { %5711 = vmatpush3.bf16.msra.mxu1 %v6426_v30  ;;  %5706 = vmatprep.subr.bf16.mxu0 %v6145_v15 }
  0x3f   :  { %5712 = vmatprep.subr.bf16.mxu1 %v6145_v15  ;;  %5108 = vmatprep.mubr.msk.f32.mxu1 %vm6146_vm1, %v6147_v25 }
  0x40   :  { %5097 = vmatprep.mubr.msk.f32.mxu0 %vm6146_vm1, %v6147_v25 }
  0x41   :  { %5708 = vmatpush3.bf16.msra.mxu0 %v6446_v35 }
  0x42   :  { %5714 = vmatpush3.bf16.msra.mxu1 %v6450_v36  ;;  %5715 = vmatprep.subr.bf16.mxu0 %v6145_v15 }
  0x43   :  { %5721 = vmatprep.subr.bf16.mxu1 %v6145_v15 }
  0x44   :  { %5098 = vmatmul.mubr.msk.f32.vlgmr.msra.gmra.mrb[8].mxu0 %vm122_vm2, %v6420_v28 }
  0x45   :  { %5109 = vmatmul.mubr.msk.f32.vlgmr.msra.gmra.mrb[8].mxu1 %vm122_vm2, %v6476_v42  ;;  %5717 = vmatpush3.bf16.msra.mxu0 %v6470_v41 }
  0x46   :  { %5718 = vmatprep.subr.bf16.mxu0 %v6145_v15  ;;  %5119 = vmatprep.mubr.msk.f32.mxu0 %vm6146_vm1, %v6147_v25 }
  0x47   :  { %5723 = vmatpush3.bf16.msra.mxu1 %v6486_v45  ;;  %5130 = vmatprep.mubr.msk.f32.mxu1 %vm6146_vm1, %v6147_v25 }
  0x48   :  { %5724 = vmatprep.subr.bf16.mxu1 %v6145_v15 }
  0x49   :  { %5720 = vmatpush3.bf16.msra.mxu0 %v6499_v48 }
  0x4a   :  { %5727 = vmatprep.subr.bf16.mxu0 %v6145_v15 }
  0x4b   :  { %5726 = vmatpush3.bf16.msra.mxu1 %v6505_v49 }
  0x4c   :  { %5120 = vmatmul.mubr.msk.f32.vlgmr.msra.gmra.mrb[10].mxu0 %vm122_vm2, %v6476_v42  ;;  %5733 = vmatprep.subr.bf16.mxu1 %v6145_v15 }
  0x4d   :  { %5729 = vmatpush3.bf16.msra.mxu0 %v6370_v14  ;;  %5141 = vmatprep.mubr.msk.f32.mxu0 %vm6146_vm1, %v6147_v25 }
  0x4e   :  { %5131 = vmatmul.mubr.msk.f32.vlgmr.msra.gmra.mrb[10].mxu1 %vm122_vm2, %v6476_v42  ;;  %5730 = vmatprep.subr.bf16.mxu0 %v6145_v15 }
  0x4f   :  { %5735 = vmatpush3.bf16.msra.mxu1 %v6373_v16  ;;  %5152 = vmatprep.mubr.msk.f32.mxu1 %vm6146_vm1, %v6147_v25 }
  0x50   :  { %5736 = vmatprep.subr.bf16.mxu1 %v6145_v15 }
  0x51   :  { %5732 = vmatpush3.bf16.msra.mxu0 %v6393_v21 }
  0x52   :  { %5739 = vmatprep.subr.bf16.mxu0 %v6145_v15 }
  0x53   :  { %5738 = vmatpush3.bf16.msra.mxu1 %v6397_v22 }
  0x54   :  { %5745 = vmatprep.subr.bf16.mxu1 %v6145_v15 }
  0xe7   :  { %v4971_v52 = vpop.f32.mrb[0].mxu0 }
  0xe8   :  { %v4990_v53 = vpop.f32.mrb[0].mxu1  ;;  %v119_v54 = vadd.f32 %v4971_v52, %v4486_v50  ;;  %v113_v55 = vpop.f32.mrb[1].mxu0 }
  0xe9   :  { %v214_v56 = vadd.f32 %v4990_v53, %v4498_v51  ;;  %v208_v57 = vpop.f32.mrb[1].mxu1  ;;  %v114_v58 = vadd.f32 %v4486_v50, %v113_v55 }
  0xea   :  { %124 = vst.msk [vmem:[#allocation2 + $0x8] sm:$0xff] %vm122_vm2, %v119_v54  ;;  %v209_v59 = vadd.f32 %v4498_v51, %v208_v57 }
  0xeb   :  { %219 = vst.msk [vmem:[#allocation2 + $0x18] sm:$0xff] %vm122_vm2, %v214_v56  ;;  %123 = vst.msk [vmem:[#allocation2] sm:$0xff] %vm122_vm2, %v114_v58 }
  0xec   :  { %218 = vst.msk [vmem:[#allocation2 + $0x10] sm:$0xff] %vm122_vm2, %v209_v59 }
  0xf2   :  { %v635_v19 = vld [vmem:[#allocation2] sm:$0x3] }
  0xf3   :  { %v636_v32 = vld [vmem:[#allocation2 + $0x10] sm:$0x3] }
  0xf7   :  { %v5009_v62 = vpop.f32.mrb[2].mxu0 }
  0xf8   :  { %v5028_v63 = vpop.f32.mrb[2].mxu1  ;;  %v309_v0 = vadd.f32 %v5009_v62, %v4510_v60  ;;  %v303_v1 = vpop.f32.mrb[3].mxu0 }
  0xf9   :  { %v404_v2 = vadd.f32 %v5028_v63, %v4522_v61  ;;  %v398_v3 = vpop.f32.mrb[3].mxu1  ;;  %v304_v4 = vadd.f32 %v4510_v60, %v303_v1  ;;  %v6563_v60 = vld [vmem:[%s7053_s5] ss:$0 sm:$0xff] }
  0xfa   :  { %314 = vst.msk [vmem:[#allocation2 + $0x28] sm:$0xff] %vm122_vm2, %v309_v0  ;;  %v399_v5 = vadd.f32 %v4522_v61, %v398_v3 }
  0xfb   :  { %409 = vst.msk [vmem:[#allocation2 + $0x38] sm:$0xff] %vm122_vm2, %v404_v2  ;;  %313 = vst.msk [vmem:[#allocation2 + $0x20] sm:$0xff] %vm122_vm2, %v304_v4 }
  0xfc   :  { %408 = vst.msk [vmem:[#allocation2 + $0x30] sm:$0xff] %vm122_vm2, %v399_v5  ;;  %v6569_v5 = vld [vmem:[%s7053_s5 + $0x1] ss:$0 sm:$0xff] }
 0x102   :  { %v880_v38 = vld [vmem:[#allocation2 + $0x3e] sm:$0x3]  ;;  %v637_v2 = vld [vmem:[#allocation2 + $0x20] sm:$0x3] }
 0x107   :  { %v5047_v8 = vpop.f32.mrb[4].mxu0 }
 0x108   :  { %v5066_v9 = vpop.f32.mrb[4].mxu1  ;;  %v499_v10 = vadd.f32 %v5047_v8, %v4534_v6  ;;  %v493_v11 = vpop.f32.mrb[5].mxu0 }
 0x109   :  { %v594_v12 = vadd.f32 %v5066_v9, %v4546_v7  ;;  %v588_v13 = vpop.f32.mrb[5].mxu1  ;;  %v494_v17 = vadd.f32 %v4534_v6, %v493_v11 }
 0x10a   :  { %504 = vst.msk [vmem:[#allocation2 + $0x48] sm:$0xff] %vm122_vm2, %v499_v10  ;;  %v589_v18 = vadd.f32 %v4546_v7, %v588_v13 }
 0x10b   :  { %599 = vst.msk [vmem:[#allocation2 + $0x58] sm:$0xff] %vm122_vm2, %v594_v12  ;;  %503 = vst.msk [vmem:[#allocation2 + $0x40] sm:$0xff] %vm122_vm2, %v494_v17 }
 0x10c   :  { %598 = vst.msk [vmem:[#allocation2 + $0x50] sm:$0xff] %vm122_vm2, %v589_v18 }
 0x10f   :  { %v707_v20 = vpop.f32.mrb[6].mxu0 }
 0x110   :  { %v857_v23 = vadd.f32 %v707_v20, %v635_v19  ;;  %v777_v24 = vpop.f32.mrb[6].mxu1  ;;  %v5077_v26 = vpop.f32.mrb[7].mxu0 }
 0x111   :  { %v5088_v27 = vpop.f32.mrb[7].mxu1  ;;  %v864_v33 = vadd.f32 %v777_v24, %v636_v32  ;;  %v881_v51 = vld [vmem:[#allocation2 + $0x4e] sm:$0x3]  ;;  %v1129_v32 = vld [vmem:[#allocation2 + $0x2] sm:$0x3] }
 0x112   :  { %v4575_v31 = vmul.f32 -1.442695, %v857_v23  ;;  %v882_v11 = vld [vmem:[#allocation2 + $0x5e] sm:$0x3] }
 0x113   :  { %v4576_v34 = vmul.f32 -1.442695, %v864_v33 }
 0x114   :  { %5983 = vpow2.f32 %v4575_v31 }
 0x115   :  { %5985 = vpow2.f32 %v4576_v34 }
 0x117   :  { %v853_v37 = vpop.f32.mrb[8].mxu0 }
 0x118   :  { %v952_v39 = vpop.f32.mrb[8].mxu1  ;;  %v5099_v40 = vpop.f32.mrb[9].mxu0  ;;  %v854_v63 = vadd.f32 %v6563_v60, %v853_v37 }
 0x119   :  { %v1102_v43 = vadd.f32 %v952_v39, %v880_v38  ;;  %v5110_v44 = vpop.f32.mrb[9].mxu1 }
 0x11b   :  { %v4581_v46 = vmul.f32 -1.442695, %v1102_v43  ;;  %v1130_v43 = vld [vmem:[#allocation2 + $0x12] sm:$0x3] }
 0x11d   :  { %5987 = vpow2.f32 %v4581_v46 }
 0x11e   :  { %v5984_v47 = vpop.eup %5983 }
 0x11f   :  { %v861_v50 = vadd.f32 1.0, %v5984_v47  ;;  %v1022_v52 = vpop.f32.mrb[10].mxu0  ;;  %v5986_v58 = vpop.eup %5985 }
 0x120   :  { %v1109_v53 = vadd.f32 %v1022_v52, %v881_v51  ;;  %v5121_v54 = vpop.f32.mrb[11].mxu0  ;;  %v868_v61 = vadd.f32 1.0, %v5986_v58  ;;  %v1367_v51 = vld [vmem:[#allocation2 + $0x3c] sm:$0x3]  ;;  %v1368_v58 = vld [vmem:[#allocation2 + $0x4c] sm:$0x3] }
 0x121   :  { %5989 = vrcp.f32 %v861_v50  ;;  %v1098_v55 = vpop.f32.mrb[10].mxu1 }
 0x122   :  { %v4582_v56 = vmul.f32 -1.442695, %v1109_v53  ;;  %v5132_v57 = vpop.f32.mrb[11].mxu1  ;;  %v1099_v7 = vadd.f32 %v6569_v5, %v1098_v55 }
 0x124   :  { %5991 = vpow2.f32 %v4582_v56 }
 0x127   :  { %v5988_v59 = vpop.eup %5987 }
 0x128   :  { %v1106_v62 = vadd.f32 1.0, %v5988_v59 }
 0x12a   :  { %5993 = vrcp.f32 %v1106_v62 }
 0x12b   :  { %v5990_v0 = vpop.eup %5989  ;;  %5995 = vrcp.f32 %v868_v61 }
 0x12c   :  { %v871_v1 = vmul.f32 %v5990_v0, %v854_v63 }
 0x12e   :  { %v5992_v3 = vpop.eup %5991  ;;  %v872_v4 = vadd.f32 %v871_v1, %v637_v2 }
 0x12f   :  { %v1113_v6 = vadd.f32 1.0, %v5992_v3 }
 0x130   :  { %5997 = vtanh.f32 %v872_v4 }
 0x131   :  { %5999 = vrcp.f32 %v1113_v6 }
 0x134   :  { %v5994_v8 = vpop.eup %5993 }
 0x135   :  { %v1116_v9 = vmul.f32 %v5994_v8, %v1099_v7  ;;  %v5996_v10 = vpop.eup %5995 }
 0x136   :  { %v874_v13 = vsub.f32 1.0, %v5996_v10  ;;  %v876_v19 = vmul.f32 %v5996_v10, %v6420_v28  ;;  %v1131_v10 = vld [vmem:[#allocation2 + $0x22] sm:$0x3] }
 0x137   :  { %v1117_v12 = vadd.f32 %v1116_v9, %v882_v11 }
 0x139   :  { %6001 = vtanh.f32 %v1117_v12 }
 0x13a   :  { %v5998_v17 = vpop.eup %5997 }
 0x13b   :  { %v875_v18 = vmul.f32 %v5998_v17, %v874_v13  ;;  %v6000_v23 = vpop.eup %5999 }
 0x13c   :  { %v1119_v28 = vsub.f32 1.0, %v6000_v23  ;;  %v1121_v27 = vmul.f32 %v6000_v23, %v6476_v42 }
 0x13d   :  { %v6573_v20 = vadd.f32 %v876_v19, %v875_v18 }
 0x13f   :  { %5142 = vmatmul.mubr.msk.f32.vlgmr.msra.gmra.mrb[12].mxu0 %vm122_vm2, %v6573_v20  ;;  %5153 = vmatmul.mubr.msk.f32.vlgmr.msra.gmra.mrb[12].mxu1 %vm122_vm2, %v6573_v20  ;;  %879 = vst.msk [vmem:[%s7054_s6] sm:$0x3] %vm878_vm3, %v6573_v20 }
 0x140   :  { %5741 = vmatpush3.bf16.msra.mxu0 %v6422_v29  ;;  %5747 = vmatpush3.bf16.msra.mxu1 %v6426_v30 }
 0x141   :  { %5742 = vmatprep.subr.bf16.mxu0 %v6145_v15  ;;  %5748 = vmatprep.subr.bf16.mxu1 %v6145_v15 }
 0x142   :  { %5163 = vmatprep.mubr.msk.f32.mxu0 %vm6146_vm1, %v6147_v25  ;;  %5174 = vmatprep.mubr.msk.f32.mxu1 %vm6146_vm1, %v6147_v25 }
 0x143   :  { %v6002_v24 = vpop.eup %6001 }
 0x144   :  { %5744 = vmatpush3.bf16.msra.mxu0 %v6446_v35  ;;  %5750 = vmatpush3.bf16.msra.mxu1 %v6450_v36  ;;  %v1120_v26 = vmul.f32 %v6002_v24, %v1119_v28  ;;  %v1369_v28 = vld [vmem:[#allocation2 + $0x5c] sm:$0x3] }
 0x145   :  { %5751 = vmatprep.subr.bf16.mxu0 %v6145_v15  ;;  %5757 = vmatprep.subr.bf16.mxu1 %v6145_v15 }
 0x146   :  { %v6597_v31 = vadd.f32 %v1121_v27, %v1120_v26 }
 0x147   :  { %5164 = vmatmul.mubr.msk.f32.vlgmr.msra.gmra.mrb[14].mxu0 %vm122_vm2, %v6573_v20 }
 0x148   :  { %1124 = vrot.lane.b32.xlu0 %v6597_v31, %s6148_s12  ;;  %5175 = vmatmul.mubr.msk.f32.vlgmr.msra.gmra.mrb[14].mxu1 %vm122_vm2, %v6597_v31 }
 0x149   :  { %5753 = vmatpush3.bf16.msra.mxu0 %v6470_v41  ;;  %5759 = vmatpush3.bf16.msra.mxu1 %v6486_v45 }
 0x14a   :  { %5754 = vmatprep.subr.bf16.mxu0 %v6145_v15  ;;  %5760 = vmatprep.subr.bf16.mxu1 %v6145_v15 }
 0x14b   :  { %5185 = vmatprep.mubr.msk.f32.mxu0 %vm6146_vm1, %v6147_v25  ;;  %5196 = vmatprep.mubr.msk.f32.mxu1 %vm6146_vm1, %v6147_v25 }
 0x14d   :  { %5756 = vmatpush3.bf16.msra.mxu0 %v6499_v48  ;;  %5762 = vmatpush3.bf16.msra.mxu1 %v6505_v49 }
 0x14e   :  { %5763 = vmatprep.subr.bf16.mxu0 %v6145_v15  ;;  %5769 = vmatprep.subr.bf16.mxu1 %v6145_v15 }
 0x150   :  { %5186 = vmatmul.mubr.msk.f32.vlgmr.msra.gmra.mrb[16].mxu0 %vm122_vm2, %v6597_v31  ;;  %5197 = vmatmul.mubr.msk.f32.vlgmr.msra.gmra.mrb[16].mxu1 %vm122_vm2, %v6597_v31 }
 0x151   :  { %5765 = vmatpush3.bf16.msra.mxu0 %v6370_v14  ;;  %5771 = vmatpush3.bf16.msra.mxu1 %v6373_v16 }
 0x152   :  { %5766 = vmatprep.subr.bf16.mxu0 %v6145_v15  ;;  %5772 = vmatprep.subr.bf16.mxu1 %v6145_v15 }
 0x153   :  { %5207 = vmatprep.mubr.msk.f32.mxu0 %vm6146_vm1, %v6147_v25  ;;  %5218 = vmatprep.mubr.msk.f32.mxu1 %vm6146_vm1, %v6147_v25 }
 0x155   :  { %5768 = vmatpush3.bf16.msra.mxu0 %v6393_v21  ;;  %5774 = vmatpush3.bf16.msra.mxu1 %v6397_v22 }
 0x156   :  { %5775 = vmatprep.subr.bf16.mxu0 %v6145_v15  ;;  %5781 = vmatprep.subr.bf16.mxu1 %v6145_v15 }
 0x1ba   :  { %v1125_v42 = vpop.permute.xlu0 %1124 }
 0x1bb   :  { %1128 = vst.msk [vmem:[%s7054_s6 + $0xe] sm:$0x3] %vm1127_vm4, %v1125_v42 }
 0x212   :  { %v1201_v33 = vpop.f32.mrb[12].mxu0  ;;  %v1271_v34 = vpop.f32.mrb[12].mxu1 }
 0x213   :  { %v1345_v37 = vadd.f32 %v1201_v33, %v1129_v32  ;;  %v5143_v38 = vpop.f32.mrb[13].mxu0  ;;  %v5154_v39 = vpop.f32.mrb[13].mxu1  ;;  %v1352_v44 = vadd.f32 %v1271_v34, %v1130_v43  ;;  %v1608_v43 = vld [vmem:[#allocation2 + $0x4] sm:$0x3] }
 0x215   :  { %v4586_v40 = vmul.f32 -1.442695, %v1345_v37  ;;  %v4587_v46 = vmul.f32 -1.442695, %v1352_v44 }
 0x217   :  { %6003 = vpow2.f32 %v4586_v40 }
 0x218   :  { %6005 = vpow2.f32 %v4587_v46 }
 0x21a   :  { %v1341_v47 = vpop.f32.mrb[14].mxu0 }
 0x21b   :  { %v5165_v50 = vpop.f32.mrb[15].mxu0  ;;  %v1438_v52 = vpop.f32.mrb[14].mxu1  ;;  %v1342_v7 = vadd.f32 %v6563_v60, %v1341_v47 }
 0x21c   :  { %v1582_v53 = vadd.f32 %v1438_v52, %v1367_v51  ;;  %v5176_v54 = vpop.f32.mrb[15].mxu1 }
 0x21e   :  { %v4591_v55 = vmul.f32 -1.442695, %v1582_v53  ;;  %v1609_v53 = vld [vmem:[#allocation2 + $0x14] sm:$0x3] }
 0x220   :  { %6007 = vpow2.f32 %v4591_v55 }
 0x221   :  { %v6004_v56 = vpop.eup %6003 }
 0x222   :  { %v1349_v57 = vadd.f32 1.0, %v6004_v56  ;;  %v6006_v2 = vpop.eup %6005 }
 0x223   :  { %v1508_v59 = vpop.f32.mrb[16].mxu0  ;;  %v1578_v61 = vpop.f32.mrb[16].mxu1  ;;  %v1356_v4 = vadd.f32 1.0, %v6006_v2  ;;  %v1847_v2 = vld [vmem:[#allocation2 + $0x4a] sm:$0x3] }
 0x224   :  { %6009 = vrcp.f32 %v1349_v57  ;;  %v1589_v62 = vadd.f32 %v1508_v59, %v1368_v58  ;;  %v5187_v63 = vpop.f32.mrb[17].mxu0  ;;  %v5198_v0 = vpop.f32.mrb[17].mxu1  ;;  %v1579_v17 = vadd.f32 %v6569_v5, %v1578_v61  ;;  %v1846_v58 = vld [vmem:[#allocation2 + $0x3a] sm:$0x3] }
 0x226   :  { %v4592_v1 = vmul.f32 -1.442695, %v1589_v62 }
 0x228   :  { %6011 = vpow2.f32 %v4592_v1 }
 0x22a   :  { %v6008_v3 = vpop.eup %6007 }
 0x22b   :  { %v1586_v6 = vadd.f32 1.0, %v6008_v3 }
 0x22d   :  { %6013 = vrcp.f32 %v1586_v6 }
 0x22e   :  { %v6010_v8 = vpop.eup %6009  ;;  %6015 = vrcp.f32 %v1356_v4 }
 0x22f   :  { %v1359_v9 = vmul.f32 %v6010_v8, %v1342_v7 }
 0x231   :  { %v1360_v11 = vadd.f32 %v1359_v9, %v1131_v10 }
 0x232   :  { %v6012_v12 = vpop.eup %6011 }
 0x233   :  { %6017 = vtanh.f32 %v1360_v11  ;;  %v1593_v13 = vadd.f32 1.0, %v6012_v12 }
 0x235   :  { %6019 = vrcp.f32 %v1593_v13 }
 0x237   :  { %v6014_v18 = vpop.eup %6013 }
 0x238   :  { %v1596_v19 = vmul.f32 %v6014_v18, %v1579_v17  ;;  %v6016_v23 = vpop.eup %6015 }
 0x239   :  { %v1362_v26 = vsub.f32 1.0, %v6016_v23  ;;  %v1364_v32 = vmul.f32 %v6016_v23, %v6573_v20  ;;  %v1610_v23 = vld [vmem:[#allocation2 + $0x24] sm:$0x3] }
 0x23a   :  { %v1597_v24 = vadd.f32 %v1596_v19, %v1369_v28 }
 0x23c   :  { %6021 = vtanh.f32 %v1597_v24 }
 0x23d   :  { %v6018_v27 = vpop.eup %6017 }
 0x23e   :  { %v1363_v42 = vmul.f32 %v6018_v27, %v1362_v26 }
 0x23f   :  { %v6020_v34 = vpop.eup %6019 }
 0x240   :  { %v6640_v33 = vadd.f32 %v1364_v32, %v1363_v42  ;;  %v1599_v20 = vsub.f32 1.0, %v6020_v34  ;;  %v1601_v39 = vmul.f32 %v6020_v34, %v6597_v31 }
 0x242   :  { %5208 = vmatmul.mubr.msk.f32.vlgmr.msra.gmra.mrb[18].mxu0 %vm122_vm2, %v6640_v33  ;;  %5219 = vmatmul.mubr.msk.f32.vlgmr.msra.gmra.mrb[18].mxu1 %vm122_vm2, %v6640_v33  ;;  %1366 = vst.msk [vmem:[%s7054_s6 + $0x2] sm:$0x3] %vm878_vm3, %v6640_v33 }
 0x243   :  { %5777 = vmatpush3.bf16.msra.mxu0 %v6422_v29  ;;  %5783 = vmatpush3.bf16.msra.mxu1 %v6426_v30 }
 0x244   :  { %5778 = vmatprep.subr.bf16.mxu0 %v6145_v15  ;;  %5784 = vmatprep.subr.bf16.mxu1 %v6145_v15 }
 0x245   :  { %5229 = vmatprep.mubr.msk.f32.mxu0 %vm6146_vm1, %v6147_v25  ;;  %5240 = vmatprep.mubr.msk.f32.mxu1 %vm6146_vm1, %v6147_v25 }
 0x246   :  { %v6022_v37 = vpop.eup %6021 }
 0x247   :  { %5780 = vmatpush3.bf16.msra.mxu0 %v6446_v35  ;;  %5786 = vmatpush3.bf16.msra.mxu1 %v6450_v36  ;;  %v1600_v38 = vmul.f32 %v6022_v37, %v1599_v20  ;;  %v1848_v20 = vld [vmem:[#allocation2 + $0x5a] sm:$0x3] }
 0x248   :  { %5787 = vmatprep.subr.bf16.mxu0 %v6145_v15  ;;  %5793 = vmatprep.subr.bf16.mxu1 %v6145_v15 }
 0x249   :  { %v6664_v40 = vadd.f32 %v1601_v39, %v1600_v38 }
 0x24a   :  { %5230 = vmatmul.mubr.msk.f32.vlgmr.msra.gmra.mrb[20].mxu0 %vm122_vm2, %v6640_v33 }
 0x24b   :  { %5789 = vmatpush3.bf16.msra.mxu0 %v6470_v41  ;;  %1604 = vrot.lane.b32.xlu0 %v6664_v40, %s6148_s12 }
 0x24c   :  { %5241 = vmatmul.mubr.msk.f32.vlgmr.msra.gmra.mrb[20].mxu1 %vm122_vm2, %v6664_v40  ;;  %5790 = vmatprep.subr.bf16.mxu0 %v6145_v15 }
 0x24d   :  { %5795 = vmatpush3.bf16.msra.mxu1 %v6486_v45  ;;  %5251 = vmatprep.mubr.msk.f32.mxu0 %vm6146_vm1, %v6147_v25 }
 0x24e   :  { %5796 = vmatprep.subr.bf16.mxu1 %v6145_v15  ;;  %5262 = vmatprep.mubr.msk.f32.mxu1 %vm6146_vm1, %v6147_v25 }
 0x24f   :  { %5792 = vmatpush3.bf16.msra.mxu0 %v6499_v48 }
 0x250   :  { %5799 = vmatprep.subr.bf16.mxu0 %v6145_v15 }
 0x251   :  { %5798 = vmatpush3.bf16.msra.mxu1 %v6505_v49 }
 0x252   :  { %5252 = vmatmul.mubr.msk.f32.vlgmr.msra.gmra.mrb[22].mxu0 %vm122_vm2, %v6664_v40  ;;  %5805 = vmatprep.subr.bf16.mxu1 %v6145_v15 }
 0x253   :  { %5801 = vmatpush3.bf16.msra.mxu0 %v6370_v14  ;;  %5273 = vmatprep.mubr.msk.f32.mxu0 %vm6146_vm1, %v6147_v25 }
 0x254   :  { %5263 = vmatmul.mubr.msk.f32.vlgmr.msra.gmra.mrb[22].mxu1 %vm122_vm2, %v6664_v40  ;;  %5802 = vmatprep.subr.bf16.mxu0 %v6145_v15 }
 0x255   :  { %5807 = vmatpush3.bf16.msra.mxu1 %v6373_v16  ;;  %5284 = vmatprep.mubr.msk.f32.mxu1 %vm6146_vm1, %v6147_v25 }
 0x256   :  { %5808 = vmatprep.subr.bf16.mxu1 %v6145_v15 }
 0x257   :  { %5804 = vmatpush3.bf16.msra.mxu0 %v6393_v21 }
 0x258   :  { %5811 = vmatprep.subr.bf16.mxu0 %v6145_v15 }
 0x259   :  { %5810 = vmatpush3.bf16.msra.mxu1 %v6397_v22 }
 0x25a   :  { %5817 = vmatprep.subr.bf16.mxu1 %v6145_v15 }
 0x2bd   :  { %v1605_v31 = vpop.permute.xlu0 %1604 }
 0x2be   :  { %1607 = vst.msk [vmem:[%s7054_s6 + $0xc] sm:$0x3] %vm1127_vm4, %v1605_v31 }
 0x315   :  { %v1680_v44 = vpop.f32.mrb[18].mxu0  ;;  %v1750_v46 = vpop.f32.mrb[18].mxu1 }
 0x316   :  { %v1824_v47 = vadd.f32 %v1680_v44, %v1608_v43  ;;  %v5209_v50 = vpop.f32.mrb[19].mxu0  ;;  %v5220_v51 = vpop.f32.mrb[19].mxu1  ;;  %v1831_v54 = vadd.f32 %v1750_v46, %v1609_v53  ;;  %v2087_v53 = vld [vmem:[#allocation2 + $0x6] sm:$0x3] }
 0x318   :  { %v4596_v52 = vmul.f32 -1.442695, %v1824_v47  ;;  %v4597_v55 = vmul.f32 -1.442695, %v1831_v54 }
 0x31a   :  { %6023 = vpow2.f32 %v4596_v52 }
 0x31b   :  { %6025 = vpow2.f32 %v4597_v55 }
 0x31d   :  { %v1820_v56 = vpop.f32.mrb[20].mxu0 }
 0x31e   :  { %v5231_v57 = vpop.f32.mrb[21].mxu0  ;;  %v1821_v17 = vadd.f32 %v6563_v60, %v1820_v56 }
 0x31f   :  { %v1917_v59 = vpop.f32.mrb[20].mxu1 }
 0x320   :  { %v2061_v61 = vadd.f32 %v1917_v59, %v1846_v58  ;;  %v5242_v62 = vpop.f32.mrb[21].mxu1 }
 0x322   :  { %v4601_v63 = vmul.f32 -1.442695, %v2061_v61  ;;  %v2088_v61 = vld [vmem:[#allocation2 + $0x16] sm:$0x3] }
 0x324   :  { %v6024_v0 = vpop.eup %6023  ;;  %6027 = vpow2.f32 %v4601_v63 }
 0x325   :  { %v1828_v1 = vadd.f32 1.0, %v6024_v0  ;;  %v1987_v3 = vpop.f32.mrb[22].mxu0  ;;  %v6026_v10 = vpop.eup %6025 }
 0x326   :  { %v2068_v4 = vadd.f32 %v1987_v3, %v1847_v2  ;;  %v5253_v6 = vpop.f32.mrb[23].mxu0  ;;  %v1835_v12 = vadd.f32 1.0, %v6026_v10  ;;  %v2325_v2 = vld [vmem:[#allocation2 + $0x38] sm:$0x3]  ;;  %v2326_v10 = vld [vmem:[#allocation2 + $0x48] sm:$0x3] }
 0x327   :  { %6029 = vrcp.f32 %v1828_v1  ;;  %v2057_v7 = vpop.f32.mrb[22].mxu1 }
 0x328   :  { %v4602_v8 = vmul.f32 -1.442695, %v2068_v4  ;;  %v5264_v9 = vpop.f32.mrb[23].mxu1  ;;  %v2058_v27 = vadd.f32 %v6569_v5, %v2057_v7 }
 0x32a   :  { %6031 = vpow2.f32 %v4602_v8 }
 0x32e   :  { %v6028_v11 = vpop.eup %6027 }
 0x32f   :  { %v2065_v13 = vadd.f32 1.0, %v6028_v11 }
 0x331   :  { %v6030_v18 = vpop.eup %6029  ;;  %6033 = vrcp.f32 %v2065_v13 }
 0x332   :  { %6035 = vrcp.f32 %v1835_v12  ;;  %v1838_v19 = vmul.f32 %v6030_v18, %v1821_v17 }
 0x334   :  { %v1839_v28 = vadd.f32 %v1838_v19, %v1610_v23  ;;  %v6032_v24 = vpop.eup %6031 }
 0x335   :  { %v2072_v26 = vadd.f32 1.0, %v6032_v24 }
 0x336   :  { %6037 = vtanh.f32 %v1839_v28 }
 0x337   :  { %6039 = vrcp.f32 %v2072_v26 }
 0x33b   :  { %v6034_v42 = vpop.eup %6033 }
 0x33c   :  { %v6036_v32 = vpop.eup %6035  ;;  %v2075_v34 = vmul.f32 %v6034_v42, %v2058_v27 }
 0x33d   :  { %v1841_v38 = vsub.f32 1.0, %v6036_v32  ;;  %v1843_v43 = vmul.f32 %v6036_v32, %v6640_v33 }
 0x33e   :  { %v2076_v37 = vadd.f32 %v2075_v34, %v1848_v20  ;;  %v2089_v34 = vld [vmem:[#allocation2 + $0x26] sm:$0x3] }
 0x340   :  { %v6038_v39 = vpop.eup %6037  ;;  %6041 = vtanh.f32 %v2076_v37 }
 0x341   :  { %v1842_v31 = vmul.f32 %v6038_v39, %v1841_v38  ;;  %v6040_v46 = vpop.eup %6039 }
 0x342   :  { %v2078_v33 = vsub.f32 1.0, %v6040_v46  ;;  %v2080_v51 = vmul.f32 %v6040_v46, %v6664_v40 }
 0x343   :  { %v6707_v44 = vadd.f32 %v1843_v43, %v1842_v31 }
 0x345   :  { %5274 = vmatmul.mubr.msk.f32.vlgmr.msra.gmra.mrb[24].mxu0 %vm122_vm2, %v6707_v44  ;;  %5285 = vmatmul.mubr.msk.f32.vlgmr.msra.gmra.mrb[24].mxu1 %vm122_vm2, %v6707_v44  ;;  %1845 = vst.msk [vmem:[%s7054_s6 + $0x4] sm:$0x3] %vm878_vm3, %v6707_v44 }
 0x346   :  { %5813 = vmatpush3.bf16.msra.mxu0 %v6422_v29  ;;  %5819 = vmatpush3.bf16.msra.mxu1 %v6426_v30 }
 0x347   :  { %5814 = vmatprep.subr.bf16.mxu0 %v6145_v15  ;;  %5820 = vmatprep.subr.bf16.mxu1 %v6145_v15 }
 0x348   :  { %5295 = vmatprep.mubr.msk.f32.mxu0 %vm6146_vm1, %v6147_v25  ;;  %5306 = vmatprep.mubr.msk.f32.mxu1 %vm6146_vm1, %v6147_v25 }
 0x34a   :  { %v6042_v47 = vpop.eup %6041  ;;  %5816 = vmatpush3.bf16.msra.mxu0 %v6446_v35  ;;  %5822 = vmatpush3.bf16.msra.mxu1 %v6450_v36 }
 0x34b   :  { %5823 = vmatprep.subr.bf16.mxu0 %v6145_v15  ;;  %5829 = vmatprep.subr.bf16.mxu1 %v6145_v15  ;;  %v2079_v50 = vmul.f32 %v6042_v47, %v2078_v33  ;;  %v2327_v33 = vld [vmem:[#allocation2 + $0x58] sm:$0x3] }
 0x34d   :  { %5296 = vmatmul.mubr.msk.f32.vlgmr.msra.gmra.mrb[26].mxu0 %vm122_vm2, %v6707_v44  ;;  %v6733_v52 = vadd.f32 %v2080_v51, %v2079_v50 }
 0x34e   :  { %5825 = vmatpush3.bf16.msra.mxu0 %v6470_v41  ;;  %5317 = vmatprep.mubr.msk.f32.mxu0 %vm6146_vm1, %v6147_v25 }
 0x34f   :  { %2083 = vrot.lane.b32.xlu1 %v6733_v52, %s6148_s12  ;;  %5307 = vmatmul.mubr.msk.f32.vlgmr.msra.gmra.mrb[26].mxu1 %vm122_vm2, %v6733_v52 }
 0x350   :  { %5831 = vmatpush3.bf16.msra.mxu1 %v6486_v45  ;;  %5826 = vmatprep.subr.bf16.mxu0 %v6145_v15 }
 0x351   :  { %5832 = vmatprep.subr.bf16.mxu1 %v6145_v15  ;;  %5328 = vmatprep.mubr.msk.f32.mxu1 %vm6146_vm1, %v6147_v25 }
 0x352   :  { %5828 = vmatpush3.bf16.msra.mxu0 %v6499_v48 }
 0x353   :  { %5835 = vmatprep.subr.bf16.mxu0 %v6145_v15 }
 0x354   :  { %5834 = vmatpush3.bf16.msra.mxu1 %v6505_v49 }
 0x355   :  { %5318 = vmatmul.mubr.msk.f32.vlgmr.msra.gmra.mrb[28].mxu0 %vm122_vm2, %v6733_v52  ;;  %5841 = vmatprep.subr.bf16.mxu1 %v6145_v15 }
 0x356   :  { %5837 = vmatpush3.bf16.msra.mxu0 %v6370_v14  ;;  %5339 = vmatprep.mubr.msk.f32.mxu0 %vm6146_vm1, %v6147_v25 }
 0x357   :  { %5329 = vmatmul.mubr.msk.f32.vlgmr.msra.gmra.mrb[28].mxu1 %vm122_vm2, %v6733_v52  ;;  %5838 = vmatprep.subr.bf16.mxu0 %v6145_v15 }
 0x358   :  { %5843 = vmatpush3.bf16.msra.mxu1 %v6373_v16  ;;  %5350 = vmatprep.mubr.msk.f32.mxu1 %vm6146_vm1, %v6147_v25 }
 0x359   :  { %5844 = vmatprep.subr.bf16.mxu1 %v6145_v15 }
 0x35a   :  { %5840 = vmatpush3.bf16.msra.mxu0 %v6393_v21 }
 0x35b   :  { %5847 = vmatprep.subr.bf16.mxu0 %v6145_v15 }
 0x35c   :  { %5846 = vmatpush3.bf16.msra.mxu1 %v6397_v22 }
 0x35d   :  { %5853 = vmatprep.subr.bf16.mxu1 %v6145_v15 }
 0x3c1   :  { %v2084_v40 = vpop.permute.xlu1 %2083 }
 0x3c2   :  { %2086 = vst.msk [vmem:[%s7054_s6 + $0xa] sm:$0x3] %vm1127_vm4, %v2084_v40 }
 0x418   :  { %v2159_v54 = vpop.f32.mrb[24].mxu0  ;;  %v2229_v55 = vpop.f32.mrb[24].mxu1 }
 0x419   :  { %v2303_v56 = vadd.f32 %v2159_v54, %v2087_v53  ;;  %v5275_v57 = vpop.f32.mrb[25].mxu0  ;;  %v5286_v58 = vpop.f32.mrb[25].mxu1  ;;  %v2310_v62 = vadd.f32 %v2229_v55, %v2088_v61  ;;  %v2566_v61 = vld [vmem:[#allocation2 + $0x8] sm:$0x3] }
 0x41b   :  { %v4606_v59 = vmul.f32 -1.442695, %v2303_v56  ;;  %v4607_v63 = vmul.f32 -1.442695, %v2310_v62 }
 0x41d   :  { %6043 = vpow2.f32 %v4606_v59 }
 0x41e   :  { %6045 = vpow2.f32 %v4607_v63 }
 0x420   :  { %v2299_v0 = vpop.f32.mrb[26].mxu0 }
 0x421   :  { %v5297_v1 = vpop.f32.mrb[27].mxu0  ;;  %v2300_v27 = vadd.f32 %v6563_v60, %v2299_v0 }
 0x422   :  { %v2396_v3 = vpop.f32.mrb[26].mxu1 }
 0x423   :  { %v2540_v4 = vadd.f32 %v2396_v3, %v2325_v2  ;;  %v5308_v6 = vpop.f32.mrb[27].mxu1 }
 0x425   :  { %v4611_v7 = vmul.f32 -1.442695, %v2540_v4  ;;  %v2567_v4 = vld [vmem:[#allocation2 + $0x18] sm:$0x3] }
 0x427   :  { %v6044_v8 = vpop.eup %6043  ;;  %6047 = vpow2.f32 %v4611_v7 }
 0x428   :  { %v2307_v9 = vadd.f32 1.0, %v6044_v8  ;;  %v2466_v11 = vpop.f32.mrb[28].mxu0  ;;  %v6046_v23 = vpop.eup %6045 }
 0x429   :  { %v2547_v12 = vadd.f32 %v2466_v11, %v2326_v10  ;;  %v5319_v13 = vpop.f32.mrb[29].mxu0  ;;  %v2314_v24 = vadd.f32 1.0, %v6046_v23  ;;  %v2804_v10 = vld [vmem:[#allocation2 + $0x36] sm:$0x3]  ;;  %v2805_v23 = vld [vmem:[#allocation2 + $0x46] sm:$0x3] }
 0x42a   :  { %6049 = vrcp.f32 %v2307_v9  ;;  %v2536_v17 = vpop.f32.mrb[28].mxu1 }
 0x42b   :  { %v4612_v18 = vmul.f32 -1.442695, %v2547_v12  ;;  %v5330_v19 = vpop.f32.mrb[29].mxu1  ;;  %v2537_v39 = vadd.f32 %v6569_v5, %v2536_v17 }
 0x42d   :  { %6051 = vpow2.f32 %v4612_v18 }
 0x431   :  { %v6048_v28 = vpop.eup %6047 }
 0x432   :  { %v2544_v26 = vadd.f32 1.0, %v6048_v28 }
 0x434   :  { %v6050_v42 = vpop.eup %6049  ;;  %6053 = vrcp.f32 %v2544_v26 }
 0x435   :  { %6055 = vrcp.f32 %v2314_v24  ;;  %v2317_v32 = vmul.f32 %v6050_v42, %v2300_v27 }
 0x437   :  { %v2318_v20 = vadd.f32 %v2317_v32, %v2089_v34  ;;  %v6052_v37 = vpop.eup %6051 }
 0x438   :  { %v2551_v38 = vadd.f32 1.0, %v6052_v37 }
 0x439   :  { %6057 = vtanh.f32 %v2318_v20 }
 0x43a   :  { %6059 = vrcp.f32 %v2551_v38 }
 0x43e   :  { %v6054_v31 = vpop.eup %6053 }
 0x43f   :  { %v6056_v43 = vpop.eup %6055  ;;  %v2554_v46 = vmul.f32 %v6054_v31, %v2537_v39 }
 0x440   :  { %v2320_v50 = vsub.f32 1.0, %v6056_v43  ;;  %v2322_v53 = vmul.f32 %v6056_v43, %v6707_v44 }
 0x441   :  { %v2555_v47 = vadd.f32 %v2554_v46, %v2327_v33  ;;  %v2568_v46 = vld [vmem:[#allocation2 + $0x28] sm:$0x3] }
 0x443   :  { %v6058_v51 = vpop.eup %6057  ;;  %6061 = vtanh.f32 %v2555_v47 }
 0x444   :  { %v2321_v40 = vmul.f32 %v6058_v51, %v2320_v50  ;;  %v6060_v55 = vpop.eup %6059 }
 0x445   :  { %v2557_v44 = vsub.f32 1.0, %v6060_v55  ;;  %v2559_v58 = vmul.f32 %v6060_v55, %v6733_v52 }
 0x446   :  { %v6774_v54 = vadd.f32 %v2322_v53, %v2321_v40 }
 0x448   :  { %5340 = vmatmul.mubr.msk.f32.vlgmr.msra.gmra.mrb[30].mxu0 %vm122_vm2, %v6774_v54  ;;  %5351 = vmatmul.mubr.msk.f32.vlgmr.msra.gmra.mrb[30].mxu1 %vm122_vm2, %v6774_v54  ;;  %2324 = vst.msk [vmem:[%s7054_s6 + $0x6] sm:$0x3] %vm878_vm3, %v6774_v54 }
 0x449   :  { %5849 = vmatpush3.bf16.msra.mxu0 %v6422_v29  ;;  %5855 = vmatpush3.bf16.msra.mxu1 %v6426_v30 }
 0x44a   :  { %5850 = vmatprep.subr.bf16.mxu0 %v6145_v15  ;;  %5856 = vmatprep.subr.bf16.mxu1 %v6145_v15 }
 0x44b   :  { %5361 = vmatprep.mubr.msk.f32.mxu0 %vm6146_vm1, %v6147_v25  ;;  %5372 = vmatprep.mubr.msk.f32.mxu1 %vm6146_vm1, %v6147_v25 }
 0x44d   :  { %v6062_v56 = vpop.eup %6061  ;;  %5852 = vmatpush3.bf16.msra.mxu0 %v6446_v35  ;;  %5858 = vmatpush3.bf16.msra.mxu1 %v6450_v36 }
 0x44e   :  { %5859 = vmatprep.subr.bf16.mxu0 %v6145_v15  ;;  %5865 = vmatprep.subr.bf16.mxu1 %v6145_v15  ;;  %v2558_v57 = vmul.f32 %v6062_v56, %v2557_v44  ;;  %v2806_v44 = vld [vmem:[#allocation2 + $0x56] sm:$0x3] }
 0x450   :  { %5362 = vmatmul.mubr.msk.f32.vlgmr.msra.gmra.mrb[32].mxu0 %vm122_vm2, %v6774_v54  ;;  %v6800_v59 = vadd.f32 %v2559_v58, %v2558_v57 }
 0x451   :  { %5861 = vmatpush3.bf16.msra.mxu0 %v6470_v41  ;;  %5383 = vmatprep.mubr.msk.f32.mxu0 %vm6146_vm1, %v6147_v25 }
 0x452   :  { %2562 = vrot.lane.b32.xlu1 %v6800_v59, %s6148_s12  ;;  %5373 = vmatmul.mubr.msk.f32.vlgmr.msra.gmra.mrb[32].mxu1 %vm122_vm2, %v6800_v59 }
 0x453   :  { %5867 = vmatpush3.bf16.msra.mxu1 %v6486_v45  ;;  %5862 = vmatprep.subr.bf16.mxu0 %v6145_v15 }
 0x454   :  { %5868 = vmatprep.subr.bf16.mxu1 %v6145_v15  ;;  %5394 = vmatprep.mubr.msk.f32.mxu1 %vm6146_vm1, %v6147_v25 }
 0x455   :  { %5864 = vmatpush3.bf16.msra.mxu0 %v6499_v48 }
 0x456   :  { %5871 = vmatprep.subr.bf16.mxu0 %v6145_v15 }
 0x457   :  { %5870 = vmatpush3.bf16.msra.mxu1 %v6505_v49 }
 0x458   :  { %5384 = vmatmul.mubr.msk.f32.vlgmr.msra.gmra.mrb[34].mxu0 %vm122_vm2, %v6800_v59  ;;  %5877 = vmatprep.subr.bf16.mxu1 %v6145_v15 }
 0x459   :  { %5873 = vmatpush3.bf16.msra.mxu0 %v6370_v14  ;;  %5405 = vmatprep.mubr.msk.f32.mxu0 %vm6146_vm1, %v6147_v25 }
 0x45a   :  { %5395 = vmatmul.mubr.msk.f32.vlgmr.msra.gmra.mrb[34].mxu1 %vm122_vm2, %v6800_v59  ;;  %5874 = vmatprep.subr.bf16.mxu0 %v6145_v15 }
 0x45b   :  { %5879 = vmatpush3.bf16.msra.mxu1 %v6373_v16  ;;  %5416 = vmatprep.mubr.msk.f32.mxu1 %vm6146_vm1, %v6147_v25 }
 0x45c   :  { %5880 = vmatprep.subr.bf16.mxu1 %v6145_v15 }
 0x45d   :  { %5876 = vmatpush3.bf16.msra.mxu0 %v6393_v21 }
 0x45e   :  { %5883 = vmatprep.subr.bf16.mxu0 %v6145_v15 }
 0x45f   :  { %5882 = vmatpush3.bf16.msra.mxu1 %v6397_v22 }
 0x460   :  { %5889 = vmatprep.subr.bf16.mxu1 %v6145_v15 }
 0x4c4   :  { %v2563_v52 = vpop.permute.xlu1 %2562 }
 0x4c5   :  { %2565 = vst.msk [vmem:[%s7054_s6 + $0x8] sm:$0x3] %vm1127_vm4, %v2563_v52 }
 0x51b   :  { %v2638_v62 = vpop.f32.mrb[30].mxu0  ;;  %v2708_v63 = vpop.f32.mrb[30].mxu1 }
 0x51c   :  { %v2782_v0 = vadd.f32 %v2638_v62, %v2566_v61  ;;  %v5341_v1 = vpop.f32.mrb[31].mxu0  ;;  %v5352_v2 = vpop.f32.mrb[31].mxu1  ;;  %v2789_v6 = vadd.f32 %v2708_v63, %v2567_v4 }
 0x51d   :  { %v3045_v2 = vld [vmem:[#allocation2 + $0xa] sm:$0x3] }
 0x51e   :  { %v4616_v3 = vmul.f32 -1.442695, %v2782_v0  ;;  %v4617_v7 = vmul.f32 -1.442695, %v2789_v6 }
 0x520   :  { %6063 = vpow2.f32 %v4616_v3 }
 0x521   :  { %6065 = vpow2.f32 %v4617_v7 }
 0x523   :  { %v2778_v8 = vpop.f32.mrb[32].mxu0 }
 0x524   :  { %v5363_v9 = vpop.f32.mrb[33].mxu0  ;;  %v2779_v39 = vadd.f32 %v6563_v60, %v2778_v8 }
 0x525   :  { %v2875_v11 = vpop.f32.mrb[32].mxu1 }
 0x526   :  { %v3019_v12 = vadd.f32 %v2875_v11, %v2804_v10  ;;  %v5374_v13 = vpop.f32.mrb[33].mxu1  ;;  %v3046_v10 = vld [vmem:[#allocation2 + $0x1a] sm:$0x3] }
 0x528   :  { %v4621_v17 = vmul.f32 -1.442695, %v3019_v12 }
 0x52a   :  { %v6064_v18 = vpop.eup %6063  ;;  %6067 = vpow2.f32 %v4621_v17 }
 0x52b   :  { %v2786_v19 = vadd.f32 1.0, %v6064_v18  ;;  %v2945_v28 = vpop.f32.mrb[34].mxu0  ;;  %v6066_v34 = vpop.eup %6065  ;;  %v3283_v18 = vld [vmem:[#allocation2 + $0x34] sm:$0x3] }
 0x52c   :  { %v3026_v24 = vadd.f32 %v2945_v28, %v2805_v23  ;;  %v5385_v26 = vpop.f32.mrb[35].mxu0  ;;  %v2793_v37 = vadd.f32 1.0, %v6066_v34 }
 0x52d   :  { %6069 = vrcp.f32 %v2786_v19  ;;  %v3015_v27 = vpop.f32.mrb[34].mxu1 }
 0x52e   :  { %v4622_v42 = vmul.f32 -1.442695, %v3026_v24  ;;  %v5396_v32 = vpop.f32.mrb[35].mxu1  ;;  %v3016_v51 = vadd.f32 %v6569_v5, %v3015_v27 }
 0x530   :  { %6071 = vpow2.f32 %v4622_v42  ;;  %v3284_v42 = vld [vmem:[#allocation2 + $0x44] sm:$0x3] }
 0x534   :  { %v6068_v20 = vpop.eup %6067 }
 0x535   :  { %v3023_v38 = vadd.f32 1.0, %v6068_v20 }
 0x537   :  { %v6070_v31 = vpop.eup %6069  ;;  %6073 = vrcp.f32 %v3023_v38 }
 0x538   :  { %6075 = vrcp.f32 %v2793_v37  ;;  %v2796_v43 = vmul.f32 %v6070_v31, %v2779_v39 }
 0x53a   :  { %v2797_v33 = vadd.f32 %v2796_v43, %v2568_v46  ;;  %v6072_v47 = vpop.eup %6071 }
 0x53b   :  { %v3030_v50 = vadd.f32 1.0, %v6072_v47  ;;  %v6908_v47 = vld [vmem:[%s7053_s5] ss:$0 sm:$0xff] }
 0x53c   :  { %6077 = vtanh.f32 %v2797_v33 }
 0x53d   :  { %6079 = vrcp.f32 %v3030_v50 }
 0x541   :  { %v6074_v40 = vpop.eup %6073 }
 0x542   :  { %v6076_v53 = vpop.eup %6075  ;;  %v3033_v55 = vmul.f32 %v6074_v40, %v3016_v51 }
 0x543   :  { %v2799_v57 = vsub.f32 1.0, %v6076_v53  ;;  %v2801_v52 = vmul.f32 %v6076_v53, %v6774_v54  ;;  %v3047_v53 = vld [vmem:[#allocation2 + $0x2a] sm:$0x3] }
 0x544   :  { %v3034_v56 = vadd.f32 %v3033_v55, %v2806_v44 }
 0x546   :  { %v6078_v58 = vpop.eup %6077  ;;  %6081 = vtanh.f32 %v3034_v56 }
 0x547   :  { %v2800_v60 = vmul.f32 %v6078_v58, %v2799_v57  ;;  %v6080_v5 = vpop.eup %6079  ;;  %v6914_v57 = vld [vmem:[%s7053_s5 + $0x1] ss:$0 sm:$0xff] }
 0x548   :  { %v3036_v54 = vsub.f32 1.0, %v6080_v5  ;;  %v3038_v0 = vmul.f32 %v6080_v5, %v6800_v59 }
 0x549   :  { %v6841_v61 = vadd.f32 %v2801_v52, %v2800_v60 }
 0x54b   :  { %5406 = vmatmul.mubr.msk.f32.vlgmr.msra.gmra.mrb[36].mxu0 %vm122_vm2, %v6841_v61  ;;  %5417 = vmatmul.mubr.msk.f32.vlgmr.msra.gmra.mrb[36].mxu1 %vm122_vm2, %v6841_v61  ;;  %2803 = vst.msk [vmem:[%s7054_s6 + $0x8] sm:$0x3] %vm878_vm3, %v6841_v61 }
 0x54c   :  { %5885 = vmatpush3.bf16.msra.mxu0 %v6422_v29  ;;  %5891 = vmatpush3.bf16.msra.mxu1 %v6426_v30 }
 0x54d   :  { %5886 = vmatprep.subr.bf16.mxu0 %v6145_v15  ;;  %5892 = vmatprep.subr.bf16.mxu1 %v6145_v15 }
 0x54e   :  { %5427 = vmatprep.mubr.msk.f32.mxu0 %vm6146_vm1, %v6147_v25  ;;  %5438 = vmatprep.mubr.msk.f32.mxu1 %vm6146_vm1, %v6147_v25 }
 0x550   :  { %v6082_v62 = vpop.eup %6081  ;;  %5888 = vmatpush3.bf16.msra.mxu0 %v6446_v35  ;;  %5894 = vmatpush3.bf16.msra.mxu1 %v6450_v36 }
 0x551   :  { %5895 = vmatprep.subr.bf16.mxu0 %v6145_v15  ;;  %5901 = vmatprep.subr.bf16.mxu1 %v6145_v15  ;;  %v3037_v63 = vmul.f32 %v6082_v62, %v3036_v54  ;;  %v3285_v54 = vld [vmem:[#allocation2 + $0x54] sm:$0x3] }
 0x553   :  { %5428 = vmatmul.mubr.msk.f32.vlgmr.msra.gmra.mrb[38].mxu0 %vm122_vm2, %v6841_v61  ;;  %v6867_v1 = vadd.f32 %v3038_v0, %v3037_v63 }
 0x554   :  { %5897 = vmatpush3.bf16.msra.mxu0 %v6470_v41  ;;  %5449 = vmatprep.mubr.msk.f32.mxu0 %vm6146_vm1, %v6147_v25 }
 0x555   :  { %3041 = vrot.lane.b32.xlu0 %v6867_v1, %s6148_s12  ;;  %5439 = vmatmul.mubr.msk.f32.vlgmr.msra.gmra.mrb[38].mxu1 %vm122_vm2, %v6867_v1 }
 0x556   :  { %5903 = vmatpush3.bf16.msra.mxu1 %v6486_v45  ;;  %5898 = vmatprep.subr.bf16.mxu0 %v6145_v15 }
 0x557   :  { %5904 = vmatprep.subr.bf16.mxu1 %v6145_v15  ;;  %5460 = vmatprep.mubr.msk.f32.mxu1 %vm6146_vm1, %v6147_v25 }
 0x558   :  { %5900 = vmatpush3.bf16.msra.mxu0 %v6499_v48 }
 0x559   :  { %5907 = vmatprep.subr.bf16.mxu0 %v6145_v15 }
 0x55a   :  { %5906 = vmatpush3.bf16.msra.mxu1 %v6505_v49 }
 0x55b   :  { %5450 = vmatmul.mubr.msk.f32.vlgmr.msra.gmra.mrb[40].mxu0 %vm122_vm2, %v6867_v1  ;;  %5913 = vmatprep.subr.bf16.mxu1 %v6145_v15 }
 0x55c   :  { %5909 = vmatpush3.bf16.msra.mxu0 %v6370_v14  ;;  %5471 = vmatprep.mubr.msk.f32.mxu0 %vm6146_vm1, %v6147_v25 }
 0x55d   :  { %5461 = vmatmul.mubr.msk.f32.vlgmr.msra.gmra.mrb[40].mxu1 %vm122_vm2, %v6867_v1  ;;  %5910 = vmatprep.subr.bf16.mxu0 %v6145_v15 }
 0x55e   :  { %5915 = vmatpush3.bf16.msra.mxu1 %v6373_v16  ;;  %5482 = vmatprep.mubr.msk.f32.mxu1 %vm6146_vm1, %v6147_v25 }
 0x55f   :  { %5916 = vmatprep.subr.bf16.mxu1 %v6145_v15 }
 0x560   :  { %5912 = vmatpush3.bf16.msra.mxu0 %v6393_v21 }
 0x561   :  { %5919 = vmatprep.subr.bf16.mxu0 %v6145_v15 }
 0x562   :  { %5918 = vmatpush3.bf16.msra.mxu1 %v6397_v22 }
 0x563   :  { %5925 = vmatprep.subr.bf16.mxu1 %v6145_v15 }
 0x5c7   :  { %v3042_v59 = vpop.permute.xlu0 %3041 }
 0x5c8   :  { %3044 = vst.msk [vmem:[%s7054_s6 + $0x6] sm:$0x3] %vm1127_vm4, %v3042_v59 }
 0x61e   :  { %v3117_v3 = vpop.f32.mrb[36].mxu0  ;;  %v3187_v4 = vpop.f32.mrb[36].mxu1 }
 0x61f   :  { %v3261_v6 = vadd.f32 %v3117_v3, %v3045_v2  ;;  %v5407_v7 = vpop.f32.mrb[37].mxu0  ;;  %v5418_v8 = vpop.f32.mrb[37].mxu1  ;;  %v3268_v11 = vadd.f32 %v3187_v4, %v3046_v10 }
 0x621   :  { %v4626_v9 = vmul.f32 -1.442695, %v3261_v6  ;;  %v4627_v12 = vmul.f32 -1.442695, %v3268_v11 }
 0x623   :  { %6083 = vpow2.f32 %v4626_v9 }
 0x624   :  { %6085 = vpow2.f32 %v4627_v12 }
 0x626   :  { %v3257_v13 = vpop.f32.mrb[38].mxu0 }
 0x627   :  { %v5429_v17 = vpop.f32.mrb[39].mxu0  ;;  %v3258_v50 = vadd.f32 %v6908_v47, %v3257_v13 }
 0x628   :  { %v3354_v19 = vpop.f32.mrb[38].mxu1 }
 0x629   :  { %v3498_v23 = vadd.f32 %v3354_v19, %v3283_v18  ;;  %v5440_v28 = vpop.f32.mrb[39].mxu1 }
 0x62a   :  { %v3762_v28 = vld [vmem:[#allocation2 + $0x32] sm:$0x3] }
 0x62b   :  { %v4631_v24 = vmul.f32 -1.442695, %v3498_v23 }
 0x62d   :  { %v6084_v26 = vpop.eup %6083  ;;  %6087 = vpow2.f32 %v4631_v24 }
 0x62e   :  { %v3265_v27 = vadd.f32 1.0, %v6084_v26  ;;  %v3424_v32 = vpop.f32.mrb[40].mxu0  ;;  %v6086_v31 = vpop.eup %6085 }
 0x62f   :  { %v3505_v34 = vadd.f32 %v3424_v32, %v3284_v42  ;;  %v5451_v20 = vpop.f32.mrb[41].mxu0  ;;  %v3272_v46 = vadd.f32 1.0, %v6086_v31 }
 0x630   :  { %6089 = vrcp.f32 %v3265_v27  ;;  %v3494_v37 = vpop.f32.mrb[40].mxu1  ;;  %v3763_v20 = vld [vmem:[#allocation2 + $0x42] sm:$0x3] }
 0x631   :  { %v4632_v38 = vmul.f32 -1.442695, %v3505_v34  ;;  %v5462_v39 = vpop.f32.mrb[41].mxu1  ;;  %v3495_v58 = vadd.f32 %v6914_v57, %v3494_v37 }
 0x633   :  { %6091 = vpow2.f32 %v4632_v38 }
 0x637   :  { %v6088_v43 = vpop.eup %6087 }
 0x638   :  { %v3502_v33 = vadd.f32 1.0, %v6088_v43 }
 0x63a   :  { %v6090_v51 = vpop.eup %6089  ;;  %6093 = vrcp.f32 %v3502_v33 }
 0x63b   :  { %6095 = vrcp.f32 %v3272_v46  ;;  %v3275_v40 = vmul.f32 %v6090_v51, %v3258_v50 }
 0x63d   :  { %v3276_v55 = vadd.f32 %v3275_v40, %v3047_v53  ;;  %v6092_v44 = vpop.eup %6091 }
 0x63e   :  { %v3509_v56 = vadd.f32 1.0, %v6092_v44 }
 0x63f   :  { %6097 = vtanh.f32 %v3276_v55 }
 0x640   :  { %6099 = vrcp.f32 %v3509_v56  ;;  %v3526_v56 = vld [vmem:[#allocation2 + $0x2c] sm:$0x3] }
 0x644   :  { %v6094_v60 = vpop.eup %6093 }
 0x645   :  { %v6096_v52 = vpop.eup %6095  ;;  %v3512_v5 = vmul.f32 %v6094_v60, %v3495_v58 }
 0x646   :  { %v3278_v63 = vsub.f32 1.0, %v6096_v52  ;;  %v3280_v2 = vmul.f32 %v6096_v52, %v6841_v61 }
 0x647   :  { %v3513_v62 = vadd.f32 %v3512_v5, %v3285_v54 }
 0x649   :  { %v6098_v0 = vpop.eup %6097  ;;  %6101 = vtanh.f32 %v3513_v62 }
 0x64a   :  { %v3279_v59 = vmul.f32 %v6098_v0, %v3278_v63  ;;  %v6100_v4 = vpop.eup %6099  ;;  %v3764_v0 = vld [vmem:[#allocation2 + $0x52] sm:$0x3] }
 0x64b   :  { %v3515_v61 = vsub.f32 1.0, %v6100_v4  ;;  %v3517_v8 = vmul.f32 %v6100_v4, %v6867_v1 }
 0x64c   :  { %v6918_v3 = vadd.f32 %v3280_v2, %v3279_v59 }
 0x64e   :  { %3282 = vst.msk [vmem:[%s7054_s6 + $0xa] sm:$0x3] %vm878_vm3, %v6918_v3  ;;  %5472 = vmatmul.mubr.msk.f32.vlgmr.msra.gmra.mrb[42].mxu0 %vm122_vm2, %v6918_v3  ;;  %5483 = vmatmul.mubr.msk.f32.vlgmr.msra.gmra.mrb[42].mxu1 %vm122_vm2, %v6918_v3 }
 0x64f   :  { %5921 = vmatpush3.bf16.msra.mxu0 %v6422_v29  ;;  %5927 = vmatpush3.bf16.msra.mxu1 %v6426_v30 }
 0x650   :  { %5922 = vmatprep.subr.bf16.mxu0 %v6145_v15  ;;  %5928 = vmatprep.subr.bf16.mxu1 %v6145_v15 }
 0x651   :  { %5493 = vmatprep.mubr.msk.f32.mxu0 %vm6146_vm1, %v6147_v25  ;;  %5504 = vmatprep.mubr.msk.f32.mxu1 %vm6146_vm1, %v6147_v25 }
 0x653   :  { %v6102_v6 = vpop.eup %6101  ;;  %5924 = vmatpush3.bf16.msra.mxu0 %v6446_v35  ;;  %5930 = vmatpush3.bf16.msra.mxu1 %v6450_v36 }
 0x654   :  { %5931 = vmatprep.subr.bf16.mxu0 %v6145_v15  ;;  %5937 = vmatprep.subr.bf16.mxu1 %v6145_v15  ;;  %v3516_v7 = vmul.f32 %v6102_v6, %v3515_v61 }
 0x656   :  { %5494 = vmatmul.mubr.msk.f32.vlgmr.msra.gmra.mrb[44].mxu0 %vm122_vm2, %v6918_v3  ;;  %v6944_v9 = vadd.f32 %v3517_v8, %v3516_v7 }
 0x657   :  { %5933 = vmatpush3.bf16.msra.mxu0 %v6470_v41  ;;  %5515 = vmatprep.mubr.msk.f32.mxu0 %vm6146_vm1, %v6147_v25 }
 0x658   :  { %3520 = vrot.lane.b32.xlu1 %v6944_v9, %s6148_s12  ;;  %5505 = vmatmul.mubr.msk.f32.vlgmr.msra.gmra.mrb[44].mxu1 %vm122_vm2, %v6944_v9 }
 0x659   :  { %5939 = vmatpush3.bf16.msra.mxu1 %v6486_v45  ;;  %5934 = vmatprep.subr.bf16.mxu0 %v6145_v15 }
 0x65a   :  { %5940 = vmatprep.subr.bf16.mxu1 %v6145_v15  ;;  %5526 = vmatprep.mubr.msk.f32.mxu1 %vm6146_vm1, %v6147_v25 }
 0x65b   :  { %5936 = vmatpush3.bf16.msra.mxu0 %v6499_v48 }
 0x65c   :  { %5943 = vmatprep.subr.bf16.mxu0 %v6145_v15 }
 0x65d   :  { %5942 = vmatpush3.bf16.msra.mxu1 %v6505_v49 }
 0x65e   :  { %5516 = vmatmul.mubr.msk.f32.vlgmr.msra.gmra.mrb[46].mxu0 %vm122_vm2, %v6944_v9  ;;  %5949 = vmatprep.subr.bf16.mxu1 %v6145_v15 }
 0x65f   :  { %5945 = vmatpush3.bf16.msra.mxu0 %v6370_v14  ;;  %5537 = vmatprep.mubr.msk.f32.mxu0 %vm6146_vm1, %v6147_v25 }
 0x660   :  { %5527 = vmatmul.mubr.msk.f32.vlgmr.msra.gmra.mrb[46].mxu1 %vm122_vm2, %v6944_v9  ;;  %5946 = vmatprep.subr.bf16.mxu0 %v6145_v15 }
 0x661   :  { %5951 = vmatpush3.bf16.msra.mxu1 %v6373_v16  ;;  %5548 = vmatprep.mubr.msk.f32.mxu1 %vm6146_vm1, %v6147_v25  ;;  %v3524_v16 = vld [vmem:[#allocation2 + $0xc] sm:$0x3] }
 0x662   :  { %5952 = vmatprep.subr.bf16.mxu1 %v6145_v15 }
 0x663   :  { %5948 = vmatpush3.bf16.msra.mxu0 %v6393_v21  ;;  %v3525_v21 = vld [vmem:[#allocation2 + $0x1c] sm:$0x3] }
 0x664   :  { %5955 = vmatprep.subr.bf16.mxu0 %v6145_v15 }
 0x665   :  { %5954 = vmatpush3.bf16.msra.mxu1 %v6397_v22 }
 0x666   :  { %5961 = vmatprep.subr.bf16.mxu1 %v6145_v15 }
 0x6ca   :  { %v3521_v14 = vpop.permute.xlu1 %3520 }
 0x6cb   :  { %3523 = vst.msk [vmem:[%s7054_s6 + $0x4] sm:$0x3] %vm1127_vm4, %v3521_v14 }
 0x721   :  { %v3596_v1 = vpop.f32.mrb[42].mxu0  ;;  %v3666_v10 = vpop.f32.mrb[42].mxu1 }
 0x722   :  { %v3740_v11 = vadd.f32 %v3596_v1, %v3524_v16  ;;  %v5473_v12 = vpop.f32.mrb[43].mxu0  ;;  %v5484_v13 = vpop.f32.mrb[43].mxu1  ;;  %v3747_v18 = vadd.f32 %v3666_v10, %v3525_v21 }
 0x723   :  { %v4241_v13 = vld [vmem:[#allocation2 + $0x30] sm:$0x3] }
 0x724   :  { %v4636_v17 = vmul.f32 -1.442695, %v3740_v11  ;;  %v4637_v19 = vmul.f32 -1.442695, %v3747_v18 }
 0x726   :  { %6103 = vpow2.f32 %v4636_v17 }
 0x727   :  { %6105 = vpow2.f32 %v4637_v19 }
 0x729   :  { %v3736_v22 = vpop.f32.mrb[44].mxu0 }
 0x72a   :  { %v5495_v23 = vpop.f32.mrb[45].mxu0  ;;  %v3737_v53 = vadd.f32 %v6908_v47, %v3736_v22 }
 0x72b   :  { %v3833_v24 = vpop.f32.mrb[44].mxu1 }
 0x72c   :  { %v3977_v26 = vadd.f32 %v3833_v24, %v3762_v28  ;;  %v5506_v27 = vpop.f32.mrb[45].mxu1  ;;  %v4242_v28 = vld [vmem:[#allocation2 + $0x40] sm:$0x3] }
 0x72e   :  { %v4641_v42 = vmul.f32 -1.442695, %v3977_v26 }
 0x730   :  { %v6104_v32 = vpop.eup %6103  ;;  %6107 = vpow2.f32 %v4641_v42 }
 0x731   :  { %v3744_v34 = vadd.f32 1.0, %v6104_v32  ;;  %v3903_v37 = vpop.f32.mrb[46].mxu0  ;;  %v6106_v33 = vpop.eup %6105 }
 0x732   :  { %v3984_v38 = vadd.f32 %v3903_v37, %v3763_v20  ;;  %v5517_v39 = vpop.f32.mrb[47].mxu0  ;;  %v3751_v51 = vadd.f32 1.0, %v6106_v33  ;;  %v4005_v33 = vld [vmem:[#allocation2 + $0x2e] sm:$0x3] }
 0x733   :  { %6109 = vrcp.f32 %v3744_v34  ;;  %v3973_v31 = vpop.f32.mrb[46].mxu1 }
 0x734   :  { %v4642_v43 = vmul.f32 -1.442695, %v3984_v38  ;;  %v5528_v46 = vpop.f32.mrb[47].mxu1  ;;  %v3974_v5 = vadd.f32 %v6914_v57, %v3973_v31 }
 0x736   :  { %6111 = vpow2.f32 %v4642_v43 }
 0x73a   :  { %v6108_v50 = vpop.eup %6107 }
 0x73b   :  { %v3981_v40 = vadd.f32 1.0, %v6108_v50 }
 0x73d   :  { %v6110_v55 = vpop.eup %6109  ;;  %6113 = vrcp.f32 %v3981_v40 }
 0x73e   :  { %6115 = vrcp.f32 %v3751_v51  ;;  %v3754_v44 = vmul.f32 %v6110_v55, %v3737_v53 }
 0x740   :  { %v3755_v58 = vadd.f32 %v3754_v44, %v3526_v56  ;;  %v6112_v60 = vpop.eup %6111 }
 0x741   :  { %v3988_v52 = vadd.f32 1.0, %v6112_v60 }
 0x742   :  { %6117 = vtanh.f32 %v3755_v58  ;;  %v4243_v58 = vld [vmem:[#allocation2 + $0x50] sm:$0x3] }
 0x743   :  { %6119 = vrcp.f32 %v3988_v52 }
 0x747   :  { %v6114_v54 = vpop.eup %6113 }
 0x748   :  { %v6116_v62 = vpop.eup %6115  ;;  %v3991_v63 = vmul.f32 %v6114_v54, %v3974_v5 }
 0x749   :  { %v3757_v2 = vsub.f32 1.0, %v6116_v62  ;;  %v3759_v6 = vmul.f32 %v6116_v62, %v6918_v3 }
 0x74a   :  { %v3992_v59 = vadd.f32 %v3991_v63, %v3764_v0 }
 0x74c   :  { %v6118_v4 = vpop.eup %6117  ;;  %6121 = vtanh.f32 %v3992_v59 }
 0x74d   :  { %v3758_v61 = vmul.f32 %v6118_v4, %v3757_v2  ;;  %v6120_v8 = vpop.eup %6119 }
 0x74e   :  { %v3994_v3 = vsub.f32 1.0, %v6120_v8 }
 0x74f   :  { %v6985_v7 = vadd.f32 %v3759_v6, %v3758_v61 }
 0x751   :  { %3761 = vst.msk [vmem:[%s7054_s6 + $0xc] sm:$0x3] %vm878_vm3, %v6985_v7  ;;  %5538 = vmatmul.mubr.msk.f32.vlgmr.msra.gmra.mrb[48].mxu0 %vm122_vm2, %v6985_v7  ;;  %5549 = vmatmul.mubr.msk.f32.vlgmr.msra.gmra.mrb[48].mxu1 %vm122_vm2, %v6985_v7 }
 0x752   :  { %5957 = vmatpush3.bf16.msra.mxu0 %v6422_v29  ;;  %5963 = vmatpush3.bf16.msra.mxu1 %v6426_v30  ;;  %v3996_v30 = vmul.f32 %v6120_v8, %v6944_v9 }
 0x753   :  { %5958 = vmatprep.subr.bf16.mxu0 %v6145_v15  ;;  %5964 = vmatprep.subr.bf16.mxu1 %v6145_v15 }
 0x754   :  { %5559 = vmatprep.mubr.msk.f32.mxu0 %vm6146_vm1, %v6147_v25  ;;  %5570 = vmatprep.mubr.msk.f32.mxu1 %vm6146_vm1, %v6147_v25 }
 0x756   :  { %v6122_v14 = vpop.eup %6121  ;;  %5960 = vmatpush3.bf16.msra.mxu0 %v6446_v35  ;;  %5966 = vmatpush3.bf16.msra.mxu1 %v6450_v36 }
 0x757   :  { %5967 = vmatprep.subr.bf16.mxu0 %v6145_v15  ;;  %5973 = vmatprep.subr.bf16.mxu1 %v6145_v15  ;;  %v3995_v29 = vmul.f32 %v6122_v14, %v3994_v3 }
 0x759   :  { %5560 = vmatmul.mubr.msk.f32.vlgmr.msra.gmra.mrb[50].mxu0 %vm122_vm2, %v6985_v7  ;;  %v7011_v16 = vadd.f32 %v3996_v30, %v3995_v29 }
 0x75a   :  { %5969 = vmatpush3.bf16.msra.mxu0 %v6470_v41  ;;  %5581 = vmatprep.mubr.msk.f32.mxu0 %vm6146_vm1, %v6147_v25 }
 0x75b   :  { %3999 = vrot.lane.b32.xlu0 %v7011_v16, %s6148_s12  ;;  %5571 = vmatmul.mubr.msk.f32.vlgmr.msra.gmra.mrb[50].mxu1 %vm122_vm2, %v7011_v16 }
 0x75c   :  { %5975 = vmatpush3.bf16.msra.mxu1 %v6486_v45  ;;  %5970 = vmatprep.subr.bf16.mxu0 %v6145_v15 }
 0x75d   :  { %5976 = vmatprep.subr.bf16.mxu1 %v6145_v15  ;;  %5592 = vmatprep.mubr.msk.f32.mxu1 %vm6146_vm1, %v6147_v25  ;;  %v4003_v15 = vld [vmem:[#allocation2 + $0xe] sm:$0x3] }
 0x75e   :  { %5972 = vmatpush3.bf16.msra.mxu0 %v6499_v48 }
 0x760   :  { %5978 = vmatpush3.bf16.msra.mxu1 %v6505_v49  ;;  %v4004_v49 = vld [vmem:[#allocation2 + $0x1e] sm:$0x3] }
 0x761   :  { %5582 = vmatmul.mubr.msk.f32.vlgmr.msra.gmra.mrb[52].mxu0 %vm122_vm2, %v7011_v16 }
 0x763   :  { %5593 = vmatmul.mubr.msk.f32.vlgmr.msra.gmra.mrb[52].mxu1 %vm122_vm2, %v7011_v16 }
 0x7cd   :  { %v4000_v35 = vpop.permute.xlu0 %3999 }
 0x7ce   :  { %4002 = vst.msk [vmem:[%s7054_s6 + $0x2] sm:$0x3] %vm1127_vm4, %v4000_v35 }
 0x824   :  { %v4075_v36 = vpop.f32.mrb[48].mxu0  ;;  %v4145_v41 = vpop.f32.mrb[48].mxu1 }
 0x825   :  { %v4219_v25 = vadd.f32 %v4075_v36, %v4003_v15  ;;  %v5539_v45 = vpop.f32.mrb[49].mxu0  ;;  %v5550_v48 = vpop.f32.mrb[49].mxu1  ;;  %v4226_v1 = vadd.f32 %v4145_v41, %v4004_v49 }
 0x827   :  { %v4646_v9 = vmul.f32 -1.442695, %v4219_v25  ;;  %v4647_v10 = vmul.f32 -1.442695, %v4226_v1 }
 0x829   :  { %6123 = vpow2.f32 %v4646_v9 }
 0x82a   :  { %6125 = vpow2.f32 %v4647_v10 }
 0x82c   :  { %v4215_v11 = vpop.f32.mrb[50].mxu0 }
 0x82d   :  { %v5561_v12 = vpop.f32.mrb[51].mxu0  ;;  %v4216_v31 = vadd.f32 %v6908_v47, %v4215_v11 }
 0x82e   :  { %v4312_v17 = vpop.f32.mrb[50].mxu1 }
 0x82f   :  { %v4456_v21 = vadd.f32 %v4312_v17, %v4241_v13  ;;  %v5572_v18 = vpop.f32.mrb[51].mxu1 }
 0x831   :  { %v4651_v19 = vmul.f32 -1.442695, %v4456_v21 }
 0x833   :  { %v6124_v22 = vpop.eup %6123  ;;  %6127 = vpow2.f32 %v4651_v19 }
 0x834   :  { %v4223_v23 = vadd.f32 1.0, %v6124_v22  ;;  %v4382_v24 = vpop.f32.mrb[52].mxu0  ;;  %v6126_v20 = vpop.eup %6125 }
 0x835   :  { %v4463_v26 = vadd.f32 %v4382_v24, %v4242_v28  ;;  %v5583_v27 = vpop.f32.mrb[53].mxu0  ;;  %v4230_v38 = vadd.f32 1.0, %v6126_v20 }
 0x836   :  { %6129 = vrcp.f32 %v4223_v23  ;;  %v4452_v42 = vpop.f32.mrb[52].mxu1 }
 0x837   :  { %v4652_v32 = vmul.f32 -1.442695, %v4463_v26  ;;  %v5594_v34 = vpop.f32.mrb[53].mxu1  ;;  %v4453_v53 = vadd.f32 %v6914_v57, %v4452_v42 }
 0x839   :  { %6131 = vpow2.f32 %v4652_v32 }
 0x83d   :  { %v6128_v37 = vpop.eup %6127 }
 0x83e   :  { %v4460_v39 = vadd.f32 1.0, %v6128_v37 }
 0x840   :  { %v6130_v43 = vpop.eup %6129  ;;  %6133 = vrcp.f32 %v4460_v39 }
 0x841   :  { %6135 = vrcp.f32 %v4230_v38  ;;  %v4233_v46 = vmul.f32 %v6130_v43, %v4216_v31 }
 0x843   :  { %v4234_v50 = vadd.f32 %v4233_v46, %v4005_v33  ;;  %v6132_v51 = vpop.eup %6131 }
 0x844   :  { %v4467_v40 = vadd.f32 1.0, %v6132_v51 }
 0x845   :  { %6137 = vtanh.f32 %v4234_v50 }
 0x846   :  { %6139 = vrcp.f32 %v4467_v40 }
 0x84a   :  { %v6134_v55 = vpop.eup %6133 }
 0x84b   :  { %v6136_v44 = vpop.eup %6135  ;;  %v4470_v56 = vmul.f32 %v6134_v55, %v4453_v53 }
 0x84c   :  { %v4236_v52 = vsub.f32 1.0, %v6136_v44  ;;  %v4238_v47 = vmul.f32 %v6136_v44, %v6985_v7 }
 0x84d   :  { %v4471_v60 = vadd.f32 %v4470_v56, %v4243_v58 }
 0x84f   :  { %v6138_v5 = vpop.eup %6137  ;;  %6141 = vtanh.f32 %v4471_v60 }
 0x850   :  { %v4237_v54 = vmul.f32 %v6138_v5, %v4236_v52  ;;  %v6140_v63 = vpop.eup %6139 }
 0x851   :  { %v4473_v57 = vsub.f32 1.0, %v6140_v63  ;;  %v4475_v2 = vmul.f32 %v6140_v63, %v7011_v16 }
 0x852   :  { %v4239_v62 = vadd.f32 %v4238_v47, %v4237_v54 }
 0x854   :  { %4240 = vst.msk [vmem:[%s7054_s6 + $0xe] sm:$0x3] %vm878_vm3, %v4239_v62 }
 0x859   :  { %v6142_v0 = vpop.eup %6141 }
 0x85a   :  { %v4474_v59 = vmul.f32 %v6142_v0, %v4473_v57 }
 0x85c   :  { %v4476_v4 = vadd.f32 %v4475_v2, %v4474_v59 }
 0x85e   :  { %4478 = vrot.lane.b32.xlu1 %v4476_v4, %s6148_s12 }
 0x8d0   :  { %v4479_v61 = vpop.permute.xlu1 %4478 }
 0x8d1   :  { %4481 = vst.msk [vmem:[%s7054_s6] sm:$0x3] %vm1127_vm4, %v4479_v61 }

// kernel: rnn_gru_forward.2
= control target key start
LH: loop header
LB: loop body
LE: loop exit
PB: predicated region body
PF: predicated region fallthrough
CT: control target
= control target key end

     0   :  { %11 = vsyncpa [#allocation4], 0  ;;  %s6650_s0 = inlined_call_operand.vmem [shape: f32[16,16], index: 0, kind: input, shape index: {}]   ;;  %s6651_s1 = inlined_call_operand.vmem [shape: f32[2,2,32], index: 1, kind: input, shape index: {}]   ;;  %s6652_s2 = inlined_call_operand.hbm [shape: f32[2,3,16,32], index: 2, kind: input, shape index: {}]   ;;  %s6653_s3 = inlined_call_operand.hbm [shape: f32[2,3,32,32], index: 3, kind: input, shape index: {}]   ;;  %s6654_s4 = inlined_call_operand.vmem [shape: f32[2,3,1,32], index: 4, kind: input, shape index: {}]   ;;  %s6655_s5 = inlined_call_operand.vmem [shape: f32[2,1,32], index: 5, kind: input, shape index: {}]   ;;  %s6656_s6 = inlined_call_operand.vmem [shape: f32[16,64], index: 6, kind: output, shape index: {}]  }
   0x1   :  { %12 = vsyncpa [#allocation6], 0  ;;  %s5951_s21 = smov [#allocation3]   ;;  %s5903_s25 = scalar_lea.hbm %s6652_s2, 1536 }
   0x2   :  { %s22_s22 = sshll.u32 %s5951_s21, 4  ;;  %p5904_p0 = scmp.ne.s32.totalorder %s6652_s2, %s5903_s25  ;;  %s23_s22 = int_to_ptr.vmem [resolvable:$true] %s22_s22 }
   0x3   :  { %p5907_p1 = scmp.lt.u32.totalorder %s5903_s25, %s6652_s2 }
   0x5   :  { %p5909_p2 = pnand %p5907_p1, %p5904_p0 }
   0x7   :  { %5912 = shalt.err (!%p5909_p2)
}
   0x8   :  { %s5913_s30 = scalar_lea.vmem %s23_s22, 1536  ;;  %p5918_p4 = scmp.lt.s32.totalorder %s23_s22, %s23_s22 }
   0x9   :  { %p5914_p3 = scmp.ne.s32.totalorder %s23_s22, %s5913_s30  ;;  %p5919_p5 = scmp.lt.s32.totalorder %s5913_s30, %s5913_s30 }
   0xb   :  { %p5920_p6 = por %p5919_p5, %p5918_p4 }
   0xd   :  { %p5921_p7 = pnand %p5920_p6, %p5914_p3 }
   0xf   :  { %5924 = shalt.err (!%p5921_p7)
}
  0x10   :  { %s5952_s7 = smov 128   ;;  %s5953_s8 = smov 8  }
  0x11   :  { %28 = dma.hbm_to_vmem [thread:$0]  %s6652_s2, 1536, %s23_s22, [#allocation4], %s5952_s7, %s5952_s7, %s5953_s8  }
  0x12   :  { %s5954_s11 = smov [#allocation5]   ;;  %s5925_s15 = scalar_lea.hbm %s6653_s3, 3072 }
  0x13   :  { %s34_s12 = sshll.u32 %s5954_s11, 4  ;;  %p5926_p8 = scmp.ne.s32.totalorder %s6653_s3, %s5925_s15  ;;  %s35_s12 = int_to_ptr.vmem [resolvable:$true] %s34_s12 }
  0x14   :  { %p5929_p9 = scmp.lt.u32.totalorder %s5925_s15, %s6653_s3 }
  0x16   :  { %p5931_p10 = pnand %p5929_p9, %p5926_p8 }
  0x18   :  { %5934 = shalt.err (!%p5931_p10)
}
  0x19   :  { %s5935_s20 = scalar_lea.vmem %s35_s12, 3072  ;;  %p5940_p12 = scmp.lt.s32.totalorder %s35_s12, %s35_s12 }
  0x1a   :  { %p5936_p11 = scmp.ne.s32.totalorder %s35_s12, %s5935_s20  ;;  %p5941_p13 = scmp.lt.s32.totalorder %s5935_s20, %s5935_s20 }
  0x1c   :  { %p5942_p0 = por %p5941_p13, %p5940_p12 }
  0x1e   :  { %p5943_p1 = pnand %p5942_p0, %p5936_p11 }
  0x20   :  { %5946 = shalt.err (!%p5943_p1)
}
  0x21   :  { %40 = dma.hbm_to_vmem [thread:$0]  %s6653_s3, 3072, %s35_s12, [#allocation6], %s5952_s7, %s5952_s7, %s5953_s8  }
  0x22   :  { %5947 = dma.done.wait [#allocation4], 1536  }
  0x23   :  { %5948 = vsyncadd [#allocation4], 4294965760 }
  0x24   :  { %5949 = dma.done.wait [#allocation6], 3072  }
  0x25   :  { %5950 = vsyncadd [#allocation6], 4294964224  ;;  %vm62_vm0 = vcmask 130048   ;;  %v53_v0 = vld [vmem:[#allocation3] sm:$0xff]  ;;  %v54_v1 = vld [vmem:[#allocation3 + $0x8] sm:$0xff]  ;;  %v5955_v28 = vmov 0.0|0.0  }
  0x26   :  { %v148_v2 = vld [vmem:[#allocation3 + $0x10] sm:$0xff]  ;;  %v5421_v3 = vpack.c.bf16 %v54_v1, %v53_v0  ;;  %v149_v4 = vld [vmem:[#allocation3 + $0x18] sm:$0xff]  ;;  %v51_v5 = vld [vmem:[%s6650_s0] sm:$0xff]  ;;  %vm5956_vm1 = vmmov 0   ;;  %v5957_v35 = vmov 0.0   ;;  %vm144_vm2 = vcmask 261120  }
  0x27   :  { %v5425_v6 = vpack.c.bf16 %v149_v4, %v148_v2  ;;  %4862 = vmatprep.mubr.msk.f32.mxu1 %vm62_vm0, %v51_v5  ;;  %4855 = vmatprep.mubr.msk.f32.mxu0 %vm62_vm0, %v51_v5  ;;  %v237_v7 = vld [vmem:[#allocation3 + $0x20] sm:$0xff]  ;;  %v238_v8 = vld [vmem:[#allocation3 + $0x28] sm:$0xff]  ;;  %v326_v9 = vld [vmem:[#allocation3 + $0x30] sm:$0xff]  ;;  %vm870_vm3 = vcmask 254976   ;;  %s5958_s20 = smov 32   ;;  %vm1119_vm4 = vcmask 517376  }
  0x28   :  { %5422 = vmatprep.subr.bf16.mxu0 %v5421_v3  ;;  %v5429_v10 = vpack.c.bf16 %v238_v8, %v237_v7  ;;  %v327_v11 = vld [vmem:[#allocation3 + $0x38] sm:$0xff]  ;;  %v415_v12 = vld [vmem:[#allocation3 + $0x40] sm:$0xff]  ;;  %v416_v13 = vld [vmem:[#allocation3 + $0x48] sm:$0xff] }
  0x29   :  { %5426 = vmatprep.subr.bf16.mxu1 %v5425_v6  ;;  %5424 = vmatpush3.bf16.msra.mxu0 %v5421_v3  ;;  %v52_v14 = vld [vmem:[%s6650_s0 + $0x8] sm:$0xff]  ;;  %v5433_v15 = vpack.c.bf16 %v327_v11, %v326_v9  ;;  %v504_v16 = vld [vmem:[#allocation3 + $0x50] sm:$0xff]  ;;  %v505_v17 = vld [vmem:[#allocation3 + $0x58] sm:$0xff]  ;;  %v5437_v18 = vpack.c.bf16 %v416_v13, %v415_v12 }
  0x2a   :  { %5428 = vmatpush3.bf16.msra.mxu1 %v5425_v6  ;;  %5430 = vmatprep.subr.bf16.mxu0 %v5429_v10  ;;  %v5441_v19 = vpack.c.bf16 %v505_v17, %v504_v16  ;;  %v592_v20 = vld [vmem:[#allocation5] sm:$0xff]  ;;  %v593_v21 = vld [vmem:[#allocation5 + $0x8] sm:$0xff]  ;;  %v594_v26 = vld [vmem:[#allocation5 + $0x10] sm:$0xff] }
  0x2b   :  { %5434 = vmatprep.subr.bf16.mxu1 %v5433_v15  ;;  %v597_v22 = vld [vmem:[#allocation5 + $0x20] sm:$0xff]  ;;  %v598_v23 = vld [vmem:[#allocation5 + $0x28] sm:$0xff]  ;;  %v6032_v24 = vpack.c.bf16 %v593_v21, %v592_v20  ;;  %v595_v27 = vld [vmem:[#allocation5 + $0x18] sm:$0xff] }
  0x2c   :  { %4856 = vmatmul.mubr.msk.f32.vlgmr.msra.gmra.mrb[0].mxu0 %vm62_vm0, %v52_v14  ;;  %v6035_v25 = vpack.c.bf16 %v598_v23, %v597_v22  ;;  %v599_v29 = vld [vmem:[#allocation5 + $0x30] sm:$0xff]  ;;  %v600_v30 = vld [vmem:[#allocation5 + $0x38] sm:$0xff]  ;;  %v6043_v31 = vpack.c.bf16 %v595_v27, %v594_v26  ;;  %v602_v33 = vld [vmem:[#allocation5 + $0x40] sm:$0xff] }
  0x2d   :  { %4863 = vmatmul.mubr.msk.f32.vlgmr.msra.gmra.mrb[0].mxu1 %vm62_vm0, %v52_v14  ;;  %5432 = vmatpush3.bf16.msra.mxu0 %v5429_v10  ;;  %v6047_v32 = vpack.c.bf16 %v600_v30, %v599_v29  ;;  %v603_v34 = vld [vmem:[#allocation5 + $0x48] sm:$0xff]  ;;  %v607_v36 = vld [vmem:[#allocation5 + $0x60] sm:$0xff]  ;;  %v604_v41 = vld [vmem:[#allocation5 + $0x50] sm:$0xff] }
  0x2e   :  { %5436 = vmatpush3.bf16.msra.mxu1 %v5433_v15  ;;  %4876 = vmatprep.mubr.msk.f32.mxu1 %vm62_vm0, %v51_v5  ;;  %v608_v37 = vld [vmem:[#allocation5 + $0x68] sm:$0xff]  ;;  %v6058_v38 = vld [vmem:[%s6651_s1] sm:$0x3]  ;;  %v6060_v39 = vpack.c.bf16 %v603_v34, %v602_v33  ;;  %v605_v42 = vld [vmem:[#allocation5 + $0x58] sm:$0xff] }
  0x2f   :  { %4869 = vmatprep.mubr.msk.f32.mxu0 %vm62_vm0, %v51_v5  ;;  %5438 = vmatprep.subr.bf16.mxu0 %v5437_v18  ;;  %v6064_v40 = vpack.c.bf16 %v608_v37, %v607_v36  ;;  %v609_v43 = vld [vmem:[#allocation5 + $0x70] sm:$0xff]  ;;  %v610_v44 = vld [vmem:[#allocation5 + $0x78] sm:$0xff]  ;;  %v6072_v45 = vpack.c.bf16 %v605_v42, %v604_v41  ;;  %v612_v47 = vld [vmem:[#allocation5 + $0x80] sm:$0xff] }
  0x30   :  { %5442 = vmatprep.subr.bf16.mxu1 %v5441_v19  ;;  %4870 = vmatmul.mubr.msk.f32.vlgmr.msra.gmra.mrb[2].mxu0 %vm62_vm0, %v52_v14  ;;  %v6076_v46 = vpack.c.bf16 %v610_v44, %v609_v43  ;;  %v613_v48 = vld [vmem:[#allocation5 + $0x88] sm:$0xff]  ;;  %v617_v49 = vld [vmem:[#allocation5 + $0xa0] sm:$0xff]  ;;  %v614_v53 = vld [vmem:[#allocation5 + $0x90] sm:$0xff] }
  0x31   :  { %4877 = vmatmul.mubr.msk.f32.vlgmr.msra.gmra.mrb[2].mxu1 %vm62_vm0, %v52_v14  ;;  %5440 = vmatpush3.bf16.msra.mxu0 %v5437_v18  ;;  %v618_v50 = vld [vmem:[#allocation5 + $0xa8] sm:$0xff]  ;;  %v6084_v51 = vpack.c.bf16 %v613_v48, %v612_v47  ;;  %v6090_v52 = vld [vmem:[%s6651_s1 + $0x2] sm:$0x3]  ;;  %v615_v54 = vld [vmem:[#allocation5 + $0x98] sm:$0xff] }
  0x32   :  { %5444 = vmatpush3.bf16.msra.mxu1 %v5441_v19  ;;  %4890 = vmatprep.mubr.msk.f32.mxu1 %vm62_vm0, %v51_v5  ;;  %v6094_v55 = vpack.c.bf16 %v618_v50, %v617_v49  ;;  %v619_v56 = vld [vmem:[#allocation5 + $0xb0] sm:$0xff]  ;;  %v620_v57 = vld [vmem:[#allocation5 + $0xb8] sm:$0xff]  ;;  %v6101_v58 = vpack.c.bf16 %v615_v54, %v614_v53  ;;  %v4480_v60 = vld [vmem:[%s6654_s4] ss:$0 sm:$0xff] }
  0x33   :  { %4883 = vmatprep.mubr.msk.f32.mxu0 %vm62_vm0, %v51_v5  ;;  %5445 = vmatprep.subr.bf16.mxu0 %v5955_v28  ;;  %v6107_v59 = vpack.c.bf16 %v620_v57, %v619_v56  ;;  %v4484_v61 = vld [vmem:[%s6654_s4 + $0x1] ss:$0 sm:$0xff]  ;;  %v4488_v5 = vld [vmem:[%s6654_s4 + $0x2] ss:$0 sm:$0xff]  ;;  %v4492_v7 = vld [vmem:[%s6654_s4 + $0x3] ss:$0 sm:$0xff] }
  0x34   :  { %5451 = vmatprep.subr.bf16.mxu1 %v5955_v28  ;;  %4884 = vmatmul.mubr.msk.f32.vlgmr.msra.gmra.mrb[4].mxu0 %vm62_vm0, %v52_v14  ;;  %v4496_v15 = vld [vmem:[%s6654_s4 + $0x4] ss:$0 sm:$0xff]  ;;  %v4500_v17 = vld [vmem:[%s6654_s4 + $0x5] ss:$0 sm:$0xff] }
  0x35   :  { %4891 = vmatmul.mubr.msk.f32.vlgmr.msra.gmra.mrb[4].mxu1 %vm62_vm0, %v52_v14  ;;  %5447 = vmatpush3.bf16.msra.mxu0 %v6032_v24 }
  0x36   :  { %5453 = vmatpush3.bf16.msra.mxu1 %v6035_v25  ;;  %5448 = vmatprep.subr.bf16.mxu0 %v5955_v28 }
  0x37   :  { %5454 = vmatprep.subr.bf16.mxu1 %v5955_v28  ;;  %4901 = vmatprep.mubr.msk.f32.mxu0 %vm5956_vm1, %v5957_v35 }
  0x38   :  { %4912 = vmatprep.mubr.msk.f32.mxu1 %vm5956_vm1, %v5957_v35 }
  0x39   :  { %5450 = vmatpush3.bf16.msra.mxu0 %v6043_v31 }
  0x3a   :  { %5456 = vmatpush3.bf16.msra.mxu1 %v6047_v32  ;;  %5457 = vmatprep.subr.bf16.mxu0 %v5955_v28 }
  0x3b   :  { %5463 = vmatprep.subr.bf16.mxu1 %v5955_v28 }
  0x3c   :  { %4902 = vmatmul.mubr.msk.f32.vlgmr.msra.gmra.mrb[6].mxu0 %vm144_vm2, %v6058_v38 }
  0x3d   :  { %4913 = vmatmul.mubr.msk.f32.vlgmr.msra.gmra.mrb[6].mxu1 %vm144_vm2, %v6058_v38  ;;  %5459 = vmatpush3.bf16.msra.mxu0 %v6060_v39 }
  0x3e   :  { %5465 = vmatpush3.bf16.msra.mxu1 %v6064_v40  ;;  %5460 = vmatprep.subr.bf16.mxu0 %v5955_v28 }
  0x3f   :  { %5466 = vmatprep.subr.bf16.mxu1 %v5955_v28  ;;  %4934 = vmatprep.mubr.msk.f32.mxu1 %vm5956_vm1, %v5957_v35 }
  0x40   :  { %4923 = vmatprep.mubr.msk.f32.mxu0 %vm5956_vm1, %v5957_v35 }
  0x41   :  { %5462 = vmatpush3.bf16.msra.mxu0 %v6072_v45 }
  0x42   :  { %5468 = vmatpush3.bf16.msra.mxu1 %v6076_v46  ;;  %5469 = vmatprep.subr.bf16.mxu0 %v5955_v28 }
  0x43   :  { %5475 = vmatprep.subr.bf16.mxu1 %v5955_v28 }
  0x44   :  { %4924 = vmatmul.mubr.msk.f32.vlgmr.msra.gmra.mrb[8].mxu0 %vm144_vm2, %v6058_v38 }
  0x45   :  { %4935 = vmatmul.mubr.msk.f32.vlgmr.msra.gmra.mrb[8].mxu1 %vm144_vm2, %v6090_v52  ;;  %5471 = vmatpush3.bf16.msra.mxu0 %v6084_v51 }
  0x46   :  { %5472 = vmatprep.subr.bf16.mxu0 %v5955_v28  ;;  %4945 = vmatprep.mubr.msk.f32.mxu0 %vm5956_vm1, %v5957_v35 }
  0x47   :  { %5477 = vmatpush3.bf16.msra.mxu1 %v6094_v55  ;;  %4956 = vmatprep.mubr.msk.f32.mxu1 %vm5956_vm1, %v5957_v35 }
  0x48   :  { %5478 = vmatprep.subr.bf16.mxu1 %v5955_v28 }
  0x49   :  { %5474 = vmatpush3.bf16.msra.mxu0 %v6101_v58 }
  0x4a   :  { %5481 = vmatprep.subr.bf16.mxu0 %v5955_v28 }
  0x4b   :  { %5480 = vmatpush3.bf16.msra.mxu1 %v6107_v59 }
  0x4c   :  { %4946 = vmatmul.mubr.msk.f32.vlgmr.msra.gmra.mrb[10].mxu0 %vm144_vm2, %v6090_v52  ;;  %5487 = vmatprep.subr.bf16.mxu1 %v5955_v28 }
  0x4d   :  { %5483 = vmatpush3.bf16.msra.mxu0 %v6032_v24  ;;  %4967 = vmatprep.mubr.msk.f32.mxu0 %vm5956_vm1, %v5957_v35 }
  0x4e   :  { %4957 = vmatmul.mubr.msk.f32.vlgmr.msra.gmra.mrb[10].mxu1 %vm144_vm2, %v6090_v52  ;;  %5484 = vmatprep.subr.bf16.mxu0 %v5955_v28 }
  0x4f   :  { %5489 = vmatpush3.bf16.msra.mxu1 %v6035_v25  ;;  %4978 = vmatprep.mubr.msk.f32.mxu1 %vm5956_vm1, %v5957_v35 }
  0x50   :  { %5490 = vmatprep.subr.bf16.mxu1 %v5955_v28 }
  0x51   :  { %5486 = vmatpush3.bf16.msra.mxu0 %v6043_v31 }
  0x52   :  { %5493 = vmatprep.subr.bf16.mxu0 %v5955_v28 }
  0x53   :  { %5492 = vmatpush3.bf16.msra.mxu1 %v6047_v32 }
  0x54   :  { %5499 = vmatprep.subr.bf16.mxu1 %v5955_v28 }
  0xff   :  { %v4857_v62 = vpop.f32.mrb[0].mxu0 }
 0x100   :  { %v4864_v63 = vpop.f32.mrb[0].mxu1  ;;  %v141_v0 = vadd.f32 %v4857_v62, %v4480_v60  ;;  %v135_v1 = vpop.f32.mrb[1].mxu0 }
 0x101   :  { %v230_v2 = vadd.f32 %v4864_v63, %v4484_v61  ;;  %v224_v3 = vpop.f32.mrb[1].mxu1  ;;  %v136_v4 = vadd.f32 %v4480_v60, %v135_v1 }
 0x102   :  { %146 = vst.msk [vmem:[#allocation2 + $0x8] sm:$0xff] %vm144_vm2, %v141_v0  ;;  %v225_v6 = vadd.f32 %v4484_v61, %v224_v3 }
 0x103   :  { %235 = vst.msk [vmem:[#allocation2 + $0x18] sm:$0xff] %vm144_vm2, %v230_v2  ;;  %145 = vst.msk [vmem:[#allocation2] sm:$0xff] %vm144_vm2, %v136_v4  ;;  %v4871_v8 = vpop.f32.mrb[2].mxu0 }
 0x104   :  { %234 = vst.msk [vmem:[#allocation2 + $0x10] sm:$0xff] %vm144_vm2, %v225_v6  ;;  %v4878_v9 = vpop.f32.mrb[2].mxu1  ;;  %v319_v10 = vadd.f32 %v4871_v8, %v4488_v5  ;;  %v313_v11 = vpop.f32.mrb[3].mxu0  ;;  %v6165_v6 = vld [vmem:[%s6655_s5] ss:$0 sm:$0xff] }
 0x105   :  { %v408_v12 = vadd.f32 %v4878_v9, %v4492_v7  ;;  %v402_v13 = vpop.f32.mrb[3].mxu1  ;;  %v314_v14 = vadd.f32 %v4488_v5, %v313_v11 }
 0x106   :  { %324 = vst.msk [vmem:[#allocation2 + $0x28] sm:$0xff] %vm144_vm2, %v319_v10  ;;  %v403_v16 = vadd.f32 %v4492_v7, %v402_v13 }
 0x107   :  { %413 = vst.msk [vmem:[#allocation2 + $0x38] sm:$0xff] %vm144_vm2, %v408_v12  ;;  %323 = vst.msk [vmem:[#allocation2 + $0x20] sm:$0xff] %vm144_vm2, %v314_v14  ;;  %v4885_v18 = vpop.f32.mrb[4].mxu0 }
 0x108   :  { %412 = vst.msk [vmem:[#allocation2 + $0x30] sm:$0xff] %vm144_vm2, %v403_v16  ;;  %v4892_v19 = vpop.f32.mrb[4].mxu1  ;;  %v497_v20 = vadd.f32 %v4885_v18, %v4496_v15  ;;  %v491_v21 = vpop.f32.mrb[5].mxu0 }
 0x109   :  { %v586_v22 = vadd.f32 %v4892_v19, %v4500_v17  ;;  %v580_v23 = vpop.f32.mrb[5].mxu1  ;;  %v492_v26 = vadd.f32 %v4496_v15, %v491_v21  ;;  %v6171_v15 = vld [vmem:[%s6655_s5 + $0x1] ss:$0 sm:$0xff] }
 0x10a   :  { %502 = vst.msk [vmem:[#allocation2 + $0x48] sm:$0xff] %vm144_vm2, %v497_v20  ;;  %v581_v27 = vadd.f32 %v4500_v17, %v580_v23  ;;  %v627_v29 = vld [vmem:[#allocation2] sm:$0x3] }
 0x10b   :  { %591 = vst.msk [vmem:[#allocation2 + $0x58] sm:$0xff] %vm144_vm2, %v586_v22  ;;  %501 = vst.msk [vmem:[#allocation2 + $0x40] sm:$0xff] %vm144_vm2, %v492_v26  ;;  %v628_v42 = vld [vmem:[#allocation2 + $0x10] sm:$0x3] }
 0x10c   :  { %590 = vst.msk [vmem:[#allocation2 + $0x50] sm:$0xff] %vm144_vm2, %v581_v27 }
 0x10e   :  { %v872_v48 = vld [vmem:[#allocation2 + $0x3e] sm:$0x3]  ;;  %v629_v12 = vld [vmem:[#allocation2 + $0x20] sm:$0x3] }
 0x10f   :  { %v699_v30 = vpop.f32.mrb[6].mxu0 }
 0x110   :  { %v849_v33 = vadd.f32 %v699_v30, %v627_v29  ;;  %v769_v34 = vpop.f32.mrb[6].mxu1  ;;  %v4903_v36 = vpop.f32.mrb[7].mxu0 }
 0x111   :  { %v4914_v37 = vpop.f32.mrb[7].mxu1  ;;  %v856_v43 = vadd.f32 %v769_v34, %v628_v42  ;;  %v873_v61 = vld [vmem:[#allocation2 + $0x4e] sm:$0x3]  ;;  %v1121_v42 = vld [vmem:[#allocation2 + $0x2] sm:$0x3] }
 0x112   :  { %v4509_v41 = vmul.f32 -1.442695, %v849_v33  ;;  %v874_v21 = vld [vmem:[#allocation2 + $0x5e] sm:$0x3] }
 0x113   :  { %v4510_v44 = vmul.f32 -1.442695, %v856_v43 }
 0x114   :  { %5741 = vpow2.f32 %v4509_v41 }
 0x115   :  { %5743 = vpow2.f32 %v4510_v44 }
 0x117   :  { %v845_v47 = vpop.f32.mrb[8].mxu0 }
 0x118   :  { %v944_v49 = vpop.f32.mrb[8].mxu1  ;;  %v4925_v50 = vpop.f32.mrb[9].mxu0  ;;  %v846_v9 = vadd.f32 %v6165_v6, %v845_v47 }
 0x119   :  { %v1094_v53 = vadd.f32 %v944_v49, %v872_v48  ;;  %v4936_v54 = vpop.f32.mrb[9].mxu1 }
 0x11b   :  { %v4515_v56 = vmul.f32 -1.442695, %v1094_v53  ;;  %v1122_v53 = vld [vmem:[#allocation2 + $0x12] sm:$0x3] }
 0x11d   :  { %5745 = vpow2.f32 %v4515_v56 }
 0x11e   :  { %v5742_v57 = vpop.eup %5741 }
 0x11f   :  { %v853_v60 = vadd.f32 1.0, %v5742_v57  ;;  %v1014_v62 = vpop.f32.mrb[10].mxu0  ;;  %v5744_v4 = vpop.eup %5743 }
 0x120   :  { %v1101_v63 = vadd.f32 %v1014_v62, %v873_v61  ;;  %v4947_v0 = vpop.f32.mrb[11].mxu0  ;;  %v860_v7 = vadd.f32 1.0, %v5744_v4  ;;  %v1359_v61 = vld [vmem:[#allocation2 + $0x3c] sm:$0x3]  ;;  %v1360_v4 = vld [vmem:[#allocation2 + $0x4c] sm:$0x3] }
 0x121   :  { %5747 = vrcp.f32 %v853_v60  ;;  %v1090_v1 = vpop.f32.mrb[10].mxu1 }
 0x122   :  { %v4516_v2 = vmul.f32 -1.442695, %v1101_v63  ;;  %v4958_v3 = vpop.f32.mrb[11].mxu1  ;;  %v1091_v17 = vadd.f32 %v6171_v15, %v1090_v1 }
 0x124   :  { %5749 = vpow2.f32 %v4516_v2 }
 0x127   :  { %v5746_v5 = vpop.eup %5745 }
 0x128   :  { %v1098_v8 = vadd.f32 1.0, %v5746_v5 }
 0x12a   :  { %5751 = vrcp.f32 %v1098_v8 }
 0x12b   :  { %v5748_v10 = vpop.eup %5747  ;;  %5753 = vrcp.f32 %v860_v7 }
 0x12c   :  { %v863_v11 = vmul.f32 %v5748_v10, %v846_v9 }
 0x12e   :  { %v5750_v13 = vpop.eup %5749  ;;  %v864_v14 = vadd.f32 %v863_v11, %v629_v12 }
 0x12f   :  { %v1105_v16 = vadd.f32 1.0, %v5750_v13 }
 0x130   :  { %5755 = vtanh.f32 %v864_v14 }
 0x131   :  { %5757 = vrcp.f32 %v1105_v16 }
 0x134   :  { %v5752_v18 = vpop.eup %5751 }
 0x135   :  { %v1108_v19 = vmul.f32 %v5752_v18, %v1091_v17  ;;  %v5754_v20 = vpop.eup %5753 }
 0x136   :  { %v866_v23 = vsub.f32 1.0, %v5754_v20  ;;  %v868_v29 = vmul.f32 %v5754_v20, %v6058_v38  ;;  %v1123_v20 = vld [vmem:[#allocation2 + $0x22] sm:$0x3] }
 0x137   :  { %v1109_v22 = vadd.f32 %v1108_v19, %v874_v21 }
 0x139   :  { %5759 = vtanh.f32 %v1109_v22 }
 0x13a   :  { %v5756_v26 = vpop.eup %5755 }
 0x13b   :  { %v867_v27 = vmul.f32 %v5756_v26, %v866_v23  ;;  %v5758_v33 = vpop.eup %5757 }
 0x13c   :  { %v1111_v38 = vsub.f32 1.0, %v5758_v33  ;;  %v1113_v37 = vmul.f32 %v5758_v33, %v6090_v52 }
 0x13d   :  { %v6175_v30 = vadd.f32 %v868_v29, %v867_v27 }
 0x13f   :  { %4968 = vmatmul.mubr.msk.f32.vlgmr.msra.gmra.mrb[12].mxu0 %vm144_vm2, %v6175_v30  ;;  %4979 = vmatmul.mubr.msk.f32.vlgmr.msra.gmra.mrb[12].mxu1 %vm144_vm2, %v6175_v30  ;;  %871 = vst.msk [vmem:[%s6656_s6] sm:$0x3] %vm870_vm3, %v6175_v30 }
 0x140   :  { %5495 = vmatpush3.bf16.msra.mxu0 %v6060_v39  ;;  %5501 = vmatpush3.bf16.msra.mxu1 %v6064_v40 }
 0x141   :  { %5496 = vmatprep.subr.bf16.mxu0 %v5955_v28  ;;  %5502 = vmatprep.subr.bf16.mxu1 %v5955_v28 }
 0x142   :  { %4989 = vmatprep.mubr.msk.f32.mxu0 %vm5956_vm1, %v5957_v35  ;;  %5000 = vmatprep.mubr.msk.f32.mxu1 %vm5956_vm1, %v5957_v35 }
 0x143   :  { %v5760_v34 = vpop.eup %5759 }
 0x144   :  { %5498 = vmatpush3.bf16.msra.mxu0 %v6072_v45  ;;  %5504 = vmatpush3.bf16.msra.mxu1 %v6076_v46  ;;  %v1112_v36 = vmul.f32 %v5760_v34, %v1111_v38  ;;  %v1361_v38 = vld [vmem:[#allocation2 + $0x5c] sm:$0x3] }
 0x145   :  { %5505 = vmatprep.subr.bf16.mxu0 %v5955_v28  ;;  %5511 = vmatprep.subr.bf16.mxu1 %v5955_v28 }
 0x146   :  { %v6199_v41 = vadd.f32 %v1113_v37, %v1112_v36 }
 0x147   :  { %4990 = vmatmul.mubr.msk.f32.vlgmr.msra.gmra.mrb[14].mxu0 %vm144_vm2, %v6175_v30 }
 0x148   :  { %1116 = vrot.lane.b32.xlu0 %v6199_v41, %s5958_s20  ;;  %5001 = vmatmul.mubr.msk.f32.vlgmr.msra.gmra.mrb[14].mxu1 %vm144_vm2, %v6199_v41 }
 0x149   :  { %5507 = vmatpush3.bf16.msra.mxu0 %v6084_v51  ;;  %5513 = vmatpush3.bf16.msra.mxu1 %v6094_v55 }
 0x14a   :  { %5508 = vmatprep.subr.bf16.mxu0 %v5955_v28  ;;  %5514 = vmatprep.subr.bf16.mxu1 %v5955_v28 }
 0x14b   :  { %5011 = vmatprep.mubr.msk.f32.mxu0 %vm5956_vm1, %v5957_v35  ;;  %5022 = vmatprep.mubr.msk.f32.mxu1 %vm5956_vm1, %v5957_v35 }
 0x14d   :  { %5510 = vmatpush3.bf16.msra.mxu0 %v6101_v58  ;;  %5516 = vmatpush3.bf16.msra.mxu1 %v6107_v59 }
 0x14e   :  { %5517 = vmatprep.subr.bf16.mxu0 %v5955_v28  ;;  %5523 = vmatprep.subr.bf16.mxu1 %v5955_v28 }
 0x150   :  { %5012 = vmatmul.mubr.msk.f32.vlgmr.msra.gmra.mrb[16].mxu0 %vm144_vm2, %v6199_v41  ;;  %5023 = vmatmul.mubr.msk.f32.vlgmr.msra.gmra.mrb[16].mxu1 %vm144_vm2, %v6199_v41 }
 0x151   :  { %5519 = vmatpush3.bf16.msra.mxu0 %v6032_v24  ;;  %5525 = vmatpush3.bf16.msra.mxu1 %v6035_v25 }
 0x152   :  { %5520 = vmatprep.subr.bf16.mxu0 %v5955_v28  ;;  %5526 = vmatprep.subr.bf16.mxu1 %v5955_v28 }
 0x153   :  { %5033 = vmatprep.mubr.msk.f32.mxu0 %vm5956_vm1, %v5957_v35  ;;  %5044 = vmatprep.mubr.msk.f32.mxu1 %vm5956_vm1, %v5957_v35 }
 0x155   :  { %5522 = vmatpush3.bf16.msra.mxu0 %v6043_v31  ;;  %5528 = vmatpush3.bf16.msra.mxu1 %v6047_v32 }
 0x156   :  { %5529 = vmatprep.subr.bf16.mxu0 %v5955_v28  ;;  %5535 = vmatprep.subr.bf16.mxu1 %v5955_v28 }
 0x1ba   :  { %v1117_v52 = vpop.permute.xlu0 %1116 }
 0x1bb   :  { %1120 = vst.msk [vmem:[%s6656_s6 + $0xe] sm:$0x3] %vm1119_vm4, %v1117_v52 }
 0x212   :  { %v1193_v43 = vpop.f32.mrb[12].mxu0  ;;  %v1263_v44 = vpop.f32.mrb[12].mxu1 }
 0x213   :  { %v1337_v47 = vadd.f32 %v1193_v43, %v1121_v42  ;;  %v4969_v48 = vpop.f32.mrb[13].mxu0  ;;  %v4980_v49 = vpop.f32.mrb[13].mxu1  ;;  %v1344_v54 = vadd.f32 %v1263_v44, %v1122_v53  ;;  %v1600_v53 = vld [vmem:[#allocation2 + $0x4] sm:$0x3] }
 0x215   :  { %v4520_v50 = vmul.f32 -1.442695, %v1337_v47  ;;  %v4521_v56 = vmul.f32 -1.442695, %v1344_v54 }
 0x217   :  { %5761 = vpow2.f32 %v4520_v50 }
 0x218   :  { %5763 = vpow2.f32 %v4521_v56 }
 0x21a   :  { %v1333_v57 = vpop.f32.mrb[14].mxu0 }
 0x21b   :  { %v4991_v60 = vpop.f32.mrb[15].mxu0  ;;  %v1430_v62 = vpop.f32.mrb[14].mxu1  ;;  %v1334_v17 = vadd.f32 %v6165_v6, %v1333_v57 }
 0x21c   :  { %v1574_v63 = vadd.f32 %v1430_v62, %v1359_v61  ;;  %v5002_v0 = vpop.f32.mrb[15].mxu1 }
 0x21e   :  { %v4525_v1 = vmul.f32 -1.442695, %v1574_v63  ;;  %v1601_v63 = vld [vmem:[#allocation2 + $0x14] sm:$0x3] }
 0x220   :  { %5765 = vpow2.f32 %v4525_v1 }
 0x221   :  { %v5762_v2 = vpop.eup %5761 }
 0x222   :  { %v1341_v3 = vadd.f32 1.0, %v5762_v2  ;;  %v5764_v12 = vpop.eup %5763 }
 0x223   :  { %v1500_v5 = vpop.f32.mrb[16].mxu0  ;;  %v1570_v7 = vpop.f32.mrb[16].mxu1  ;;  %v1348_v14 = vadd.f32 1.0, %v5764_v12  ;;  %v1839_v12 = vld [vmem:[#allocation2 + $0x4a] sm:$0x3] }
 0x224   :  { %5767 = vrcp.f32 %v1341_v3  ;;  %v1581_v8 = vadd.f32 %v1500_v5, %v1360_v4  ;;  %v5013_v9 = vpop.f32.mrb[17].mxu0  ;;  %v5024_v10 = vpop.f32.mrb[17].mxu1  ;;  %v1571_v26 = vadd.f32 %v6171_v15, %v1570_v7  ;;  %v1838_v4 = vld [vmem:[#allocation2 + $0x3a] sm:$0x3] }
 0x226   :  { %v4526_v11 = vmul.f32 -1.442695, %v1581_v8 }
 0x228   :  { %5769 = vpow2.f32 %v4526_v11 }
 0x22a   :  { %v5766_v13 = vpop.eup %5765 }
 0x22b   :  { %v1578_v16 = vadd.f32 1.0, %v5766_v13 }
 0x22d   :  { %5771 = vrcp.f32 %v1578_v16 }
 0x22e   :  { %v5768_v18 = vpop.eup %5767  ;;  %5773 = vrcp.f32 %v1348_v14 }
 0x22f   :  { %v1351_v19 = vmul.f32 %v5768_v18, %v1334_v17 }
 0x231   :  { %v1352_v21 = vadd.f32 %v1351_v19, %v1123_v20 }
 0x232   :  { %v5770_v22 = vpop.eup %5769 }
 0x233   :  { %5775 = vtanh.f32 %v1352_v21  ;;  %v1585_v23 = vadd.f32 1.0, %v5770_v22 }
 0x235   :  { %5777 = vrcp.f32 %v1585_v23 }
 0x237   :  { %v5772_v27 = vpop.eup %5771 }
 0x238   :  { %v1588_v29 = vmul.f32 %v5772_v27, %v1571_v26  ;;  %v5774_v33 = vpop.eup %5773 }
 0x239   :  { %v1354_v36 = vsub.f32 1.0, %v5774_v33  ;;  %v1356_v42 = vmul.f32 %v5774_v33, %v6175_v30  ;;  %v1602_v33 = vld [vmem:[#allocation2 + $0x24] sm:$0x3] }
 0x23a   :  { %v1589_v34 = vadd.f32 %v1588_v29, %v1361_v38 }
 0x23c   :  { %5779 = vtanh.f32 %v1589_v34 }
 0x23d   :  { %v5776_v37 = vpop.eup %5775 }
 0x23e   :  { %v1355_v52 = vmul.f32 %v5776_v37, %v1354_v36 }
 0x23f   :  { %v5778_v44 = vpop.eup %5777 }
 0x240   :  { %v6242_v43 = vadd.f32 %v1356_v42, %v1355_v52  ;;  %v1591_v30 = vsub.f32 1.0, %v5778_v44  ;;  %v1593_v49 = vmul.f32 %v5778_v44, %v6199_v41 }
 0x242   :  { %5034 = vmatmul.mubr.msk.f32.vlgmr.msra.gmra.mrb[18].mxu0 %vm144_vm2, %v6242_v43  ;;  %5045 = vmatmul.mubr.msk.f32.vlgmr.msra.gmra.mrb[18].mxu1 %vm144_vm2, %v6242_v43  ;;  %1358 = vst.msk [vmem:[%s6656_s6 + $0x2] sm:$0x3] %vm870_vm3, %v6242_v43 }
 0x243   :  { %5531 = vmatpush3.bf16.msra.mxu0 %v6060_v39  ;;  %5537 = vmatpush3.bf16.msra.mxu1 %v6064_v40 }
 0x244   :  { %5532 = vmatprep.subr.bf16.mxu0 %v5955_v28  ;;  %5538 = vmatprep.subr.bf16.mxu1 %v5955_v28 }
 0x245   :  { %5055 = vmatprep.mubr.msk.f32.mxu0 %vm5956_vm1, %v5957_v35  ;;  %5066 = vmatprep.mubr.msk.f32.mxu1 %vm5956_vm1, %v5957_v35 }
 0x246   :  { %v5780_v47 = vpop.eup %5779 }
 0x247   :  { %5534 = vmatpush3.bf16.msra.mxu0 %v6072_v45  ;;  %5540 = vmatpush3.bf16.msra.mxu1 %v6076_v46  ;;  %v1592_v48 = vmul.f32 %v5780_v47, %v1591_v30  ;;  %v1840_v30 = vld [vmem:[#allocation2 + $0x5a] sm:$0x3] }
 0x248   :  { %5541 = vmatprep.subr.bf16.mxu0 %v5955_v28  ;;  %5547 = vmatprep.subr.bf16.mxu1 %v5955_v28 }
 0x249   :  { %v6266_v50 = vadd.f32 %v1593_v49, %v1592_v48 }
 0x24a   :  { %5056 = vmatmul.mubr.msk.f32.vlgmr.msra.gmra.mrb[20].mxu0 %vm144_vm2, %v6242_v43 }
 0x24b   :  { %5543 = vmatpush3.bf16.msra.mxu0 %v6084_v51  ;;  %1596 = vrot.lane.b32.xlu0 %v6266_v50, %s5958_s20 }
 0x24c   :  { %5067 = vmatmul.mubr.msk.f32.vlgmr.msra.gmra.mrb[20].mxu1 %vm144_vm2, %v6266_v50  ;;  %5544 = vmatprep.subr.bf16.mxu0 %v5955_v28 }
 0x24d   :  { %5549 = vmatpush3.bf16.msra.mxu1 %v6094_v55  ;;  %5077 = vmatprep.mubr.msk.f32.mxu0 %vm5956_vm1, %v5957_v35 }
 0x24e   :  { %5550 = vmatprep.subr.bf16.mxu1 %v5955_v28  ;;  %5088 = vmatprep.mubr.msk.f32.mxu1 %vm5956_vm1, %v5957_v35 }
 0x24f   :  { %5546 = vmatpush3.bf16.msra.mxu0 %v6101_v58 }
 0x250   :  { %5553 = vmatprep.subr.bf16.mxu0 %v5955_v28 }
 0x251   :  { %5552 = vmatpush3.bf16.msra.mxu1 %v6107_v59 }
 0x252   :  { %5078 = vmatmul.mubr.msk.f32.vlgmr.msra.gmra.mrb[22].mxu0 %vm144_vm2, %v6266_v50  ;;  %5559 = vmatprep.subr.bf16.mxu1 %v5955_v28 }
 0x253   :  { %5555 = vmatpush3.bf16.msra.mxu0 %v6032_v24  ;;  %5099 = vmatprep.mubr.msk.f32.mxu0 %vm5956_vm1, %v5957_v35 }
 0x254   :  { %5089 = vmatmul.mubr.msk.f32.vlgmr.msra.gmra.mrb[22].mxu1 %vm144_vm2, %v6266_v50  ;;  %5556 = vmatprep.subr.bf16.mxu0 %v5955_v28 }
 0x255   :  { %5561 = vmatpush3.bf16.msra.mxu1 %v6035_v25  ;;  %5110 = vmatprep.mubr.msk.f32.mxu1 %vm5956_vm1, %v5957_v35 }
 0x256   :  { %5562 = vmatprep.subr.bf16.mxu1 %v5955_v28 }
 0x257   :  { %5558 = vmatpush3.bf16.msra.mxu0 %v6043_v31 }
 0x258   :  { %5565 = vmatprep.subr.bf16.mxu0 %v5955_v28 }
 0x259   :  { %5564 = vmatpush3.bf16.msra.mxu1 %v6047_v32 }
 0x25a   :  { %5571 = vmatprep.subr.bf16.mxu1 %v5955_v28 }
 0x2bd   :  { %v1597_v41 = vpop.permute.xlu0 %1596 }
 0x2be   :  { %1599 = vst.msk [vmem:[%s6656_s6 + $0xc] sm:$0x3] %vm1119_vm4, %v1597_v41 }
 0x315   :  { %v1672_v54 = vpop.f32.mrb[18].mxu0  ;;  %v1742_v56 = vpop.f32.mrb[18].mxu1 }
 0x316   :  { %v1816_v57 = vadd.f32 %v1672_v54, %v1600_v53  ;;  %v5035_v60 = vpop.f32.mrb[19].mxu0  ;;  %v5046_v61 = vpop.f32.mrb[19].mxu1  ;;  %v1823_v0 = vadd.f32 %v1742_v56, %v1601_v63  ;;  %v2079_v63 = vld [vmem:[#allocation2 + $0x6] sm:$0x3] }
 0x318   :  { %v4530_v62 = vmul.f32 -1.442695, %v1816_v57  ;;  %v4531_v1 = vmul.f32 -1.442695, %v1823_v0 }
 0x31a   :  { %5781 = vpow2.f32 %v4530_v62 }
 0x31b   :  { %5783 = vpow2.f32 %v4531_v1 }
 0x31d   :  { %v1812_v2 = vpop.f32.mrb[20].mxu0 }
 0x31e   :  { %v5057_v3 = vpop.f32.mrb[21].mxu0  ;;  %v1813_v26 = vadd.f32 %v6165_v6, %v1812_v2 }
 0x31f   :  { %v1909_v5 = vpop.f32.mrb[20].mxu1 }
 0x320   :  { %v2053_v7 = vadd.f32 %v1909_v5, %v1838_v4  ;;  %v5068_v8 = vpop.f32.mrb[21].mxu1 }
 0x322   :  { %v4535_v9 = vmul.f32 -1.442695, %v2053_v7  ;;  %v2080_v7 = vld [vmem:[#allocation2 + $0x16] sm:$0x3] }
 0x324   :  { %v5782_v10 = vpop.eup %5781  ;;  %5785 = vpow2.f32 %v4535_v9 }
 0x325   :  { %v1820_v11 = vadd.f32 1.0, %v5782_v10  ;;  %v1979_v13 = vpop.f32.mrb[22].mxu0  ;;  %v5784_v20 = vpop.eup %5783 }
 0x326   :  { %v2060_v14 = vadd.f32 %v1979_v13, %v1839_v12  ;;  %v5079_v16 = vpop.f32.mrb[23].mxu0  ;;  %v1827_v22 = vadd.f32 1.0, %v5784_v20  ;;  %v2317_v12 = vld [vmem:[#allocation2 + $0x38] sm:$0x3]  ;;  %v2318_v20 = vld [vmem:[#allocation2 + $0x48] sm:$0x3] }
 0x327   :  { %5787 = vrcp.f32 %v1820_v11  ;;  %v2049_v17 = vpop.f32.mrb[22].mxu1 }
 0x328   :  { %v4536_v18 = vmul.f32 -1.442695, %v2060_v14  ;;  %v5090_v19 = vpop.f32.mrb[23].mxu1  ;;  %v2050_v37 = vadd.f32 %v6171_v15, %v2049_v17 }
 0x32a   :  { %5789 = vpow2.f32 %v4536_v18 }
 0x32e   :  { %v5786_v21 = vpop.eup %5785 }
 0x32f   :  { %v2057_v23 = vadd.f32 1.0, %v5786_v21 }
 0x331   :  { %v5788_v27 = vpop.eup %5787  ;;  %5791 = vrcp.f32 %v2057_v23 }
 0x332   :  { %5793 = vrcp.f32 %v1827_v22  ;;  %v1830_v29 = vmul.f32 %v5788_v27, %v1813_v26 }
 0x334   :  { %v1831_v38 = vadd.f32 %v1830_v29, %v1602_v33  ;;  %v5790_v34 = vpop.eup %5789 }
 0x335   :  { %v2064_v36 = vadd.f32 1.0, %v5790_v34 }
 0x336   :  { %5795 = vtanh.f32 %v1831_v38 }
 0x337   :  { %5797 = vrcp.f32 %v2064_v36 }
 0x33b   :  { %v5792_v52 = vpop.eup %5791 }
 0x33c   :  { %v5794_v42 = vpop.eup %5793  ;;  %v2067_v44 = vmul.f32 %v5792_v52, %v2050_v37 }
 0x33d   :  { %v1833_v48 = vsub.f32 1.0, %v5794_v42  ;;  %v1835_v53 = vmul.f32 %v5794_v42, %v6242_v43 }
 0x33e   :  { %v2068_v47 = vadd.f32 %v2067_v44, %v1840_v30  ;;  %v2081_v44 = vld [vmem:[#allocation2 + $0x26] sm:$0x3] }
 0x340   :  { %v5796_v49 = vpop.eup %5795  ;;  %5799 = vtanh.f32 %v2068_v47 }
 0x341   :  { %v1834_v41 = vmul.f32 %v5796_v49, %v1833_v48  ;;  %v5798_v56 = vpop.eup %5797 }
 0x342   :  { %v2070_v43 = vsub.f32 1.0, %v5798_v56  ;;  %v2072_v61 = vmul.f32 %v5798_v56, %v6266_v50 }
 0x343   :  { %v6309_v54 = vadd.f32 %v1835_v53, %v1834_v41 }
 0x345   :  { %5100 = vmatmul.mubr.msk.f32.vlgmr.msra.gmra.mrb[24].mxu0 %vm144_vm2, %v6309_v54  ;;  %5111 = vmatmul.mubr.msk.f32.vlgmr.msra.gmra.mrb[24].mxu1 %vm144_vm2, %v6309_v54  ;;  %1837 = vst.msk [vmem:[%s6656_s6 + $0x4] sm:$0x3] %vm870_vm3, %v6309_v54 }
 0x346   :  { %5567 = vmatpush3.bf16.msra.mxu0 %v6060_v39  ;;  %5573 = vmatpush3.bf16.msra.mxu1 %v6064_v40 }
 0x347   :  { %5568 = vmatprep.subr.bf16.mxu0 %v5955_v28  ;;  %5574 = vmatprep.subr.bf16.mxu1 %v5955_v28 }
 0x348   :  { %5121 = vmatprep.mubr.msk.f32.mxu0 %vm5956_vm1, %v5957_v35  ;;  %5132 = vmatprep.mubr.msk.f32.mxu1 %vm5956_vm1, %v5957_v35 }
 0x34a   :  { %v5800_v57 = vpop.eup %5799  ;;  %5570 = vmatpush3.bf16.msra.mxu0 %v6072_v45  ;;  %5576 = vmatpush3.bf16.msra.mxu1 %v6076_v46 }
 0x34b   :  { %5577 = vmatprep.subr.bf16.mxu0 %v5955_v28  ;;  %5583 = vmatprep.subr.bf16.mxu1 %v5955_v28  ;;  %v2071_v60 = vmul.f32 %v5800_v57, %v2070_v43  ;;  %v2319_v43 = vld [vmem:[#allocation2 + $0x58] sm:$0x3] }
 0x34d   :  { %5122 = vmatmul.mubr.msk.f32.vlgmr.msra.gmra.mrb[26].mxu0 %vm144_vm2, %v6309_v54  ;;  %v6335_v62 = vadd.f32 %v2072_v61, %v2071_v60 }
 0x34e   :  { %5579 = vmatpush3.bf16.msra.mxu0 %v6084_v51  ;;  %5143 = vmatprep.mubr.msk.f32.mxu0 %vm5956_vm1, %v5957_v35 }
 0x34f   :  { %2075 = vrot.lane.b32.xlu1 %v6335_v62, %s5958_s20  ;;  %5133 = vmatmul.mubr.msk.f32.vlgmr.msra.gmra.mrb[26].mxu1 %vm144_vm2, %v6335_v62 }
 0x350   :  { %5585 = vmatpush3.bf16.msra.mxu1 %v6094_v55  ;;  %5580 = vmatprep.subr.bf16.mxu0 %v5955_v28 }
 0x351   :  { %5586 = vmatprep.subr.bf16.mxu1 %v5955_v28  ;;  %5154 = vmatprep.mubr.msk.f32.mxu1 %vm5956_vm1, %v5957_v35 }
 0x352   :  { %5582 = vmatpush3.bf16.msra.mxu0 %v6101_v58 }
 0x353   :  { %5589 = vmatprep.subr.bf16.mxu0 %v5955_v28 }
 0x354   :  { %5588 = vmatpush3.bf16.msra.mxu1 %v6107_v59 }
 0x355   :  { %5144 = vmatmul.mubr.msk.f32.vlgmr.msra.gmra.mrb[28].mxu0 %vm144_vm2, %v6335_v62  ;;  %5595 = vmatprep.subr.bf16.mxu1 %v5955_v28 }
 0x356   :  { %5591 = vmatpush3.bf16.msra.mxu0 %v6032_v24  ;;  %5165 = vmatprep.mubr.msk.f32.mxu0 %vm5956_vm1, %v5957_v35 }
 0x357   :  { %5155 = vmatmul.mubr.msk.f32.vlgmr.msra.gmra.mrb[28].mxu1 %vm144_vm2, %v6335_v62  ;;  %5592 = vmatprep.subr.bf16.mxu0 %v5955_v28 }
 0x358   :  { %5597 = vmatpush3.bf16.msra.mxu1 %v6035_v25  ;;  %5176 = vmatprep.mubr.msk.f32.mxu1 %vm5956_vm1, %v5957_v35 }
 0x359   :  { %5598 = vmatprep.subr.bf16.mxu1 %v5955_v28 }
 0x35a   :  { %5594 = vmatpush3.bf16.msra.mxu0 %v6043_v31 }
 0x35b   :  { %5601 = vmatprep.subr.bf16.mxu0 %v5955_v28 }
 0x35c   :  { %5600 = vmatpush3.bf16.msra.mxu1 %v6047_v32 }
 0x35d   :  { %5607 = vmatprep.subr.bf16.mxu1 %v5955_v28 }
 0x3c1   :  { %v2076_v50 = vpop.permute.xlu1 %2075 }
 0x3c2   :  { %2078 = vst.msk [vmem:[%s6656_s6 + $0xa] sm:$0x3] %vm1119_vm4, %v2076_v50 }
 0x418   :  { %v2151_v0 = vpop.f32.mrb[24].mxu0  ;;  %v2221_v1 = vpop.f32.mrb[24].mxu1 }
 0x419   :  { %v2295_v2 = vadd.f32 %v2151_v0, %v2079_v63  ;;  %v5101_v3 = vpop.f32.mrb[25].mxu0  ;;  %v5112_v4 = vpop.f32.mrb[25].mxu1  ;;  %v2302_v8 = vadd.f32 %v2221_v1, %v2080_v7  ;;  %v2558_v7 = vld [vmem:[#allocation2 + $0x8] sm:$0x3] }
 0x41b   :  { %v4540_v5 = vmul.f32 -1.442695, %v2295_v2  ;;  %v4541_v9 = vmul.f32 -1.442695, %v2302_v8 }
 0x41d   :  { %5801 = vpow2.f32 %v4540_v5 }
 0x41e   :  { %5803 = vpow2.f32 %v4541_v9 }
 0x420   :  { %v2291_v10 = vpop.f32.mrb[26].mxu0 }
 0x421   :  { %v5123_v11 = vpop.f32.mrb[27].mxu0  ;;  %v2292_v37 = vadd.f32 %v6165_v6, %v2291_v10 }
 0x422   :  { %v2388_v13 = vpop.f32.mrb[26].mxu1 }
 0x423   :  { %v2532_v14 = vadd.f32 %v2388_v13, %v2317_v12  ;;  %v5134_v16 = vpop.f32.mrb[27].mxu1 }
 0x425   :  { %v4545_v17 = vmul.f32 -1.442695, %v2532_v14  ;;  %v2559_v14 = vld [vmem:[#allocation2 + $0x18] sm:$0x3] }
 0x427   :  { %v5802_v18 = vpop.eup %5801  ;;  %5805 = vpow2.f32 %v4545_v17 }
 0x428   :  { %v2299_v19 = vadd.f32 1.0, %v5802_v18  ;;  %v2458_v21 = vpop.f32.mrb[28].mxu0  ;;  %v5804_v33 = vpop.eup %5803 }
 0x429   :  { %v2539_v22 = vadd.f32 %v2458_v21, %v2318_v20  ;;  %v5145_v23 = vpop.f32.mrb[29].mxu0  ;;  %v2306_v34 = vadd.f32 1.0, %v5804_v33  ;;  %v2796_v20 = vld [vmem:[#allocation2 + $0x36] sm:$0x3]  ;;  %v2797_v33 = vld [vmem:[#allocation2 + $0x46] sm:$0x3] }
 0x42a   :  { %5807 = vrcp.f32 %v2299_v19  ;;  %v2528_v26 = vpop.f32.mrb[28].mxu1 }
 0x42b   :  { %v4546_v27 = vmul.f32 -1.442695, %v2539_v22  ;;  %v5156_v29 = vpop.f32.mrb[29].mxu1  ;;  %v2529_v49 = vadd.f32 %v6171_v15, %v2528_v26 }
 0x42d   :  { %5809 = vpow2.f32 %v4546_v27 }
 0x431   :  { %v5806_v38 = vpop.eup %5805 }
 0x432   :  { %v2536_v36 = vadd.f32 1.0, %v5806_v38 }
 0x434   :  { %v5808_v52 = vpop.eup %5807  ;;  %5811 = vrcp.f32 %v2536_v36 }
 0x435   :  { %5813 = vrcp.f32 %v2306_v34  ;;  %v2309_v42 = vmul.f32 %v5808_v52, %v2292_v37 }
 0x437   :  { %v2310_v30 = vadd.f32 %v2309_v42, %v2081_v44  ;;  %v5810_v47 = vpop.eup %5809 }
 0x438   :  { %v2543_v48 = vadd.f32 1.0, %v5810_v47 }
 0x439   :  { %5815 = vtanh.f32 %v2310_v30 }
 0x43a   :  { %5817 = vrcp.f32 %v2543_v48 }
 0x43e   :  { %v5812_v41 = vpop.eup %5811 }
 0x43f   :  { %v5814_v53 = vpop.eup %5813  ;;  %v2546_v56 = vmul.f32 %v5812_v41, %v2529_v49 }
 0x440   :  { %v2312_v60 = vsub.f32 1.0, %v5814_v53  ;;  %v2314_v63 = vmul.f32 %v5814_v53, %v6309_v54 }
 0x441   :  { %v2547_v57 = vadd.f32 %v2546_v56, %v2319_v43  ;;  %v2560_v56 = vld [vmem:[#allocation2 + $0x28] sm:$0x3] }
 0x443   :  { %v5816_v61 = vpop.eup %5815  ;;  %5819 = vtanh.f32 %v2547_v57 }
 0x444   :  { %v2313_v50 = vmul.f32 %v5816_v61, %v2312_v60  ;;  %v5818_v1 = vpop.eup %5817 }
 0x445   :  { %v2549_v54 = vsub.f32 1.0, %v5818_v1  ;;  %v2551_v4 = vmul.f32 %v5818_v1, %v6335_v62 }
 0x446   :  { %v6376_v0 = vadd.f32 %v2314_v63, %v2313_v50 }
 0x448   :  { %5166 = vmatmul.mubr.msk.f32.vlgmr.msra.gmra.mrb[30].mxu0 %vm144_vm2, %v6376_v0  ;;  %5177 = vmatmul.mubr.msk.f32.vlgmr.msra.gmra.mrb[30].mxu1 %vm144_vm2, %v6376_v0  ;;  %2316 = vst.msk [vmem:[%s6656_s6 + $0x6] sm:$0x3] %vm870_vm3, %v6376_v0 }
 0x449   :  { %5603 = vmatpush3.bf16.msra.mxu0 %v6060_v39  ;;  %5609 = vmatpush3.bf16.msra.mxu1 %v6064_v40 }
 0x44a   :  { %5604 = vmatprep.subr.bf16.mxu0 %v5955_v28  ;;  %5610 = vmatprep.subr.bf16.mxu1 %v5955_v28 }
 0x44b   :  { %5187 = vmatprep.mubr.msk.f32.mxu0 %vm5956_vm1, %v5957_v35  ;;  %5198 = vmatprep.mubr.msk.f32.mxu1 %vm5956_vm1, %v5957_v35 }
 0x44d   :  { %v5820_v2 = vpop.eup %5819  ;;  %5606 = vmatpush3.bf16.msra.mxu0 %v6072_v45  ;;  %5612 = vmatpush3.bf16.msra.mxu1 %v6076_v46 }
 0x44e   :  { %5613 = vmatprep.subr.bf16.mxu0 %v5955_v28  ;;  %5619 = vmatprep.subr.bf16.mxu1 %v5955_v28  ;;  %v2550_v3 = vmul.f32 %v5820_v2, %v2549_v54  ;;  %v2798_v54 = vld [vmem:[#allocation2 + $0x56] sm:$0x3] }
 0x450   :  { %5188 = vmatmul.mubr.msk.f32.vlgmr.msra.gmra.mrb[32].mxu0 %vm144_vm2, %v6376_v0  ;;  %v6402_v5 = vadd.f32 %v2551_v4, %v2550_v3 }
 0x451   :  { %5615 = vmatpush3.bf16.msra.mxu0 %v6084_v51  ;;  %5209 = vmatprep.mubr.msk.f32.mxu0 %vm5956_vm1, %v5957_v35 }
 0x452   :  { %2554 = vrot.lane.b32.xlu1 %v6402_v5, %s5958_s20  ;;  %5199 = vmatmul.mubr.msk.f32.vlgmr.msra.gmra.mrb[32].mxu1 %vm144_vm2, %v6402_v5 }
 0x453   :  { %5621 = vmatpush3.bf16.msra.mxu1 %v6094_v55  ;;  %5616 = vmatprep.subr.bf16.mxu0 %v5955_v28 }
 0x454   :  { %5622 = vmatprep.subr.bf16.mxu1 %v5955_v28  ;;  %5220 = vmatprep.mubr.msk.f32.mxu1 %vm5956_vm1, %v5957_v35 }
 0x455   :  { %5618 = vmatpush3.bf16.msra.mxu0 %v6101_v58 }
 0x456   :  { %5625 = vmatprep.subr.bf16.mxu0 %v5955_v28 }
 0x457   :  { %5624 = vmatpush3.bf16.msra.mxu1 %v6107_v59 }
 0x458   :  { %5210 = vmatmul.mubr.msk.f32.vlgmr.msra.gmra.mrb[34].mxu0 %vm144_vm2, %v6402_v5  ;;  %5631 = vmatprep.subr.bf16.mxu1 %v5955_v28 }
 0x459   :  { %5627 = vmatpush3.bf16.msra.mxu0 %v6032_v24  ;;  %5231 = vmatprep.mubr.msk.f32.mxu0 %vm5956_vm1, %v5957_v35 }
 0x45a   :  { %5221 = vmatmul.mubr.msk.f32.vlgmr.msra.gmra.mrb[34].mxu1 %vm144_vm2, %v6402_v5  ;;  %5628 = vmatprep.subr.bf16.mxu0 %v5955_v28 }
 0x45b   :  { %5633 = vmatpush3.bf16.msra.mxu1 %v6035_v25  ;;  %5242 = vmatprep.mubr.msk.f32.mxu1 %vm5956_vm1, %v5957_v35 }
 0x45c   :  { %5634 = vmatprep.subr.bf16.mxu1 %v5955_v28 }
 0x45d   :  { %5630 = vmatpush3.bf16.msra.mxu0 %v6043_v31 }
 0x45e   :  { %5637 = vmatprep.subr.bf16.mxu0 %v5955_v28 }
 0x45f   :  { %5636 = vmatpush3.bf16.msra.mxu1 %v6047_v32 }
 0x460   :  { %5643 = vmatprep.subr.bf16.mxu1 %v5955_v28 }
 0x4c4   :  { %v2555_v62 = vpop.permute.xlu1 %2554 }
 0x4c5   :  { %2557 = vst.msk [vmem:[%s6656_s6 + $0x8] sm:$0x3] %vm1119_vm4, %v2555_v62 }
 0x51b   :  { %v2630_v8 = vpop.f32.mrb[30].mxu0  ;;  %v2700_v9 = vpop.f32.mrb[30].mxu1 }
 0x51c   :  { %v2774_v10 = vadd.f32 %v2630_v8, %v2558_v7  ;;  %v5167_v11 = vpop.f32.mrb[31].mxu0  ;;  %v5178_v12 = vpop.f32.mrb[31].mxu1  ;;  %v2781_v16 = vadd.f32 %v2700_v9, %v2559_v14 }
 0x51d   :  { %v3037_v12 = vld [vmem:[#allocation2 + $0xa] sm:$0x3] }
 0x51e   :  { %v4550_v13 = vmul.f32 -1.442695, %v2774_v10  ;;  %v4551_v17 = vmul.f32 -1.442695, %v2781_v16 }
 0x520   :  { %5821 = vpow2.f32 %v4550_v13 }
 0x521   :  { %5823 = vpow2.f32 %v4551_v17 }
 0x523   :  { %v2770_v18 = vpop.f32.mrb[32].mxu0 }
 0x524   :  { %v5189_v19 = vpop.f32.mrb[33].mxu0  ;;  %v2771_v49 = vadd.f32 %v6165_v6, %v2770_v18 }
 0x525   :  { %v2867_v21 = vpop.f32.mrb[32].mxu1 }
 0x526   :  { %v3011_v22 = vadd.f32 %v2867_v21, %v2796_v20  ;;  %v5200_v23 = vpop.f32.mrb[33].mxu1  ;;  %v3038_v20 = vld [vmem:[#allocation2 + $0x1a] sm:$0x3] }
 0x528   :  { %v4555_v26 = vmul.f32 -1.442695, %v3011_v22 }
 0x52a   :  { %v5822_v27 = vpop.eup %5821  ;;  %5825 = vpow2.f32 %v4555_v26 }
 0x52b   :  { %v2778_v29 = vadd.f32 1.0, %v5822_v27  ;;  %v2937_v38 = vpop.f32.mrb[34].mxu0  ;;  %v5824_v44 = vpop.eup %5823  ;;  %v3275_v27 = vld [vmem:[#allocation2 + $0x34] sm:$0x3] }
 0x52c   :  { %v3018_v34 = vadd.f32 %v2937_v38, %v2797_v33  ;;  %v5211_v36 = vpop.f32.mrb[35].mxu0  ;;  %v2785_v47 = vadd.f32 1.0, %v5824_v44 }
 0x52d   :  { %5827 = vrcp.f32 %v2778_v29  ;;  %v3007_v37 = vpop.f32.mrb[34].mxu1 }
 0x52e   :  { %v4556_v52 = vmul.f32 -1.442695, %v3018_v34  ;;  %v5222_v42 = vpop.f32.mrb[35].mxu1  ;;  %v3008_v61 = vadd.f32 %v6171_v15, %v3007_v37 }
 0x530   :  { %5829 = vpow2.f32 %v4556_v52  ;;  %v3276_v52 = vld [vmem:[#allocation2 + $0x44] sm:$0x3] }
 0x534   :  { %v5826_v30 = vpop.eup %5825 }
 0x535   :  { %v3015_v48 = vadd.f32 1.0, %v5826_v30 }
 0x537   :  { %v5828_v41 = vpop.eup %5827  ;;  %5831 = vrcp.f32 %v3015_v48 }
 0x538   :  { %5833 = vrcp.f32 %v2785_v47  ;;  %v2788_v53 = vmul.f32 %v5828_v41, %v2771_v49 }
 0x53a   :  { %v2789_v43 = vadd.f32 %v2788_v53, %v2560_v56  ;;  %v5830_v57 = vpop.eup %5829 }
 0x53b   :  { %v3022_v60 = vadd.f32 1.0, %v5830_v57  ;;  %v6510_v57 = vld [vmem:[%s6655_s5] ss:$0 sm:$0xff] }
 0x53c   :  { %5835 = vtanh.f32 %v2789_v43 }
 0x53d   :  { %5837 = vrcp.f32 %v3022_v60 }
 0x541   :  { %v5832_v50 = vpop.eup %5831 }
 0x542   :  { %v5834_v63 = vpop.eup %5833  ;;  %v3025_v1 = vmul.f32 %v5832_v50, %v3008_v61 }
 0x543   :  { %v2791_v3 = vsub.f32 1.0, %v5834_v63  ;;  %v2793_v62 = vmul.f32 %v5834_v63, %v6376_v0  ;;  %v3039_v63 = vld [vmem:[#allocation2 + $0x2a] sm:$0x3] }
 0x544   :  { %v3026_v2 = vadd.f32 %v3025_v1, %v2798_v54 }
 0x546   :  { %v5836_v4 = vpop.eup %5835  ;;  %5839 = vtanh.f32 %v3026_v2 }
 0x547   :  { %v2792_v6 = vmul.f32 %v5836_v4, %v2791_v3  ;;  %v5838_v15 = vpop.eup %5837  ;;  %v6516_v3 = vld [vmem:[%s6655_s5 + $0x1] ss:$0 sm:$0xff] }
 0x548   :  { %v3028_v0 = vsub.f32 1.0, %v5838_v15  ;;  %v3030_v10 = vmul.f32 %v5838_v15, %v6402_v5 }
 0x549   :  { %v6443_v7 = vadd.f32 %v2793_v62, %v2792_v6 }
 0x54b   :  { %5232 = vmatmul.mubr.msk.f32.vlgmr.msra.gmra.mrb[36].mxu0 %vm144_vm2, %v6443_v7  ;;  %5243 = vmatmul.mubr.msk.f32.vlgmr.msra.gmra.mrb[36].mxu1 %vm144_vm2, %v6443_v7  ;;  %2795 = vst.msk [vmem:[%s6656_s6 + $0x8] sm:$0x3] %vm870_vm3, %v6443_v7 }
 0x54c   :  { %5639 = vmatpush3.bf16.msra.mxu0 %v6060_v39  ;;  %5645 = vmatpush3.bf16.msra.mxu1 %v6064_v40 }
 0x54d   :  { %5640 = vmatprep.subr.bf16.mxu0 %v5955_v28  ;;  %5646 = vmatprep.subr.bf16.mxu1 %v5955_v28 }
 0x54e   :  { %5253 = vmatprep.mubr.msk.f32.mxu0 %vm5956_vm1, %v5957_v35  ;;  %5264 = vmatprep.mubr.msk.f32.mxu1 %vm5956_vm1, %v5957_v35 }
 0x550   :  { %v5840_v8 = vpop.eup %5839  ;;  %5642 = vmatpush3.bf16.msra.mxu0 %v6072_v45  ;;  %5648 = vmatpush3.bf16.msra.mxu1 %v6076_v46 }
 0x551   :  { %5649 = vmatprep.subr.bf16.mxu0 %v5955_v28  ;;  %5655 = vmatprep.subr.bf16.mxu1 %v5955_v28  ;;  %v3029_v9 = vmul.f32 %v5840_v8, %v3028_v0  ;;  %v3277_v0 = vld [vmem:[#allocation2 + $0x54] sm:$0x3] }
 0x553   :  { %5254 = vmatmul.mubr.msk.f32.vlgmr.msra.gmra.mrb[38].mxu0 %vm144_vm2, %v6443_v7  ;;  %v6469_v11 = vadd.f32 %v3030_v10, %v3029_v9 }
 0x554   :  { %5651 = vmatpush3.bf16.msra.mxu0 %v6084_v51  ;;  %5275 = vmatprep.mubr.msk.f32.mxu0 %vm5956_vm1, %v5957_v35 }
 0x555   :  { %3033 = vrot.lane.b32.xlu0 %v6469_v11, %s5958_s20  ;;  %5265 = vmatmul.mubr.msk.f32.vlgmr.msra.gmra.mrb[38].mxu1 %vm144_vm2, %v6469_v11 }
 0x556   :  { %5657 = vmatpush3.bf16.msra.mxu1 %v6094_v55  ;;  %5652 = vmatprep.subr.bf16.mxu0 %v5955_v28 }
 0x557   :  { %5658 = vmatprep.subr.bf16.mxu1 %v5955_v28  ;;  %5286 = vmatprep.mubr.msk.f32.mxu1 %vm5956_vm1, %v5957_v35 }
 0x558   :  { %5654 = vmatpush3.bf16.msra.mxu0 %v6101_v58 }
 0x559   :  { %5661 = vmatprep.subr.bf16.mxu0 %v5955_v28 }
 0x55a   :  { %5660 = vmatpush3.bf16.msra.mxu1 %v6107_v59 }
 0x55b   :  { %5276 = vmatmul.mubr.msk.f32.vlgmr.msra.gmra.mrb[40].mxu0 %vm144_vm2, %v6469_v11  ;;  %5667 = vmatprep.subr.bf16.mxu1 %v5955_v28 }
 0x55c   :  { %5663 = vmatpush3.bf16.msra.mxu0 %v6032_v24  ;;  %5297 = vmatprep.mubr.msk.f32.mxu0 %vm5956_vm1, %v5957_v35 }
 0x55d   :  { %5287 = vmatmul.mubr.msk.f32.vlgmr.msra.gmra.mrb[40].mxu1 %vm144_vm2, %v6469_v11  ;;  %5664 = vmatprep.subr.bf16.mxu0 %v5955_v28 }
 0x55e   :  { %5669 = vmatpush3.bf16.msra.mxu1 %v6035_v25  ;;  %5308 = vmatprep.mubr.msk.f32.mxu1 %vm5956_vm1, %v5957_v35 }
 0x55f   :  { %5670 = vmatprep.subr.bf16.mxu1 %v5955_v28 }
 0x560   :  { %5666 = vmatpush3.bf16.msra.mxu0 %v6043_v31 }
 0x561   :  { %5673 = vmatprep.subr.bf16.mxu0 %v5955_v28 }
 0x562   :  { %5672 = vmatpush3.bf16.msra.mxu1 %v6047_v32 }
 0x563   :  { %5679 = vmatprep.subr.bf16.mxu1 %v5955_v28 }
 0x5c7   :  { %v3034_v5 = vpop.permute.xlu0 %3033 }
 0x5c8   :  { %3036 = vst.msk [vmem:[%s6656_s6 + $0x6] sm:$0x3] %vm1119_vm4, %v3034_v5 }
 0x61e   :  { %v3109_v13 = vpop.f32.mrb[36].mxu0  ;;  %v3179_v14 = vpop.f32.mrb[36].mxu1 }
 0x61f   :  { %v3253_v16 = vadd.f32 %v3109_v13, %v3037_v12  ;;  %v5233_v17 = vpop.f32.mrb[37].mxu0  ;;  %v5244_v18 = vpop.f32.mrb[37].mxu1  ;;  %v3260_v21 = vadd.f32 %v3179_v14, %v3038_v20 }
 0x621   :  { %v4560_v19 = vmul.f32 -1.442695, %v3253_v16  ;;  %v4561_v22 = vmul.f32 -1.442695, %v3260_v21 }
 0x623   :  { %5841 = vpow2.f32 %v4560_v19 }
 0x624   :  { %5843 = vpow2.f32 %v4561_v22 }
 0x626   :  { %v3249_v23 = vpop.f32.mrb[38].mxu0 }
 0x627   :  { %v5255_v26 = vpop.f32.mrb[39].mxu0  ;;  %v3250_v60 = vadd.f32 %v6510_v57, %v3249_v23 }
 0x628   :  { %v3346_v29 = vpop.f32.mrb[38].mxu1 }
 0x629   :  { %v3490_v33 = vadd.f32 %v3346_v29, %v3275_v27  ;;  %v5266_v38 = vpop.f32.mrb[39].mxu1 }
 0x62a   :  { %v3754_v38 = vld [vmem:[#allocation2 + $0x32] sm:$0x3] }
 0x62b   :  { %v4565_v34 = vmul.f32 -1.442695, %v3490_v33 }
 0x62d   :  { %v5842_v36 = vpop.eup %5841  ;;  %5845 = vpow2.f32 %v4565_v34 }
 0x62e   :  { %v3257_v37 = vadd.f32 1.0, %v5842_v36  ;;  %v3416_v42 = vpop.f32.mrb[40].mxu0  ;;  %v5844_v41 = vpop.eup %5843 }
 0x62f   :  { %v3497_v44 = vadd.f32 %v3416_v42, %v3276_v52  ;;  %v5277_v30 = vpop.f32.mrb[41].mxu0  ;;  %v3264_v56 = vadd.f32 1.0, %v5844_v41 }
 0x630   :  { %5847 = vrcp.f32 %v3257_v37  ;;  %v3486_v47 = vpop.f32.mrb[40].mxu1  ;;  %v3755_v30 = vld [vmem:[#allocation2 + $0x42] sm:$0x3] }
 0x631   :  { %v4566_v48 = vmul.f32 -1.442695, %v3497_v44  ;;  %v5288_v49 = vpop.f32.mrb[41].mxu1  ;;  %v3487_v4 = vadd.f32 %v6516_v3, %v3486_v47 }
 0x633   :  { %5849 = vpow2.f32 %v4566_v48 }
 0x637   :  { %v5846_v53 = vpop.eup %5845 }
 0x638   :  { %v3494_v43 = vadd.f32 1.0, %v5846_v53 }
 0x63a   :  { %v5848_v61 = vpop.eup %5847  ;;  %5851 = vrcp.f32 %v3494_v43 }
 0x63b   :  { %5853 = vrcp.f32 %v3264_v56  ;;  %v3267_v50 = vmul.f32 %v5848_v61, %v3250_v60 }
 0x63d   :  { %v3268_v1 = vadd.f32 %v3267_v50, %v3039_v63  ;;  %v5850_v54 = vpop.eup %5849 }
 0x63e   :  { %v3501_v2 = vadd.f32 1.0, %v5850_v54 }
 0x63f   :  { %5855 = vtanh.f32 %v3268_v1 }
 0x640   :  { %5857 = vrcp.f32 %v3501_v2  ;;  %v3518_v2 = vld [vmem:[#allocation2 + $0x2c] sm:$0x3] }
 0x644   :  { %v5852_v6 = vpop.eup %5851 }
 0x645   :  { %v5854_v62 = vpop.eup %5853  ;;  %v3504_v15 = vmul.f32 %v5852_v6, %v3487_v4 }
 0x646   :  { %v3270_v9 = vsub.f32 1.0, %v5854_v62  ;;  %v3272_v12 = vmul.f32 %v5854_v62, %v6443_v7 }
 0x647   :  { %v3505_v8 = vadd.f32 %v3504_v15, %v3277_v0 }
 0x649   :  { %v5856_v10 = vpop.eup %5855  ;;  %5859 = vtanh.f32 %v3505_v8 }
 0x64a   :  { %v3271_v5 = vmul.f32 %v5856_v10, %v3270_v9  ;;  %v5858_v14 = vpop.eup %5857  ;;  %v3756_v10 = vld [vmem:[#allocation2 + $0x52] sm:$0x3] }
 0x64b   :  { %v3507_v7 = vsub.f32 1.0, %v5858_v14  ;;  %v3509_v18 = vmul.f32 %v5858_v14, %v6469_v11 }
 0x64c   :  { %v6520_v13 = vadd.f32 %v3272_v12, %v3271_v5 }
 0x64e   :  { %3274 = vst.msk [vmem:[%s6656_s6 + $0xa] sm:$0x3] %vm870_vm3, %v6520_v13  ;;  %5298 = vmatmul.mubr.msk.f32.vlgmr.msra.gmra.mrb[42].mxu0 %vm144_vm2, %v6520_v13  ;;  %5309 = vmatmul.mubr.msk.f32.vlgmr.msra.gmra.mrb[42].mxu1 %vm144_vm2, %v6520_v13 }
 0x64f   :  { %5675 = vmatpush3.bf16.msra.mxu0 %v6060_v39  ;;  %5681 = vmatpush3.bf16.msra.mxu1 %v6064_v40 }
 0x650   :  { %5676 = vmatprep.subr.bf16.mxu0 %v5955_v28  ;;  %5682 = vmatprep.subr.bf16.mxu1 %v5955_v28 }
 0x651   :  { %5319 = vmatprep.mubr.msk.f32.mxu0 %vm5956_vm1, %v5957_v35  ;;  %5330 = vmatprep.mubr.msk.f32.mxu1 %vm5956_vm1, %v5957_v35 }
 0x653   :  { %v5860_v16 = vpop.eup %5859  ;;  %5678 = vmatpush3.bf16.msra.mxu0 %v6072_v45  ;;  %5684 = vmatpush3.bf16.msra.mxu1 %v6076_v46 }
 0x654   :  { %5685 = vmatprep.subr.bf16.mxu0 %v5955_v28  ;;  %5691 = vmatprep.subr.bf16.mxu1 %v5955_v28  ;;  %v3508_v17 = vmul.f32 %v5860_v16, %v3507_v7 }
 0x656   :  { %5320 = vmatmul.mubr.msk.f32.vlgmr.msra.gmra.mrb[44].mxu0 %vm144_vm2, %v6520_v13  ;;  %v6546_v19 = vadd.f32 %v3509_v18, %v3508_v17 }
 0x657   :  { %5687 = vmatpush3.bf16.msra.mxu0 %v6084_v51  ;;  %5341 = vmatprep.mubr.msk.f32.mxu0 %vm5956_vm1, %v5957_v35 }
 0x658   :  { %3512 = vrot.lane.b32.xlu1 %v6546_v19, %s5958_s20  ;;  %5331 = vmatmul.mubr.msk.f32.vlgmr.msra.gmra.mrb[44].mxu1 %vm144_vm2, %v6546_v19 }
 0x659   :  { %5693 = vmatpush3.bf16.msra.mxu1 %v6094_v55  ;;  %5688 = vmatprep.subr.bf16.mxu0 %v5955_v28 }
 0x65a   :  { %5694 = vmatprep.subr.bf16.mxu1 %v5955_v28  ;;  %5352 = vmatprep.mubr.msk.f32.mxu1 %vm5956_vm1, %v5957_v35 }
 0x65b   :  { %5690 = vmatpush3.bf16.msra.mxu0 %v6101_v58 }
 0x65c   :  { %5697 = vmatprep.subr.bf16.mxu0 %v5955_v28 }
 0x65d   :  { %5696 = vmatpush3.bf16.msra.mxu1 %v6107_v59 }
 0x65e   :  { %5342 = vmatmul.mubr.msk.f32.vlgmr.msra.gmra.mrb[46].mxu0 %vm144_vm2, %v6546_v19  ;;  %5703 = vmatprep.subr.bf16.mxu1 %v5955_v28 }
 0x65f   :  { %5699 = vmatpush3.bf16.msra.mxu0 %v6032_v24  ;;  %5363 = vmatprep.mubr.msk.f32.mxu0 %vm5956_vm1, %v5957_v35 }
 0x660   :  { %5353 = vmatmul.mubr.msk.f32.vlgmr.msra.gmra.mrb[46].mxu1 %vm144_vm2, %v6546_v19  ;;  %5700 = vmatprep.subr.bf16.mxu0 %v5955_v28 }
 0x661   :  { %5705 = vmatpush3.bf16.msra.mxu1 %v6035_v25  ;;  %5374 = vmatprep.mubr.msk.f32.mxu1 %vm5956_vm1, %v5957_v35  ;;  %v3516_v25 = vld [vmem:[#allocation2 + $0xc] sm:$0x3] }
 0x662   :  { %5706 = vmatprep.subr.bf16.mxu1 %v5955_v28 }
 0x663   :  { %5702 = vmatpush3.bf16.msra.mxu0 %v6043_v31  ;;  %v3517_v31 = vld [vmem:[#allocation2 + $0x1c] sm:$0x3] }
 0x664   :  { %5709 = vmatprep.subr.bf16.mxu0 %v5955_v28 }
 0x665   :  { %5708 = vmatpush3.bf16.msra.mxu1 %v6047_v32 }
 0x666   :  { %5715 = vmatprep.subr.bf16.mxu1 %v5955_v28 }
 0x6ca   :  { %v3513_v24 = vpop.permute.xlu1 %3512 }
 0x6cb   :  { %3515 = vst.msk [vmem:[%s6656_s6 + $0x4] sm:$0x3] %vm1119_vm4, %v3513_v24 }
 0x721   :  { %v3588_v11 = vpop.f32.mrb[42].mxu0  ;;  %v3658_v20 = vpop.f32.mrb[42].mxu1 }
 0x722   :  { %v3732_v21 = vadd.f32 %v3588_v11, %v3516_v25  ;;  %v5299_v22 = vpop.f32.mrb[43].mxu0  ;;  %v5310_v23 = vpop.f32.mrb[43].mxu1  ;;  %v3739_v27 = vadd.f32 %v3658_v20, %v3517_v31 }
 0x723   :  { %v4233_v23 = vld [vmem:[#allocation2 + $0x30] sm:$0x3] }
 0x724   :  { %v4570_v26 = vmul.f32 -1.442695, %v3732_v21  ;;  %v4571_v29 = vmul.f32 -1.442695, %v3739_v27 }
 0x726   :  { %5861 = vpow2.f32 %v4570_v26 }
 0x727   :  { %5863 = vpow2.f32 %v4571_v29 }
 0x729   :  { %v3728_v32 = vpop.f32.mrb[44].mxu0 }
 0x72a   :  { %v5321_v33 = vpop.f32.mrb[45].mxu0  ;;  %v3729_v63 = vadd.f32 %v6510_v57, %v3728_v32 }
 0x72b   :  { %v3825_v34 = vpop.f32.mrb[44].mxu1 }
 0x72c   :  { %v3969_v36 = vadd.f32 %v3825_v34, %v3754_v38  ;;  %v5332_v37 = vpop.f32.mrb[45].mxu1  ;;  %v4234_v38 = vld [vmem:[#allocation2 + $0x40] sm:$0x3] }
 0x72e   :  { %v4575_v52 = vmul.f32 -1.442695, %v3969_v36 }
 0x730   :  { %v5862_v42 = vpop.eup %5861  ;;  %5865 = vpow2.f32 %v4575_v52 }
 0x731   :  { %v3736_v44 = vadd.f32 1.0, %v5862_v42  ;;  %v3895_v47 = vpop.f32.mrb[46].mxu0  ;;  %v5864_v43 = vpop.eup %5863 }
 0x732   :  { %v3976_v48 = vadd.f32 %v3895_v47, %v3755_v30  ;;  %v5343_v49 = vpop.f32.mrb[47].mxu0  ;;  %v3743_v61 = vadd.f32 1.0, %v5864_v43  ;;  %v3997_v43 = vld [vmem:[#allocation2 + $0x2e] sm:$0x3] }
 0x733   :  { %5867 = vrcp.f32 %v3736_v44  ;;  %v3965_v41 = vpop.f32.mrb[46].mxu1 }
 0x734   :  { %v4576_v53 = vmul.f32 -1.442695, %v3976_v48  ;;  %v5354_v56 = vpop.f32.mrb[47].mxu1  ;;  %v3966_v15 = vadd.f32 %v6516_v3, %v3965_v41 }
 0x736   :  { %5869 = vpow2.f32 %v4576_v53 }
 0x73a   :  { %v5866_v60 = vpop.eup %5865 }
 0x73b   :  { %v3973_v50 = vadd.f32 1.0, %v5866_v60 }
 0x73d   :  { %v5868_v1 = vpop.eup %5867  ;;  %5871 = vrcp.f32 %v3973_v50 }
 0x73e   :  { %5873 = vrcp.f32 %v3743_v61  ;;  %v3746_v54 = vmul.f32 %v5868_v1, %v3729_v63 }
 0x740   :  { %v3747_v4 = vadd.f32 %v3746_v54, %v3518_v2  ;;  %v5870_v6 = vpop.eup %5869 }
 0x741   :  { %v3980_v62 = vadd.f32 1.0, %v5870_v6 }
 0x742   :  { %5875 = vtanh.f32 %v3747_v4  ;;  %v4235_v4 = vld [vmem:[#allocation2 + $0x50] sm:$0x3] }
 0x743   :  { %5877 = vrcp.f32 %v3980_v62 }
 0x747   :  { %v5872_v0 = vpop.eup %5871 }
 0x748   :  { %v5874_v8 = vpop.eup %5873  ;;  %v3983_v9 = vmul.f32 %v5872_v0, %v3966_v15 }
 0x749   :  { %v3749_v12 = vsub.f32 1.0, %v5874_v8  ;;  %v3751_v16 = vmul.f32 %v5874_v8, %v6520_v13 }
 0x74a   :  { %v3984_v5 = vadd.f32 %v3983_v9, %v3756_v10 }
 0x74c   :  { %v5876_v14 = vpop.eup %5875  ;;  %5879 = vtanh.f32 %v3984_v5 }
 0x74d   :  { %v3750_v7 = vmul.f32 %v5876_v14, %v3749_v12  ;;  %v5878_v18 = vpop.eup %5877 }
 0x74e   :  { %v3986_v13 = vsub.f32 1.0, %v5878_v18 }
 0x74f   :  { %v6587_v17 = vadd.f32 %v3751_v16, %v3750_v7 }
 0x751   :  { %3753 = vst.msk [vmem:[%s6656_s6 + $0xc] sm:$0x3] %vm870_vm3, %v6587_v17  ;;  %5364 = vmatmul.mubr.msk.f32.vlgmr.msra.gmra.mrb[48].mxu0 %vm144_vm2, %v6587_v17  ;;  %5375 = vmatmul.mubr.msk.f32.vlgmr.msra.gmra.mrb[48].mxu1 %vm144_vm2, %v6587_v17 }
 0x752   :  { %5711 = vmatpush3.bf16.msra.mxu0 %v6060_v39  ;;  %5717 = vmatpush3.bf16.msra.mxu1 %v6064_v40  ;;  %v3988_v40 = vmul.f32 %v5878_v18, %v6546_v19 }
 0x753   :  { %5712 = vmatprep.subr.bf16.mxu0 %v5955_v28  ;;  %5718 = vmatprep.subr.bf16.mxu1 %v5955_v28 }
 0x754   :  { %5385 = vmatprep.mubr.msk.f32.mxu0 %vm5956_vm1, %v5957_v35  ;;  %5396 = vmatprep.mubr.msk.f32.mxu1 %vm5956_vm1, %v5957_v35 }
 0x756   :  { %v5880_v24 = vpop.eup %5879  ;;  %5714 = vmatpush3.bf16.msra.mxu0 %v6072_v45  ;;  %5720 = vmatpush3.bf16.msra.mxu1 %v6076_v46 }
 0x757   :  { %5721 = vmatprep.subr.bf16.mxu0 %v5955_v28  ;;  %5727 = vmatprep.subr.bf16.mxu1 %v5955_v28  ;;  %v3987_v39 = vmul.f32 %v5880_v24, %v3986_v13 }
 0x759   :  { %5386 = vmatmul.mubr.msk.f32.vlgmr.msra.gmra.mrb[50].mxu0 %vm144_vm2, %v6587_v17  ;;  %v6613_v25 = vadd.f32 %v3988_v40, %v3987_v39 }
 0x75a   :  { %5723 = vmatpush3.bf16.msra.mxu0 %v6084_v51  ;;  %5407 = vmatprep.mubr.msk.f32.mxu0 %vm5956_vm1, %v5957_v35 }
 0x75b   :  { %3991 = vrot.lane.b32.xlu0 %v6613_v25, %s5958_s20  ;;  %5397 = vmatmul.mubr.msk.f32.vlgmr.msra.gmra.mrb[50].mxu1 %vm144_vm2, %v6613_v25 }
 0x75c   :  { %5729 = vmatpush3.bf16.msra.mxu1 %v6094_v55  ;;  %5724 = vmatprep.subr.bf16.mxu0 %v5955_v28 }
 0x75d   :  { %5730 = vmatprep.subr.bf16.mxu1 %v5955_v28  ;;  %5418 = vmatprep.mubr.msk.f32.mxu1 %vm5956_vm1, %v5957_v35  ;;  %v3995_v28 = vld [vmem:[#allocation2 + $0xe] sm:$0x3] }
 0x75e   :  { %5726 = vmatpush3.bf16.msra.mxu0 %v6101_v58 }
 0x760   :  { %5732 = vmatpush3.bf16.msra.mxu1 %v6107_v59  ;;  %v3996_v59 = vld [vmem:[#allocation2 + $0x1e] sm:$0x3] }
 0x761   :  { %5408 = vmatmul.mubr.msk.f32.vlgmr.msra.gmra.mrb[52].mxu0 %vm144_vm2, %v6613_v25 }
 0x763   :  { %5419 = vmatmul.mubr.msk.f32.vlgmr.msra.gmra.mrb[52].mxu1 %vm144_vm2, %v6613_v25 }
 0x7cd   :  { %v3992_v45 = vpop.permute.xlu0 %3991 }
 0x7ce   :  { %3994 = vst.msk [vmem:[%s6656_s6 + $0x2] sm:$0x3] %vm1119_vm4, %v3992_v45 }
 0x824   :  { %v4067_v46 = vpop.f32.mrb[48].mxu0  ;;  %v4137_v51 = vpop.f32.mrb[48].mxu1 }
 0x825   :  { %v4211_v35 = vadd.f32 %v4067_v46, %v3995_v28  ;;  %v5365_v55 = vpop.f32.mrb[49].mxu0  ;;  %v5376_v58 = vpop.f32.mrb[49].mxu1  ;;  %v4218_v11 = vadd.f32 %v4137_v51, %v3996_v59 }
 0x827   :  { %v4580_v19 = vmul.f32 -1.442695, %v4211_v35  ;;  %v4581_v20 = vmul.f32 -1.442695, %v4218_v11 }
 0x829   :  { %5881 = vpow2.f32 %v4580_v19 }
 0x82a   :  { %5883 = vpow2.f32 %v4581_v20 }
 0x82c   :  { %v4207_v21 = vpop.f32.mrb[50].mxu0 }
 0x82d   :  { %v5387_v22 = vpop.f32.mrb[51].mxu0  ;;  %v4208_v41 = vadd.f32 %v6510_v57, %v4207_v21 }
 0x82e   :  { %v4304_v26 = vpop.f32.mrb[50].mxu1 }
 0x82f   :  { %v4448_v31 = vadd.f32 %v4304_v26, %v4233_v23  ;;  %v5398_v27 = vpop.f32.mrb[51].mxu1 }
 0x831   :  { %v4585_v29 = vmul.f32 -1.442695, %v4448_v31 }
 0x833   :  { %v5882_v32 = vpop.eup %5881  ;;  %5885 = vpow2.f32 %v4585_v29 }
 0x834   :  { %v4215_v33 = vadd.f32 1.0, %v5882_v32  ;;  %v4374_v34 = vpop.f32.mrb[52].mxu0  ;;  %v5884_v30 = vpop.eup %5883 }
 0x835   :  { %v4455_v36 = vadd.f32 %v4374_v34, %v4234_v38  ;;  %v5409_v37 = vpop.f32.mrb[53].mxu0  ;;  %v4222_v48 = vadd.f32 1.0, %v5884_v30 }
 0x836   :  { %5887 = vrcp.f32 %v4215_v33  ;;  %v4444_v52 = vpop.f32.mrb[52].mxu1 }
 0x837   :  { %v4586_v42 = vmul.f32 -1.442695, %v4455_v36  ;;  %v5420_v44 = vpop.f32.mrb[53].mxu1  ;;  %v4445_v63 = vadd.f32 %v6516_v3, %v4444_v52 }
 0x839   :  { %5889 = vpow2.f32 %v4586_v42 }
 0x83d   :  { %v5886_v47 = vpop.eup %5885 }
 0x83e   :  { %v4452_v49 = vadd.f32 1.0, %v5886_v47 }
 0x840   :  { %v5888_v53 = vpop.eup %5887  ;;  %5891 = vrcp.f32 %v4452_v49 }
 0x841   :  { %5893 = vrcp.f32 %v4222_v48  ;;  %v4225_v56 = vmul.f32 %v5888_v53, %v4208_v41 }
 0x843   :  { %v4226_v60 = vadd.f32 %v4225_v56, %v3997_v43  ;;  %v5890_v61 = vpop.eup %5889 }
 0x844   :  { %v4459_v50 = vadd.f32 1.0, %v5890_v61 }
 0x845   :  { %5895 = vtanh.f32 %v4226_v60 }
 0x846   :  { %5897 = vrcp.f32 %v4459_v50 }
 0x84a   :  { %v5892_v1 = vpop.eup %5891 }
 0x84b   :  { %v5894_v54 = vpop.eup %5893  ;;  %v4462_v2 = vmul.f32 %v5892_v1, %v4445_v63 }
 0x84c   :  { %v4228_v62 = vsub.f32 1.0, %v5894_v54  ;;  %v4230_v57 = vmul.f32 %v5894_v54, %v6587_v17 }
 0x84d   :  { %v4463_v6 = vadd.f32 %v4462_v2, %v4235_v4 }
 0x84f   :  { %v5896_v15 = vpop.eup %5895  ;;  %5899 = vtanh.f32 %v4463_v6 }
 0x850   :  { %v4229_v0 = vmul.f32 %v5896_v15, %v4228_v62  ;;  %v5898_v9 = vpop.eup %5897 }
 0x851   :  { %v4465_v3 = vsub.f32 1.0, %v5898_v9  ;;  %v4467_v12 = vmul.f32 %v5898_v9, %v6613_v25 }
 0x852   :  { %v4231_v8 = vadd.f32 %v4230_v57, %v4229_v0 }
 0x854   :  { %4232 = vst.msk [vmem:[%s6656_s6 + $0xe] sm:$0x3] %vm870_vm3, %v4231_v8 }
 0x859   :  { %v5900_v10 = vpop.eup %5899 }
 0x85a   :  { %v4466_v5 = vmul.f32 %v5900_v10, %v4465_v3 }
 0x85c   :  { %v4468_v14 = vadd.f32 %v4467_v12, %v4466_v5 }
 0x85e   :  { %4470 = vrot.lane.b32.xlu1 %v4468_v14, %s5958_s20 }
 0x8d0   :  { %v4471_v7 = vpop.permute.xlu1 %4470 }
 0x8d1   :  { %4473 = vst.msk [vmem:[%s6656_s6] sm:$0x3] %vm1119_vm4, %v4471_v7 }
 0x8d2   :  { %4478 = vsyncpa [#allocation4], 1 }
 0x8d3   :  { %4479 = vsyncpa [#allocation6], 1 }

</bundles_post_ra>
